<compile_context>
chip_gen: v6e
topology: v6e:2x2x1
jax: 0.10.0
libtpu: 0.0.40
codegen_flags: <defaults>
</compile_context>

<pallas_src>
import jax
import jax.numpy as jnp
from jax.experimental import pallas as pl
from jax.experimental.pallas import tpu as pltpu

# ----------------------- toy configuration ---------------------------------
N_BATCH = 2
CH = 3
IMG = 32
P_ENC = 8                        # encoder patch size  (vit_base_patch32 analog)
P_DEC = 4                        # decoder patch size  (vit_base_patch16 analog)
D = P_DEC * P_DEC * CH           # 48 ; must equal p_dec^2*3 for unpatchify
HEADS = 4
DH = D // HEADS                  # 12
D_MLP = 4 * D                    # 192
DEPTH_ENC = 2
DEPTH_DEC = 2
LN_EPS = 1e-6
SCALE = 1.0 / (DH ** 0.5)

L_ENC = (IMG // P_ENC) ** 2      # 16 encoder patches
L_DEC = (IMG // P_DEC) ** 2      # 64 decoder patches
CP_ENC = CH * P_ENC * P_ENC      # 192
CP_DEC = CH * P_DEC * P_DEC      # 48
S_ENC = L_ENC + 1                # 17 (cls + patches)
S_DEC = L_DEC + 1                # 65 (z   + patches)
PAD_HEAD = 8                     # [head token, 7 pad rows] -> patches 8-aligned
S_ENC_PAD = PAD_HEAD + L_ENC     # 24
S_DEC_PAD = PAD_HEAD + L_DEC     # 72
ROWS_PER_BLK = 8                 # per-block rows in the consolidated f32 "vecs"

STAGE_KEYS = ("patch_w", "wqk", "bqk", "wvo", "w1", "b1", "w2", "vecs")
N_STAGE = len(STAGE_KEYS)        # 8 consolidated arrays per ViT stage


# ------------------------------ kernel --------------------------------------
def _layer_norm(v, g, b):
    mu = jnp.mean(v, axis=-1, keepdims=True)
    var = jnp.mean(jnp.square(v - mu), axis=-1, keepdims=True)
    return (v - mu) * jax.lax.rsqrt(var + LN_EPS) * g + b


def _run_stage(x, stage):
    """Pre-LN transformer blocks + final LayerNorm on one front-padded (S_pad, D)
    sequence.  Rows 1..7 are padding and masked out as attention keys."""
    (_, wqk_ref, bqk_ref, wvo_ref, w1_ref, b1_ref, w2_ref, vecs_ref) = stage
    depth = wqk_ref.shape[0]
    s_pad = x.shape[0]

    # -inf mask for the 7 front-pad key columns (pad query rows are never read).
    kidx = jax.lax.broadcasted_iota(jnp.int32, (1, s_pad), 1)
    neg = jnp.where((kidx >= 1) & (kidx < PAD_HEAD), -1e30, 0.0).astype(jnp.float32)

    for d in range(depth):                            # depth = 2 -> static unroll
        # 8-aligned sublane slice of the consolidated per-block f32 vectors:
        # rows = [ln1_g, ln1_b, ln2_g, ln2_b, b_attn_out, b_mlp_out, pad, pad]
        vg = vecs_ref[d * ROWS_PER_BLK:(d + 1) * ROWS_PER_BLK]

        # ---- multi-head self attention (Wo folded into Wv) ----
        h1 = _layer_norm(x, vg[0:1], vg[1:2]).astype(jnp.bfloat16)
        qk = (jnp.dot(h1, wqk_ref[d], preferred_element_type=jnp.float32)
              + bqk_ref[d]).astype(jnp.bfloat16)                        # (S, 2D)
        attn = jnp.zeros_like(x) + vg[4:5]            # bo (+ folded bv@Wo)
        for hd in range(HEADS):                       # HEADS = 4 -> static unroll
            q = qk[:, hd * DH:(hd + 1) * DH]          # lane offsets < 128
            k = qk[:, D + hd * DH:D + (hd + 1) * DH]
            s = jax.lax.dot_general(q, k, (((1,), (1,)), ((), ())),
                                    preferred_element_type=jnp.float32) * SCALE
            s = s + neg                               # mask padded keys
            s = s - jnp.max(s, axis=-1, keepdims=True)
            p = jnp.exp(s)
            p = p * pl.reciprocal(jnp.sum(p, axis=-1, keepdims=True), approx=True)
            # v'_h = h1 @ (Wv_h @ Wo_h): 48-lane output at lane 0, K=48 matmul.
            vo = jnp.dot(h1, wvo_ref[d, hd],
                         preferred_element_type=jnp.float32).astype(jnp.bfloat16)
            attn = attn + jnp.dot(p.astype(jnp.bfloat16), vo,
                                  preferred_element_type=jnp.float32)   # (S, D)
        x = x + attn

        # ---- MLP ----
        h2 = _layer_norm(x, vg[2:3], vg[3:4]).astype(jnp.bfloat16)
        m = jnp.dot(h2, w1_ref[d], preferred_element_type=jnp.float32) + b1_ref[d]
        # TODO(synk): timm's nn.GELU is erf-exact; tanh approximation used for guaranteed Mosaic lowering.
        m = jax.nn.gelu(m, approximate=True)
        m = jnp.dot(m.astype(jnp.bfloat16), w2_ref[d],
                    preferred_element_type=jnp.float32) + vg[5:6]
        x = x + m

    norm_g = vecs_ref[depth * ROWS_PER_BLK:depth * ROWS_PER_BLK + 1]
    norm_b = vecs_ref[depth * ROWS_PER_BLK + 1:depth * ROWS_PER_BLK + 2]
    return _layer_norm(x, norm_g, norm_b)


def cd_kernel(*refs):
    """Whole CDModel forward for one batch element (grid axis = batch)."""
    enc_patches_ref, dec_patches_ref, enc_cls_ref, dec_pos_ref = refs[:4]
    enc_stage = refs[4:4 + N_STAGE]
    dec_stage = refs[4 + N_STAGE:4 + 2 * N_STAGE]
    out_ref = refs[4 + 2 * N_STAGE]

    enc_patch_w, enc_vecs = enc_stage[0], enc_stage[7]
    dec_patch_w, dec_vecs = dec_stage[0], dec_stage[7]
    enc_patch_b = enc_vecs[DEPTH_ENC * ROWS_PER_BLK + 2:DEPTH_ENC * ROWS_PER_BLK + 3]
    dec_patch_b = dec_vecs[DEPTH_DEC * ROWS_PER_BLK + 2:DEPTH_DEC * ROWS_PER_BLK + 3]

    pad_rows = jnp.zeros((PAD_HEAD - 1, D), jnp.float32)      # 7 zero pad rows

    # ---------------- encoder: ViT over img2, cls token -> z ------------------
    t = jnp.dot(enc_patches_ref[0].astype(jnp.bfloat16), enc_patch_w[...],
                preferred_element_type=jnp.float32) + enc_patch_b      # (L_ENC, D)
    # [cls, 7 pad, patches] built in registers; encoder pos_embed is zeroed.
    xe = jnp.concatenate([enc_cls_ref[...], pad_rows, t], axis=0)      # (24, D)
    xe = _run_stage(xe, enc_stage)
    z = xe[0:1, :]                                 # forward_head(pre_logits=True)

    # ---------------- decoder: ViT over img1 with z prepended -----------------
    dp = dec_patches_ref[0]                                            # (L_DEC, D)
    y = jnp.dot(dp.astype(jnp.bfloat16), dec_patch_w[...],
                preferred_element_type=jnp.float32) + dec_patch_b
    # [z, 7 pad, patches] + front-padded pos_embed (rows 1..7 of pos are zero).
    xd = jnp.concatenate([z, pad_rows, y], axis=0) + dec_pos_ref[...]  # (72, D)
    xd = _run_stage(xd, dec_stage)

    # Drop z + pad rows (8-aligned sublane slice) and add img1 in channel-last
    # patch-token space; the wrapper's unpatchify yields unpatchify(.) + img1.
    out_ref[0] = xd[PAD_HEAD:PAD_HEAD + L_DEC, :] + dp


# ----------------------------- JAX glue --------------------------------------
def extract_patches_cl(img, p):
    """(N, C, H, W) -> (N, L, p*p*C), each patch flattened channel-LAST so that
    unpatchify(extract_patches_cl(img, p), p) == img (lets the kernel fold the
    final residual add into token space)."""
    n, c, hh, ww = img.shape
    h, w = hh // p, ww // p
    x = img.reshape(n, c, h, p, w, p)
    x = jnp.transpose(x, (0, 2, 4, 3, 5, 1))          # (N, h, w, p, p, C)
    return x.reshape(n, h * w, p * p * c)


def unpatchify(x, p):
    """(N, L, p*p*3) -> (N, 3, H, W), identical to the reference unpatchify."""
    n, l, _ = x.shape
    h = w = int(l ** 0.5)
    assert h * w == l
    x = x.reshape(n, h, w, p, p, 3)
    x = jnp.einsum('nhwpqc->nchpwq', x)
    return x.reshape(n, 3, h * p, w * p)


def _const_spec(arr):
    # Same block every grid step -> Pallas keeps the weight resident (no re-DMA).
    return pl.BlockSpec(arr.shape, lambda i, nd=arr.ndim: (0,) * nd)


def cd_model_forward(params, img1, img2):
    n = img1.shape[0]
    enc_patches = extract_patches_cl(img2, P_ENC)          # (N, 16, 192)
    dec_patches = extract_patches_cl(img1, P_DEC)          # (N, 64, 48)
    # Front-padded decoder pos_embed: [pos_cls, 7 zero rows, pos_patches].
    dec_pos_pad = jnp.concatenate(
        [params["dec_pos"][0:1],
         jnp.zeros((PAD_HEAD - 1, D), jnp.float32),
         params["dec_pos"][1:]], axis=0)                   # (72, 48)

    enc_w = [params["enc"][k] for k in STAGE_KEYS]
    dec_w = [params["dec"][k] for k in STAGE_KEYS]
    consts = [params["enc_cls"], dec_pos_pad] + enc_w + dec_w

    const_bytes = sum(int(a.size) * a.dtype.itemsize for a in consts)
    io_bytes = (int(enc_patches.size) + int(dec_patches.size) + n * L_DEC * D) * 4
    cost = pl.CostEstimate(flops=18_500_000 * n,
                           transcendentals=90_000 * n,
                           bytes_accessed=const_bytes + io_bytes)

    # grid=(N,) "parallel": batch is sharded over v7x's two TensorCores.
    # (On single-TC v5e/v6e, fusing the batch into one grid step with M = N*S_pad
    #  amortizes the fixed per-step overhead; kept per-element here for v7x.)
    grid_spec = pltpu.PrefetchScalarGridSpec(
        num_scalar_prefetch=0,
        grid=(n,),
        in_specs=[pl.BlockSpec((1, L_ENC, CP_ENC), lambda i: (i, 0, 0)),
                  pl.BlockSpec((1, L_DEC, CP_DEC), lambda i: (i, 0, 0))]
                 + [_const_spec(a) for a in consts],
        out_specs=pl.BlockSpec((1, L_DEC, D), lambda i: (i, 0, 0)),
    )

    tokens = pl.pallas_call(
        cd_kernel,
        out_shape=jax.ShapeDtypeStruct((n, L_DEC, D), jnp.float32),
        grid_spec=grid_spec,
        compiler_params=pltpu.CompilerParams(dimension_semantics=("parallel",)),
        cost_estimate=cost,
    )(enc_patches, dec_patches, *consts)

    # tokens already contain the +img1 residual (added in patch-token space).
    return unpatchify(tokens, P_DEC)


# ------------------------- deterministic init --------------------------------
def init_params(key):
    keys = iter(jax.random.split(key, 128))

    def nrm(shape, std=0.02):
        return (std * jax.random.normal(next(keys), shape)).astype(jnp.float32)

    def make_stage(depth, in_feat):
        wqk, wvo = [], []
        for _ in range(depth):
            wq, wk = nrm((D, D)), nrm((D, D))
            wv, wo = nrm((D, D)), nrm((D, D))
            wqk.append(jnp.concatenate([wq, wk], axis=1))               # (D, 2D)
            # Fold the output projection into V:  Wvo[h] = Wv[:, h] @ Wo[h, :]
            wvo.append(jnp.stack([wv[:, h * DH:(h + 1) * DH] @ wo[h * DH:(h + 1) * DH, :]
                                  for h in range(HEADS)]))              # (H, D, D)
        # Consolidated per-block f32 vectors, 8 rows / block (sublane aligned):
        # [ln1_g, ln1_b, ln2_g, ln2_b, b_attn_out(=bo+bv@Wo, zero), b_mlp_out, pad, pad]
        blk_rows = jnp.concatenate([jnp.ones((1, D)), jnp.zeros((1, D)),
                                    jnp.ones((1, D)), jnp.zeros((1, D)),
                                    jnp.zeros((4, D))], axis=0)
        vecs = jnp.concatenate([jnp.tile(blk_rows, (depth, 1)),         # depth*8 rows
                                jnp.ones((1, D)), jnp.zeros((1, D)),    # final norm g,b
                                jnp.zeros((1, D))],                     # patch-embed bias
                               axis=0).astype(jnp.float32)              # (depth*8+3, D)
        return {
            # matmul weights stored bf16 (MXU operands); biases / LN params f32.
            "patch_w": nrm((in_feat, D)).astype(jnp.bfloat16),
            "wqk": jnp.stack(wqk).astype(jnp.bfloat16),                 # (depth, D, 2D)
            "bqk": jnp.zeros((depth, 1, 2 * D), jnp.float32),
            "wvo": jnp.stack(wvo).astype(jnp.bfloat16),                 # (depth, H, D, D)
            "w1": jnp.stack([nrm((D, D_MLP)) for _ in range(depth)]).astype(jnp.bfloat16),
            "b1": jnp.zeros((depth, 1, D_MLP), jnp.float32),
            "w2": jnp.stack([nrm((D_MLP, D)) for _ in range(depth)]).astype(jnp.bfloat16),
            "vecs": vecs,
        }

    return {
        "enc": make_stage(DEPTH_ENC, CP_ENC),
        "enc_cls": nrm((1, D)),
        # encoder pos_embed is zeroed in CDModel.__init__ -> omitted entirely
        "dec": make_stage(DEPTH_DEC, CP_DEC),
        "dec_pos": nrm((S_DEC, D)),
    }


# --------------------------------- main ---------------------------------------
if __name__ == "__main__":
    key = jax.random.PRNGKey(0)
    k_img1, k_img2, k_params = jax.random.split(key, 3)
    img1 = jax.random.normal(k_img1, (N_BATCH, CH, IMG, IMG), jnp.float32)
    img2 = jax.random.normal(k_img2, (N_BATCH, CH, IMG, IMG), jnp.float32)
    params = init_params(k_params)

    out = jax.jit(cd_model_forward)(params, img1, img2)
    out = jax.block_until_ready(out)

    assert out.shape == (N_BATCH, CH, IMG, IMG), out.shape
    assert bool(jnp.all(jnp.isfinite(out)))
    print("KERNEL_OK")
</pallas_src>

<mosaic_0001>
module attributes {stable_mosaic.version = 11 : i64} {
  func.func @cd_kernel(%arg0: i32, %arg1: memref<1x16x192xf32, #tpu.memory_space<vmem>>, %arg2: memref<1x64x48xf32, #tpu.memory_space<vmem>>, %arg3: memref<1x48xf32, #tpu.memory_space<vmem>>, %arg4: memref<72x48xf32, #tpu.memory_space<vmem>>, %arg5: memref<192x48xbf16, #tpu.memory_space<vmem>>, %arg6: memref<2x48x96xbf16, #tpu.memory_space<vmem>>, %arg7: memref<2x1x96xf32, #tpu.memory_space<vmem>>, %arg8: memref<2x4x48x48xbf16, #tpu.memory_space<vmem>>, %arg9: memref<2x48x192xbf16, #tpu.memory_space<vmem>>, %arg10: memref<2x1x192xf32, #tpu.memory_space<vmem>>, %arg11: memref<2x192x48xbf16, #tpu.memory_space<vmem>>, %arg12: memref<19x48xf32, #tpu.memory_space<vmem>>, %arg13: memref<48x48xbf16, #tpu.memory_space<vmem>>, %arg14: memref<2x48x96xbf16, #tpu.memory_space<vmem>>, %arg15: memref<2x1x96xf32, #tpu.memory_space<vmem>>, %arg16: memref<2x4x48x48xbf16, #tpu.memory_space<vmem>>, %arg17: memref<2x48x192xbf16, #tpu.memory_space<vmem>>, %arg18: memref<2x1x192xf32, #tpu.memory_space<vmem>>, %arg19: memref<2x192x48xbf16, #tpu.memory_space<vmem>>, %arg20: memref<19x48xf32, #tpu.memory_space<vmem>>, %arg21: memref<1x64x48xf32, #tpu.memory_space<vmem>>) attributes {dimension_semantics = [#tpu.dimension_semantics<parallel>], iteration_bounds = array<i64: 2>, scalar_prefetch = 0 : i64, scratch_operands = 0 : i64, tpu.core_type = #tpu.core_type<tc>, window_params = [{transform_indices = @transform_0, window_bounds = array<i64: 1, 16, 192>}, {transform_indices = @transform_1, window_bounds = array<i64: 1, 64, 48>}, {pipeline_mode = #tpu.pipeline_mode<synchronous>, transform_indices = @transform_2, window_bounds = array<i64: 1, 48>}, {pipeline_mode = #tpu.pipeline_mode<synchronous>, transform_indices = @transform_3, window_bounds = array<i64: 72, 48>}, {pipeline_mode = #tpu.pipeline_mode<synchronous>, transform_indices = @transform_4, window_bounds = array<i64: 192, 48>}, {pipeline_mode = #tpu.pipeline_mode<synchronous>, transform_indices = @transform_5, window_bounds = array<i64: 2, 48, 96>}, {pipeline_mode = #tpu.pipeline_mode<synchronous>, transform_indices = @transform_6, window_bounds = array<i64: 2, 1, 96>}, {pipeline_mode = #tpu.pipeline_mode<synchronous>, transform_indices = @transform_7, window_bounds = array<i64: 2, 4, 48, 48>}, {pipeline_mode = #tpu.pipeline_mode<synchronous>, transform_indices = @transform_8, window_bounds = array<i64: 2, 48, 192>}, {pipeline_mode = #tpu.pipeline_mode<synchronous>, transform_indices = @transform_9, window_bounds = array<i64: 2, 1, 192>}, {pipeline_mode = #tpu.pipeline_mode<synchronous>, transform_indices = @transform_10, window_bounds = array<i64: 2, 192, 48>}, {pipeline_mode = #tpu.pipeline_mode<synchronous>, transform_indices = @transform_11, window_bounds = array<i64: 19, 48>}, {pipeline_mode = #tpu.pipeline_mode<synchronous>, transform_indices = @transform_12, window_bounds = array<i64: 48, 48>}, {pipeline_mode = #tpu.pipeline_mode<synchronous>, transform_indices = @transform_13, window_bounds = array<i64: 2, 48, 96>}, {pipeline_mode = #tpu.pipeline_mode<synchronous>, transform_indices = @transform_14, window_bounds = array<i64: 2, 1, 96>}, {pipeline_mode = #tpu.pipeline_mode<synchronous>, transform_indices = @transform_15, window_bounds = array<i64: 2, 4, 48, 48>}, {pipeline_mode = #tpu.pipeline_mode<synchronous>, transform_indices = @transform_16, window_bounds = array<i64: 2, 48, 192>}, {pipeline_mode = #tpu.pipeline_mode<synchronous>, transform_indices = @transform_17, window_bounds = array<i64: 2, 1, 192>}, {pipeline_mode = #tpu.pipeline_mode<synchronous>, transform_indices = @transform_18, window_bounds = array<i64: 2, 192, 48>}, {pipeline_mode = #tpu.pipeline_mode<synchronous>, transform_indices = @transform_19, window_bounds = array<i64: 19, 48>}, {transform_indices = @transform_20, window_bounds = array<i64: 1, 64, 48>}]} {
    %c18 = arith.constant 18 : index
    %c0 = arith.constant 0 : index
    %0 = vector.load %arg12[%c18, %c0] : memref<19x48xf32, #tpu.memory_space<vmem>>, vector<1x48xf32>
    %c18_0 = arith.constant 18 : index
    %c0_1 = arith.constant 0 : index
    %1 = vector.load %arg20[%c18_0, %c0_1] : memref<19x48xf32, #tpu.memory_space<vmem>>, vector<1x48xf32>
    %cst = arith.constant 0.000000e+00 : f32
    %2 = vector.broadcast %cst : f32 to vector<7x48xf32>
    %c0_2 = arith.constant 0 : index
    %c0_3 = arith.constant 0 : index
    %c0_4 = arith.constant 0 : index
    %3 = vector.load %arg1[%c0_2, %c0_3, %c0_4] : memref<1x16x192xf32, #tpu.memory_space<vmem>>, vector<1x16x192xf32>
    %4 = vector.shape_cast %3 : vector<1x16x192xf32> to vector<16x192xf32>
    %5 = arith.truncf %4 : vector<16x192xf32> to vector<16x192xbf16>
    %c0_5 = arith.constant 0 : index
    %c0_6 = arith.constant 0 : index
    %6 = vector.load %arg5[%c0_5, %c0_6] : memref<192x48xbf16, #tpu.memory_space<vmem>>, vector<192x48xbf16>
    %cst_7 = arith.constant dense<0.000000e+00> : vector<16x48xf32>
    %7 = tpu.matmul %5, %6, %cst_7 {dimension_numbers = #tpu.dot_dimension_numbers<[1], [0], [0], [1], [0, 0, 1, 1], [], []>} : vector<16x192xbf16>, vector<192x48xbf16>, vector<16x48xf32> -> vector<16x48xf32>
    %8 = vector.broadcast %0 : vector<1x48xf32> to vector<16x48xf32>
    %9 = arith.addf %7, %8 : vector<16x48xf32>
    %c0_8 = arith.constant 0 : index
    %c0_9 = arith.constant 0 : index
    %10 = vector.load %arg3[%c0_8, %c0_9] : memref<1x48xf32, #tpu.memory_space<vmem>>, vector<1x48xf32>
    %11 = tpu.concatenate %10, %2, %9 in 0 : vector<1x48xf32>, vector<7x48xf32>, vector<16x48xf32> -> vector<24x48xf32>
    %12 = tpu.iota {dimensions = array<i32: 1>} : vector<1x24xi32>
    %c1_i32 = arith.constant 1 : i32
    %13 = vector.broadcast %c1_i32 : i32 to vector<1x24xi32>
    %14 = arith.cmpi sge, %12, %13 : vector<1x24xi32>
    %c8_i32 = arith.constant 8 : i32
    %15 = vector.broadcast %c8_i32 : i32 to vector<1x24xi32>
    %16 = arith.cmpi slt, %12, %15 : vector<1x24xi32>
    %17 = arith.andi %14, %16 : vector<1x24xi1>
    %cst_10 = arith.constant -1.000000e+30 : f32
    %cst_11 = arith.constant 0.000000e+00 : f32
    %18 = vector.broadcast %cst_10 : f32 to vector<1x24xf32>
    %19 = vector.broadcast %cst_11 : f32 to vector<1x24xf32>
    %20 = arith.select %17, %18, %19 : vector<1x24xi1>, vector<1x24xf32>
    %c0_12 = arith.constant 0 : index
    %c0_13 = arith.constant 0 : index
    %21 = vector.load %arg12[%c0_12, %c0_13] : memref<19x48xf32, #tpu.memory_space<vmem>>, vector<8x48xf32>
    %22 = vector.extract_strided_slice %21 {offsets = [0, 0], sizes = [1, 48], strides = [1, 1]} : vector<8x48xf32> to vector<1x48xf32>
    %23 = vector.extract_strided_slice %21 {offsets = [1, 0], sizes = [1, 48], strides = [1, 1]} : vector<8x48xf32> to vector<1x48xf32>
    %cst_14 = arith.constant dense<0.000000e+00> : vector<24xf32>
    %24 = vector.multi_reduction <add>, %11, %cst_14 [1] : vector<24x48xf32> to vector<24xf32>
    %25 = vector.shape_cast %24 : vector<24xf32> to vector<24x1xf32>
    %cst_15 = arith.constant 4.800000e+01 : f32
    %26 = vector.broadcast %cst_15 : f32 to vector<24x1xf32>
    %27 = arith.divf %25, %26 : vector<24x1xf32>
    %28 = vector.broadcast %27 : vector<24x1xf32> to vector<24x48xf32>
    %29 = arith.subf %11, %28 : vector<24x48xf32>
    %30 = arith.mulf %29, %29 : vector<24x48xf32>
    %cst_16 = arith.constant dense<0.000000e+00> : vector<24xf32>
    %31 = vector.multi_reduction <add>, %30, %cst_16 [1] : vector<24x48xf32> to vector<24xf32>
    %32 = vector.shape_cast %31 : vector<24xf32> to vector<24x1xf32>
    %cst_17 = arith.constant 4.800000e+01 : f32
    %33 = vector.broadcast %cst_17 : f32 to vector<24x1xf32>
    %34 = arith.divf %32, %33 : vector<24x1xf32>
    %35 = vector.broadcast %27 : vector<24x1xf32> to vector<24x48xf32>
    %36 = arith.subf %11, %35 : vector<24x48xf32>
    %cst_18 = arith.constant 9.99999997E-7 : f32
    %37 = vector.broadcast %cst_18 : f32 to vector<24x1xf32>
    %38 = arith.addf %34, %37 : vector<24x1xf32>
    %39 = math.rsqrt %38 : vector<24x1xf32>
    %40 = vector.broadcast %39 : vector<24x1xf32> to vector<24x48xf32>
    %41 = arith.mulf %36, %40 : vector<24x48xf32>
    %42 = vector.broadcast %22 : vector<1x48xf32> to vector<24x48xf32>
    %43 = arith.mulf %41, %42 : vector<24x48xf32>
    %44 = vector.broadcast %23 : vector<1x48xf32> to vector<24x48xf32>
    %45 = arith.addf %43, %44 : vector<24x48xf32>
    %46 = arith.truncf %45 : vector<24x48xf32> to vector<24x48xbf16>
    %c0_19 = arith.constant 0 : index
    %c0_20 = arith.constant 0 : index
    %c0_21 = arith.constant 0 : index
    %47 = vector.load %arg6[%c0_19, %c0_20, %c0_21] : memref<2x48x96xbf16, #tpu.memory_space<vmem>>, vector<1x48x96xbf16>
    %48 = vector.shape_cast %47 : vector<1x48x96xbf16> to vector<48x96xbf16>
    %cst_22 = arith.constant dense<0.000000e+00> : vector<24x96xf32>
    %49 = tpu.matmul %46, %48, %cst_22 {dimension_numbers = #tpu.dot_dimension_numbers<[1], [0], [0], [1], [0, 0, 1, 1], [], []>} : vector<24x48xbf16>, vector<48x96xbf16>, vector<24x96xf32> -> vector<24x96xf32>
    %c0_23 = arith.constant 0 : index
    %c0_24 = arith.constant 0 : index
    %c0_25 = arith.constant 0 : index
    %50 = vector.load %arg7[%c0_23, %c0_24, %c0_25] : memref<2x1x96xf32, #tpu.memory_space<vmem>>, vector<1x1x96xf32>
    %51 = vector.shape_cast %50 : vector<1x1x96xf32> to vector<1x96xf32>
    %52 = vector.broadcast %51 : vector<1x96xf32> to vector<24x96xf32>
    %53 = arith.addf %49, %52 : vector<24x96xf32>
    %54 = arith.truncf %53 : vector<24x96xf32> to vector<24x96xbf16>
    %cst_26 = arith.constant 0.000000e+00 : f32
    %55 = vector.broadcast %cst_26 : f32 to vector<24x48xf32>
    %56 = vector.extract_strided_slice %21 {offsets = [4, 0], sizes = [1, 48], strides = [1, 1]} : vector<8x48xf32> to vector<1x48xf32>
    %57 = vector.broadcast %56 : vector<1x48xf32> to vector<24x48xf32>
    %58 = arith.addf %55, %57 : vector<24x48xf32>
    %59 = vector.extract_strided_slice %54 {offsets = [0, 0], sizes = [24, 12], strides = [1, 1]} : vector<24x96xbf16> to vector<24x12xbf16>
    %60 = vector.extract_strided_slice %54 {offsets = [0, 48], sizes = [24, 12], strides = [1, 1]} : vector<24x96xbf16> to vector<24x12xbf16>
    %cst_27 = arith.constant dense<0.000000e+00> : vector<24x24xf32>
    %61 = tpu.matmul %59, %60, %cst_27 {dimension_numbers = #tpu.dot_dimension_numbers<[1], [1], [0], [0], [0, 0, 1, 0], [], []>} : vector<24x12xbf16>, vector<24x12xbf16>, vector<24x24xf32> -> vector<24x24xf32>
    %cst_28 = arith.constant 0.288675129 : f32
    %62 = vector.broadcast %cst_28 : f32 to vector<24x24xf32>
    %63 = arith.mulf %61, %62 : vector<24x24xf32>
    %64 = vector.broadcast %20 : vector<1x24xf32> to vector<24x24xf32>
    %65 = arith.addf %63, %64 : vector<24x24xf32>
    %cst_29 = arith.constant dense<0xFF800000> : vector<24xf32>
    %66 = vector.multi_reduction <maximumf>, %65, %cst_29 [1] : vector<24x24xf32> to vector<24xf32>
    %67 = vector.shape_cast %66 : vector<24xf32> to vector<24x1xf32>
    %68 = vector.broadcast %67 : vector<24x1xf32> to vector<24x24xf32>
    %69 = arith.subf %65, %68 : vector<24x24xf32>
    %70 = math.exp %69 : vector<24x24xf32>
    %cst_30 = arith.constant dense<0.000000e+00> : vector<24xf32>
    %71 = vector.multi_reduction <add>, %70, %cst_30 [1] : vector<24x24xf32> to vector<24xf32>
    %72 = vector.shape_cast %71 : vector<24xf32> to vector<24x1xf32>
    %73 = tpu.reciprocal %72 {approx = true} : vector<24x1xf32> -> vector<24x1xf32>
    %74 = vector.broadcast %73 : vector<24x1xf32> to vector<24x24xf32>
    %75 = arith.mulf %70, %74 : vector<24x24xf32>
    %c0_31 = arith.constant 0 : index
    %c0_32 = arith.constant 0 : index
    %c0_33 = arith.constant 0 : index
    %c0_34 = arith.constant 0 : index
    %76 = vector.load %arg8[%c0_31, %c0_32, %c0_33, %c0_34] : memref<2x4x48x48xbf16, #tpu.memory_space<vmem>>, vector<1x1x48x48xbf16>
    %77 = vector.shape_cast %76 : vector<1x1x48x48xbf16> to vector<48x48xbf16>
    %cst_35 = arith.constant dense<0.000000e+00> : vector<24x48xf32>
    %78 = tpu.matmul %46, %77, %cst_35 {dimension_numbers = #tpu.dot_dimension_numbers<[1], [0], [0], [1], [0, 0, 1, 1], [], []>} : vector<24x48xbf16>, vector<48x48xbf16>, vector<24x48xf32> -> vector<24x48xf32>
    %79 = arith.truncf %78 : vector<24x48xf32> to vector<24x48xbf16>
    %80 = arith.truncf %75 : vector<24x24xf32> to vector<24x24xbf16>
    %cst_36 = arith.constant dense<0.000000e+00> : vector<24x48xf32>
    %81 = tpu.matmul %80, %79, %cst_36 {dimension_numbers = #tpu.dot_dimension_numbers<[1], [0], [0], [1], [0, 0, 1, 1], [], []>} : vector<24x24xbf16>, vector<24x48xbf16>, vector<24x48xf32> -> vector<24x48xf32>
    %82 = arith.addf %58, %81 : vector<24x48xf32>
    %83 = vector.extract_strided_slice %54 {offsets = [0, 12], sizes = [24, 12], strides = [1, 1]} : vector<24x96xbf16> to vector<24x12xbf16>
    %84 = vector.extract_strided_slice %54 {offsets = [0, 60], sizes = [24, 12], strides = [1, 1]} : vector<24x96xbf16> to vector<24x12xbf16>
    %cst_37 = arith.constant dense<0.000000e+00> : vector<24x24xf32>
    %85 = tpu.matmul %83, %84, %cst_37 {dimension_numbers = #tpu.dot_dimension_numbers<[1], [1], [0], [0], [0, 0, 1, 0], [], []>} : vector<24x12xbf16>, vector<24x12xbf16>, vector<24x24xf32> -> vector<24x24xf32>
    %cst_38 = arith.constant 0.288675129 : f32
    %86 = vector.broadcast %cst_38 : f32 to vector<24x24xf32>
    %87 = arith.mulf %85, %86 : vector<24x24xf32>
    %88 = vector.broadcast %20 : vector<1x24xf32> to vector<24x24xf32>
    %89 = arith.addf %87, %88 : vector<24x24xf32>
    %cst_39 = arith.constant dense<0xFF800000> : vector<24xf32>
    %90 = vector.multi_reduction <maximumf>, %89, %cst_39 [1] : vector<24x24xf32> to vector<24xf32>
    %91 = vector.shape_cast %90 : vector<24xf32> to vector<24x1xf32>
    %92 = vector.broadcast %91 : vector<24x1xf32> to vector<24x24xf32>
    %93 = arith.subf %89, %92 : vector<24x24xf32>
    %94 = math.exp %93 : vector<24x24xf32>
    %cst_40 = arith.constant dense<0.000000e+00> : vector<24xf32>
    %95 = vector.multi_reduction <add>, %94, %cst_40 [1] : vector<24x24xf32> to vector<24xf32>
    %96 = vector.shape_cast %95 : vector<24xf32> to vector<24x1xf32>
    %97 = tpu.reciprocal %96 {approx = true} : vector<24x1xf32> -> vector<24x1xf32>
    %98 = vector.broadcast %97 : vector<24x1xf32> to vector<24x24xf32>
    %99 = arith.mulf %94, %98 : vector<24x24xf32>
    %c0_41 = arith.constant 0 : index
    %c1 = arith.constant 1 : index
    %c0_42 = arith.constant 0 : index
    %c0_43 = arith.constant 0 : index
    %100 = vector.load %arg8[%c0_41, %c1, %c0_42, %c0_43] : memref<2x4x48x48xbf16, #tpu.memory_space<vmem>>, vector<1x1x48x48xbf16>
    %101 = vector.shape_cast %100 : vector<1x1x48x48xbf16> to vector<48x48xbf16>
    %cst_44 = arith.constant dense<0.000000e+00> : vector<24x48xf32>
    %102 = tpu.matmul %46, %101, %cst_44 {dimension_numbers = #tpu.dot_dimension_numbers<[1], [0], [0], [1], [0, 0, 1, 1], [], []>} : vector<24x48xbf16>, vector<48x48xbf16>, vector<24x48xf32> -> vector<24x48xf32>
    %103 = arith.truncf %102 : vector<24x48xf32> to vector<24x48xbf16>
    %104 = arith.truncf %99 : vector<24x24xf32> to vector<24x24xbf16>
    %cst_45 = arith.constant dense<0.000000e+00> : vector<24x48xf32>
    %105 = tpu.matmul %104, %103, %cst_45 {dimension_numbers = #tpu.dot_dimension_numbers<[1], [0], [0], [1], [0, 0, 1, 1], [], []>} : vector<24x24xbf16>, vector<24x48xbf16>, vector<24x48xf32> -> vector<24x48xf32>
    %106 = arith.addf %82, %105 : vector<24x48xf32>
    %107 = vector.extract_strided_slice %54 {offsets = [0, 24], sizes = [24, 12], strides = [1, 1]} : vector<24x96xbf16> to vector<24x12xbf16>
    %108 = vector.extract_strided_slice %54 {offsets = [0, 72], sizes = [24, 12], strides = [1, 1]} : vector<24x96xbf16> to vector<24x12xbf16>
    %cst_46 = arith.constant dense<0.000000e+00> : vector<24x24xf32>
    %109 = tpu.matmul %107, %108, %cst_46 {dimension_numbers = #tpu.dot_dimension_numbers<[1], [1], [0], [0], [0, 0, 1, 0], [], []>} : vector<24x12xbf16>, vector<24x12xbf16>, vector<24x24xf32> -> vector<24x24xf32>
    %cst_47 = arith.constant 0.288675129 : f32
    %110 = vector.broadcast %cst_47 : f32 to vector<24x24xf32>
    %111 = arith.mulf %109, %110 : vector<24x24xf32>
    %112 = vector.broadcast %20 : vector<1x24xf32> to vector<24x24xf32>
    %113 = arith.addf %111, %112 : vector<24x24xf32>
    %cst_48 = arith.constant dense<0xFF800000> : vector<24xf32>
    %114 = vector.multi_reduction <maximumf>, %113, %cst_48 [1] : vector<24x24xf32> to vector<24xf32>
    %115 = vector.shape_cast %114 : vector<24xf32> to vector<24x1xf32>
    %116 = vector.broadcast %115 : vector<24x1xf32> to vector<24x24xf32>
    %117 = arith.subf %113, %116 : vector<24x24xf32>
    %118 = math.exp %117 : vector<24x24xf32>
    %cst_49 = arith.constant dense<0.000000e+00> : vector<24xf32>
    %119 = vector.multi_reduction <add>, %118, %cst_49 [1] : vector<24x24xf32> to vector<24xf32>
    %120 = vector.shape_cast %119 : vector<24xf32> to vector<24x1xf32>
    %121 = tpu.reciprocal %120 {approx = true} : vector<24x1xf32> -> vector<24x1xf32>
    %122 = vector.broadcast %121 : vector<24x1xf32> to vector<24x24xf32>
    %123 = arith.mulf %118, %122 : vector<24x24xf32>
    %c0_50 = arith.constant 0 : index
    %c2 = arith.constant 2 : index
    %c0_51 = arith.constant 0 : index
    %c0_52 = arith.constant 0 : index
    %124 = vector.load %arg8[%c0_50, %c2, %c0_51, %c0_52] : memref<2x4x48x48xbf16, #tpu.memory_space<vmem>>, vector<1x1x48x48xbf16>
    %125 = vector.shape_cast %124 : vector<1x1x48x48xbf16> to vector<48x48xbf16>
    %cst_53 = arith.constant dense<0.000000e+00> : vector<24x48xf32>
    %126 = tpu.matmul %46, %125, %cst_53 {dimension_numbers = #tpu.dot_dimension_numbers<[1], [0], [0], [1], [0, 0, 1, 1], [], []>} : vector<24x48xbf16>, vector<48x48xbf16>, vector<24x48xf32> -> vector<24x48xf32>
    %127 = arith.truncf %126 : vector<24x48xf32> to vector<24x48xbf16>
    %128 = arith.truncf %123 : vector<24x24xf32> to vector<24x24xbf16>
    %cst_54 = arith.constant dense<0.000000e+00> : vector<24x48xf32>
    %129 = tpu.matmul %128, %127, %cst_54 {dimension_numbers = #tpu.dot_dimension_numbers<[1], [0], [0], [1], [0, 0, 1, 1], [], []>} : vector<24x24xbf16>, vector<24x48xbf16>, vector<24x48xf32> -> vector<24x48xf32>
    %130 = arith.addf %106, %129 : vector<24x48xf32>
    %131 = vector.extract_strided_slice %54 {offsets = [0, 36], sizes = [24, 12], strides = [1, 1]} : vector<24x96xbf16> to vector<24x12xbf16>
    %132 = vector.extract_strided_slice %54 {offsets = [0, 84], sizes = [24, 12], strides = [1, 1]} : vector<24x96xbf16> to vector<24x12xbf16>
    %cst_55 = arith.constant dense<0.000000e+00> : vector<24x24xf32>
    %133 = tpu.matmul %131, %132, %cst_55 {dimension_numbers = #tpu.dot_dimension_numbers<[1], [1], [0], [0], [0, 0, 1, 0], [], []>} : vector<24x12xbf16>, vector<24x12xbf16>, vector<24x24xf32> -> vector<24x24xf32>
    %cst_56 = arith.constant 0.288675129 : f32
    %134 = vector.broadcast %cst_56 : f32 to vector<24x24xf32>
    %135 = arith.mulf %133, %134 : vector<24x24xf32>
    %136 = vector.broadcast %20 : vector<1x24xf32> to vector<24x24xf32>
    %137 = arith.addf %135, %136 : vector<24x24xf32>
    %cst_57 = arith.constant dense<0xFF800000> : vector<24xf32>
    %138 = vector.multi_reduction <maximumf>, %137, %cst_57 [1] : vector<24x24xf32> to vector<24xf32>
    %139 = vector.shape_cast %138 : vector<24xf32> to vector<24x1xf32>
    %140 = vector.broadcast %139 : vector<24x1xf32> to vector<24x24xf32>
    %141 = arith.subf %137, %140 : vector<24x24xf32>
    %142 = math.exp %141 : vector<24x24xf32>
    %cst_58 = arith.constant dense<0.000000e+00> : vector<24xf32>
    %143 = vector.multi_reduction <add>, %142, %cst_58 [1] : vector<24x24xf32> to vector<24xf32>
    %144 = vector.shape_cast %143 : vector<24xf32> to vector<24x1xf32>
    %145 = tpu.reciprocal %144 {approx = true} : vector<24x1xf32> -> vector<24x1xf32>
    %146 = vector.broadcast %145 : vector<24x1xf32> to vector<24x24xf32>
    %147 = arith.mulf %142, %146 : vector<24x24xf32>
    %c0_59 = arith.constant 0 : index
    %c3 = arith.constant 3 : index
    %c0_60 = arith.constant 0 : index
    %c0_61 = arith.constant 0 : index
    %148 = vector.load %arg8[%c0_59, %c3, %c0_60, %c0_61] : memref<2x4x48x48xbf16, #tpu.memory_space<vmem>>, vector<1x1x48x48xbf16>
    %149 = vector.shape_cast %148 : vector<1x1x48x48xbf16> to vector<48x48xbf16>
    %cst_62 = arith.constant dense<0.000000e+00> : vector<24x48xf32>
    %150 = tpu.matmul %46, %149, %cst_62 {dimension_numbers = #tpu.dot_dimension_numbers<[1], [0], [0], [1], [0, 0, 1, 1], [], []>} : vector<24x48xbf16>, vector<48x48xbf16>, vector<24x48xf32> -> vector<24x48xf32>
    %151 = arith.truncf %150 : vector<24x48xf32> to vector<24x48xbf16>
    %152 = arith.truncf %147 : vector<24x24xf32> to vector<24x24xbf16>
    %cst_63 = arith.constant dense<0.000000e+00> : vector<24x48xf32>
    %153 = tpu.matmul %152, %151, %cst_63 {dimension_numbers = #tpu.dot_dimension_numbers<[1], [0], [0], [1], [0, 0, 1, 1], [], []>} : vector<24x24xbf16>, vector<24x48xbf16>, vector<24x48xf32> -> vector<24x48xf32>
    %154 = arith.addf %130, %153 : vector<24x48xf32>
    %155 = arith.addf %11, %154 : vector<24x48xf32>
    %156 = vector.extract_strided_slice %21 {offsets = [2, 0], sizes = [1, 48], strides = [1, 1]} : vector<8x48xf32> to vector<1x48xf32>
    %157 = vector.extract_strided_slice %21 {offsets = [3, 0], sizes = [1, 48], strides = [1, 1]} : vector<8x48xf32> to vector<1x48xf32>
    %cst_64 = arith.constant dense<0.000000e+00> : vector<24xf32>
    %158 = vector.multi_reduction <add>, %155, %cst_64 [1] : vector<24x48xf32> to vector<24xf32>
    %159 = vector.shape_cast %158 : vector<24xf32> to vector<24x1xf32>
    %cst_65 = arith.constant 4.800000e+01 : f32
    %160 = vector.broadcast %cst_65 : f32 to vector<24x1xf32>
    %161 = arith.divf %159, %160 : vector<24x1xf32>
    %162 = vector.broadcast %161 : vector<24x1xf32> to vector<24x48xf32>
    %163 = arith.subf %155, %162 : vector<24x48xf32>
    %164 = arith.mulf %163, %163 : vector<24x48xf32>
    %cst_66 = arith.constant dense<0.000000e+00> : vector<24xf32>
    %165 = vector.multi_reduction <add>, %164, %cst_66 [1] : vector<24x48xf32> to vector<24xf32>
    %166 = vector.shape_cast %165 : vector<24xf32> to vector<24x1xf32>
    %cst_67 = arith.constant 4.800000e+01 : f32
    %167 = vector.broadcast %cst_67 : f32 to vector<24x1xf32>
    %168 = arith.divf %166, %167 : vector<24x1xf32>
    %169 = vector.broadcast %161 : vector<24x1xf32> to vector<24x48xf32>
    %170 = arith.subf %155, %169 : vector<24x48xf32>
    %cst_68 = arith.constant 9.99999997E-7 : f32
    %171 = vector.broadcast %cst_68 : f32 to vector<24x1xf32>
    %172 = arith.addf %168, %171 : vector<24x1xf32>
    %173 = math.rsqrt %172 : vector<24x1xf32>
    %174 = vector.broadcast %173 : vector<24x1xf32> to vector<24x48xf32>
    %175 = arith.mulf %170, %174 : vector<24x48xf32>
    %176 = vector.broadcast %156 : vector<1x48xf32> to vector<24x48xf32>
    %177 = arith.mulf %175, %176 : vector<24x48xf32>
    %178 = vector.broadcast %157 : vector<1x48xf32> to vector<24x48xf32>
    %179 = arith.addf %177, %178 : vector<24x48xf32>
    %180 = arith.truncf %179 : vector<24x48xf32> to vector<24x48xbf16>
    %c0_69 = arith.constant 0 : index
    %c0_70 = arith.constant 0 : index
    %c0_71 = arith.constant 0 : index
    %181 = vector.load %arg9[%c0_69, %c0_70, %c0_71] : memref<2x48x192xbf16, #tpu.memory_space<vmem>>, vector<1x48x192xbf16>
    %182 = vector.shape_cast %181 : vector<1x48x192xbf16> to vector<48x192xbf16>
    %cst_72 = arith.constant dense<0.000000e+00> : vector<24x192xf32>
    %183 = tpu.matmul %180, %182, %cst_72 {dimension_numbers = #tpu.dot_dimension_numbers<[1], [0], [0], [1], [0, 0, 1, 1], [], []>} : vector<24x48xbf16>, vector<48x192xbf16>, vector<24x192xf32> -> vector<24x192xf32>
    %c0_73 = arith.constant 0 : index
    %c0_74 = arith.constant 0 : index
    %c0_75 = arith.constant 0 : index
    %184 = vector.load %arg10[%c0_73, %c0_74, %c0_75] : memref<2x1x192xf32, #tpu.memory_space<vmem>>, vector<1x1x192xf32>
    %185 = vector.shape_cast %184 : vector<1x1x192xf32> to vector<1x192xf32>
    %186 = vector.broadcast %185 : vector<1x192xf32> to vector<24x192xf32>
    %187 = arith.addf %183, %186 : vector<24x192xf32>
    %188 = arith.mulf %187, %187 : vector<24x192xf32>
    %189 = arith.mulf %187, %188 : vector<24x192xf32>
    %cst_76 = arith.constant 4.471500e-02 : f32
    %190 = vector.broadcast %cst_76 : f32 to vector<24x192xf32>
    %191 = arith.mulf %190, %189 : vector<24x192xf32>
    %192 = arith.addf %187, %191 : vector<24x192xf32>
    %cst_77 = arith.constant 0.797884583 : f32
    %193 = vector.broadcast %cst_77 : f32 to vector<24x192xf32>
    %194 = arith.mulf %193, %192 : vector<24x192xf32>
    %195 = math.tanh %194 : vector<24x192xf32>
    %cst_78 = arith.constant 1.000000e+00 : f32
    %196 = vector.broadcast %cst_78 : f32 to vector<24x192xf32>
    %197 = arith.addf %196, %195 : vector<24x192xf32>
    %cst_79 = arith.constant 5.000000e-01 : f32
    %198 = vector.broadcast %cst_79 : f32 to vector<24x192xf32>
    %199 = arith.mulf %198, %197 : vector<24x192xf32>
    %200 = arith.mulf %187, %199 : vector<24x192xf32>
    %201 = arith.truncf %200 : vector<24x192xf32> to vector<24x192xbf16>
    %c0_80 = arith.constant 0 : index
    %c0_81 = arith.constant 0 : index
    %c0_82 = arith.constant 0 : index
    %202 = vector.load %arg11[%c0_80, %c0_81, %c0_82] : memref<2x192x48xbf16, #tpu.memory_space<vmem>>, vector<1x192x48xbf16>
    %203 = vector.shape_cast %202 : vector<1x192x48xbf16> to vector<192x48xbf16>
    %cst_83 = arith.constant dense<0.000000e+00> : vector<24x48xf32>
    %204 = tpu.matmul %201, %203, %cst_83 {dimension_numbers = #tpu.dot_dimension_numbers<[1], [0], [0], [1], [0, 0, 1, 1], [], []>} : vector<24x192xbf16>, vector<192x48xbf16>, vector<24x48xf32> -> vector<24x48xf32>
    %205 = vector.extract_strided_slice %21 {offsets = [5, 0], sizes = [1, 48], strides = [1, 1]} : vector<8x48xf32> to vector<1x48xf32>
    %206 = vector.broadcast %205 : vector<1x48xf32> to vector<24x48xf32>
    %207 = arith.addf %204, %206 : vector<24x48xf32>
    %208 = arith.addf %155, %207 : vector<24x48xf32>
    %c8 = arith.constant 8 : index
    %c0_84 = arith.constant 0 : index
    %209 = vector.load %arg12[%c8, %c0_84] : memref<19x48xf32, #tpu.memory_space<vmem>>, vector<8x48xf32>
    %210 = vector.extract_strided_slice %209 {offsets = [0, 0], sizes = [1, 48], strides = [1, 1]} : vector<8x48xf32> to vector<1x48xf32>
    %211 = vector.extract_strided_slice %209 {offsets = [1, 0], sizes = [1, 48], strides = [1, 1]} : vector<8x48xf32> to vector<1x48xf32>
    %cst_85 = arith.constant dense<0.000000e+00> : vector<24xf32>
    %212 = vector.multi_reduction <add>, %208, %cst_85 [1] : vector<24x48xf32> to vector<24xf32>
    %213 = vector.shape_cast %212 : vector<24xf32> to vector<24x1xf32>
    %cst_86 = arith.constant 4.800000e+01 : f32
    %214 = vector.broadcast %cst_86 : f32 to vector<24x1xf32>
    %215 = arith.divf %213, %214 : vector<24x1xf32>
    %216 = vector.broadcast %215 : vector<24x1xf32> to vector<24x48xf32>
    %217 = arith.subf %208, %216 : vector<24x48xf32>
    %218 = arith.mulf %217, %217 : vector<24x48xf32>
    %cst_87 = arith.constant dense<0.000000e+00> : vector<24xf32>
    %219 = vector.multi_reduction <add>, %218, %cst_87 [1] : vector<24x48xf32> to vector<24xf32>
    %220 = vector.shape_cast %219 : vector<24xf32> to vector<24x1xf32>
    %cst_88 = arith.constant 4.800000e+01 : f32
    %221 = vector.broadcast %cst_88 : f32 to vector<24x1xf32>
    %222 = arith.divf %220, %221 : vector<24x1xf32>
    %223 = vector.broadcast %215 : vector<24x1xf32> to vector<24x48xf32>
    %224 = arith.subf %208, %223 : vector<24x48xf32>
    %cst_89 = arith.constant 9.99999997E-7 : f32
    %225 = vector.broadcast %cst_89 : f32 to vector<24x1xf32>
    %226 = arith.addf %222, %225 : vector<24x1xf32>
    %227 = math.rsqrt %226 : vector<24x1xf32>
    %228 = vector.broadcast %227 : vector<24x1xf32> to vector<24x48xf32>
    %229 = arith.mulf %224, %228 : vector<24x48xf32>
    %230 = vector.broadcast %210 : vector<1x48xf32> to vector<24x48xf32>
    %231 = arith.mulf %229, %230 : vector<24x48xf32>
    %232 = vector.broadcast %211 : vector<1x48xf32> to vector<24x48xf32>
    %233 = arith.addf %231, %232 : vector<24x48xf32>
    %234 = arith.truncf %233 : vector<24x48xf32> to vector<24x48xbf16>
    %c1_90 = arith.constant 1 : index
    %c0_91 = arith.constant 0 : index
    %c0_92 = arith.constant 0 : index
    %235 = vector.load %arg6[%c1_90, %c0_91, %c0_92] : memref<2x48x96xbf16, #tpu.memory_space<vmem>>, vector<1x48x96xbf16>
    %236 = vector.shape_cast %235 : vector<1x48x96xbf16> to vector<48x96xbf16>
    %cst_93 = arith.constant dense<0.000000e+00> : vector<24x96xf32>
    %237 = tpu.matmul %234, %236, %cst_93 {dimension_numbers = #tpu.dot_dimension_numbers<[1], [0], [0], [1], [0, 0, 1, 1], [], []>} : vector<24x48xbf16>, vector<48x96xbf16>, vector<24x96xf32> -> vector<24x96xf32>
    %c1_94 = arith.constant 1 : index
    %c0_95 = arith.constant 0 : index
    %c0_96 = arith.constant 0 : index
    %238 = vector.load %arg7[%c1_94, %c0_95, %c0_96] : memref<2x1x96xf32, #tpu.memory_space<vmem>>, vector<1x1x96xf32>
    %239 = vector.shape_cast %238 : vector<1x1x96xf32> to vector<1x96xf32>
    %240 = vector.broadcast %239 : vector<1x96xf32> to vector<24x96xf32>
    %241 = arith.addf %237, %240 : vector<24x96xf32>
    %242 = arith.truncf %241 : vector<24x96xf32> to vector<24x96xbf16>
    %cst_97 = arith.constant 0.000000e+00 : f32
    %243 = vector.broadcast %cst_97 : f32 to vector<24x48xf32>
    %244 = vector.extract_strided_slice %209 {offsets = [4, 0], sizes = [1, 48], strides = [1, 1]} : vector<8x48xf32> to vector<1x48xf32>
    %245 = vector.broadcast %244 : vector<1x48xf32> to vector<24x48xf32>
    %246 = arith.addf %243, %245 : vector<24x48xf32>
    %247 = vector.extract_strided_slice %242 {offsets = [0, 0], sizes = [24, 12], strides = [1, 1]} : vector<24x96xbf16> to vector<24x12xbf16>
    %248 = vector.extract_strided_slice %242 {offsets = [0, 48], sizes = [24, 12], strides = [1, 1]} : vector<24x96xbf16> to vector<24x12xbf16>
    %cst_98 = arith.constant dense<0.000000e+00> : vector<24x24xf32>
    %249 = tpu.matmul %247, %248, %cst_98 {dimension_numbers = #tpu.dot_dimension_numbers<[1], [1], [0], [0], [0, 0, 1, 0], [], []>} : vector<24x12xbf16>, vector<24x12xbf16>, vector<24x24xf32> -> vector<24x24xf32>
    %cst_99 = arith.constant 0.288675129 : f32
    %250 = vector.broadcast %cst_99 : f32 to vector<24x24xf32>
    %251 = arith.mulf %249, %250 : vector<24x24xf32>
    %252 = vector.broadcast %20 : vector<1x24xf32> to vector<24x24xf32>
    %253 = arith.addf %251, %252 : vector<24x24xf32>
    %cst_100 = arith.constant dense<0xFF800000> : vector<24xf32>
    %254 = vector.multi_reduction <maximumf>, %253, %cst_100 [1] : vector<24x24xf32> to vector<24xf32>
    %255 = vector.shape_cast %254 : vector<24xf32> to vector<24x1xf32>
    %256 = vector.broadcast %255 : vector<24x1xf32> to vector<24x24xf32>
    %257 = arith.subf %253, %256 : vector<24x24xf32>
    %258 = math.exp %257 : vector<24x24xf32>
    %cst_101 = arith.constant dense<0.000000e+00> : vector<24xf32>
    %259 = vector.multi_reduction <add>, %258, %cst_101 [1] : vector<24x24xf32> to vector<24xf32>
    %260 = vector.shape_cast %259 : vector<24xf32> to vector<24x1xf32>
    %261 = tpu.reciprocal %260 {approx = true} : vector<24x1xf32> -> vector<24x1xf32>
    %262 = vector.broadcast %261 : vector<24x1xf32> to vector<24x24xf32>
    %263 = arith.mulf %258, %262 : vector<24x24xf32>
    %c1_102 = arith.constant 1 : index
    %c0_103 = arith.constant 0 : index
    %c0_104 = arith.constant 0 : index
    %c0_105 = arith.constant 0 : index
    %264 = vector.load %arg8[%c1_102, %c0_103, %c0_104, %c0_105] : memref<2x4x48x48xbf16, #tpu.memory_space<vmem>>, vector<1x1x48x48xbf16>
    %265 = vector.shape_cast %264 : vector<1x1x48x48xbf16> to vector<48x48xbf16>
    %cst_106 = arith.constant dense<0.000000e+00> : vector<24x48xf32>
    %266 = tpu.matmul %234, %265, %cst_106 {dimension_numbers = #tpu.dot_dimension_numbers<[1], [0], [0], [1], [0, 0, 1, 1], [], []>} : vector<24x48xbf16>, vector<48x48xbf16>, vector<24x48xf32> -> vector<24x48xf32>
    %267 = arith.truncf %266 : vector<24x48xf32> to vector<24x48xbf16>
    %268 = arith.truncf %263 : vector<24x24xf32> to vector<24x24xbf16>
    %cst_107 = arith.constant dense<0.000000e+00> : vector<24x48xf32>
    %269 = tpu.matmul %268, %267, %cst_107 {dimension_numbers = #tpu.dot_dimension_numbers<[1], [0], [0], [1], [0, 0, 1, 1], [], []>} : vector<24x24xbf16>, vector<24x48xbf16>, vector<24x48xf32> -> vector<24x48xf32>
    %270 = arith.addf %246, %269 : vector<24x48xf32>
    %271 = vector.extract_strided_slice %242 {offsets = [0, 12], sizes = [24, 12], strides = [1, 1]} : vector<24x96xbf16> to vector<24x12xbf16>
    %272 = vector.extract_strided_slice %242 {offsets = [0, 60], sizes = [24, 12], strides = [1, 1]} : vector<24x96xbf16> to vector<24x12xbf16>
    %cst_108 = arith.constant dense<0.000000e+00> : vector<24x24xf32>
    %273 = tpu.matmul %271, %272, %cst_108 {dimension_numbers = #tpu.dot_dimension_numbers<[1], [1], [0], [0], [0, 0, 1, 0], [], []>} : vector<24x12xbf16>, vector<24x12xbf16>, vector<24x24xf32> -> vector<24x24xf32>
    %cst_109 = arith.constant 0.288675129 : f32
    %274 = vector.broadcast %cst_109 : f32 to vector<24x24xf32>
    %275 = arith.mulf %273, %274 : vector<24x24xf32>
    %276 = vector.broadcast %20 : vector<1x24xf32> to vector<24x24xf32>
    %277 = arith.addf %275, %276 : vector<24x24xf32>
    %cst_110 = arith.constant dense<0xFF800000> : vector<24xf32>
    %278 = vector.multi_reduction <maximumf>, %277, %cst_110 [1] : vector<24x24xf32> to vector<24xf32>
    %279 = vector.shape_cast %278 : vector<24xf32> to vector<24x1xf32>
    %280 = vector.broadcast %279 : vector<24x1xf32> to vector<24x24xf32>
    %281 = arith.subf %277, %280 : vector<24x24xf32>
    %282 = math.exp %281 : vector<24x24xf32>
    %cst_111 = arith.constant dense<0.000000e+00> : vector<24xf32>
    %283 = vector.multi_reduction <add>, %282, %cst_111 [1] : vector<24x24xf32> to vector<24xf32>
    %284 = vector.shape_cast %283 : vector<24xf32> to vector<24x1xf32>
    %285 = tpu.reciprocal %284 {approx = true} : vector<24x1xf32> -> vector<24x1xf32>
    %286 = vector.broadcast %285 : vector<24x1xf32> to vector<24x24xf32>
    %287 = arith.mulf %282, %286 : vector<24x24xf32>
    %c1_112 = arith.constant 1 : index
    %c1_113 = arith.constant 1 : index
    %c0_114 = arith.constant 0 : index
    %c0_115 = arith.constant 0 : index
    %288 = vector.load %arg8[%c1_112, %c1_113, %c0_114, %c0_115] : memref<2x4x48x48xbf16, #tpu.memory_space<vmem>>, vector<1x1x48x48xbf16>
    %289 = vector.shape_cast %288 : vector<1x1x48x48xbf16> to vector<48x48xbf16>
    %cst_116 = arith.constant dense<0.000000e+00> : vector<24x48xf32>
    %290 = tpu.matmul %234, %289, %cst_116 {dimension_numbers = #tpu.dot_dimension_numbers<[1], [0], [0], [1], [0, 0, 1, 1], [], []>} : vector<24x48xbf16>, vector<48x48xbf16>, vector<24x48xf32> -> vector<24x48xf32>
    %291 = arith.truncf %290 : vector<24x48xf32> to vector<24x48xbf16>
    %292 = arith.truncf %287 : vector<24x24xf32> to vector<24x24xbf16>
    %cst_117 = arith.constant dense<0.000000e+00> : vector<24x48xf32>
    %293 = tpu.matmul %292, %291, %cst_117 {dimension_numbers = #tpu.dot_dimension_numbers<[1], [0], [0], [1], [0, 0, 1, 1], [], []>} : vector<24x24xbf16>, vector<24x48xbf16>, vector<24x48xf32> -> vector<24x48xf32>
    %294 = arith.addf %270, %293 : vector<24x48xf32>
    %295 = vector.extract_strided_slice %242 {offsets = [0, 24], sizes = [24, 12], strides = [1, 1]} : vector<24x96xbf16> to vector<24x12xbf16>
    %296 = vector.extract_strided_slice %242 {offsets = [0, 72], sizes = [24, 12], strides = [1, 1]} : vector<24x96xbf16> to vector<24x12xbf16>
    %cst_118 = arith.constant dense<0.000000e+00> : vector<24x24xf32>
    %297 = tpu.matmul %295, %296, %cst_118 {dimension_numbers = #tpu.dot_dimension_numbers<[1], [1], [0], [0], [0, 0, 1, 0], [], []>} : vector<24x12xbf16>, vector<24x12xbf16>, vector<24x24xf32> -> vector<24x24xf32>
    %cst_119 = arith.constant 0.288675129 : f32
    %298 = vector.broadcast %cst_119 : f32 to vector<24x24xf32>
    %299 = arith.mulf %297, %298 : vector<24x24xf32>
    %300 = vector.broadcast %20 : vector<1x24xf32> to vector<24x24xf32>
    %301 = arith.addf %299, %300 : vector<24x24xf32>
    %cst_120 = arith.constant dense<0xFF800000> : vector<24xf32>
    %302 = vector.multi_reduction <maximumf>, %301, %cst_120 [1] : vector<24x24xf32> to vector<24xf32>
    %303 = vector.shape_cast %302 : vector<24xf32> to vector<24x1xf32>
    %304 = vector.broadcast %303 : vector<24x1xf32> to vector<24x24xf32>
    %305 = arith.subf %301, %304 : vector<24x24xf32>
    %306 = math.exp %305 : vector<24x24xf32>
    %cst_121 = arith.constant dense<0.000000e+00> : vector<24xf32>
    %307 = vector.multi_reduction <add>, %306, %cst_121 [1] : vector<24x24xf32> to vector<24xf32>
    %308 = vector.shape_cast %307 : vector<24xf32> to vector<24x1xf32>
    %309 = tpu.reciprocal %308 {approx = true} : vector<24x1xf32> -> vector<24x1xf32>
    %310 = vector.broadcast %309 : vector<24x1xf32> to vector<24x24xf32>
    %311 = arith.mulf %306, %310 : vector<24x24xf32>
    %c1_122 = arith.constant 1 : index
    %c2_123 = arith.constant 2 : index
    %c0_124 = arith.constant 0 : index
    %c0_125 = arith.constant 0 : index
    %312 = vector.load %arg8[%c1_122, %c2_123, %c0_124, %c0_125] : memref<2x4x48x48xbf16, #tpu.memory_space<vmem>>, vector<1x1x48x48xbf16>
    %313 = vector.shape_cast %312 : vector<1x1x48x48xbf16> to vector<48x48xbf16>
    %cst_126 = arith.constant dense<0.000000e+00> : vector<24x48xf32>
    %314 = tpu.matmul %234, %313, %cst_126 {dimension_numbers = #tpu.dot_dimension_numbers<[1], [0], [0], [1], [0, 0, 1, 1], [], []>} : vector<24x48xbf16>, vector<48x48xbf16>, vector<24x48xf32> -> vector<24x48xf32>
    %315 = arith.truncf %314 : vector<24x48xf32> to vector<24x48xbf16>
    %316 = arith.truncf %311 : vector<24x24xf32> to vector<24x24xbf16>
    %cst_127 = arith.constant dense<0.000000e+00> : vector<24x48xf32>
    %317 = tpu.matmul %316, %315, %cst_127 {dimension_numbers = #tpu.dot_dimension_numbers<[1], [0], [0], [1], [0, 0, 1, 1], [], []>} : vector<24x24xbf16>, vector<24x48xbf16>, vector<24x48xf32> -> vector<24x48xf32>
    %318 = arith.addf %294, %317 : vector<24x48xf32>
    %319 = vector.extract_strided_slice %242 {offsets = [0, 36], sizes = [24, 12], strides = [1, 1]} : vector<24x96xbf16> to vector<24x12xbf16>
    %320 = vector.extract_strided_slice %242 {offsets = [0, 84], sizes = [24, 12], strides = [1, 1]} : vector<24x96xbf16> to vector<24x12xbf16>
    %cst_128 = arith.constant dense<0.000000e+00> : vector<24x24xf32>
    %321 = tpu.matmul %319, %320, %cst_128 {dimension_numbers = #tpu.dot_dimension_numbers<[1], [1], [0], [0], [0, 0, 1, 0], [], []>} : vector<24x12xbf16>, vector<24x12xbf16>, vector<24x24xf32> -> vector<24x24xf32>
    %cst_129 = arith.constant 0.288675129 : f32
    %322 = vector.broadcast %cst_129 : f32 to vector<24x24xf32>
    %323 = arith.mulf %321, %322 : vector<24x24xf32>
    %324 = vector.broadcast %20 : vector<1x24xf32> to vector<24x24xf32>
    %325 = arith.addf %323, %324 : vector<24x24xf32>
    %cst_130 = arith.constant dense<0xFF800000> : vector<24xf32>
    %326 = vector.multi_reduction <maximumf>, %325, %cst_130 [1] : vector<24x24xf32> to vector<24xf32>
    %327 = vector.shape_cast %326 : vector<24xf32> to vector<24x1xf32>
    %328 = vector.broadcast %327 : vector<24x1xf32> to vector<24x24xf32>
    %329 = arith.subf %325, %328 : vector<24x24xf32>
    %330 = math.exp %329 : vector<24x24xf32>
    %cst_131 = arith.constant dense<0.000000e+00> : vector<24xf32>
    %331 = vector.multi_reduction <add>, %330, %cst_131 [1] : vector<24x24xf32> to vector<24xf32>
    %332 = vector.shape_cast %331 : vector<24xf32> to vector<24x1xf32>
    %333 = tpu.reciprocal %332 {approx = true} : vector<24x1xf32> -> vector<24x1xf32>
    %334 = vector.broadcast %333 : vector<24x1xf32> to vector<24x24xf32>
    %335 = arith.mulf %330, %334 : vector<24x24xf32>
    %c1_132 = arith.constant 1 : index
    %c3_133 = arith.constant 3 : index
    %c0_134 = arith.constant 0 : index
    %c0_135 = arith.constant 0 : index
    %336 = vector.load %arg8[%c1_132, %c3_133, %c0_134, %c0_135] : memref<2x4x48x48xbf16, #tpu.memory_space<vmem>>, vector<1x1x48x48xbf16>
    %337 = vector.shape_cast %336 : vector<1x1x48x48xbf16> to vector<48x48xbf16>
    %cst_136 = arith.constant dense<0.000000e+00> : vector<24x48xf32>
    %338 = tpu.matmul %234, %337, %cst_136 {dimension_numbers = #tpu.dot_dimension_numbers<[1], [0], [0], [1], [0, 0, 1, 1], [], []>} : vector<24x48xbf16>, vector<48x48xbf16>, vector<24x48xf32> -> vector<24x48xf32>
    %339 = arith.truncf %338 : vector<24x48xf32> to vector<24x48xbf16>
    %340 = arith.truncf %335 : vector<24x24xf32> to vector<24x24xbf16>
    %cst_137 = arith.constant dense<0.000000e+00> : vector<24x48xf32>
    %341 = tpu.matmul %340, %339, %cst_137 {dimension_numbers = #tpu.dot_dimension_numbers<[1], [0], [0], [1], [0, 0, 1, 1], [], []>} : vector<24x24xbf16>, vector<24x48xbf16>, vector<24x48xf32> -> vector<24x48xf32>
    %342 = arith.addf %318, %341 : vector<24x48xf32>
    %343 = arith.addf %208, %342 : vector<24x48xf32>
    %344 = vector.extract_strided_slice %209 {offsets = [2, 0], sizes = [1, 48], strides = [1, 1]} : vector<8x48xf32> to vector<1x48xf32>
    %345 = vector.extract_strided_slice %209 {offsets = [3, 0], sizes = [1, 48], strides = [1, 1]} : vector<8x48xf32> to vector<1x48xf32>
    %cst_138 = arith.constant dense<0.000000e+00> : vector<24xf32>
    %346 = vector.multi_reduction <add>, %343, %cst_138 [1] : vector<24x48xf32> to vector<24xf32>
    %347 = vector.shape_cast %346 : vector<24xf32> to vector<24x1xf32>
    %cst_139 = arith.constant 4.800000e+01 : f32
    %348 = vector.broadcast %cst_139 : f32 to vector<24x1xf32>
    %349 = arith.divf %347, %348 : vector<24x1xf32>
    %350 = vector.broadcast %349 : vector<24x1xf32> to vector<24x48xf32>
    %351 = arith.subf %343, %350 : vector<24x48xf32>
    %352 = arith.mulf %351, %351 : vector<24x48xf32>
    %cst_140 = arith.constant dense<0.000000e+00> : vector<24xf32>
    %353 = vector.multi_reduction <add>, %352, %cst_140 [1] : vector<24x48xf32> to vector<24xf32>
    %354 = vector.shape_cast %353 : vector<24xf32> to vector<24x1xf32>
    %cst_141 = arith.constant 4.800000e+01 : f32
    %355 = vector.broadcast %cst_141 : f32 to vector<24x1xf32>
    %356 = arith.divf %354, %355 : vector<24x1xf32>
    %357 = vector.broadcast %349 : vector<24x1xf32> to vector<24x48xf32>
    %358 = arith.subf %343, %357 : vector<24x48xf32>
    %cst_142 = arith.constant 9.99999997E-7 : f32
    %359 = vector.broadcast %cst_142 : f32 to vector<24x1xf32>
    %360 = arith.addf %356, %359 : vector<24x1xf32>
    %361 = math.rsqrt %360 : vector<24x1xf32>
    %362 = vector.broadcast %361 : vector<24x1xf32> to vector<24x48xf32>
    %363 = arith.mulf %358, %362 : vector<24x48xf32>
    %364 = vector.broadcast %344 : vector<1x48xf32> to vector<24x48xf32>
    %365 = arith.mulf %363, %364 : vector<24x48xf32>
    %366 = vector.broadcast %345 : vector<1x48xf32> to vector<24x48xf32>
    %367 = arith.addf %365, %366 : vector<24x48xf32>
    %368 = arith.truncf %367 : vector<24x48xf32> to vector<24x48xbf16>
    %c1_143 = arith.constant 1 : index
    %c0_144 = arith.constant 0 : index
    %c0_145 = arith.constant 0 : index
    %369 = vector.load %arg9[%c1_143, %c0_144, %c0_145] : memref<2x48x192xbf16, #tpu.memory_space<vmem>>, vector<1x48x192xbf16>
    %370 = vector.shape_cast %369 : vector<1x48x192xbf16> to vector<48x192xbf16>
    %cst_146 = arith.constant dense<0.000000e+00> : vector<24x192xf32>
    %371 = tpu.matmul %368, %370, %cst_146 {dimension_numbers = #tpu.dot_dimension_numbers<[1], [0], [0], [1], [0, 0, 1, 1], [], []>} : vector<24x48xbf16>, vector<48x192xbf16>, vector<24x192xf32> -> vector<24x192xf32>
    %c1_147 = arith.constant 1 : index
    %c0_148 = arith.constant 0 : index
    %c0_149 = arith.constant 0 : index
    %372 = vector.load %arg10[%c1_147, %c0_148, %c0_149] : memref<2x1x192xf32, #tpu.memory_space<vmem>>, vector<1x1x192xf32>
    %373 = vector.shape_cast %372 : vector<1x1x192xf32> to vector<1x192xf32>
    %374 = vector.broadcast %373 : vector<1x192xf32> to vector<24x192xf32>
    %375 = arith.addf %371, %374 : vector<24x192xf32>
    %376 = arith.mulf %375, %375 : vector<24x192xf32>
    %377 = arith.mulf %375, %376 : vector<24x192xf32>
    %cst_150 = arith.constant 4.471500e-02 : f32
    %378 = vector.broadcast %cst_150 : f32 to vector<24x192xf32>
    %379 = arith.mulf %378, %377 : vector<24x192xf32>
    %380 = arith.addf %375, %379 : vector<24x192xf32>
    %cst_151 = arith.constant 0.797884583 : f32
    %381 = vector.broadcast %cst_151 : f32 to vector<24x192xf32>
    %382 = arith.mulf %381, %380 : vector<24x192xf32>
    %383 = math.tanh %382 : vector<24x192xf32>
    %cst_152 = arith.constant 1.000000e+00 : f32
    %384 = vector.broadcast %cst_152 : f32 to vector<24x192xf32>
    %385 = arith.addf %384, %383 : vector<24x192xf32>
    %cst_153 = arith.constant 5.000000e-01 : f32
    %386 = vector.broadcast %cst_153 : f32 to vector<24x192xf32>
    %387 = arith.mulf %386, %385 : vector<24x192xf32>
    %388 = arith.mulf %375, %387 : vector<24x192xf32>
    %389 = arith.truncf %388 : vector<24x192xf32> to vector<24x192xbf16>
    %c1_154 = arith.constant 1 : index
    %c0_155 = arith.constant 0 : index
    %c0_156 = arith.constant 0 : index
    %390 = vector.load %arg11[%c1_154, %c0_155, %c0_156] : memref<2x192x48xbf16, #tpu.memory_space<vmem>>, vector<1x192x48xbf16>
    %391 = vector.shape_cast %390 : vector<1x192x48xbf16> to vector<192x48xbf16>
    %cst_157 = arith.constant dense<0.000000e+00> : vector<24x48xf32>
    %392 = tpu.matmul %389, %391, %cst_157 {dimension_numbers = #tpu.dot_dimension_numbers<[1], [0], [0], [1], [0, 0, 1, 1], [], []>} : vector<24x192xbf16>, vector<192x48xbf16>, vector<24x48xf32> -> vector<24x48xf32>
    %393 = vector.extract_strided_slice %209 {offsets = [5, 0], sizes = [1, 48], strides = [1, 1]} : vector<8x48xf32> to vector<1x48xf32>
    %394 = vector.broadcast %393 : vector<1x48xf32> to vector<24x48xf32>
    %395 = arith.addf %392, %394 : vector<24x48xf32>
    %396 = arith.addf %343, %395 : vector<24x48xf32>
    %c16 = arith.constant 16 : index
    %c0_158 = arith.constant 0 : index
    %397 = vector.load %arg12[%c16, %c0_158] : memref<19x48xf32, #tpu.memory_space<vmem>>, vector<1x48xf32>
    %c17 = arith.constant 17 : index
    %c0_159 = arith.constant 0 : index
    %398 = vector.load %arg12[%c17, %c0_159] : memref<19x48xf32, #tpu.memory_space<vmem>>, vector<1x48xf32>
    %cst_160 = arith.constant dense<0.000000e+00> : vector<24xf32>
    %399 = vector.multi_reduction <add>, %396, %cst_160 [1] : vector<24x48xf32> to vector<24xf32>
    %400 = vector.shape_cast %399 : vector<24xf32> to vector<24x1xf32>
    %cst_161 = arith.constant 4.800000e+01 : f32
    %401 = vector.broadcast %cst_161 : f32 to vector<24x1xf32>
    %402 = arith.divf %400, %401 : vector<24x1xf32>
    %403 = vector.broadcast %402 : vector<24x1xf32> to vector<24x48xf32>
    %404 = arith.subf %396, %403 : vector<24x48xf32>
    %405 = arith.mulf %404, %404 : vector<24x48xf32>
    %cst_162 = arith.constant dense<0.000000e+00> : vector<24xf32>
    %406 = vector.multi_reduction <add>, %405, %cst_162 [1] : vector<24x48xf32> to vector<24xf32>
    %407 = vector.shape_cast %406 : vector<24xf32> to vector<24x1xf32>
    %cst_163 = arith.constant 4.800000e+01 : f32
    %408 = vector.broadcast %cst_163 : f32 to vector<24x1xf32>
    %409 = arith.divf %407, %408 : vector<24x1xf32>
    %410 = vector.broadcast %402 : vector<24x1xf32> to vector<24x48xf32>
    %411 = arith.subf %396, %410 : vector<24x48xf32>
    %cst_164 = arith.constant 9.99999997E-7 : f32
    %412 = vector.broadcast %cst_164 : f32 to vector<24x1xf32>
    %413 = arith.addf %409, %412 : vector<24x1xf32>
    %414 = math.rsqrt %413 : vector<24x1xf32>
    %415 = vector.broadcast %414 : vector<24x1xf32> to vector<24x48xf32>
    %416 = arith.mulf %411, %415 : vector<24x48xf32>
    %417 = vector.broadcast %397 : vector<1x48xf32> to vector<24x48xf32>
    %418 = arith.mulf %416, %417 : vector<24x48xf32>
    %419 = vector.broadcast %398 : vector<1x48xf32> to vector<24x48xf32>
    %420 = arith.addf %418, %419 : vector<24x48xf32>
    %421 = vector.extract_strided_slice %420 {offsets = [0, 0], sizes = [1, 48], strides = [1, 1]} : vector<24x48xf32> to vector<1x48xf32>
    %c0_165 = arith.constant 0 : index
    %c0_166 = arith.constant 0 : index
    %c0_167 = arith.constant 0 : index
    %422 = vector.load %arg2[%c0_165, %c0_166, %c0_167] : memref<1x64x48xf32, #tpu.memory_space<vmem>>, vector<1x64x48xf32>
    %423 = vector.shape_cast %422 : vector<1x64x48xf32> to vector<64x48xf32>
    %424 = arith.truncf %423 : vector<64x48xf32> to vector<64x48xbf16>
    %c0_168 = arith.constant 0 : index
    %c0_169 = arith.constant 0 : index
    %425 = vector.load %arg13[%c0_168, %c0_169] : memref<48x48xbf16, #tpu.memory_space<vmem>>, vector<48x48xbf16>
    %cst_170 = arith.constant dense<0.000000e+00> : vector<64x48xf32>
    %426 = tpu.matmul %424, %425, %cst_170 {dimension_numbers = #tpu.dot_dimension_numbers<[1], [0], [0], [1], [0, 0, 1, 1], [], []>} : vector<64x48xbf16>, vector<48x48xbf16>, vector<64x48xf32> -> vector<64x48xf32>
    %427 = vector.broadcast %1 : vector<1x48xf32> to vector<64x48xf32>
    %428 = arith.addf %426, %427 : vector<64x48xf32>
    %429 = tpu.concatenate %421, %2, %428 in 0 : vector<1x48xf32>, vector<7x48xf32>, vector<64x48xf32> -> vector<72x48xf32>
    %c0_171 = arith.constant 0 : index
    %c0_172 = arith.constant 0 : index
    %430 = vector.load %arg4[%c0_171, %c0_172] : memref<72x48xf32, #tpu.memory_space<vmem>>, vector<72x48xf32>
    %431 = arith.addf %429, %430 : vector<72x48xf32>
    %432 = tpu.iota {dimensions = array<i32: 1>} : vector<1x72xi32>
    %c1_i32_173 = arith.constant 1 : i32
    %433 = vector.broadcast %c1_i32_173 : i32 to vector<1x72xi32>
    %434 = arith.cmpi sge, %432, %433 : vector<1x72xi32>
    %c8_i32_174 = arith.constant 8 : i32
    %435 = vector.broadcast %c8_i32_174 : i32 to vector<1x72xi32>
    %436 = arith.cmpi slt, %432, %435 : vector<1x72xi32>
    %437 = arith.andi %434, %436 : vector<1x72xi1>
    %cst_175 = arith.constant -1.000000e+30 : f32
    %cst_176 = arith.constant 0.000000e+00 : f32
    %438 = vector.broadcast %cst_175 : f32 to vector<1x72xf32>
    %439 = vector.broadcast %cst_176 : f32 to vector<1x72xf32>
    %440 = arith.select %437, %438, %439 : vector<1x72xi1>, vector<1x72xf32>
    %c0_177 = arith.constant 0 : index
    %c0_178 = arith.constant 0 : index
    %441 = vector.load %arg20[%c0_177, %c0_178] : memref<19x48xf32, #tpu.memory_space<vmem>>, vector<8x48xf32>
    %442 = vector.extract_strided_slice %441 {offsets = [0, 0], sizes = [1, 48], strides = [1, 1]} : vector<8x48xf32> to vector<1x48xf32>
    %443 = vector.extract_strided_slice %441 {offsets = [1, 0], sizes = [1, 48], strides = [1, 1]} : vector<8x48xf32> to vector<1x48xf32>
    %cst_179 = arith.constant dense<0.000000e+00> : vector<72xf32>
    %444 = vector.multi_reduction <add>, %431, %cst_179 [1] : vector<72x48xf32> to vector<72xf32>
    %445 = vector.shape_cast %444 : vector<72xf32> to vector<72x1xf32>
    %cst_180 = arith.constant 4.800000e+01 : f32
    %446 = vector.broadcast %cst_180 : f32 to vector<72x1xf32>
    %447 = arith.divf %445, %446 : vector<72x1xf32>
    %448 = vector.broadcast %447 : vector<72x1xf32> to vector<72x48xf32>
    %449 = arith.subf %431, %448 : vector<72x48xf32>
    %450 = arith.mulf %449, %449 : vector<72x48xf32>
    %cst_181 = arith.constant dense<0.000000e+00> : vector<72xf32>
    %451 = vector.multi_reduction <add>, %450, %cst_181 [1] : vector<72x48xf32> to vector<72xf32>
    %452 = vector.shape_cast %451 : vector<72xf32> to vector<72x1xf32>
    %cst_182 = arith.constant 4.800000e+01 : f32
    %453 = vector.broadcast %cst_182 : f32 to vector<72x1xf32>
    %454 = arith.divf %452, %453 : vector<72x1xf32>
    %455 = vector.broadcast %447 : vector<72x1xf32> to vector<72x48xf32>
    %456 = arith.subf %431, %455 : vector<72x48xf32>
    %cst_183 = arith.constant 9.99999997E-7 : f32
    %457 = vector.broadcast %cst_183 : f32 to vector<72x1xf32>
    %458 = arith.addf %454, %457 : vector<72x1xf32>
    %459 = math.rsqrt %458 : vector<72x1xf32>
    %460 = vector.broadcast %459 : vector<72x1xf32> to vector<72x48xf32>
    %461 = arith.mulf %456, %460 : vector<72x48xf32>
    %462 = vector.broadcast %442 : vector<1x48xf32> to vector<72x48xf32>
    %463 = arith.mulf %461, %462 : vector<72x48xf32>
    %464 = vector.broadcast %443 : vector<1x48xf32> to vector<72x48xf32>
    %465 = arith.addf %463, %464 : vector<72x48xf32>
    %466 = arith.truncf %465 : vector<72x48xf32> to vector<72x48xbf16>
    %c0_184 = arith.constant 0 : index
    %c0_185 = arith.constant 0 : index
    %c0_186 = arith.constant 0 : index
    %467 = vector.load %arg14[%c0_184, %c0_185, %c0_186] : memref<2x48x96xbf16, #tpu.memory_space<vmem>>, vector<1x48x96xbf16>
    %468 = vector.shape_cast %467 : vector<1x48x96xbf16> to vector<48x96xbf16>
    %cst_187 = arith.constant dense<0.000000e+00> : vector<72x96xf32>
    %469 = tpu.matmul %466, %468, %cst_187 {dimension_numbers = #tpu.dot_dimension_numbers<[1], [0], [0], [1], [0, 0, 1, 1], [], []>} : vector<72x48xbf16>, vector<48x96xbf16>, vector<72x96xf32> -> vector<72x96xf32>
    %c0_188 = arith.constant 0 : index
    %c0_189 = arith.constant 0 : index
    %c0_190 = arith.constant 0 : index
    %470 = vector.load %arg15[%c0_188, %c0_189, %c0_190] : memref<2x1x96xf32, #tpu.memory_space<vmem>>, vector<1x1x96xf32>
    %471 = vector.shape_cast %470 : vector<1x1x96xf32> to vector<1x96xf32>
    %472 = vector.broadcast %471 : vector<1x96xf32> to vector<72x96xf32>
    %473 = arith.addf %469, %472 : vector<72x96xf32>
    %474 = arith.truncf %473 : vector<72x96xf32> to vector<72x96xbf16>
    %cst_191 = arith.constant 0.000000e+00 : f32
    %475 = vector.broadcast %cst_191 : f32 to vector<72x48xf32>
    %476 = vector.extract_strided_slice %441 {offsets = [4, 0], sizes = [1, 48], strides = [1, 1]} : vector<8x48xf32> to vector<1x48xf32>
    %477 = vector.broadcast %476 : vector<1x48xf32> to vector<72x48xf32>
    %478 = arith.addf %475, %477 : vector<72x48xf32>
    %479 = vector.extract_strided_slice %474 {offsets = [0, 0], sizes = [72, 12], strides = [1, 1]} : vector<72x96xbf16> to vector<72x12xbf16>
    %480 = vector.extract_strided_slice %474 {offsets = [0, 48], sizes = [72, 12], strides = [1, 1]} : vector<72x96xbf16> to vector<72x12xbf16>
    %cst_192 = arith.constant dense<0.000000e+00> : vector<72x72xf32>
    %481 = tpu.matmul %479, %480, %cst_192 {dimension_numbers = #tpu.dot_dimension_numbers<[1], [1], [0], [0], [0, 0, 1, 0], [], []>} : vector<72x12xbf16>, vector<72x12xbf16>, vector<72x72xf32> -> vector<72x72xf32>
    %cst_193 = arith.constant 0.288675129 : f32
    %482 = vector.broadcast %cst_193 : f32 to vector<72x72xf32>
    %483 = arith.mulf %481, %482 : vector<72x72xf32>
    %484 = vector.broadcast %440 : vector<1x72xf32> to vector<72x72xf32>
    %485 = arith.addf %483, %484 : vector<72x72xf32>
    %cst_194 = arith.constant dense<0xFF800000> : vector<72xf32>
    %486 = vector.multi_reduction <maximumf>, %485, %cst_194 [1] : vector<72x72xf32> to vector<72xf32>
    %487 = vector.shape_cast %486 : vector<72xf32> to vector<72x1xf32>
    %488 = vector.broadcast %487 : vector<72x1xf32> to vector<72x72xf32>
    %489 = arith.subf %485, %488 : vector<72x72xf32>
    %490 = math.exp %489 : vector<72x72xf32>
    %cst_195 = arith.constant dense<0.000000e+00> : vector<72xf32>
    %491 = vector.multi_reduction <add>, %490, %cst_195 [1] : vector<72x72xf32> to vector<72xf32>
    %492 = vector.shape_cast %491 : vector<72xf32> to vector<72x1xf32>
    %493 = tpu.reciprocal %492 {approx = true} : vector<72x1xf32> -> vector<72x1xf32>
    %494 = vector.broadcast %493 : vector<72x1xf32> to vector<72x72xf32>
    %495 = arith.mulf %490, %494 : vector<72x72xf32>
    %c0_196 = arith.constant 0 : index
    %c0_197 = arith.constant 0 : index
    %c0_198 = arith.constant 0 : index
    %c0_199 = arith.constant 0 : index
    %496 = vector.load %arg16[%c0_196, %c0_197, %c0_198, %c0_199] : memref<2x4x48x48xbf16, #tpu.memory_space<vmem>>, vector<1x1x48x48xbf16>
    %497 = vector.shape_cast %496 : vector<1x1x48x48xbf16> to vector<48x48xbf16>
    %cst_200 = arith.constant dense<0.000000e+00> : vector<72x48xf32>
    %498 = tpu.matmul %466, %497, %cst_200 {dimension_numbers = #tpu.dot_dimension_numbers<[1], [0], [0], [1], [0, 0, 1, 1], [], []>} : vector<72x48xbf16>, vector<48x48xbf16>, vector<72x48xf32> -> vector<72x48xf32>
    %499 = arith.truncf %498 : vector<72x48xf32> to vector<72x48xbf16>
    %500 = arith.truncf %495 : vector<72x72xf32> to vector<72x72xbf16>
    %cst_201 = arith.constant dense<0.000000e+00> : vector<72x48xf32>
    %501 = tpu.matmul %500, %499, %cst_201 {dimension_numbers = #tpu.dot_dimension_numbers<[1], [0], [0], [1], [0, 0, 1, 1], [], []>} : vector<72x72xbf16>, vector<72x48xbf16>, vector<72x48xf32> -> vector<72x48xf32>
    %502 = arith.addf %478, %501 : vector<72x48xf32>
    %503 = vector.extract_strided_slice %474 {offsets = [0, 12], sizes = [72, 12], strides = [1, 1]} : vector<72x96xbf16> to vector<72x12xbf16>
    %504 = vector.extract_strided_slice %474 {offsets = [0, 60], sizes = [72, 12], strides = [1, 1]} : vector<72x96xbf16> to vector<72x12xbf16>
    %cst_202 = arith.constant dense<0.000000e+00> : vector<72x72xf32>
    %505 = tpu.matmul %503, %504, %cst_202 {dimension_numbers = #tpu.dot_dimension_numbers<[1], [1], [0], [0], [0, 0, 1, 0], [], []>} : vector<72x12xbf16>, vector<72x12xbf16>, vector<72x72xf32> -> vector<72x72xf32>
    %cst_203 = arith.constant 0.288675129 : f32
    %506 = vector.broadcast %cst_203 : f32 to vector<72x72xf32>
    %507 = arith.mulf %505, %506 : vector<72x72xf32>
    %508 = vector.broadcast %440 : vector<1x72xf32> to vector<72x72xf32>
    %509 = arith.addf %507, %508 : vector<72x72xf32>
    %cst_204 = arith.constant dense<0xFF800000> : vector<72xf32>
    %510 = vector.multi_reduction <maximumf>, %509, %cst_204 [1] : vector<72x72xf32> to vector<72xf32>
    %511 = vector.shape_cast %510 : vector<72xf32> to vector<72x1xf32>
    %512 = vector.broadcast %511 : vector<72x1xf32> to vector<72x72xf32>
    %513 = arith.subf %509, %512 : vector<72x72xf32>
    %514 = math.exp %513 : vector<72x72xf32>
    %cst_205 = arith.constant dense<0.000000e+00> : vector<72xf32>
    %515 = vector.multi_reduction <add>, %514, %cst_205 [1] : vector<72x72xf32> to vector<72xf32>
    %516 = vector.shape_cast %515 : vector<72xf32> to vector<72x1xf32>
    %517 = tpu.reciprocal %516 {approx = true} : vector<72x1xf32> -> vector<72x1xf32>
    %518 = vector.broadcast %517 : vector<72x1xf32> to vector<72x72xf32>
    %519 = arith.mulf %514, %518 : vector<72x72xf32>
    %c0_206 = arith.constant 0 : index
    %c1_207 = arith.constant 1 : index
    %c0_208 = arith.constant 0 : index
    %c0_209 = arith.constant 0 : index
    %520 = vector.load %arg16[%c0_206, %c1_207, %c0_208, %c0_209] : memref<2x4x48x48xbf16, #tpu.memory_space<vmem>>, vector<1x1x48x48xbf16>
    %521 = vector.shape_cast %520 : vector<1x1x48x48xbf16> to vector<48x48xbf16>
    %cst_210 = arith.constant dense<0.000000e+00> : vector<72x48xf32>
    %522 = tpu.matmul %466, %521, %cst_210 {dimension_numbers = #tpu.dot_dimension_numbers<[1], [0], [0], [1], [0, 0, 1, 1], [], []>} : vector<72x48xbf16>, vector<48x48xbf16>, vector<72x48xf32> -> vector<72x48xf32>
    %523 = arith.truncf %522 : vector<72x48xf32> to vector<72x48xbf16>
    %524 = arith.truncf %519 : vector<72x72xf32> to vector<72x72xbf16>
    %cst_211 = arith.constant dense<0.000000e+00> : vector<72x48xf32>
    %525 = tpu.matmul %524, %523, %cst_211 {dimension_numbers = #tpu.dot_dimension_numbers<[1], [0], [0], [1], [0, 0, 1, 1], [], []>} : vector<72x72xbf16>, vector<72x48xbf16>, vector<72x48xf32> -> vector<72x48xf32>
    %526 = arith.addf %502, %525 : vector<72x48xf32>
    %527 = vector.extract_strided_slice %474 {offsets = [0, 24], sizes = [72, 12], strides = [1, 1]} : vector<72x96xbf16> to vector<72x12xbf16>
    %528 = vector.extract_strided_slice %474 {offsets = [0, 72], sizes = [72, 12], strides = [1, 1]} : vector<72x96xbf16> to vector<72x12xbf16>
    %cst_212 = arith.constant dense<0.000000e+00> : vector<72x72xf32>
    %529 = tpu.matmul %527, %528, %cst_212 {dimension_numbers = #tpu.dot_dimension_numbers<[1], [1], [0], [0], [0, 0, 1, 0], [], []>} : vector<72x12xbf16>, vector<72x12xbf16>, vector<72x72xf32> -> vector<72x72xf32>
    %cst_213 = arith.constant 0.288675129 : f32
    %530 = vector.broadcast %cst_213 : f32 to vector<72x72xf32>
    %531 = arith.mulf %529, %530 : vector<72x72xf32>
    %532 = vector.broadcast %440 : vector<1x72xf32> to vector<72x72xf32>
    %533 = arith.addf %531, %532 : vector<72x72xf32>
    %cst_214 = arith.constant dense<0xFF800000> : vector<72xf32>
    %534 = vector.multi_reduction <maximumf>, %533, %cst_214 [1] : vector<72x72xf32> to vector<72xf32>
    %535 = vector.shape_cast %534 : vector<72xf32> to vector<72x1xf32>
    %536 = vector.broadcast %535 : vector<72x1xf32> to vector<72x72xf32>
    %537 = arith.subf %533, %536 : vector<72x72xf32>
    %538 = math.exp %537 : vector<72x72xf32>
    %cst_215 = arith.constant dense<0.000000e+00> : vector<72xf32>
    %539 = vector.multi_reduction <add>, %538, %cst_215 [1] : vector<72x72xf32> to vector<72xf32>
    %540 = vector.shape_cast %539 : vector<72xf32> to vector<72x1xf32>
    %541 = tpu.reciprocal %540 {approx = true} : vector<72x1xf32> -> vector<72x1xf32>
    %542 = vector.broadcast %541 : vector<72x1xf32> to vector<72x72xf32>
    %543 = arith.mulf %538, %542 : vector<72x72xf32>
    %c0_216 = arith.constant 0 : index
    %c2_217 = arith.constant 2 : index
    %c0_218 = arith.constant 0 : index
    %c0_219 = arith.constant 0 : index
    %544 = vector.load %arg16[%c0_216, %c2_217, %c0_218, %c0_219] : memref<2x4x48x48xbf16, #tpu.memory_space<vmem>>, vector<1x1x48x48xbf16>
    %545 = vector.shape_cast %544 : vector<1x1x48x48xbf16> to vector<48x48xbf16>
    %cst_220 = arith.constant dense<0.000000e+00> : vector<72x48xf32>
    %546 = tpu.matmul %466, %545, %cst_220 {dimension_numbers = #tpu.dot_dimension_numbers<[1], [0], [0], [1], [0, 0, 1, 1], [], []>} : vector<72x48xbf16>, vector<48x48xbf16>, vector<72x48xf32> -> vector<72x48xf32>
    %547 = arith.truncf %546 : vector<72x48xf32> to vector<72x48xbf16>
    %548 = arith.truncf %543 : vector<72x72xf32> to vector<72x72xbf16>
    %cst_221 = arith.constant dense<0.000000e+00> : vector<72x48xf32>
    %549 = tpu.matmul %548, %547, %cst_221 {dimension_numbers = #tpu.dot_dimension_numbers<[1], [0], [0], [1], [0, 0, 1, 1], [], []>} : vector<72x72xbf16>, vector<72x48xbf16>, vector<72x48xf32> -> vector<72x48xf32>
    %550 = arith.addf %526, %549 : vector<72x48xf32>
    %551 = vector.extract_strided_slice %474 {offsets = [0, 36], sizes = [72, 12], strides = [1, 1]} : vector<72x96xbf16> to vector<72x12xbf16>
    %552 = vector.extract_strided_slice %474 {offsets = [0, 84], sizes = [72, 12], strides = [1, 1]} : vector<72x96xbf16> to vector<72x12xbf16>
    %cst_222 = arith.constant dense<0.000000e+00> : vector<72x72xf32>
    %553 = tpu.matmul %551, %552, %cst_222 {dimension_numbers = #tpu.dot_dimension_numbers<[1], [1], [0], [0], [0, 0, 1, 0], [], []>} : vector<72x12xbf16>, vector<72x12xbf16>, vector<72x72xf32> -> vector<72x72xf32>
    %cst_223 = arith.constant 0.288675129 : f32
    %554 = vector.broadcast %cst_223 : f32 to vector<72x72xf32>
    %555 = arith.mulf %553, %554 : vector<72x72xf32>
    %556 = vector.broadcast %440 : vector<1x72xf32> to vector<72x72xf32>
    %557 = arith.addf %555, %556 : vector<72x72xf32>
    %cst_224 = arith.constant dense<0xFF800000> : vector<72xf32>
    %558 = vector.multi_reduction <maximumf>, %557, %cst_224 [1] : vector<72x72xf32> to vector<72xf32>
    %559 = vector.shape_cast %558 : vector<72xf32> to vector<72x1xf32>
    %560 = vector.broadcast %559 : vector<72x1xf32> to vector<72x72xf32>
    %561 = arith.subf %557, %560 : vector<72x72xf32>
    %562 = math.exp %561 : vector<72x72xf32>
    %cst_225 = arith.constant dense<0.000000e+00> : vector<72xf32>
    %563 = vector.multi_reduction <add>, %562, %cst_225 [1] : vector<72x72xf32> to vector<72xf32>
    %564 = vector.shape_cast %563 : vector<72xf32> to vector<72x1xf32>
    %565 = tpu.reciprocal %564 {approx = true} : vector<72x1xf32> -> vector<72x1xf32>
    %566 = vector.broadcast %565 : vector<72x1xf32> to vector<72x72xf32>
    %567 = arith.mulf %562, %566 : vector<72x72xf32>
    %c0_226 = arith.constant 0 : index
    %c3_227 = arith.constant 3 : index
    %c0_228 = arith.constant 0 : index
    %c0_229 = arith.constant 0 : index
    %568 = vector.load %arg16[%c0_226, %c3_227, %c0_228, %c0_229] : memref<2x4x48x48xbf16, #tpu.memory_space<vmem>>, vector<1x1x48x48xbf16>
    %569 = vector.shape_cast %568 : vector<1x1x48x48xbf16> to vector<48x48xbf16>
    %cst_230 = arith.constant dense<0.000000e+00> : vector<72x48xf32>
    %570 = tpu.matmul %466, %569, %cst_230 {dimension_numbers = #tpu.dot_dimension_numbers<[1], [0], [0], [1], [0, 0, 1, 1], [], []>} : vector<72x48xbf16>, vector<48x48xbf16>, vector<72x48xf32> -> vector<72x48xf32>
    %571 = arith.truncf %570 : vector<72x48xf32> to vector<72x48xbf16>
    %572 = arith.truncf %567 : vector<72x72xf32> to vector<72x72xbf16>
    %cst_231 = arith.constant dense<0.000000e+00> : vector<72x48xf32>
    %573 = tpu.matmul %572, %571, %cst_231 {dimension_numbers = #tpu.dot_dimension_numbers<[1], [0], [0], [1], [0, 0, 1, 1], [], []>} : vector<72x72xbf16>, vector<72x48xbf16>, vector<72x48xf32> -> vector<72x48xf32>
    %574 = arith.addf %550, %573 : vector<72x48xf32>
    %575 = arith.addf %431, %574 : vector<72x48xf32>
    %576 = vector.extract_strided_slice %441 {offsets = [2, 0], sizes = [1, 48], strides = [1, 1]} : vector<8x48xf32> to vector<1x48xf32>
    %577 = vector.extract_strided_slice %441 {offsets = [3, 0], sizes = [1, 48], strides = [1, 1]} : vector<8x48xf32> to vector<1x48xf32>
    %cst_232 = arith.constant dense<0.000000e+00> : vector<72xf32>
    %578 = vector.multi_reduction <add>, %575, %cst_232 [1] : vector<72x48xf32> to vector<72xf32>
    %579 = vector.shape_cast %578 : vector<72xf32> to vector<72x1xf32>
    %cst_233 = arith.constant 4.800000e+01 : f32
    %580 = vector.broadcast %cst_233 : f32 to vector<72x1xf32>
    %581 = arith.divf %579, %580 : vector<72x1xf32>
    %582 = vector.broadcast %581 : vector<72x1xf32> to vector<72x48xf32>
    %583 = arith.subf %575, %582 : vector<72x48xf32>
    %584 = arith.mulf %583, %583 : vector<72x48xf32>
    %cst_234 = arith.constant dense<0.000000e+00> : vector<72xf32>
    %585 = vector.multi_reduction <add>, %584, %cst_234 [1] : vector<72x48xf32> to vector<72xf32>
    %586 = vector.shape_cast %585 : vector<72xf32> to vector<72x1xf32>
    %cst_235 = arith.constant 4.800000e+01 : f32
    %587 = vector.broadcast %cst_235 : f32 to vector<72x1xf32>
    %588 = arith.divf %586, %587 : vector<72x1xf32>
    %589 = vector.broadcast %581 : vector<72x1xf32> to vector<72x48xf32>
    %590 = arith.subf %575, %589 : vector<72x48xf32>
    %cst_236 = arith.constant 9.99999997E-7 : f32
    %591 = vector.broadcast %cst_236 : f32 to vector<72x1xf32>
    %592 = arith.addf %588, %591 : vector<72x1xf32>
    %593 = math.rsqrt %592 : vector<72x1xf32>
    %594 = vector.broadcast %593 : vector<72x1xf32> to vector<72x48xf32>
    %595 = arith.mulf %590, %594 : vector<72x48xf32>
    %596 = vector.broadcast %576 : vector<1x48xf32> to vector<72x48xf32>
    %597 = arith.mulf %595, %596 : vector<72x48xf32>
    %598 = vector.broadcast %577 : vector<1x48xf32> to vector<72x48xf32>
    %599 = arith.addf %597, %598 : vector<72x48xf32>
    %600 = arith.truncf %599 : vector<72x48xf32> to vector<72x48xbf16>
    %c0_237 = arith.constant 0 : index
    %c0_238 = arith.constant 0 : index
    %c0_239 = arith.constant 0 : index
    %601 = vector.load %arg17[%c0_237, %c0_238, %c0_239] : memref<2x48x192xbf16, #tpu.memory_space<vmem>>, vector<1x48x192xbf16>
    %602 = vector.shape_cast %601 : vector<1x48x192xbf16> to vector<48x192xbf16>
    %cst_240 = arith.constant dense<0.000000e+00> : vector<72x192xf32>
    %603 = tpu.matmul %600, %602, %cst_240 {dimension_numbers = #tpu.dot_dimension_numbers<[1], [0], [0], [1], [0, 0, 1, 1], [], []>} : vector<72x48xbf16>, vector<48x192xbf16>, vector<72x192xf32> -> vector<72x192xf32>
    %c0_241 = arith.constant 0 : index
    %c0_242 = arith.constant 0 : index
    %c0_243 = arith.constant 0 : index
    %604 = vector.load %arg18[%c0_241, %c0_242, %c0_243] : memref<2x1x192xf32, #tpu.memory_space<vmem>>, vector<1x1x192xf32>
    %605 = vector.shape_cast %604 : vector<1x1x192xf32> to vector<1x192xf32>
    %606 = vector.broadcast %605 : vector<1x192xf32> to vector<72x192xf32>
    %607 = arith.addf %603, %606 : vector<72x192xf32>
    %608 = arith.mulf %607, %607 : vector<72x192xf32>
    %609 = arith.mulf %607, %608 : vector<72x192xf32>
    %cst_244 = arith.constant 4.471500e-02 : f32
    %610 = vector.broadcast %cst_244 : f32 to vector<72x192xf32>
    %611 = arith.mulf %610, %609 : vector<72x192xf32>
    %612 = arith.addf %607, %611 : vector<72x192xf32>
    %cst_245 = arith.constant 0.797884583 : f32
    %613 = vector.broadcast %cst_245 : f32 to vector<72x192xf32>
    %614 = arith.mulf %613, %612 : vector<72x192xf32>
    %615 = math.tanh %614 : vector<72x192xf32>
    %cst_246 = arith.constant 1.000000e+00 : f32
    %616 = vector.broadcast %cst_246 : f32 to vector<72x192xf32>
    %617 = arith.addf %616, %615 : vector<72x192xf32>
    %cst_247 = arith.constant 5.000000e-01 : f32
    %618 = vector.broadcast %cst_247 : f32 to vector<72x192xf32>
    %619 = arith.mulf %618, %617 : vector<72x192xf32>
    %620 = arith.mulf %607, %619 : vector<72x192xf32>
    %621 = arith.truncf %620 : vector<72x192xf32> to vector<72x192xbf16>
    %c0_248 = arith.constant 0 : index
    %c0_249 = arith.constant 0 : index
    %c0_250 = arith.constant 0 : index
    %622 = vector.load %arg19[%c0_248, %c0_249, %c0_250] : memref<2x192x48xbf16, #tpu.memory_space<vmem>>, vector<1x192x48xbf16>
    %623 = vector.shape_cast %622 : vector<1x192x48xbf16> to vector<192x48xbf16>
    %cst_251 = arith.constant dense<0.000000e+00> : vector<72x48xf32>
    %624 = tpu.matmul %621, %623, %cst_251 {dimension_numbers = #tpu.dot_dimension_numbers<[1], [0], [0], [1], [0, 0, 1, 1], [], []>} : vector<72x192xbf16>, vector<192x48xbf16>, vector<72x48xf32> -> vector<72x48xf32>
    %625 = vector.extract_strided_slice %441 {offsets = [5, 0], sizes = [1, 48], strides = [1, 1]} : vector<8x48xf32> to vector<1x48xf32>
    %626 = vector.broadcast %625 : vector<1x48xf32> to vector<72x48xf32>
    %627 = arith.addf %624, %626 : vector<72x48xf32>
    %628 = arith.addf %575, %627 : vector<72x48xf32>
    %c8_252 = arith.constant 8 : index
    %c0_253 = arith.constant 0 : index
    %629 = vector.load %arg20[%c8_252, %c0_253] : memref<19x48xf32, #tpu.memory_space<vmem>>, vector<8x48xf32>
    %630 = vector.extract_strided_slice %629 {offsets = [0, 0], sizes = [1, 48], strides = [1, 1]} : vector<8x48xf32> to vector<1x48xf32>
    %631 = vector.extract_strided_slice %629 {offsets = [1, 0], sizes = [1, 48], strides = [1, 1]} : vector<8x48xf32> to vector<1x48xf32>
    %cst_254 = arith.constant dense<0.000000e+00> : vector<72xf32>
    %632 = vector.multi_reduction <add>, %628, %cst_254 [1] : vector<72x48xf32> to vector<72xf32>
    %633 = vector.shape_cast %632 : vector<72xf32> to vector<72x1xf32>
    %cst_255 = arith.constant 4.800000e+01 : f32
    %634 = vector.broadcast %cst_255 : f32 to vector<72x1xf32>
    %635 = arith.divf %633, %634 : vector<72x1xf32>
    %636 = vector.broadcast %635 : vector<72x1xf32> to vector<72x48xf32>
    %637 = arith.subf %628, %636 : vector<72x48xf32>
    %638 = arith.mulf %637, %637 : vector<72x48xf32>
    %cst_256 = arith.constant dense<0.000000e+00> : vector<72xf32>
    %639 = vector.multi_reduction <add>, %638, %cst_256 [1] : vector<72x48xf32> to vector<72xf32>
    %640 = vector.shape_cast %639 : vector<72xf32> to vector<72x1xf32>
    %cst_257 = arith.constant 4.800000e+01 : f32
    %641 = vector.broadcast %cst_257 : f32 to vector<72x1xf32>
    %642 = arith.divf %640, %641 : vector<72x1xf32>
    %643 = vector.broadcast %635 : vector<72x1xf32> to vector<72x48xf32>
    %644 = arith.subf %628, %643 : vector<72x48xf32>
    %cst_258 = arith.constant 9.99999997E-7 : f32
    %645 = vector.broadcast %cst_258 : f32 to vector<72x1xf32>
    %646 = arith.addf %642, %645 : vector<72x1xf32>
    %647 = math.rsqrt %646 : vector<72x1xf32>
    %648 = vector.broadcast %647 : vector<72x1xf32> to vector<72x48xf32>
    %649 = arith.mulf %644, %648 : vector<72x48xf32>
    %650 = vector.broadcast %630 : vector<1x48xf32> to vector<72x48xf32>
    %651 = arith.mulf %649, %650 : vector<72x48xf32>
    %652 = vector.broadcast %631 : vector<1x48xf32> to vector<72x48xf32>
    %653 = arith.addf %651, %652 : vector<72x48xf32>
    %654 = arith.truncf %653 : vector<72x48xf32> to vector<72x48xbf16>
    %c1_259 = arith.constant 1 : index
    %c0_260 = arith.constant 0 : index
    %c0_261 = arith.constant 0 : index
    %655 = vector.load %arg14[%c1_259, %c0_260, %c0_261] : memref<2x48x96xbf16, #tpu.memory_space<vmem>>, vector<1x48x96xbf16>
    %656 = vector.shape_cast %655 : vector<1x48x96xbf16> to vector<48x96xbf16>
    %cst_262 = arith.constant dense<0.000000e+00> : vector<72x96xf32>
    %657 = tpu.matmul %654, %656, %cst_262 {dimension_numbers = #tpu.dot_dimension_numbers<[1], [0], [0], [1], [0, 0, 1, 1], [], []>} : vector<72x48xbf16>, vector<48x96xbf16>, vector<72x96xf32> -> vector<72x96xf32>
    %c1_263 = arith.constant 1 : index
    %c0_264 = arith.constant 0 : index
    %c0_265 = arith.constant 0 : index
    %658 = vector.load %arg15[%c1_263, %c0_264, %c0_265] : memref<2x1x96xf32, #tpu.memory_space<vmem>>, vector<1x1x96xf32>
    %659 = vector.shape_cast %658 : vector<1x1x96xf32> to vector<1x96xf32>
    %660 = vector.broadcast %659 : vector<1x96xf32> to vector<72x96xf32>
    %661 = arith.addf %657, %660 : vector<72x96xf32>
    %662 = arith.truncf %661 : vector<72x96xf32> to vector<72x96xbf16>
    %cst_266 = arith.constant 0.000000e+00 : f32
    %663 = vector.broadcast %cst_266 : f32 to vector<72x48xf32>
    %664 = vector.extract_strided_slice %629 {offsets = [4, 0], sizes = [1, 48], strides = [1, 1]} : vector<8x48xf32> to vector<1x48xf32>
    %665 = vector.broadcast %664 : vector<1x48xf32> to vector<72x48xf32>
    %666 = arith.addf %663, %665 : vector<72x48xf32>
    %667 = vector.extract_strided_slice %662 {offsets = [0, 0], sizes = [72, 12], strides = [1, 1]} : vector<72x96xbf16> to vector<72x12xbf16>
    %668 = vector.extract_strided_slice %662 {offsets = [0, 48], sizes = [72, 12], strides = [1, 1]} : vector<72x96xbf16> to vector<72x12xbf16>
    %cst_267 = arith.constant dense<0.000000e+00> : vector<72x72xf32>
    %669 = tpu.matmul %667, %668, %cst_267 {dimension_numbers = #tpu.dot_dimension_numbers<[1], [1], [0], [0], [0, 0, 1, 0], [], []>} : vector<72x12xbf16>, vector<72x12xbf16>, vector<72x72xf32> -> vector<72x72xf32>
    %cst_268 = arith.constant 0.288675129 : f32
    %670 = vector.broadcast %cst_268 : f32 to vector<72x72xf32>
    %671 = arith.mulf %669, %670 : vector<72x72xf32>
    %672 = vector.broadcast %440 : vector<1x72xf32> to vector<72x72xf32>
    %673 = arith.addf %671, %672 : vector<72x72xf32>
    %cst_269 = arith.constant dense<0xFF800000> : vector<72xf32>
    %674 = vector.multi_reduction <maximumf>, %673, %cst_269 [1] : vector<72x72xf32> to vector<72xf32>
    %675 = vector.shape_cast %674 : vector<72xf32> to vector<72x1xf32>
    %676 = vector.broadcast %675 : vector<72x1xf32> to vector<72x72xf32>
    %677 = arith.subf %673, %676 : vector<72x72xf32>
    %678 = math.exp %677 : vector<72x72xf32>
    %cst_270 = arith.constant dense<0.000000e+00> : vector<72xf32>
    %679 = vector.multi_reduction <add>, %678, %cst_270 [1] : vector<72x72xf32> to vector<72xf32>
    %680 = vector.shape_cast %679 : vector<72xf32> to vector<72x1xf32>
    %681 = tpu.reciprocal %680 {approx = true} : vector<72x1xf32> -> vector<72x1xf32>
    %682 = vector.broadcast %681 : vector<72x1xf32> to vector<72x72xf32>
    %683 = arith.mulf %678, %682 : vector<72x72xf32>
    %c1_271 = arith.constant 1 : index
    %c0_272 = arith.constant 0 : index
    %c0_273 = arith.constant 0 : index
    %c0_274 = arith.constant 0 : index
    %684 = vector.load %arg16[%c1_271, %c0_272, %c0_273, %c0_274] : memref<2x4x48x48xbf16, #tpu.memory_space<vmem>>, vector<1x1x48x48xbf16>
    %685 = vector.shape_cast %684 : vector<1x1x48x48xbf16> to vector<48x48xbf16>
    %cst_275 = arith.constant dense<0.000000e+00> : vector<72x48xf32>
    %686 = tpu.matmul %654, %685, %cst_275 {dimension_numbers = #tpu.dot_dimension_numbers<[1], [0], [0], [1], [0, 0, 1, 1], [], []>} : vector<72x48xbf16>, vector<48x48xbf16>, vector<72x48xf32> -> vector<72x48xf32>
    %687 = arith.truncf %686 : vector<72x48xf32> to vector<72x48xbf16>
    %688 = arith.truncf %683 : vector<72x72xf32> to vector<72x72xbf16>
    %cst_276 = arith.constant dense<0.000000e+00> : vector<72x48xf32>
    %689 = tpu.matmul %688, %687, %cst_276 {dimension_numbers = #tpu.dot_dimension_numbers<[1], [0], [0], [1], [0, 0, 1, 1], [], []>} : vector<72x72xbf16>, vector<72x48xbf16>, vector<72x48xf32> -> vector<72x48xf32>
    %690 = arith.addf %666, %689 : vector<72x48xf32>
    %691 = vector.extract_strided_slice %662 {offsets = [0, 12], sizes = [72, 12], strides = [1, 1]} : vector<72x96xbf16> to vector<72x12xbf16>
    %692 = vector.extract_strided_slice %662 {offsets = [0, 60], sizes = [72, 12], strides = [1, 1]} : vector<72x96xbf16> to vector<72x12xbf16>
    %cst_277 = arith.constant dense<0.000000e+00> : vector<72x72xf32>
    %693 = tpu.matmul %691, %692, %cst_277 {dimension_numbers = #tpu.dot_dimension_numbers<[1], [1], [0], [0], [0, 0, 1, 0], [], []>} : vector<72x12xbf16>, vector<72x12xbf16>, vector<72x72xf32> -> vector<72x72xf32>
    %cst_278 = arith.constant 0.288675129 : f32
    %694 = vector.broadcast %cst_278 : f32 to vector<72x72xf32>
    %695 = arith.mulf %693, %694 : vector<72x72xf32>
    %696 = vector.broadcast %440 : vector<1x72xf32> to vector<72x72xf32>
    %697 = arith.addf %695, %696 : vector<72x72xf32>
    %cst_279 = arith.constant dense<0xFF800000> : vector<72xf32>
    %698 = vector.multi_reduction <maximumf>, %697, %cst_279 [1] : vector<72x72xf32> to vector<72xf32>
    %699 = vector.shape_cast %698 : vector<72xf32> to vector<72x1xf32>
    %700 = vector.broadcast %699 : vector<72x1xf32> to vector<72x72xf32>
    %701 = arith.subf %697, %700 : vector<72x72xf32>
    %702 = math.exp %701 : vector<72x72xf32>
    %cst_280 = arith.constant dense<0.000000e+00> : vector<72xf32>
    %703 = vector.multi_reduction <add>, %702, %cst_280 [1] : vector<72x72xf32> to vector<72xf32>
    %704 = vector.shape_cast %703 : vector<72xf32> to vector<72x1xf32>
    %705 = tpu.reciprocal %704 {approx = true} : vector<72x1xf32> -> vector<72x1xf32>
    %706 = vector.broadcast %705 : vector<72x1xf32> to vector<72x72xf32>
    %707 = arith.mulf %702, %706 : vector<72x72xf32>
    %c1_281 = arith.constant 1 : index
    %c1_282 = arith.constant 1 : index
    %c0_283 = arith.constant 0 : index
    %c0_284 = arith.constant 0 : index
    %708 = vector.load %arg16[%c1_281, %c1_282, %c0_283, %c0_284] : memref<2x4x48x48xbf16, #tpu.memory_space<vmem>>, vector<1x1x48x48xbf16>
    %709 = vector.shape_cast %708 : vector<1x1x48x48xbf16> to vector<48x48xbf16>
    %cst_285 = arith.constant dense<0.000000e+00> : vector<72x48xf32>
    %710 = tpu.matmul %654, %709, %cst_285 {dimension_numbers = #tpu.dot_dimension_numbers<[1], [0], [0], [1], [0, 0, 1, 1], [], []>} : vector<72x48xbf16>, vector<48x48xbf16>, vector<72x48xf32> -> vector<72x48xf32>
    %711 = arith.truncf %710 : vector<72x48xf32> to vector<72x48xbf16>
    %712 = arith.truncf %707 : vector<72x72xf32> to vector<72x72xbf16>
    %cst_286 = arith.constant dense<0.000000e+00> : vector<72x48xf32>
    %713 = tpu.matmul %712, %711, %cst_286 {dimension_numbers = #tpu.dot_dimension_numbers<[1], [0], [0], [1], [0, 0, 1, 1], [], []>} : vector<72x72xbf16>, vector<72x48xbf16>, vector<72x48xf32> -> vector<72x48xf32>
    %714 = arith.addf %690, %713 : vector<72x48xf32>
    %715 = vector.extract_strided_slice %662 {offsets = [0, 24], sizes = [72, 12], strides = [1, 1]} : vector<72x96xbf16> to vector<72x12xbf16>
    %716 = vector.extract_strided_slice %662 {offsets = [0, 72], sizes = [72, 12], strides = [1, 1]} : vector<72x96xbf16> to vector<72x12xbf16>
    %cst_287 = arith.constant dense<0.000000e+00> : vector<72x72xf32>
    %717 = tpu.matmul %715, %716, %cst_287 {dimension_numbers = #tpu.dot_dimension_numbers<[1], [1], [0], [0], [0, 0, 1, 0], [], []>} : vector<72x12xbf16>, vector<72x12xbf16>, vector<72x72xf32> -> vector<72x72xf32>
    %cst_288 = arith.constant 0.288675129 : f32
    %718 = vector.broadcast %cst_288 : f32 to vector<72x72xf32>
    %719 = arith.mulf %717, %718 : vector<72x72xf32>
    %720 = vector.broadcast %440 : vector<1x72xf32> to vector<72x72xf32>
    %721 = arith.addf %719, %720 : vector<72x72xf32>
    %cst_289 = arith.constant dense<0xFF800000> : vector<72xf32>
    %722 = vector.multi_reduction <maximumf>, %721, %cst_289 [1] : vector<72x72xf32> to vector<72xf32>
    %723 = vector.shape_cast %722 : vector<72xf32> to vector<72x1xf32>
    %724 = vector.broadcast %723 : vector<72x1xf32> to vector<72x72xf32>
    %725 = arith.subf %721, %724 : vector<72x72xf32>
    %726 = math.exp %725 : vector<72x72xf32>
    %cst_290 = arith.constant dense<0.000000e+00> : vector<72xf32>
    %727 = vector.multi_reduction <add>, %726, %cst_290 [1] : vector<72x72xf32> to vector<72xf32>
    %728 = vector.shape_cast %727 : vector<72xf32> to vector<72x1xf32>
    %729 = tpu.reciprocal %728 {approx = true} : vector<72x1xf32> -> vector<72x1xf32>
    %730 = vector.broadcast %729 : vector<72x1xf32> to vector<72x72xf32>
    %731 = arith.mulf %726, %730 : vector<72x72xf32>
    %c1_291 = arith.constant 1 : index
    %c2_292 = arith.constant 2 : index
    %c0_293 = arith.constant 0 : index
    %c0_294 = arith.constant 0 : index
    %732 = vector.load %arg16[%c1_291, %c2_292, %c0_293, %c0_294] : memref<2x4x48x48xbf16, #tpu.memory_space<vmem>>, vector<1x1x48x48xbf16>
    %733 = vector.shape_cast %732 : vector<1x1x48x48xbf16> to vector<48x48xbf16>
    %cst_295 = arith.constant dense<0.000000e+00> : vector<72x48xf32>
    %734 = tpu.matmul %654, %733, %cst_295 {dimension_numbers = #tpu.dot_dimension_numbers<[1], [0], [0], [1], [0, 0, 1, 1], [], []>} : vector<72x48xbf16>, vector<48x48xbf16>, vector<72x48xf32> -> vector<72x48xf32>
    %735 = arith.truncf %734 : vector<72x48xf32> to vector<72x48xbf16>
    %736 = arith.truncf %731 : vector<72x72xf32> to vector<72x72xbf16>
    %cst_296 = arith.constant dense<0.000000e+00> : vector<72x48xf32>
    %737 = tpu.matmul %736, %735, %cst_296 {dimension_numbers = #tpu.dot_dimension_numbers<[1], [0], [0], [1], [0, 0, 1, 1], [], []>} : vector<72x72xbf16>, vector<72x48xbf16>, vector<72x48xf32> -> vector<72x48xf32>
    %738 = arith.addf %714, %737 : vector<72x48xf32>
    %739 = vector.extract_strided_slice %662 {offsets = [0, 36], sizes = [72, 12], strides = [1, 1]} : vector<72x96xbf16> to vector<72x12xbf16>
    %740 = vector.extract_strided_slice %662 {offsets = [0, 84], sizes = [72, 12], strides = [1, 1]} : vector<72x96xbf16> to vector<72x12xbf16>
    %cst_297 = arith.constant dense<0.000000e+00> : vector<72x72xf32>
    %741 = tpu.matmul %739, %740, %cst_297 {dimension_numbers = #tpu.dot_dimension_numbers<[1], [1], [0], [0], [0, 0, 1, 0], [], []>} : vector<72x12xbf16>, vector<72x12xbf16>, vector<72x72xf32> -> vector<72x72xf32>
    %cst_298 = arith.constant 0.288675129 : f32
    %742 = vector.broadcast %cst_298 : f32 to vector<72x72xf32>
    %743 = arith.mulf %741, %742 : vector<72x72xf32>
    %744 = vector.broadcast %440 : vector<1x72xf32> to vector<72x72xf32>
    %745 = arith.addf %743, %744 : vector<72x72xf32>
    %cst_299 = arith.constant dense<0xFF800000> : vector<72xf32>
    %746 = vector.multi_reduction <maximumf>, %745, %cst_299 [1] : vector<72x72xf32> to vector<72xf32>
    %747 = vector.shape_cast %746 : vector<72xf32> to vector<72x1xf32>
    %748 = vector.broadcast %747 : vector<72x1xf32> to vector<72x72xf32>
    %749 = arith.subf %745, %748 : vector<72x72xf32>
    %750 = math.exp %749 : vector<72x72xf32>
    %cst_300 = arith.constant dense<0.000000e+00> : vector<72xf32>
    %751 = vector.multi_reduction <add>, %750, %cst_300 [1] : vector<72x72xf32> to vector<72xf32>
    %752 = vector.shape_cast %751 : vector<72xf32> to vector<72x1xf32>
    %753 = tpu.reciprocal %752 {approx = true} : vector<72x1xf32> -> vector<72x1xf32>
    %754 = vector.broadcast %753 : vector<72x1xf32> to vector<72x72xf32>
    %755 = arith.mulf %750, %754 : vector<72x72xf32>
    %c1_301 = arith.constant 1 : index
    %c3_302 = arith.constant 3 : index
    %c0_303 = arith.constant 0 : index
    %c0_304 = arith.constant 0 : index
    %756 = vector.load %arg16[%c1_301, %c3_302, %c0_303, %c0_304] : memref<2x4x48x48xbf16, #tpu.memory_space<vmem>>, vector<1x1x48x48xbf16>
    %757 = vector.shape_cast %756 : vector<1x1x48x48xbf16> to vector<48x48xbf16>
    %cst_305 = arith.constant dense<0.000000e+00> : vector<72x48xf32>
    %758 = tpu.matmul %654, %757, %cst_305 {dimension_numbers = #tpu.dot_dimension_numbers<[1], [0], [0], [1], [0, 0, 1, 1], [], []>} : vector<72x48xbf16>, vector<48x48xbf16>, vector<72x48xf32> -> vector<72x48xf32>
    %759 = arith.truncf %758 : vector<72x48xf32> to vector<72x48xbf16>
    %760 = arith.truncf %755 : vector<72x72xf32> to vector<72x72xbf16>
    %cst_306 = arith.constant dense<0.000000e+00> : vector<72x48xf32>
    %761 = tpu.matmul %760, %759, %cst_306 {dimension_numbers = #tpu.dot_dimension_numbers<[1], [0], [0], [1], [0, 0, 1, 1], [], []>} : vector<72x72xbf16>, vector<72x48xbf16>, vector<72x48xf32> -> vector<72x48xf32>
    %762 = arith.addf %738, %761 : vector<72x48xf32>
    %763 = arith.addf %628, %762 : vector<72x48xf32>
    %764 = vector.extract_strided_slice %629 {offsets = [2, 0], sizes = [1, 48], strides = [1, 1]} : vector<8x48xf32> to vector<1x48xf32>
    %765 = vector.extract_strided_slice %629 {offsets = [3, 0], sizes = [1, 48], strides = [1, 1]} : vector<8x48xf32> to vector<1x48xf32>
    %cst_307 = arith.constant dense<0.000000e+00> : vector<72xf32>
    %766 = vector.multi_reduction <add>, %763, %cst_307 [1] : vector<72x48xf32> to vector<72xf32>
    %767 = vector.shape_cast %766 : vector<72xf32> to vector<72x1xf32>
    %cst_308 = arith.constant 4.800000e+01 : f32
    %768 = vector.broadcast %cst_308 : f32 to vector<72x1xf32>
    %769 = arith.divf %767, %768 : vector<72x1xf32>
    %770 = vector.broadcast %769 : vector<72x1xf32> to vector<72x48xf32>
    %771 = arith.subf %763, %770 : vector<72x48xf32>
    %772 = arith.mulf %771, %771 : vector<72x48xf32>
    %cst_309 = arith.constant dense<0.000000e+00> : vector<72xf32>
    %773 = vector.multi_reduction <add>, %772, %cst_309 [1] : vector<72x48xf32> to vector<72xf32>
    %774 = vector.shape_cast %773 : vector<72xf32> to vector<72x1xf32>
    %cst_310 = arith.constant 4.800000e+01 : f32
    %775 = vector.broadcast %cst_310 : f32 to vector<72x1xf32>
    %776 = arith.divf %774, %775 : vector<72x1xf32>
    %777 = vector.broadcast %769 : vector<72x1xf32> to vector<72x48xf32>
    %778 = arith.subf %763, %777 : vector<72x48xf32>
    %cst_311 = arith.constant 9.99999997E-7 : f32
    %779 = vector.broadcast %cst_311 : f32 to vector<72x1xf32>
    %780 = arith.addf %776, %779 : vector<72x1xf32>
    %781 = math.rsqrt %780 : vector<72x1xf32>
    %782 = vector.broadcast %781 : vector<72x1xf32> to vector<72x48xf32>
    %783 = arith.mulf %778, %782 : vector<72x48xf32>
    %784 = vector.broadcast %764 : vector<1x48xf32> to vector<72x48xf32>
    %785 = arith.mulf %783, %784 : vector<72x48xf32>
    %786 = vector.broadcast %765 : vector<1x48xf32> to vector<72x48xf32>
    %787 = arith.addf %785, %786 : vector<72x48xf32>
    %788 = arith.truncf %787 : vector<72x48xf32> to vector<72x48xbf16>
    %c1_312 = arith.constant 1 : index
    %c0_313 = arith.constant 0 : index
    %c0_314 = arith.constant 0 : index
    %789 = vector.load %arg17[%c1_312, %c0_313, %c0_314] : memref<2x48x192xbf16, #tpu.memory_space<vmem>>, vector<1x48x192xbf16>
    %790 = vector.shape_cast %789 : vector<1x48x192xbf16> to vector<48x192xbf16>
    %cst_315 = arith.constant dense<0.000000e+00> : vector<72x192xf32>
    %791 = tpu.matmul %788, %790, %cst_315 {dimension_numbers = #tpu.dot_dimension_numbers<[1], [0], [0], [1], [0, 0, 1, 1], [], []>} : vector<72x48xbf16>, vector<48x192xbf16>, vector<72x192xf32> -> vector<72x192xf32>
    %c1_316 = arith.constant 1 : index
    %c0_317 = arith.constant 0 : index
    %c0_318 = arith.constant 0 : index
    %792 = vector.load %arg18[%c1_316, %c0_317, %c0_318] : memref<2x1x192xf32, #tpu.memory_space<vmem>>, vector<1x1x192xf32>
    %793 = vector.shape_cast %792 : vector<1x1x192xf32> to vector<1x192xf32>
    %794 = vector.broadcast %793 : vector<1x192xf32> to vector<72x192xf32>
    %795 = arith.addf %791, %794 : vector<72x192xf32>
    %796 = arith.mulf %795, %795 : vector<72x192xf32>
    %797 = arith.mulf %795, %796 : vector<72x192xf32>
    %cst_319 = arith.constant 4.471500e-02 : f32
    %798 = vector.broadcast %cst_319 : f32 to vector<72x192xf32>
    %799 = arith.mulf %798, %797 : vector<72x192xf32>
    %800 = arith.addf %795, %799 : vector<72x192xf32>
    %cst_320 = arith.constant 0.797884583 : f32
    %801 = vector.broadcast %cst_320 : f32 to vector<72x192xf32>
    %802 = arith.mulf %801, %800 : vector<72x192xf32>
    %803 = math.tanh %802 : vector<72x192xf32>
    %cst_321 = arith.constant 1.000000e+00 : f32
    %804 = vector.broadcast %cst_321 : f32 to vector<72x192xf32>
    %805 = arith.addf %804, %803 : vector<72x192xf32>
    %cst_322 = arith.constant 5.000000e-01 : f32
    %806 = vector.broadcast %cst_322 : f32 to vector<72x192xf32>
    %807 = arith.mulf %806, %805 : vector<72x192xf32>
    %808 = arith.mulf %795, %807 : vector<72x192xf32>
    %809 = arith.truncf %808 : vector<72x192xf32> to vector<72x192xbf16>
    %c1_323 = arith.constant 1 : index
    %c0_324 = arith.constant 0 : index
    %c0_325 = arith.constant 0 : index
    %810 = vector.load %arg19[%c1_323, %c0_324, %c0_325] : memref<2x192x48xbf16, #tpu.memory_space<vmem>>, vector<1x192x48xbf16>
    %811 = vector.shape_cast %810 : vector<1x192x48xbf16> to vector<192x48xbf16>
    %cst_326 = arith.constant dense<0.000000e+00> : vector<72x48xf32>
    %812 = tpu.matmul %809, %811, %cst_326 {dimension_numbers = #tpu.dot_dimension_numbers<[1], [0], [0], [1], [0, 0, 1, 1], [], []>} : vector<72x192xbf16>, vector<192x48xbf16>, vector<72x48xf32> -> vector<72x48xf32>
    %813 = vector.extract_strided_slice %629 {offsets = [5, 0], sizes = [1, 48], strides = [1, 1]} : vector<8x48xf32> to vector<1x48xf32>
    %814 = vector.broadcast %813 : vector<1x48xf32> to vector<72x48xf32>
    %815 = arith.addf %812, %814 : vector<72x48xf32>
    %816 = arith.addf %763, %815 : vector<72x48xf32>
    %c16_327 = arith.constant 16 : index
    %c0_328 = arith.constant 0 : index
    %817 = vector.load %arg20[%c16_327, %c0_328] : memref<19x48xf32, #tpu.memory_space<vmem>>, vector<1x48xf32>
    %c17_329 = arith.constant 17 : index
    %c0_330 = arith.constant 0 : index
    %818 = vector.load %arg20[%c17_329, %c0_330] : memref<19x48xf32, #tpu.memory_space<vmem>>, vector<1x48xf32>
    %cst_331 = arith.constant dense<0.000000e+00> : vector<72xf32>
    %819 = vector.multi_reduction <add>, %816, %cst_331 [1] : vector<72x48xf32> to vector<72xf32>
    %820 = vector.shape_cast %819 : vector<72xf32> to vector<72x1xf32>
    %cst_332 = arith.constant 4.800000e+01 : f32
    %821 = vector.broadcast %cst_332 : f32 to vector<72x1xf32>
    %822 = arith.divf %820, %821 : vector<72x1xf32>
    %823 = vector.broadcast %822 : vector<72x1xf32> to vector<72x48xf32>
    %824 = arith.subf %816, %823 : vector<72x48xf32>
    %825 = arith.mulf %824, %824 : vector<72x48xf32>
    %cst_333 = arith.constant dense<0.000000e+00> : vector<72xf32>
    %826 = vector.multi_reduction <add>, %825, %cst_333 [1] : vector<72x48xf32> to vector<72xf32>
    %827 = vector.shape_cast %826 : vector<72xf32> to vector<72x1xf32>
    %cst_334 = arith.constant 4.800000e+01 : f32
    %828 = vector.broadcast %cst_334 : f32 to vector<72x1xf32>
    %829 = arith.divf %827, %828 : vector<72x1xf32>
    %830 = vector.broadcast %822 : vector<72x1xf32> to vector<72x48xf32>
    %831 = arith.subf %816, %830 : vector<72x48xf32>
    %cst_335 = arith.constant 9.99999997E-7 : f32
    %832 = vector.broadcast %cst_335 : f32 to vector<72x1xf32>
    %833 = arith.addf %829, %832 : vector<72x1xf32>
    %834 = math.rsqrt %833 : vector<72x1xf32>
    %835 = vector.broadcast %834 : vector<72x1xf32> to vector<72x48xf32>
    %836 = arith.mulf %831, %835 : vector<72x48xf32>
    %837 = vector.broadcast %817 : vector<1x48xf32> to vector<72x48xf32>
    %838 = arith.mulf %836, %837 : vector<72x48xf32>
    %839 = vector.broadcast %818 : vector<1x48xf32> to vector<72x48xf32>
    %840 = arith.addf %838, %839 : vector<72x48xf32>
    %841 = vector.extract_strided_slice %840 {offsets = [8, 0], sizes = [64, 48], strides = [1, 1]} : vector<72x48xf32> to vector<64x48xf32>
    %842 = arith.addf %841, %423 : vector<64x48xf32>
    %c0_336 = arith.constant 0 : index
    %c0_337 = arith.constant 0 : index
    %c0_338 = arith.constant 0 : index
    %843 = vector.load %arg21[%c0_336, %c0_337, %c0_338] : memref<1x64x48xf32, #tpu.memory_space<vmem>>, vector<1x64x48xf32>
    %844 = vector.shape_cast %843 : vector<1x64x48xf32> to vector<64x48xf32>
    %845 = vector.shape_cast %842 : vector<64x48xf32> to vector<1x64x48xf32>
    tpu.vector_store %arg21[%c0_336, %c0_337, %c0_338], %845 {strides = array<i32>} : memref<1x64x48xf32, #tpu.memory_space<vmem>>, vector<1x64x48xf32>,
    return
  }
  func.func @transform_0(%arg0: i32) -> (i32, i32, i32) {
    %c0_i32 = arith.constant 0 : i32
    %c0_i32_0 = arith.constant 0 : i32
    %c0_i32_1 = arith.constant 0 : i32
    return %arg0, %c0_i32, %c0_i32_0 : i32, i32, i32
  }
  func.func @transform_1(%arg0: i32) -> (i32, i32, i32) {
    %c0_i32 = arith.constant 0 : i32
    %c0_i32_0 = arith.constant 0 : i32
    %c0_i32_1 = arith.constant 0 : i32
    return %arg0, %c0_i32, %c0_i32_0 : i32, i32, i32
  }
  func.func @transform_2(%arg0: i32) -> (i32, i32) {
    %c0_i32 = arith.constant 0 : i32
    %c0_i32_0 = arith.constant 0 : i32
    %c0_i32_1 = arith.constant 0 : i32
    return %c0_i32, %c0_i32_0 : i32, i32
  }
  func.func @transform_3(%arg0: i32) -> (i32, i32) {
    %c0_i32 = arith.constant 0 : i32
    %c0_i32_0 = arith.constant 0 : i32
    %c0_i32_1 = arith.constant 0 : i32
    return %c0_i32, %c0_i32_0 : i32, i32
  }
  func.func @transform_4(%arg0: i32) -> (i32, i32) {
    %c0_i32 = arith.constant 0 : i32
    %c0_i32_0 = arith.constant 0 : i32
    %c0_i32_1 = arith.constant 0 : i32
    return %c0_i32, %c0_i32_0 : i32, i32
  }
  func.func @transform_5(%arg0: i32) -> (i32, i32, i32) {
    %c0_i32 = arith.constant 0 : i32
    %c0_i32_0 = arith.constant 0 : i32
    %c0_i32_1 = arith.constant 0 : i32
    %c0_i32_2 = arith.constant 0 : i32
    return %c0_i32, %c0_i32_0, %c0_i32_1 : i32, i32, i32
  }
  func.func @transform_6(%arg0: i32) -> (i32, i32, i32) {
    %c0_i32 = arith.constant 0 : i32
    %c0_i32_0 = arith.constant 0 : i32
    %c0_i32_1 = arith.constant 0 : i32
    %c0_i32_2 = arith.constant 0 : i32
    return %c0_i32, %c0_i32_0, %c0_i32_1 : i32, i32, i32
  }
  func.func @transform_7(%arg0: i32) -> (i32, i32, i32, i32) {
    %c0_i32 = arith.constant 0 : i32
    %c0_i32_0 = arith.constant 0 : i32
    %c0_i32_1 = arith.constant 0 : i32
    %c0_i32_2 = arith.constant 0 : i32
    %c0_i32_3 = arith.constant 0 : i32
    return %c0_i32, %c0_i32_0, %c0_i32_1, %c0_i32_2 : i32, i32, i32, i32
  }
  func.func @transform_8(%arg0: i32) -> (i32, i32, i32) {
    %c0_i32 = arith.constant 0 : i32
    %c0_i32_0 = arith.constant 0 : i32
    %c0_i32_1 = arith.constant 0 : i32
    %c0_i32_2 = arith.constant 0 : i32
    return %c0_i32, %c0_i32_0, %c0_i32_1 : i32, i32, i32
  }
  func.func @transform_9(%arg0: i32) -> (i32, i32, i32) {
    %c0_i32 = arith.constant 0 : i32
    %c0_i32_0 = arith.constant 0 : i32
    %c0_i32_1 = arith.constant 0 : i32
    %c0_i32_2 = arith.constant 0 : i32
    return %c0_i32, %c0_i32_0, %c0_i32_1 : i32, i32, i32
  }
  func.func @transform_10(%arg0: i32) -> (i32, i32, i32) {
    %c0_i32 = arith.constant 0 : i32
    %c0_i32_0 = arith.constant 0 : i32
    %c0_i32_1 = arith.constant 0 : i32
    %c0_i32_2 = arith.constant 0 : i32
    return %c0_i32, %c0_i32_0, %c0_i32_1 : i32, i32, i32
  }
  func.func @transform_11(%arg0: i32) -> (i32, i32) {
    %c0_i32 = arith.constant 0 : i32
    %c0_i32_0 = arith.constant 0 : i32
    %c0_i32_1 = arith.constant 0 : i32
    return %c0_i32, %c0_i32_0 : i32, i32
  }
  func.func @transform_12(%arg0: i32) -> (i32, i32) {
    %c0_i32 = arith.constant 0 : i32
    %c0_i32_0 = arith.constant 0 : i32
    %c0_i32_1 = arith.constant 0 : i32
    return %c0_i32, %c0_i32_0 : i32, i32
  }
  func.func @transform_13(%arg0: i32) -> (i32, i32, i32) {
    %c0_i32 = arith.constant 0 : i32
    %c0_i32_0 = arith.constant 0 : i32
    %c0_i32_1 = arith.constant 0 : i32
    %c0_i32_2 = arith.constant 0 : i32
    return %c0_i32, %c0_i32_0, %c0_i32_1 : i32, i32, i32
  }
  func.func @transform_14(%arg0: i32) -> (i32, i32, i32) {
    %c0_i32 = arith.constant 0 : i32
    %c0_i32_0 = arith.constant 0 : i32
    %c0_i32_1 = arith.constant 0 : i32
    %c0_i32_2 = arith.constant 0 : i32
    return %c0_i32, %c0_i32_0, %c0_i32_1 : i32, i32, i32
  }
  func.func @transform_15(%arg0: i32) -> (i32, i32, i32, i32) {
    %c0_i32 = arith.constant 0 : i32
    %c0_i32_0 = arith.constant 0 : i32
    %c0_i32_1 = arith.constant 0 : i32
    %c0_i32_2 = arith.constant 0 : i32
    %c0_i32_3 = arith.constant 0 : i32
    return %c0_i32, %c0_i32_0, %c0_i32_1, %c0_i32_2 : i32, i32, i32, i32
  }
  func.func @transform_16(%arg0: i32) -> (i32, i32, i32) {
    %c0_i32 = arith.constant 0 : i32
    %c0_i32_0 = arith.constant 0 : i32
    %c0_i32_1 = arith.constant 0 : i32
    %c0_i32_2 = arith.constant 0 : i32
    return %c0_i32, %c0_i32_0, %c0_i32_1 : i32, i32, i32
  }
  func.func @transform_17(%arg0: i32) -> (i32, i32, i32) {
    %c0_i32 = arith.constant 0 : i32
    %c0_i32_0 = arith.constant 0 : i32
    %c0_i32_1 = arith.constant 0 : i32
    %c0_i32_2 = arith.constant 0 : i32
    return %c0_i32, %c0_i32_0, %c0_i32_1 : i32, i32, i32
  }
  func.func @transform_18(%arg0: i32) -> (i32, i32, i32) {
    %c0_i32 = arith.constant 0 : i32
    %c0_i32_0 = arith.constant 0 : i32
    %c0_i32_1 = arith.constant 0 : i32
    %c0_i32_2 = arith.constant 0 : i32
    return %c0_i32, %c0_i32_0, %c0_i32_1 : i32, i32, i32
  }
  func.func @transform_19(%arg0: i32) -> (i32, i32) {
    %c0_i32 = arith.constant 0 : i32
    %c0_i32_0 = arith.constant 0 : i32
    %c0_i32_1 = arith.constant 0 : i32
    return %c0_i32, %c0_i32_0 : i32, i32
  }
  func.func @transform_20(%arg0: i32) -> (i32, i32, i32) {
    %c0_i32 = arith.constant 0 : i32
    %c0_i32_0 = arith.constant 0 : i32
    %c0_i32_1 = arith.constant 0 : i32
    return %arg0, %c0_i32, %c0_i32_0 : i32, i32, i32
  }
}

</mosaic_0001>

<bundles_post_ra>
// kernel: cd_model_forward.1
= control target key start
LH: loop header
LB: loop body
LE: loop exit
PB: predicated region body
PF: predicated region fallthrough
CT: control target
= control target key end

     0   :  { %s16262_s0 = inlined_call_operand.vmem [shape: f32[2,16,192], index: 0, kind: input, shape index: {}]   ;;  %s16263_s1 = inlined_call_operand.vmem [shape: f32[2,64,48], index: 1, kind: input, shape index: {}]   ;;  %s16264_s2 = inlined_call_operand.vmem [shape: f32[1,48], index: 2, kind: input, shape index: {}]   ;;  %s16265_s3 = inlined_call_operand.vmem [shape: f32[72,48], index: 3, kind: input, shape index: {}]   ;;  %s16266_s4 = inlined_call_operand.vmem [shape: bf16[192,48], index: 4, kind: input, shape index: {}]   ;;  %s16267_s5 = inlined_call_operand.vmem [shape: bf16[2,48,96], index: 5, kind: input, shape index: {}]   ;;  %s16268_s6 = inlined_call_operand.vmem [shape: f32[2,1,96], index: 6, kind: input, shape index: {}]   ;;  %s16269_s7 = inlined_call_operand.vmem [shape: bf16[2,4,48,48], index: 7, kind: input, shape index: {}]   ;;  %s16270_s8 = inlined_call_operand.vmem [shape: bf16[2,48,192], index: 8, kind: input, shape index: {}]   ;;  %s16271_s9 = inlined_call_operand.vmem [shape: f32[2,1,192], index: 9, kind: input, shape index: {}]   ;;  %s16272_s10 = inlined_call_operand.vmem [shape: bf16[2,192,48], index: 10, kind: input, shape index: {}]   ;;  %s16273_s11 = inlined_call_operand.vmem [shape: f32[19,48], index: 11, kind: input, shape index: {}]   ;;  %s16274_s12 = inlined_call_operand.vmem [shape: bf16[48,48], index: 12, kind: input, shape index: {}]   ;;  %s16275_s13 = inlined_call_operand.vmem [shape: bf16[2,48,96], index: 13, kind: input, shape index: {}]   ;;  %s16276_s14 = inlined_call_operand.vmem [shape: f32[2,1,96], index: 14, kind: input, shape index: {}]   ;;  %s16277_s15 = inlined_call_operand.vmem [shape: bf16[2,4,48,48], index: 15, kind: input, shape index: {}]   ;;  %s16278_s16 = inlined_call_operand.vmem [shape: bf16[2,48,192], index: 16, kind: input, shape index: {}]   ;;  %s16279_s17 = inlined_call_operand.vmem [shape: f32[2,1,192], index: 17, kind: input, shape index: {}]   ;;  %s16280_s18 = inlined_call_operand.vmem [shape: bf16[2,192,48], index: 18, kind: input, shape index: {}]   ;;  %s16281_s19 = inlined_call_operand.vmem [shape: f32[19,48], index: 19, kind: input, shape index: {}]   ;;  %s16282_s20 = inlined_call_operand.vmem [shape: f32[2,64,48], index: 20, kind: output, shape index: {}]  }
   0x1   :  { %16305 = sst [smem:[#allocation2_spill]] %s16262_s0 }
   0x2   :  { %16306 = sst [smem:[#allocation3_spill]] %s16263_s1  ;;  %s12460_s1 = smov 0  }
   0x3   :  { %16307 = sst [smem:[#allocation4_spill]] %s16264_s2 }
   0x4   :  { %16308 = sst [smem:[#allocation5_spill]] %s16265_s3 }
   0x5   :  { %16309 = sst [smem:[#allocation6_spill]] %s16266_s4 }
   0x6   :  { %16310 = sst [smem:[#allocation7_spill]] %s16267_s5 }
   0x7   :  { %16311 = sst [smem:[#allocation8_spill]] %s16268_s6 }
   0x8   :  { %16312 = sst [smem:[#allocation9_spill]] %s16269_s7 }
   0x9   :  { %16313 = sst [smem:[#allocation10_spill]] %s16270_s8 }
   0xa   :  { %16314 = sst [smem:[#allocation11_spill]] %s16271_s9 }
   0xb   :  { %16315 = sst [smem:[#allocation12_spill]] %s16272_s10 }
   0xc LB: > { %s9637_s22 = sadd.s32 4294967295, %s12343_s1   ;;  %p9641_p0 = scmp.ge.s32.totalorder %s12343_s1, 1  ;;  %s12343_s1 = sphi %s12460_s1, %s30_s1  }
   0xd   : > { %p572_p1 = scmp.lt.s32.totalorder %s12343_s1, 3 }
   0xf   : > { %p573_p2 = pnand %p9641_p0, %p572_p1 }
  0x10   : > { %s16316_s2 = sld [smem:[#allocation6_spill]] (!%p573_p2)  ;;  %p635_p3 = scmp.lt.s32.totalorder (!%p573_p2), %s9637_s22, 1 }
  0x11   : > { %576 = sbr.rel (%p573_p2) target bundleno = 13359 (0x342f), region = 100  ;;  %s16317_s30 = sld [smem:[#allocation2_spill]] (!%p573_p2) }
  0x12   : > { %s16318_s27 = sld [smem:[#allocation4_spill]] (!%p573_p2)  ;;  %s16295_s21 = smov (!%p573_p2), 116  }
  0x13   : > { %s16319_s5 = sld [smem:[#allocation7_spill]] (!%p573_p2)  ;;  %s16289_s4 = smov (!%p573_p2), 104  }
  0x14   : > { %s16320_s6 = sld [smem:[#allocation8_spill]] (!%p573_p2)  ;;  %s16285_s29 = smov (!%p573_p2), 92  }
  0x15   : > { %s16321_s7 = sld [smem:[#allocation9_spill]] (!%p573_p2)  ;;  %s16325_s25 = smov (!%p573_p2), 68  }
  0x16   : > { %v11570_v0 = vld [vmem:[%s16316_s2 + $0x38] sm:$0xff]   ;;  %v16301_v1 = vmov 0   ;;  %v11571_v2 = vld [vmem:[%s16316_s2 + $0x30] sm:$0xff]   ;;  %s16338_s22 = smov (!%p635_p3, %s9637_s22), 1  ;;  %v11572_v3 = vld [vmem:[%s16316_s2 + $0x28] sm:$0xff]   ;;  %vm805_vm0 = vcmask 1040384   ;;  %v807_v55 = vlaneseq }
  0x17   : > { %763 = vmatprep.subr.bf16.mxu0 %v16301_v1  ;;  %s10182_s28 = sshll.u32 %s16338_s22, 5  ;;  %v11573_v4 = vld [vmem:[%s16316_s2 + $0x20] sm:$0xff]   ;;  %vm759_vm1 = vcmask 523264   ;;  %vm814_vm2 = vcmask 392192   ;;  %v11574_v7 = vld [vmem:[%s16316_s2 + $0x18] sm:$0xff]   ;;  %v11575_v12 = vld [vmem:[%s16316_s2 + $0x10] sm:$0xff]  }
  0x18   : > { %764 = vmatpush1.bf16.msra.mxu0 %v11570_v0  ;;  %s12486_s0 = scalar_lea.vmem %s16317_s30, %s10182_s28  ;;  %v804_v9 = vld [vmem:[%s16318_s27] sm:$0x1]  ;;  %v11576_v13 = vld [vmem:[%s16316_s2 + $0x8] sm:$0xff]   ;;  %v11578_v15 = vld [vmem:[%s16316_s2 + $0x58] sm:$0xff]   ;;  %v12564_v59 = vshrl.u32 %v807_v55, 7  ;;  %s16297_s30 = smov 80  }
  0x19   : > { %765 = vmatprep.subr.bf16.mxu0 %v16301_v1  ;;  %v654_v5 = vld [vmem:[%s12486_s0 + $0x8] sm:$0xff]  ;;  %v656_v6 = vld [vmem:[%s12486_s0 + $0x18] sm:$0xff]  ;;  %v12501_v10 = vsel %vm805_vm0, %v804_v9, 0.0  ;;  %v11577_v14 = vld [vmem:[%s16316_s2] sm:$0xff]   ;;  %vm969_vm3 = vcmask 97280   ;;  %vm1036_vm7 = vcmask 195584  }
  0x1a   : > { %v658_v8 = vpack.c.bf16 %v656_v6, %v654_v5  ;;  %v815_v11 = vsel %vm814_vm2, %v12501_v10, 0.0  ;;  %v11579_v16 = vld [vmem:[%s16316_s2 + $0x50] sm:$0xff]   ;;  %v11580_v17 = vld [vmem:[%s16316_s2 + $0x48] sm:$0xff]   ;;  %v11581_v18 = vld [vmem:[%s16316_s2 + $0x40] sm:$0xff]   ;;  %v12567_v60 = vsub.s32 0, %v12564_v59  ;;  %vm1152_vm8 = vcmask 1043456  }
  0x1b   : > { %816 = vadd.xlane.f32.xlu0 %v815_v11  ;;  %v653_v19 = vld [vmem:[%s12486_s0] sm:$0xff]  ;;  %v655_v20 = vld [vmem:[%s12486_s0 + $0x10] sm:$0xff]  ;;  %v11583_v47 = vld [vmem:[%s16319_s5 + $0x8] sm:$0xff]   ;;  %s16293_s0 = smov 68   ;;  %s16291_s28 = smov 56   ;;  %vm12354_vm9 = vmmov 0  }
  0x1c   : > { %766 = vmatpush1.bf16.msra.mxu0 %v11571_v2  ;;  %9661 = vmatprep.mubr.msk.bf16.mxu0 %vm759_vm1, %v658_v8  ;;  %v657_v21 = vpack.c.bf16 %v655_v20, %v653_v19  ;;  %v9648_v24 = vld [vmem:[%s16273_s11 + $0x12] ss:$0 sm:$0xff]  ;;  %v11584_v48 = vld [vmem:[%s16319_s5] sm:$0xff]   ;;  %v12577_v2 = vsub.s32 1, %v12564_v59  ;;  %s16287_s27 = smov 44   ;;  %s16322_s8 = sld [smem:[#allocation10_spill]] }
  0x1d   : > { %767 = vmatprep.subr.bf16.mxu0 %v16301_v1  ;;  %v11582_v46 = vld [vmem:[%s16319_s5 + $0x10] sm:$0xff]   ;;  %v12572_v62 = vld [vmem:[%s16273_s11] sm:$0xff]  ;;  %s16323_s10 = sld [smem:[#allocation12_spill]]  ;;  %s16326_s26 = smov 56   ;;  %vm4391_vm10 = vcmask 588800  }
  0x1e   : > { %10546 = vmatprep.subr.bf16.mxu1 %v11582_v46  ;;  %v858_v0 = vrot.slane %v12572_v62, %v12567_v60  ;;  %v865_v6 = vrot.slane %v12572_v62, %v12577_v2  ;;  %s16324_s9 = sld [smem:[#allocation11_spill]]  ;;  %s16327_s23 = smov 104  }
  0x1f   : > { %10547 = vmatpush3.bf16.msra.mxu1 %v11582_v46  ;;  %s16329_s24 = smov 92   ;;  %s16300_s3 = sshll.u32 %s16338_s22, 6 }
  0x20   : > { %768 = vmatpush1.bf16.msra.mxu0 %v11572_v3  ;;  %10548 = vmatprep.subr.bf16.mxu1 %v11583_v47  ;;  %s16332_s2 = smov 80  }
  0x21   : > { %769 = vmatprep.subr.bf16.mxu0 %v16301_v1 }
  0x23   : > { %10549 = vmatpush3.bf16.msra.mxu1 %v11583_v47  ;;  %v16303_v47 = vmov 0.0  }
  0x24   : > { %770 = vmatpush1.bf16.msra.mxu0 %v11573_v4  ;;  %10550 = vmatprep.subr.bf16.mxu1 %v11584_v48 }
  0x25   : > { %771 = vmatprep.subr.bf16.mxu0 %v16301_v1 }
  0x27   : > { %10551 = vmatpush3.bf16.msra.mxu1 %v11584_v48 }
  0x28   : > { %772 = vmatpush1.bf16.msra.mxu0 %v11574_v7 }
  0x29   : > { %773 = vmatprep.subr.bf16.mxu0 %v16301_v1 }
  0x2c   : > { %774 = vmatpush1.bf16.msra.mxu0 %v11575_v12 }
  0x2d   : > { %775 = vmatprep.subr.bf16.mxu0 %v16301_v1 }
  0x30   : > { %776 = vmatpush1.bf16.msra.mxu0 %v11576_v13 }
  0x31   : > { %777 = vmatprep.subr.bf16.mxu0 %v16301_v1 }
  0x34   : > { %778 = vmatpush1.bf16.msra.mxu0 %v11577_v14 }
  0x35   : > { %787 = vmatprep.subr.bf16.mxu0 %v16301_v1 }
  0x38   : > { %788 = vmatpush2.bf16.msra.mxu0 %v11578_v15 }
  0x39   : > { %789 = vmatprep.subr.bf16.mxu0 %v16301_v1 }
  0x3c   : > { %790 = vmatpush2.bf16.msra.mxu0 %v11579_v16 }
  0x3d   : > { %791 = vmatprep.subr.bf16.mxu0 %v16301_v1 }
  0x40   : > { %792 = vmatpush2.bf16.msra.mxu0 %v11580_v17  ;;  %v9662_v17 = vld [vmem:[%s16320_s6] ss:$0 sm:$0xff] }
  0x41   : > { %793 = vmatprep.subr.bf16.mxu0 %v16301_v1 }
  0x44   : > { %794 = vmatpush2.bf16.msra.mxu0 %v11581_v18 }
  0x47   : > { %796 = vmatmul.mubr.bf16.vlgmr.msra.gmra.mxu0 %v657_v21 }
  0xa4   : > { %v817_v22 = vpop.xlane.xlu0 %816 }
  0xa5   : > { %v825_v23 = vmul.f32 0.020833334, %v817_v22 }
  0xa7   : > { %v828_v27 = vsub.f32 %v12501_v10, %v825_v23 }
  0xa9   : > { %v831_v32 = vmul.f32 %v828_v27, %v828_v27 }
  0xab   : > { %v834_v35 = vsel %vm814_vm2, %v831_v32, 0.0 }
 0x107   : > { %v797_v25 = vpop.f32.mrf.mxu0 }
 0x108   : > { %v12540_v26 = vadd.f32 %v9648_v24, %v797_v25 }
 0x109   : > { %v799_v28 = vpop.f32.mrf.mxu0 }
 0x10a   : > { %v818_v29 = vsel %vm814_vm2, %v12540_v26, 0.0 }
 0x10b   : > { %v800_v30 = vpop.f32.mrf.mxu0  ;;  %819 = vadd.xlane.f32.xlu0 %v818_v29 }
 0x10c   : > { %v12545_v31 = vadd.f32 %v9648_v24, %v800_v30 }
 0x10d   : > { %v802_v33 = vpop.f32.mrf.mxu0 }
 0x10e   : > { %v821_v34 = vsel %vm814_vm2, %v12545_v31, 0.0  ;;  %v11585_v33 = vld [vmem:[%s16321_s7 + $0x10] sm:$0xff]  }
 0x10f   : > { %822 = vadd.xlane.f32.xlu1 %v821_v34 }
 0x113   : > { %835 = vadd.xlane.f32.xlu1 %v834_v35 }
 0x194   : > { %v820_v36 = vpop.xlane.xlu0 %819 }
 0x195   : > { %v826_v37 = vmul.f32 0.020833334, %v820_v36 }
 0x197   : > { %v829_v38 = vsub.f32 %v12540_v26, %v826_v37 }
 0x198   : > { %v823_v39 = vpop.xlane.xlu1 %822 }
 0x199   : > { %v827_v40 = vmul.f32 0.020833334, %v823_v39  ;;  %v832_v41 = vmul.f32 %v829_v38, %v829_v38 }
 0x19b   : > { %v830_v42 = vsub.f32 %v12545_v31, %v827_v40  ;;  %v837_v43 = vsel %vm814_vm2, %v832_v41, 0.0  ;;  %v11587_v40 = vld [vmem:[%s16321_s7] sm:$0xff]  }
 0x19c   : > { %838 = vadd.xlane.f32.xlu0 %v837_v43  ;;  %v836_v49 = vpop.xlane.xlu1 %835 }
 0x19d   : > { %v833_v44 = vmul.f32 %v830_v42, %v830_v42  ;;  %v843_v50 = vmul.f32 0.020833334, %v836_v49 }
 0x19f   : > { %v840_v45 = vsel %vm814_vm2, %v833_v44, 0.0  ;;  %v846_v51 = vadd.f32 1e-06, %v843_v50 }
 0x1a0   : > { %841 = vadd.xlane.f32.xlu1 %v840_v45 }
 0x1a1   : > { %11729 = vrsqrt.f32 %v846_v51 }
 0x1ae   : > { %v11730_v61 = vpop.eup %11729 }
 0x1af   : > { %v852_v63 = vmul.f32 %v11730_v61, %v828_v27 }
 0x1b1   : > { %v859_v5 = vmul.f32 %v858_v0, %v852_v63 }
 0x1b3   : > { %v866_v9 = vadd.f32 %v865_v6, %v859_v5 }
 0x225   : > { %v839_v52 = vpop.xlane.xlu0 %838 }
 0x226   : > { %v844_v53 = vmul.f32 0.020833334, %v839_v52 }
 0x228   : > { %v847_v54 = vadd.f32 1e-06, %v844_v53 }
 0x229   : > { %v842_v56 = vpop.xlane.xlu1 %841 }
 0x22a   : > { %11731 = vrsqrt.f32 %v847_v54  ;;  %v845_v57 = vmul.f32 0.020833334, %v842_v56 }
 0x22c   : > { %v848_v58 = vadd.f32 1e-06, %v845_v57 }
 0x22e   : > { %11733 = vrsqrt.f32 %v848_v58 }
 0x237   : > { %v11732_v3 = vpop.eup %11731 }
 0x238   : > { %v853_v4 = vmul.f32 %v11732_v3, %v829_v38  ;;  %v11586_v38 = vld [vmem:[%s16321_s7 + $0x8] sm:$0xff]  }
 0x23a   : > { %v860_v7 = vmul.f32 %v858_v0, %v853_v4 }
 0x23b   : > { %v11734_v8 = vpop.eup %11733 }
 0x23c   : > { %v867_v11 = vadd.f32 %v865_v6, %v860_v7  ;;  %v854_v12 = vmul.f32 %v11734_v8, %v830_v42  ;;  %v808_v42 = vand.u32 127, %v807_v55 }
 0x23e   : > { %v12581_v13 = vpack.c.bf16 %v867_v11, %v866_v9  ;;  %v861_v14 = vmul.f32 %v858_v0, %v854_v12  ;;  %vm809_vm4 = vcmp.ge.s32.totalorder %v808_v42, 1  ;;  %vm810_vm5 = vcmp.lt.s32.totalorder %v808_v42, 8 }
 0x23f   : > { %vm811_vm6 = vmand %vm809_vm4, %vm810_vm5 }
 0x240   : > { %10552 = vmatprep.mubr.msk.bf16.mxu1 %vm814_vm2, %v12581_v13  ;;  %v868_v15 = vadd.f32 %v865_v6, %v861_v14  ;;  %v12637_v48 = vsel %vm811_vm6, -1e+30, %v16303_v47 }
 0x242   : > { %v12585_v16 = vpack.c.bf16 %v868_v15, %v868_v15 }
 0x244   : > { %10553 = vmatmul.mubr.msk.bf16.vlgmr.msra.gmra.mxu1 %vm814_vm2, %v12585_v16 }
 0x304   : > { %v10554_v18 = vpop.f32.mrf.mxu1 }
 0x305   : > { %v951_v19 = vadd.f32 %v10554_v18, %v9662_v17 }
 0x306   : > { %v942_v20 = vpop.f32.mrf.mxu1 }
 0x307   : > { %v12592_v21 = vpack.c.bf16 %v951_v19, %v951_v19  ;;  %v943_v24 = vadd.f32 %v9662_v17, %v942_v20 }
 0x308   : > { %v10555_v22 = vpop.f32.mrf.mxu1 }
 0x309   : > { %967 = vrot.lane.b32.xlu0 %v12592_v21, %s16297_s30 }
 0x30a   : > { %v945_v23 = vpop.f32.mrf.mxu1 }
 0x30b   : > { %v946_v25 = vadd.f32 %v9662_v17, %v945_v23 }
 0x30d   : > { %v12596_v27 = vpack.c.bf16 %v946_v25, %v943_v24 }
 0x30f   : > { %1207 = vrot.lane.b32.xlu0 %v12596_v27, %s16295_s21  ;;  %965 = vrot.lane.b32.xlu1 %v12596_v27, %s16297_s30 }
 0x310   : > { %10560 = vmatprep.mubr.msk.bf16.mxu1 %vm969_vm3, %v12596_v27 }
 0x313   : > { %1213 = vrot.lane.b32.xlu1 %v12592_v21, %s16293_s0 }
 0x317   : > { %1211 = vrot.lane.b32.xlu1 %v12596_v27, %s16293_s0 }
 0x31b   : > { %1209 = vrot.lane.b32.xlu1 %v12592_v21, %s16295_s21 }
 0x37b   : > { %v968_v28 = vpop.permute.xlu0 %967 }
 0x37c   : > { %11528 = vmatprep.subr.msk.bf16.mxu1 %vm969_vm3, %v968_v28  ;;  %v980_v29 = vsel %vm969_vm3, %v968_v28, 0 }
 0x37d   : > { %10557 = vmatpush3.bf16.xpose.msra.mxu1 %v980_v29 }
 0x381   : > { %v1208_v30 = vpop.permute.xlu0 %1207  ;;  %v966_v32 = vpop.permute.xlu1 %965 }
 0x382   : > { %11529 = vmatprep.subr.msk.bf16.mxu1 %vm969_vm3, %v966_v32  ;;  %10586 = vmatprep.mubr.msk.bf16.mxu0 %vm969_vm3, %v1208_v30  ;;  %v977_v34 = vsel %vm969_vm3, %v966_v32, 0  ;;  %v11588_v30 = vld [vmem:[%s16321_s7 + $0x28] sm:$0xff]  }
 0x385   : > { %10559 = vmatpush3.bf16.xpose.msra.mxu1 %v977_v34  ;;  %v1214_v35 = vpop.permute.xlu1 %1213 }
 0x386   : > { %11531 = vmatprep.subr.msk.bf16.mxu0 %vm969_vm3, %v1214_v35  ;;  %v1225_v36 = vsel %vm969_vm3, %v1214_v35, 0  ;;  %10564 = vmatprep.subr.bf16.mxu1 %v11585_v33 }
 0x387   : > { %10583 = vmatpush3.bf16.xpose.msra.mxu0 %v1225_v36 }
 0x389   : > { %v1212_v37 = vpop.permute.xlu1 %1211 }
 0x38a   : > { %11532 = vmatprep.subr.msk.bf16.mxu0 %vm969_vm3, %v1212_v37  ;;  %v1222_v39 = vsel %vm969_vm3, %v1212_v37, 0 }
 0x38c   : > { %10561 = vmatmul.mubr.msk.bf16.vlgmr.msra.gmra.mxu1 %vm969_vm3, %v12592_v21 }
 0x38d   : > { %10565 = vmatpush3.bf16.msra.mxu1 %v11585_v33  ;;  %10570 = vmatprep.mubr.msk.bf16.mxu1 %vm814_vm2, %v12581_v13  ;;  %v1210_v41 = vpop.permute.xlu1 %1209 }
 0x38e   : > { %10566 = vmatprep.subr.bf16.mxu1 %v11586_v38 }
 0x38f   : > { %10585 = vmatpush3.bf16.xpose.msra.mxu0 %v1222_v39 }
 0x391   : > { %10567 = vmatpush3.bf16.msra.mxu1 %v11586_v38 }
 0x392   : > { %10568 = vmatprep.subr.bf16.mxu1 %v11587_v40 }
 0x395   : > { %10569 = vmatpush3.bf16.msra.mxu1 %v11587_v40 }
 0x396   : > { %10587 = vmatmul.mubr.msk.bf16.vlgmr.msra.gmra.mxu0 %vm969_vm3, %v1210_v41 }
 0x398   : > { %10571 = vmatmul.mubr.msk.bf16.vlgmr.msra.gmra.mxu1 %vm814_vm2, %v12585_v16 }
 0x44c   : > { %v10562_v43 = vpop.f32.mrf.mxu1 }
 0x44d   : > { %v1032_v45 = vmul.f32 0.28867513, %v10562_v43 }
 0x44e   : > { %v1016_v44 = vpop.f32.mrf.mxu1 }
 0x44f   : > { %v1030_v46 = vmul.f32 0.28867513, %v1016_v44  ;;  %v1035_v54 = vadd.f32 %v1032_v45, %v12637_v48 }
 0x450   : > { %v10563_v49 = vpop.f32.mrf.mxu1 }
 0x451   : > { %v1033_v50 = vadd.f32 %v1030_v46, %v12637_v48  ;;  %v1043_v57 = vsel %vm1036_vm7, %v1035_v54, -inf }
 0x452   : > { %v1019_v51 = vpop.f32.mrf.mxu1 }
 0x453   : > { %v1031_v52 = vmul.f32 0.28867513, %v1019_v51  ;;  %v1037_v53 = vsel %vm1036_vm7, %v1033_v50, -inf }
 0x454   : > { %1038 = vmax.xlane.f32.xlu0 %v1037_v53 }
 0x455   : > { %v1034_v55 = vadd.f32 %v1031_v52, %v12637_v48 }
 0x456   : > { %v10588_v56 = vpop.f32.mrf.mxu0 }
 0x457   : > { %v1040_v58 = vsel %vm1036_vm7, %v1034_v55, -inf  ;;  %v1277_v33 = vmul.f32 0.28867513, %v10588_v56 }
 0x458   : > { %v1261_v61 = vpop.f32.mrf.mxu0  ;;  %1044 = vmax.xlane.f32.xlu0 %v1043_v57  ;;  %v10572_v63 = vpop.f32.mrf.mxu1  ;;  %1041 = vmax.xlane.f32.xlu1 %v1040_v58 }
 0x459   : > { %v1143_v0 = vpack.c.bf16 %v10572_v63, %v10572_v63  ;;  %v1275_v32 = vmul.f32 0.28867513, %v1261_v61  ;;  %v1280_v38 = vadd.f32 %v1277_v33, %v12637_v48  ;;  %v11589_v63 = vld [vmem:[%s16321_s7 + $0x20] sm:$0xff]  }
 0x45a   : > { %v1128_v3 = vpop.f32.mrf.mxu1  ;;  %v10589_v4 = vpop.f32.mrf.mxu0 }
 0x45b   : > { %v1154_v5 = vsel %vm1152_vm8, %v1143_v0, 0  ;;  %11530 = vmatprep.subr.msk.bf16.mxu1 %vm1152_vm8, %v1143_v0  ;;  %v1278_v35 = vadd.f32 %v1275_v32, %v12637_v48  ;;  %v1287_v40 = vsel %vm1036_vm7, %v1280_v38, -inf }
 0x45c   : > { %v10573_v6 = vpop.f32.mrf.mxu1  ;;  %10575 = vmatpush3.bf16.msra.mxu1 %v1154_v5  ;;  %v1264_v34 = vpop.f32.mrf.mxu0 }
 0x45d   : > { %v1276_v36 = vmul.f32 0.28867513, %v1264_v34  ;;  %v1281_v37 = vsel %vm1036_vm7, %v1278_v35, -inf }
 0x45e   : > { %v1131_v7 = vpop.f32.mrf.mxu1 }
 0x45f   : > { %v1142_v8 = vpack.c.bf16 %v1131_v7, %v1128_v3  ;;  %v1279_v39 = vadd.f32 %v1276_v36, %v12637_v48  ;;  %v11590_v3 = vld [vmem:[%s16321_s7 + $0x18] sm:$0xff]  }
 0x461   : > { %10576 = vmatprep.subr.bf16.mxu1 %v1142_v8  ;;  %v1284_v41 = vsel %vm1036_vm7, %v1279_v39, -inf }
 0x462   : > { %10577 = vmatpush3.bf16.msra.mxu1 %v1142_v8 }
 0x463   : > { %10590 = vmatprep.subr.bf16.mxu1 %v11588_v30 }
 0x4dd   : > { %v1039_v9 = vpop.xlane.xlu0 %1038 }
 0x4de   : > { %v1046_v11 = vsub.f32 %v1033_v50, %v1039_v9 }
 0x4e0   : > { %v1049_v12 = vmul.f32 1.442695, %v1046_v11 }
 0x4e1   : > { %v1045_v14 = vpop.xlane.xlu0 %1044  ;;  %v1042_v15 = vpop.xlane.xlu1 %1041 }
 0x4e2   : > { %11735 = vpow2.f32 %v1049_v12  ;;  %v1048_v17 = vsub.f32 %v1035_v54, %v1045_v14  ;;  %v1047_v18 = vsub.f32 %v1034_v55, %v1042_v15 }
 0x4e4   : > { %v1053_v19 = vmul.f32 1.442695, %v1048_v17  ;;  %v1051_v20 = vmul.f32 1.442695, %v1047_v18 }
 0x4e6   : > { %11737 = vpow2.f32 %v1053_v19 }
 0x4e7   : > { %11739 = vpow2.f32 %v1051_v20 }
 0x4ef   : > { %v11736_v22 = vpop.eup %11735 }
 0x4f0   : > { %v1055_v23 = vsel %vm1036_vm7, %v11736_v22, 0.0 }
 0x4f1   : > { %1056 = vadd.xlane.f32.xlu0 %v1055_v23 }
 0x4f3   : > { %v11738_v24 = vpop.eup %11737 }
 0x4f4   : > { %v11740_v25 = vpop.eup %11739  ;;  %v1061_v28 = vsel %vm1036_vm7, %v11738_v24, 0.0 }
 0x4f5   : > { %1062 = vadd.xlane.f32.xlu1 %v1061_v28  ;;  %v1058_v29 = vsel %vm1036_vm7, %v11740_v25, 0.0 }
 0x4f6   : > { %1059 = vadd.xlane.f32.xlu0 %v1058_v29 }
 0x506   : > { %1455 = vrot.lane.b32.xlu1 %v12596_v27, %s16291_s28 }
 0x50a   : > { %1451 = vrot.lane.b32.xlu1 %v12596_v27, %s16289_s4 }
 0x50c   : > { %1457 = vrot.lane.b32.xlu0 %v12592_v21, %s16291_s28 }
 0x50e   : > { %1453 = vrot.lane.b32.xlu1 %v12592_v21, %s16289_s4  ;;  %s16330_s4 = sld [smem:[#allocation3_spill]] }
 0x52b   : > { %1282 = vmax.xlane.f32.xlu0 %v1281_v37 }
 0x52f   : > { %1288 = vmax.xlane.f32.xlu0 %v1287_v40 }
 0x532   : > { %1285 = vmax.xlane.f32.xlu1 %v1284_v41 }
 0x57a   : > { %v1057_v42 = vpop.xlane.xlu0 %1056 }
 0x57b   : > { %11741 = vrcp.f32 %v1057_v42 }
 0x57e   : > { %v1063_v43 = vpop.xlane.xlu1 %1062 }
 0x57f   : > { %v1060_v44 = vpop.xlane.xlu0 %1059  ;;  %11743 = vrcp.f32 %v1063_v43 }
 0x580   : > { %11745 = vrcp.f32 %v1060_v44 }
 0x582   : > { %v1456_v45 = vpop.permute.xlu1 %1455 }
 0x583   : > { %v1458_v46 = vpop.permute.xlu0 %1457  ;;  %v1466_v53 = vsel %vm969_vm3, %v1456_v45, 0 }
 0x584   : > { %11534 = vmatprep.subr.msk.bf16.mxu0 %vm969_vm3, %v1458_v46  ;;  %v1469_v49 = vsel %vm969_vm3, %v1458_v46, 0 }
 0x585   : > { %10609 = vmatpush3.bf16.xpose.msra.mxu0 %v1469_v49 }
 0x586   : > { %11535 = vmatprep.subr.msk.bf16.mxu0 %vm969_vm3, %v1456_v45  ;;  %v1452_v50 = vpop.permute.xlu1 %1451 }
 0x587   : > { %10612 = vmatprep.mubr.msk.bf16.mxu0 %vm969_vm3, %v1452_v50 }
 0x588   : > { %v11742_v51 = vpop.eup %11741 }
 0x589   : > { %v1067_v56 = vmul.f32 %v11742_v51, %v11736_v22 }
 0x58a   : > { %v1454_v0 = vpop.permute.xlu1 %1453 }
 0x58c   : > { %v11744_v52 = vpop.eup %11743 }
 0x58d   : > { %v11746_v54 = vpop.eup %11745  ;;  %10611 = vmatpush3.bf16.xpose.msra.mxu0 %v1466_v53  ;;  %v1069_v55 = vmul.f32 %v11744_v52, %v11738_v24 }
 0x58e   : > { %v1068_v57 = vmul.f32 %v11746_v54, %v11740_v25 }
 0x58f   : > { %v1145_v58 = vpack.c.bf16 %v1069_v55, %v1069_v55 }
 0x590   : > { %v1144_v61 = vpack.c.bf16 %v1068_v57, %v1067_v56  ;;  %v11591_v56 = vld [vmem:[%s16321_s7 + $0x40] sm:$0xff]  }
 0x592   : > { %10578 = vmatprep.mubr.msk.bf16.mxu1 %vm1036_vm7, %v1144_v61 }
 0x593   : > { %10579 = vmatmul.mubr.msk.bf16.vlgmr.msra.gmra.mxu1 %vm1036_vm7, %v1145_v58 }
 0x594   : > { %10591 = vmatpush3.bf16.msra.mxu1 %v11588_v30  ;;  %10596 = vmatprep.mubr.msk.bf16.mxu1 %vm814_vm2, %v12581_v13 }
 0x595   : > { %10613 = vmatmul.mubr.msk.bf16.vlgmr.msra.gmra.mxu0 %vm969_vm3, %v1454_v0  ;;  %10592 = vmatprep.subr.bf16.mxu1 %v11589_v63 }
 0x598   : > { %10593 = vmatpush3.bf16.msra.mxu1 %v11589_v63 }
 0x599   : > { %10594 = vmatprep.subr.bf16.mxu1 %v11590_v3 }
 0x59c   : > { %10595 = vmatpush3.bf16.msra.mxu1 %v11590_v3  ;;  %v11592_v3 = vld [vmem:[%s16321_s7 + $0x38] sm:$0xff]  }
 0x59f   : > { %10597 = vmatmul.mubr.msk.bf16.vlgmr.msra.gmra.mxu1 %vm814_vm2, %v12585_v16 }
 0x5b4   : > { %v1283_v4 = vpop.xlane.xlu0 %1282 }
 0x5b5   : > { %v1290_v5 = vsub.f32 %v1278_v35, %v1283_v4  ;;  %v11593_v4 = vld [vmem:[%s16321_s7 + $0x30] sm:$0xff]  }
 0x5b7   : > { %v1293_v6 = vmul.f32 1.442695, %v1290_v5 }
 0x5b8   : > { %v1289_v7 = vpop.xlane.xlu0 %1288 }
 0x5b9   : > { %11747 = vpow2.f32 %v1293_v6  ;;  %v1292_v8 = vsub.f32 %v1280_v38, %v1289_v7 }
 0x5bb   : > { %v1297_v9 = vmul.f32 1.442695, %v1292_v8  ;;  %v1286_v11 = vpop.xlane.xlu1 %1285 }
 0x5bc   : > { %v1291_v12 = vsub.f32 %v1279_v39, %v1286_v11 }
 0x5bd   : > { %11749 = vpow2.f32 %v1297_v9 }
 0x5be   : > { %v1295_v14 = vmul.f32 1.442695, %v1291_v12 }
 0x5c0   : > { %11751 = vpow2.f32 %v1295_v14 }
 0x5c6   : > { %v11748_v15 = vpop.eup %11747 }
 0x5c7   : > { %v1299_v17 = vsel %vm1036_vm7, %v11748_v15, 0.0 }
 0x5c8   : > { %1300 = vadd.xlane.f32.xlu0 %v1299_v17 }
 0x5ca   : > { %v11750_v18 = vpop.eup %11749 }
 0x5cb   : > { %v1305_v19 = vsel %vm1036_vm7, %v11750_v18, 0.0 }
 0x5cc   : > { %1306 = vadd.xlane.f32.xlu1 %v1305_v19 }
 0x5cd   : > { %v11752_v20 = vpop.eup %11751 }
 0x5ce   : > { %v1302_v22 = vsel %vm1036_vm7, %v11752_v20, 0.0 }
 0x5cf   : > { %1303 = vadd.xlane.f32.xlu0 %v1302_v22 }
 0x5dd   : > { %1699 = vrot.lane.b32.xlu1 %v12596_v27, %s16287_s27 }
 0x5e1   : > { %1695 = vrot.lane.b32.xlu1 %v12596_v27, %s16285_s29 }
 0x5e5   : > { %1697 = vrot.lane.b32.xlu1 %v12592_v21, %s16285_s29  ;;  %1701 = vrot.lane.b32.xlu0 %v12592_v21, %s16287_s27  ;;  %s16328_s29 = smov 44   ;;  %s16331_s27 = sld [smem:[#allocation5_spill]] }
 0x651   : > { %v1301_v23 = vpop.xlane.xlu0 %1300 }
 0x652   : > { %11753 = vrcp.f32 %v1301_v23 }
 0x653   : > { %v12696_v24 = vpop.f32.mrf.mxu1 }
 0x655   : > { %v10614_v25 = vpop.f32.mrf.mxu0  ;;  %v12698_v28 = vpop.f32.mrf.mxu1 }
 0x656   : > { %v1307_v29 = vpop.xlane.xlu1 %1306  ;;  %v1521_v33 = vmul.f32 0.28867513, %v10614_v25 }
 0x657   : > { %11755 = vrcp.f32 %v1307_v29  ;;  %v1505_v30 = vpop.f32.mrf.mxu0  ;;  %v10581_v32 = vpop.f32.mrf.mxu1 }
 0x658   : > { %v1519_v34 = vmul.f32 0.28867513, %v1505_v30  ;;  %v1304_v27 = vpop.xlane.xlu0 %1303  ;;  %v1524_v39 = vadd.f32 %v1521_v33, %v12637_v48 }
 0x659   : > { %v10615_v35 = vpop.f32.mrf.mxu0  ;;  %11757 = vrcp.f32 %v1304_v27  ;;  %v12703_v40 = vpop.f32.mrf.mxu1  ;;  %v12735_v27 = vsub.s32 4, %v12564_v59 }
 0x65a   : > { %v1522_v36 = vadd.f32 %v1519_v34, %v12637_v48  ;;  %v1531_v45 = vsel %vm1036_vm7, %v1524_v39, -inf  ;;  %v1700_v5 = vpop.permute.xlu1 %1699 }
 0x65b   : > { %v1508_v37 = vpop.f32.mrf.mxu0  ;;  %v1710_v9 = vsel %vm969_vm3, %v1700_v5, 0  ;;  %v12739_v35 = vrot.slane %v12572_v62, %v12735_v27 }
 0x65c   : > { %v1520_v21 = vmul.f32 0.28867513, %v1508_v37  ;;  %v1525_v38 = vsel %vm1036_vm7, %v1522_v36, -inf  ;;  %v1702_v6 = vpop.permute.xlu0 %1701 }
 0x65d   : > { %1526 = vmax.xlane.f32.xlu0 %v1525_v38  ;;  %v1713_v8 = vsel %vm969_vm3, %v1702_v6, 0 }
 0x65e   : > { %v1523_v41 = vadd.f32 %v1520_v21, %v12637_v48  ;;  %v1696_v7 = vpop.permute.xlu1 %1695  ;;  %v1204_v21 = vadd.f32 %v12698_v28, %v12739_v35  ;;  %v11594_v28 = vld [vmem:[%s16321_s7 + $0x58] sm:$0xff]  }
 0x65f   : > { %v10598_v42 = vpop.f32.mrf.mxu1  ;;  %v11754_v50 = vpop.eup %11753 }
 0x660   : > { %v1388_v43 = vpack.c.bf16 %v10598_v42, %v10598_v42  ;;  %v1528_v44 = vsel %vm1036_vm7, %v1523_v41, -inf  ;;  %v1311_v58 = vmul.f32 %v11754_v50, %v11748_v15 }
 0x661   : > { %v1373_v46 = vpop.f32.mrf.mxu1  ;;  %1529 = vmax.xlane.f32.xlu1 %v1528_v44  ;;  %1532 = vmax.xlane.f32.xlu0 %v1531_v45 }
 0x662   : > { %v1398_v49 = vsel %vm1152_vm8, %v1388_v43, 0  ;;  %11533 = vmatprep.subr.msk.bf16.mxu1 %vm1152_vm8, %v1388_v43  ;;  %v1698_v11 = vpop.permute.xlu1 %1697 }
 0x663   : > { %v10599_v51 = vpop.f32.mrf.mxu1  ;;  %10601 = vmatpush3.bf16.msra.mxu1 %v1398_v49 }
 0x664   : > { %v11756_v52 = vpop.eup %11755 }
 0x665   : > { %v1376_v53 = vpop.f32.mrf.mxu1  ;;  %v1313_v57 = vmul.f32 %v11756_v52, %v11750_v18 }
 0x666   : > { %v11758_v54 = vpop.eup %11757  ;;  %v1387_v55 = vpack.c.bf16 %v1376_v53, %v1373_v46 }
 0x667   : > { %v1312_v61 = vmul.f32 %v11758_v54, %v11752_v20  ;;  %v1390_v0 = vpack.c.bf16 %v1313_v57, %v1313_v57 }
 0x668   : > { %10602 = vmatprep.subr.bf16.mxu1 %v1387_v55 }
 0x669   : > { %10603 = vmatpush3.bf16.msra.mxu1 %v1387_v55  ;;  %v1389_v63 = vpack.c.bf16 %v1312_v61, %v1311_v58 }
 0x66a   : > { %10616 = vmatprep.subr.bf16.mxu1 %v11591_v56 }
 0x66b   : > { %10604 = vmatprep.mubr.msk.bf16.mxu1 %vm1036_vm7, %v1389_v63 }
 0x66c   : > { %10605 = vmatmul.mubr.msk.bf16.vlgmr.msra.gmra.mxu1 %vm1036_vm7, %v1390_v0 }
 0x66d   : > { %10617 = vmatpush3.bf16.msra.mxu1 %v11591_v56  ;;  %10622 = vmatprep.mubr.msk.bf16.mxu1 %vm814_vm2, %v12581_v13 }
 0x66e   : > { %10618 = vmatprep.subr.bf16.mxu1 %v11592_v3 }
 0x671   : > { %10619 = vmatpush3.bf16.msra.mxu1 %v11592_v3 }
 0x672   : > { %10620 = vmatprep.subr.bf16.mxu1 %v11593_v4 }
 0x675   : > { %10621 = vmatpush3.bf16.msra.mxu1 %v11593_v4 }
 0x676   : > { %11537 = vmatprep.subr.msk.bf16.mxu1 %vm969_vm3, %v1702_v6 }
 0x678   : > { %10623 = vmatmul.mubr.msk.bf16.vlgmr.msra.gmra.mxu1 %vm814_vm2, %v12585_v16 }
 0x679   : > { %10635 = vmatpush3.bf16.xpose.msra.mxu1 %v1713_v8  ;;  %10638 = vmatprep.mubr.msk.bf16.mxu1 %vm969_vm3, %v1696_v7 }
 0x67a   : > { %11538 = vmatprep.subr.msk.bf16.mxu1 %vm969_vm3, %v1700_v5 }
 0x681   : > { %10637 = vmatpush3.bf16.xpose.msra.mxu1 %v1710_v9 }
 0x688   : > { %10639 = vmatmul.mubr.msk.bf16.vlgmr.msra.gmra.mxu1 %vm969_vm3, %v1698_v11 }
 0x6e6   : > { %v1527_v12 = vpop.xlane.xlu0 %1526 }
 0x6e7   : > { %v1534_v14 = vsub.f32 %v1522_v36, %v1527_v12  ;;  %v1206_v36 = vadd.f32 %v12696_v24, %v12739_v35 }
 0x6e9   : > { %v1537_v15 = vmul.f32 1.442695, %v1534_v14 }
 0x6ea   : > { %v1533_v17 = vpop.xlane.xlu0 %1532  ;;  %v1530_v18 = vpop.xlane.xlu1 %1529 }
 0x6eb   : > { %11759 = vpow2.f32 %v1537_v15  ;;  %v1536_v19 = vsub.f32 %v1524_v39, %v1533_v17  ;;  %v1535_v20 = vsub.f32 %v1523_v41, %v1530_v18 }
 0x6ed   : > { %v1541_v22 = vmul.f32 1.442695, %v1536_v19  ;;  %v1539_v23 = vmul.f32 1.442695, %v1535_v20  ;;  %v11595_v20 = vld [vmem:[%s16321_s7 + $0x50] sm:$0xff]  }
 0x6ef   : > { %11761 = vpow2.f32 %v1541_v22  ;;  %v11596_v22 = vld [vmem:[%s16321_s7 + $0x48] sm:$0xff]  }
 0x6f0   : > { %11763 = vpow2.f32 %v1539_v23 }
 0x6f8   : > { %v11760_v25 = vpop.eup %11759 }
 0x6f9   : > { %v1543_v29 = vsel %vm1036_vm7, %v11760_v25, 0.0 }
 0x6fa   : > { %1544 = vadd.xlane.f32.xlu0 %v1543_v29 }
 0x6fc   : > { %v11762_v30 = vpop.eup %11761 }
 0x6fd   : > { %v11764_v32 = vpop.eup %11763  ;;  %v1549_v33 = vsel %vm1036_vm7, %v11762_v30, 0.0 }
 0x6fe   : > { %1550 = vadd.xlane.f32.xlu1 %v1549_v33  ;;  %v1546_v34 = vsel %vm1036_vm7, %v11764_v32, 0.0 }
 0x6ff   : > { %1547 = vadd.xlane.f32.xlu0 %v1546_v34 }
 0x72c   : > { %v10606_v37 = vpop.f32.mrf.mxu1 }
 0x72d   : > { %v12745_v38 = vadd.f32 %v10606_v37, %v1206_v36 }
 0x72e   : > { %v1434_v39 = vpop.f32.mrf.mxu1 }
 0x72f   : > { %v12747_v41 = vadd.f32 %v1434_v39, %v1204_v21 }
 0x730   : > { %v10607_v42 = vpop.f32.mrf.mxu1 }
 0x732   : > { %v12749_v43 = vpop.f32.mrf.mxu1 }
 0x738   : > { %v10624_v44 = vpop.f32.mrf.mxu1 }
 0x739   : > { %v1632_v45 = vpack.c.bf16 %v10624_v44, %v10624_v44 }
 0x73a   : > { %v1617_v46 = vpop.f32.mrf.mxu1 }
 0x73b   : > { %v1642_v49 = vsel %vm1152_vm8, %v1632_v45, 0  ;;  %11536 = vmatprep.subr.msk.bf16.mxu0 %vm1152_vm8, %v1632_v45 }
 0x73c   : > { %v10625_v24 = vpop.f32.mrf.mxu1  ;;  %10627 = vmatpush3.bf16.msra.mxu0 %v1642_v49 }
 0x73e   : > { %v1620_v50 = vpop.f32.mrf.mxu1 }
 0x73f   : > { %v1631_v51 = vpack.c.bf16 %v1620_v50, %v1617_v46 }
 0x741   : > { %10628 = vmatprep.subr.bf16.mxu0 %v1631_v51 }
 0x742   : > { %10629 = vmatpush3.bf16.msra.mxu0 %v1631_v51 }
 0x743   : > { %10642 = vmatprep.subr.bf16.mxu0 %v11594_v28 }
 0x748   : > { %v10640_v52 = vpop.f32.mrf.mxu1 }
 0x749   : > { %v1765_v54 = vmul.f32 0.28867513, %v10640_v52 }
 0x74a   : > { %v1749_v53 = vpop.f32.mrf.mxu1 }
 0x74b   : > { %v1763_v55 = vmul.f32 0.28867513, %v1749_v53  ;;  %v1768_v0 = vadd.f32 %v1765_v54, %v12637_v48 }
 0x74c   : > { %v10641_v56 = vpop.f32.mrf.mxu1 }
 0x74d   : > { %v1766_v57 = vadd.f32 %v1763_v55, %v12637_v48  ;;  %v1775_v5 = vsel %vm1036_vm7, %v1768_v0, -inf }
 0x74e   : > { %v1752_v58 = vpop.f32.mrf.mxu1 }
 0x74f   : > { %v1764_v61 = vmul.f32 0.28867513, %v1752_v58  ;;  %v1769_v63 = vsel %vm1036_vm7, %v1766_v57, -inf }
 0x750   : > { %1770 = vmax.xlane.f32.xlu0 %v1769_v63 }
 0x751   : > { %v1767_v3 = vadd.f32 %v1764_v61, %v12637_v48 }
 0x753   : > { %v1772_v4 = vsel %vm1036_vm7, %v1767_v3, -inf }
 0x754   : > { %1773 = vmax.xlane.f32.xlu1 %v1772_v4  ;;  %1776 = vmax.xlane.f32.xlu0 %v1775_v5 }
 0x783   : > { %v1545_v6 = vpop.xlane.xlu0 %1544 }
 0x784   : > { %11765 = vrcp.f32 %v1545_v6 }
 0x787   : > { %v1551_v7 = vpop.xlane.xlu1 %1550 }
 0x788   : > { %v1548_v8 = vpop.xlane.xlu0 %1547  ;;  %11767 = vrcp.f32 %v1551_v7 }
 0x789   : > { %11769 = vrcp.f32 %v1548_v8 }
 0x791   : > { %v11766_v9 = vpop.eup %11765 }
 0x792   : > { %v1555_v15 = vmul.f32 %v11766_v9, %v11760_v25  ;;  %v1205_v9 = vadd.f32 %v12703_v40, %v12739_v35 }
 0x795   : > { %v11768_v11 = vpop.eup %11767 }
 0x796   : > { %v11770_v12 = vpop.eup %11769  ;;  %v1557_v14 = vmul.f32 %v11768_v11, %v11762_v30 }
 0x797   : > { %v1556_v17 = vmul.f32 %v11770_v12, %v11764_v32  ;;  %v1449_v12 = vadd.f32 %v12749_v43, %v1205_v9 }
 0x798   : > { %v1634_v18 = vpack.c.bf16 %v1557_v14, %v1557_v14 }
 0x799   : > { %v1633_v19 = vpack.c.bf16 %v1556_v17, %v1555_v15 }
 0x79b   : > { %10630 = vmatprep.mubr.msk.bf16.mxu0 %vm1036_vm7, %v1633_v19 }
 0x79c   : > { %10631 = vmatmul.mubr.msk.bf16.vlgmr.msra.gmra.mxu0 %vm1036_vm7, %v1634_v18 }
 0x79d   : > { %10643 = vmatpush3.bf16.msra.mxu0 %v11594_v28  ;;  %10648 = vmatprep.mubr.msk.bf16.mxu0 %vm814_vm2, %v12581_v13 }
 0x79e   : > { %10644 = vmatprep.subr.bf16.mxu0 %v11595_v20 }
 0x7a1   : > { %10645 = vmatpush3.bf16.msra.mxu0 %v11595_v20 }
 0x7a2   : > { %10646 = vmatprep.subr.bf16.mxu0 %v11596_v22 }
 0x7a5   : > { %10647 = vmatpush3.bf16.msra.mxu0 %v11596_v22 }
 0x7a8   : > { %10649 = vmatmul.mubr.msk.bf16.vlgmr.msra.gmra.mxu0 %vm814_vm2, %v12585_v16 }
 0x7d9   : > { %v1771_v23 = vpop.xlane.xlu0 %1770 }
 0x7da   : > { %v1778_v25 = vsub.f32 %v1766_v57, %v1771_v23 }
 0x7dc   : > { %v1781_v29 = vmul.f32 1.442695, %v1778_v25 }
 0x7dd   : > { %v1777_v30 = vpop.xlane.xlu0 %1776  ;;  %v1774_v32 = vpop.xlane.xlu1 %1773 }
 0x7de   : > { %11771 = vpow2.f32 %v1781_v29  ;;  %v1780_v33 = vsub.f32 %v1768_v0, %v1777_v30  ;;  %v1779_v34 = vsub.f32 %v1767_v3, %v1774_v32 }
 0x7e0   : > { %v1785_v13 = vmul.f32 1.442695, %v1780_v33  ;;  %v1783_v36 = vmul.f32 1.442695, %v1779_v34 }
 0x7e2   : > { %11773 = vpow2.f32 %v1785_v13 }
 0x7e3   : > { %11775 = vpow2.f32 %v1783_v36 }
 0x7eb   : > { %v11772_v37 = vpop.eup %11771 }
 0x7ec   : > { %v1787_v21 = vsel %vm1036_vm7, %v11772_v37, 0.0 }
 0x7ed   : > { %1788 = vadd.xlane.f32.xlu1 %v1787_v21 }
 0x7ef   : > { %v11774_v39 = vpop.eup %11773 }
 0x7f0   : > { %v11776_v42 = vpop.eup %11775  ;;  %v1793_v16 = vsel %vm1036_vm7, %v11774_v39, 0.0 }
 0x7f1   : > { %1794 = vadd.xlane.f32.xlu1 %v1793_v16  ;;  %v1790_v44 = vsel %vm1036_vm7, %v11776_v42, 0.0 }
 0x7f2   : > { %1791 = vadd.xlane.f32.xlu0 %v1790_v44  ;;  %v11599_v44 = vld [vmem:[%s16322_s8 + $0x24] ss:$8 sps:$4 sm:$0xff]  }
 0x85c   : > { %v10632_v45 = vpop.f32.mrf.mxu0 }
 0x85d   : > { %v1694_v46 = vadd.f32 %v10632_v45, %v12745_v38  ;;  %v11597_v45 = vld [vmem:[%s16322_s8 + $0x20] ss:$8 sps:$4 sm:$0xff]  }
 0x85e   : > { %v1678_v49 = vpop.f32.mrf.mxu0 }
 0x85f   : > { %v1692_v24 = vadd.f32 %v1678_v49, %v12747_v41  ;;  %v11602_v49 = vld [vmem:[%s16322_s8 + $0x14] ss:$8 sps:$4 sm:$0xff]  }
 0x860   : > { %v10633_v50 = vpop.f32.mrf.mxu0 }
 0x861   : > { %v11603_v50 = vld [vmem:[%s16322_s8] ss:$8 sps:$4 sm:$0xff]  }
 0x862   : > { %v1681_v51 = vpop.f32.mrf.mxu0 }
 0x863   : > { %v1693_v18 = vadd.f32 %v1681_v51, %v1449_v12 }
 0x868   : > { %v10650_v28 = vpop.f32.mrf.mxu0 }
 0x869   : > { %v1876_v52 = vpack.c.bf16 %v10650_v28, %v10650_v28 }
 0x86a   : > { %v1861_v53 = vpop.f32.mrf.mxu0 }
 0x86b   : > { %v1886_v54 = vsel %vm1152_vm8, %v1876_v52, 0  ;;  %11539 = vmatprep.subr.msk.bf16.mxu1 %vm1152_vm8, %v1876_v52 }
 0x86c   : > { %v10651_v55 = vpop.f32.mrf.mxu0  ;;  %10653 = vmatpush3.bf16.msra.mxu1 %v1886_v54 }
 0x86e   : > { %v1864_v56 = vpop.f32.mrf.mxu0 }
 0x86f   : > { %v1875_v57 = vpack.c.bf16 %v1864_v56, %v1861_v53 }
 0x871   : > { %10654 = vmatprep.subr.bf16.mxu1 %v1875_v57 }
 0x872   : > { %10655 = vmatpush3.bf16.msra.mxu1 %v1875_v57 }
 0x873   : > { %2061 = vmatprep.subr.bf16.mxu1 %v11599_v44 }
 0x876   : > { %v1789_v58 = vpop.xlane.xlu1 %1788 }
 0x877   : > { %11777 = vrcp.f32 %v1789_v58 }
 0x87a   : > { %v1795_v38 = vpop.xlane.xlu1 %1794 }
 0x87b   : > { %v1792_v61 = vpop.xlane.xlu0 %1791  ;;  %11779 = vrcp.f32 %v1795_v38  ;;  %v12828_v38 = vsub.s32 2, %v12564_v59 }
 0x87c   : > { %11781 = vrcp.f32 %v1792_v61 }
 0x884   : > { %v11778_v41 = vpop.eup %11777 }
 0x885   : > { %v1799_v4 = vmul.f32 %v11778_v41, %v11772_v37 }
 0x888   : > { %v11780_v63 = vpop.eup %11779 }
 0x889   : > { %v11782_v0 = vpop.eup %11781  ;;  %v1801_v3 = vmul.f32 %v11780_v63, %v11774_v39  ;;  %v1984_v63 = vrot.slane %v12572_v62, %v12828_v38 }
 0x88a   : > { %v1800_v5 = vmul.f32 %v11782_v0, %v11776_v42  ;;  %v12833_v0 = vsub.s32 3, %v12564_v59 }
 0x88b   : > { %v1878_v6 = vpack.c.bf16 %v1801_v3, %v1801_v3 }
 0x88c   : > { %v1877_v7 = vpack.c.bf16 %v1800_v5, %v1799_v4 }
 0x88e   : > { %10656 = vmatprep.mubr.msk.bf16.mxu1 %vm1036_vm7, %v1877_v7  ;;  %v1991_v7 = vrot.slane %v12572_v62, %v12833_v0 }
 0x88f   : > { %10657 = vmatmul.mubr.msk.bf16.vlgmr.msra.gmra.mxu1 %vm1036_vm7, %v1878_v6 }
 0x890   : > { %2083 = vmatprep.mubr.bf16.mxu1 %v16301_v1  ;;  %2062 = vmatpush1.bf16.msra.mxu1 %v11597_v45 }
 0x891   : > { %2063 = vmatprep.subr.bf16.mxu1 %v11602_v49 }
 0x94f   : > { %v10658_v8 = vpop.f32.mrf.mxu1 }
 0x950   : > { %v1938_v14 = vadd.f32 %v10658_v8, %v1694_v46  ;;  %v11600_v46 = vld [vmem:[%s16322_s8 + $0x10] ss:$8 sps:$4 sm:$0xff]  }
 0x951   : > { %v1922_v11 = vpop.f32.mrf.mxu1  ;;  %2064 = vmatpush1.bf16.msra.mxu1 %v11600_v46 }
 0x952   : > { %v1936_v15 = vadd.f32 %v1922_v11, %v1692_v24  ;;  %v12791_v22 = vadd.f32 %v1938_v14, %v12545_v31  ;;  %v11605_v24 = vld [vmem:[%s16322_s8 + $0x4] ss:$8 sps:$4 sm:$0xff]   ;;  %v11606_v14 = vld [vmem:[%s16323_s10 + $0x38] sm:$0xff]  }
 0x953   : > { %v10659_v17 = vpop.f32.mrf.mxu1  ;;  %2065 = vmatprep.subr.bf16.mxu1 %v11605_v24 }
 0x954   : > { %v12788_v19 = vadd.f32 %v1936_v15, %v12501_v10  ;;  %v1948_v35 = vsel %vm814_vm2, %v12791_v22, 0.0 }
 0x955   : > { %v1925_v20 = vpop.f32.mrf.mxu1  ;;  %2066 = vmatpush1.bf16.msra.mxu1 %v11603_v50 }
 0x956   : > { %v1937_v23 = vadd.f32 %v1925_v20, %v1693_v18  ;;  %v1942_v25 = vsel %vm814_vm2, %v12788_v19, 0.0  ;;  %2266 = vmatprep.subr.bf16.mxu1 %v16301_v1  ;;  %v11607_v18 = vld [vmem:[%s16323_s10 + $0x30] sm:$0xff]  }
 0x957   : > { %1943 = vadd.xlane.f32.xlu0 %v1942_v25  ;;  %v11609_v25 = vld [vmem:[%s16323_s10 + $0x20] sm:$0xff]  }
 0x958   : > { %v12796_v40 = vadd.f32 %v1937_v23, %v12540_v26  ;;  %v11608_v23 = vld [vmem:[%s16323_s10 + $0x28] sm:$0xff]  }
 0x95a   : > { %v1945_v43 = vsel %vm814_vm2, %v12796_v40, 0.0 }
 0x95b   : > { %1949 = vadd.xlane.f32.xlu0 %v1948_v35  ;;  %1946 = vadd.xlane.f32.xlu1 %v1945_v43  ;;  %v11610_v35 = vld [vmem:[%s16323_s10 + $0x18] sm:$0xff]   ;;  %v11611_v43 = vld [vmem:[%s16323_s10 + $0x10] sm:$0xff]  }
 0x9e0   : > { %v1944_v10 = vpop.xlane.xlu0 %1943 }
 0x9e1   : > { %v1951_v29 = vmul.f32 0.020833334, %v1944_v10  ;;  %v11612_v10 = vld [vmem:[%s16323_s10 + $0x8] sm:$0xff]  }
 0x9e3   : > { %v1954_v31 = vsub.f32 %v12788_v19, %v1951_v29  ;;  %v11613_v29 = vld [vmem:[%s16323_s10] sm:$0xff]  }
 0x9e4   : > { %v1950_v30 = vpop.xlane.xlu0 %1949  ;;  %v1947_v32 = vpop.xlane.xlu1 %1946 }
 0x9e5   : > { %v1953_v33 = vmul.f32 0.020833334, %v1950_v30  ;;  %v1952_v34 = vmul.f32 0.020833334, %v1947_v32  ;;  %v1957_v13 = vmul.f32 %v1954_v31, %v1954_v31  ;;  %v11615_v30 = vld [vmem:[%s16323_s10 + $0x50] sm:$0xff]   ;;  %v11616_v32 = vld [vmem:[%s16323_s10 + $0x48] sm:$0xff]  }
 0x9e7   : > { %v1956_v26 = vsub.f32 %v12791_v22, %v1953_v33  ;;  %v1955_v36 = vsub.f32 %v12796_v40, %v1952_v34  ;;  %v1960_v37 = vsel %vm814_vm2, %v1957_v13, 0.0  ;;  %v11617_v33 = vld [vmem:[%s16323_s10 + $0x40] sm:$0xff]  }
 0x9e8   : > { %1961 = vadd.xlane.f32.xlu1 %v1960_v37  ;;  %v2003_v34 = vld [vmem:[%s16324_s9] sm:$0x3] }
 0x9e9   : > { %v1959_v21 = vmul.f32 %v1956_v26, %v1956_v26  ;;  %v1958_v39 = vmul.f32 %v1955_v36, %v1955_v36  ;;  %v2008_v13 = vrot.slane %v2003_v34, %v12567_v60 }
 0x9eb   : > { %v1966_v42 = vsel %vm814_vm2, %v1959_v21, 0.0  ;;  %v1963_v16 = vsel %vm814_vm2, %v1958_v39, 0.0 }
 0x9ec   : > { %1967 = vadd.xlane.f32.xlu1 %v1966_v42  ;;  %1964 = vadd.xlane.f32.xlu0 %v1963_v16 }
 0xa71   : > { %v1962_v51 = vpop.xlane.xlu1 %1961 }
 0xa72   : > { %v1969_v28 = vmul.f32 0.020833334, %v1962_v51 }
 0xa74   : > { %v1972_v52 = vadd.f32 1e-06, %v1969_v28 }
 0xa75   : > { %v1965_v53 = vpop.xlane.xlu0 %1964  ;;  %v1968_v54 = vpop.xlane.xlu1 %1967 }
 0xa76   : > { %11783 = vrsqrt.f32 %v1972_v52  ;;  %v1970_v55 = vmul.f32 0.020833334, %v1965_v53  ;;  %v1971_v56 = vmul.f32 0.020833334, %v1968_v54 }
 0xa78   : > { %v1973_v57 = vadd.f32 1e-06, %v1970_v55  ;;  %v1974_v58 = vadd.f32 1e-06, %v1971_v56 }
 0xa7a   : > { %11785 = vrsqrt.f32 %v1973_v57 }
 0xa7b   : > { %11787 = vrsqrt.f32 %v1974_v58 }
 0xa83   : > { %v11784_v61 = vpop.eup %11783 }
 0xa84   : > { %v1978_v41 = vmul.f32 %v11784_v61, %v1954_v31  ;;  %v11614_v31 = vld [vmem:[%s16323_s10 + $0x58] sm:$0xff]  }
 0xa86   : > { %v1985_v6 = vmul.f32 %v1984_v63, %v1978_v41 }
 0xa87   : > { %v11786_v3 = vpop.eup %11785 }
 0xa88   : > { %v11788_v4 = vpop.eup %11787  ;;  %v1979_v5 = vmul.f32 %v11786_v3, %v1955_v36  ;;  %v1992_v11 = vadd.f32 %v1991_v7, %v1985_v6 }
 0xa89   : > { %v1980_v9 = vmul.f32 %v11788_v4, %v1956_v26  ;;  %v2012_v26 = vrot.slane %v2003_v34, %v12577_v2 }
 0xa8a   : > { %v1986_v8 = vmul.f32 %v1984_v63, %v1979_v5 }
 0xa8b   : > { %v1987_v17 = vmul.f32 %v1984_v63, %v1980_v9 }
 0xa8c   : > { %v1993_v12 = vadd.f32 %v1991_v7, %v1986_v8 }
 0xa8d   : > { %v1994_v62 = vadd.f32 %v1991_v7, %v1987_v17 }
 0xa8e   : > { %v1995_v15 = vpack.c.bf16 %v1993_v12, %v1992_v11 }
 0xa8f   : > { %v1996_v20 = vpack.c.bf16 %v1994_v62, %v1994_v62 }
 0xa90   : > { %9728 = vmatmul.mubr.msk.bf16.vlgmr.msra.gmra.mxu1 %vm814_vm2, %v1995_v15 }
 0xa91   : > { %2093 = vmatprep.mubr.bf16.mxu1 %v16301_v1  ;;  %2267 = vmatpush1.bf16.msra.mxu1 %v11606_v14 }
 0xa92   : > { %2268 = vmatprep.subr.bf16.mxu1 %v16301_v1 }
 0xa95   : > { %2269 = vmatpush1.bf16.msra.mxu1 %v11607_v18 }
 0xa96   : > { %2270 = vmatprep.subr.bf16.mxu1 %v16301_v1 }
 0xa98   : > { %9729 = vmatmul.mubr.msk.bf16.gmra.mxu1 %vm814_vm2, %v1996_v20 }
 0xa99   : > { %2271 = vmatpush1.bf16.msra.mxu1 %v11608_v23 }
 0xa9a   : > { %2272 = vmatprep.subr.bf16.mxu1 %v16301_v1 }
 0xa9d   : > { %2273 = vmatpush1.bf16.msra.mxu1 %v11609_v25 }
 0xa9e   : > { %2274 = vmatprep.subr.bf16.mxu1 %v16301_v1 }
 0xaa1   : > { %2275 = vmatpush1.bf16.msra.mxu1 %v11610_v35 }
 0xaa2   : > { %2276 = vmatprep.subr.bf16.mxu1 %v16301_v1 }
 0xaa5   : > { %2277 = vmatpush1.bf16.msra.mxu1 %v11611_v43 }
 0xaa6   : > { %2278 = vmatprep.subr.bf16.mxu1 %v16301_v1 }
 0xaa9   : > { %2279 = vmatpush1.bf16.msra.mxu1 %v11612_v10 }
 0xaaa   : > { %2280 = vmatprep.subr.bf16.mxu1 %v16301_v1 }
 0xaad   : > { %2281 = vmatpush1.bf16.msra.mxu1 %v11613_v29 }
 0xaae   : > { %2290 = vmatprep.subr.bf16.mxu1 %v16301_v1 }
 0xab1   : > { %2291 = vmatpush2.bf16.msra.mxu1 %v11614_v31 }
 0xab2   : > { %2292 = vmatprep.subr.bf16.mxu1 %v16301_v1 }
 0xab5   : > { %2293 = vmatpush2.bf16.msra.mxu1 %v11615_v30 }
 0xab6   : > { %2294 = vmatprep.subr.bf16.mxu1 %v16301_v1 }
 0xab9   : > { %2295 = vmatpush2.bf16.msra.mxu1 %v11616_v32 }
 0xaba   : > { %2296 = vmatprep.subr.bf16.mxu1 %v16301_v1 }
 0xabd   : > { %2297 = vmatpush2.bf16.msra.mxu1 %v11617_v33 }
 0xb50   : > { %v2085_v36 = vpop.f32.mrf.mxu1 }
 0xb51   : > { %v12892_v37 = vadd.f32 %v2085_v36, %v2008_v13 }
 0xb52   : > { %v2087_v21 = vpop.f32.mrf.mxu1 }
 0xb53   : > { %v2102_v39 = vmul.f32 %v12892_v37, %v12892_v37  ;;  %v2088_v42 = vadd.f32 %v2087_v21, %v2012_v26 }
 0xb54   : > { %v2089_v16 = vpop.f32.mrf.mxu1 }
 0xb55   : > { %v2108_v44 = vmul.f32 %v2102_v39, %v12892_v37  ;;  %v2103_v45 = vmul.f32 %v2088_v42, %v2088_v42  ;;  %v2090_v46 = vadd.f32 %v2089_v16, %v2008_v13 }
 0xb56   : > { %v2091_v49 = vpop.f32.mrf.mxu1 }
 0xb57   : > { %v2114_v24 = vmul.f32 0.044715, %v2108_v44  ;;  %v2109_v50 = vmul.f32 %v2103_v45, %v2088_v42  ;;  %v2104_v51 = vmul.f32 %v2090_v46, %v2090_v46  ;;  %v2092_v28 = vadd.f32 %v2091_v49, %v2012_v26 }
 0xb58   : > { %v2095_v52 = vpop.f32.mrf.mxu1 }
 0xb59   : > { %v2120_v53 = vadd.f32 %v2114_v24, %v12892_v37  ;;  %v2115_v54 = vmul.f32 0.044715, %v2109_v50  ;;  %v2110_v55 = vmul.f32 %v2104_v51, %v2090_v46  ;;  %v2105_v56 = vmul.f32 %v2092_v28, %v2092_v28 }
 0xb5a   : > { %v2096_v57 = vadd.f32 %v2095_v52, %v2008_v13  ;;  %v2097_v58 = vpop.f32.mrf.mxu1 }
 0xb5b   : > { %v2126_v61 = vmul.f32 0.7978846, %v2120_v53  ;;  %v2121_v41 = vadd.f32 %v2115_v54, %v2088_v42  ;;  %v2116_v63 = vmul.f32 0.044715, %v2110_v55  ;;  %v2111_v3 = vmul.f32 %v2105_v56, %v2092_v28 }
 0xb5c   : > { %v2106_v4 = vmul.f32 %v2096_v57, %v2096_v57  ;;  %v2098_v5 = vadd.f32 %v2097_v58, %v2012_v26  ;;  %v2099_v6 = vpop.f32.mrf.mxu1 }
 0xb5d   : > { %v2127_v7 = vmul.f32 0.7978846, %v2121_v41  ;;  %v2122_v8 = vadd.f32 %v2116_v63, %v2090_v46  ;;  %v2117_v9 = vmul.f32 0.044715, %v2111_v3  ;;  %11789 = vtanh.f32 %v2126_v61 }
 0xb5e   : > { %v2112_v11 = vmul.f32 %v2106_v4, %v2096_v57  ;;  %v2107_v12 = vmul.f32 %v2098_v5, %v2098_v5  ;;  %v2100_v14 = vpop.f32.mrf.mxu1 }
 0xb5f   : > { %11791 = vtanh.f32 %v2127_v7  ;;  %v2128_v15 = vmul.f32 0.7978846, %v2122_v8  ;;  %v2123_v17 = vadd.f32 %v2117_v9, %v2092_v28 }
 0xb60   : > { %v2118_v18 = vmul.f32 0.044715, %v2112_v11  ;;  %v2113_v62 = vmul.f32 %v2107_v12, %v2098_v5 }
 0xb61   : > { %11793 = vtanh.f32 %v2128_v15  ;;  %v2129_v20 = vmul.f32 0.7978846, %v2123_v17 }
 0xb62   : > { %v2124_v23 = vadd.f32 %v2118_v18, %v2096_v57  ;;  %v2119_v25 = vmul.f32 0.044715, %v2113_v62 }
 0xb63   : > { %11795 = vtanh.f32 %v2129_v20 }
 0xb64   : > { %v2130_v35 = vmul.f32 0.7978846, %v2124_v23  ;;  %v2125_v43 = vadd.f32 %v2119_v25, %v2098_v5 }
 0xb66   : > { %11797 = vtanh.f32 %v2130_v35  ;;  %v2131_v10 = vmul.f32 0.7978846, %v2125_v43 }
 0xb68   : > { %11799 = vtanh.f32 %v2131_v10 }
 0xb6a   : > { %v11790_v29 = vpop.eup %11789 }
 0xb6b   : > { %v2138_v33 = vadd.f32 1.0, %v11790_v29 }
 0xb6c   : > { %v11792_v31 = vpop.eup %11791 }
 0xb6d   : > { %v2139_v30 = vadd.f32 1.0, %v11792_v31  ;;  %v2144_v39 = vmul.f32 0.5, %v2138_v33 }
 0xb6e   : > { %v11794_v32 = vpop.eup %11793 }
 0xb6f   : > { %v2140_v34 = vadd.f32 1.0, %v11794_v32  ;;  %v2145_v26 = vmul.f32 0.5, %v2139_v30  ;;  %v2150_v52 = vmul.f32 %v2144_v39, %v12892_v37  ;;  %v12323_v37 = vld [vmem:[%s16273_s11] sm:$0xff] }
 0xb70   : > { %v11796_v13 = vpop.eup %11795 }
 0xb71   : > { %v2146_v36 = vmul.f32 0.5, %v2140_v34  ;;  %v2141_v21 = vadd.f32 1.0, %v11796_v13  ;;  %v2151_v50 = vmul.f32 %v2145_v26, %v2088_v42  ;;  %v12902_v42 = vsub.s32 5, %v12564_v59  ;;  %v11618_v26 = vld [vmem:[%s16319_s5 + $0x28] sm:$0xff]  }
 0xb72   : > { %10660 = vmatprep.subr.bf16.mxu0 %v11618_v26 }
 0xb73   : > { %v11798_v16 = vpop.eup %11797  ;;  %v2147_v44 = vmul.f32 0.5, %v2141_v21  ;;  %v2152_v45 = vmul.f32 %v2146_v36, %v2090_v46  ;;  %v11619_v36 = vld [vmem:[%s16319_s5 + $0x20] sm:$0xff]   ;;  %10661 = vmatpush3.bf16.msra.mxu0 %v11618_v26  ;;  %v11620_v21 = vld [vmem:[%s16319_s5 + $0x18] sm:$0xff]   ;;  %s13253_s5 = scalar_lea.vmem %s16330_s4, %s16300_s3 }
 0xb74   : > { %v2142_v49 = vadd.f32 1.0, %v11798_v16  ;;  %10662 = vmatprep.subr.bf16.mxu0 %v11619_v36 }
 0xb75   : > { %v11800_v24 = vpop.eup %11799  ;;  %v2153_v51 = vmul.f32 %v2147_v44, %v2092_v28  ;;  %v2156_v55 = vpack.c.bf16 %v2152_v45, %v2150_v52  ;;  %v2187_v28 = vrot.slane %v12323_v37, %v12902_v42 }
 0xb76   : > { %v2143_v53 = vadd.f32 1.0, %v11800_v24  ;;  %v2148_v58 = vmul.f32 0.5, %v2142_v49 }
 0xb77   : > { %v2157_v54 = vpack.c.bf16 %v2153_v51, %v2151_v50  ;;  %10663 = vmatpush3.bf16.msra.mxu0 %v11619_v36 }
 0xb78   : > { %v2149_v56 = vmul.f32 0.5, %v2143_v53  ;;  %v2154_v63 = vmul.f32 %v2148_v58, %v2096_v57  ;;  %10664 = vmatprep.subr.bf16.mxu0 %v11620_v21  ;;  %v12941_v53 = vld [vmem:[%s16273_s11 + $0x8] sm:$0xff] }
 0xb79   : > { %9742 = vmatprep.mubr.msk.bf16.mxu1 %vm759_vm1, %v2157_v54 }
 0xb7a   : > { %2299 = vmatmul.mubr.bf16.vlgmr.msra.gmra.mxu1 %v2156_v55  ;;  %v2155_v61 = vmul.f32 %v2149_v56, %v2098_v5  ;;  %v2158_v46 = vpack.c.bf16 %v2154_v63, %v2154_v63  ;;  %v2360_v56 = vrot.slane %v12941_v53, %v12567_v60  ;;  %v2367_v63 = vrot.slane %v12941_v53, %v12577_v2 }
 0xb7b   : > { %10665 = vmatpush3.bf16.msra.mxu0 %v11620_v21 }
 0xb7c   : > { %v2159_v41 = vpack.c.bf16 %v2155_v61, %v2155_v61 }
 0xb7e   : > { %9743 = vmatprep.mubr.msk.bf16.mxu1 %vm759_vm1, %v2159_v41 }
 0xb82   : > { %2307 = vmatmul.mubr.bf16.gmra.mxu1 %v2158_v46 }
 0xc3a   : > { %v2300_v3 = vpop.f32.mrf.mxu1 }
 0xc3b   : > { %v2301_v4 = vadd.f32 %v2300_v3, %v2187_v28 }
 0xc3c   : > { %v2302_v6 = vpop.f32.mrf.mxu1 }
 0xc3d   : > { %v12909_v5 = vadd.f32 %v2301_v4, %v12788_v19 }
 0xc3e   : > { %v2303_v57 = vpop.f32.mrf.mxu1 }
 0xc3f   : > { %v2304_v7 = vadd.f32 %v2303_v57, %v2187_v28  ;;  %v2318_v8 = vsel %vm814_vm2, %v12909_v5, 0.0 }
 0xc40   : > { %v2305_v9 = vpop.f32.mrf.mxu1  ;;  %2319 = vadd.xlane.f32.xlu0 %v2318_v8 }
 0xc41   : > { %v12914_v59 = vadd.f32 %v2304_v7, %v12796_v40  ;;  %v9751_v9 = vld [vmem:[%s16320_s6 + $0x1] ss:$0 sm:$0xff] }
 0xc42   : > { %v2308_v11 = vpop.f32.mrf.mxu1 }
 0xc43   : > { %v2309_v12 = vadd.f32 %v2308_v11, %v2187_v28  ;;  %v2321_v14 = vsel %vm814_vm2, %v12914_v59, 0.0 }
 0xc44   : > { %2322 = vadd.xlane.f32.xlu1 %v2321_v14  ;;  %v2310_v15 = vpop.f32.mrf.mxu1 }
 0xc45   : > { %v12919_v19 = vadd.f32 %v2309_v12, %v12791_v22 }
 0xc46   : > { %v2311_v17 = vpop.f32.mrf.mxu1 }
 0xc47   : > { %v2324_v18 = vsel %vm814_vm2, %v12919_v19, 0.0 }
 0xc48   : > { %v2312_v62 = vpop.f32.mrf.mxu1  ;;  %2325 = vadd.xlane.f32.xlu0 %v2324_v18 }
 0xcc9   : > { %v2320_v20 = vpop.xlane.xlu0 %2319 }
 0xcca   : > { %v2327_v23 = vmul.f32 0.020833334, %v2320_v20 }
 0xccc   : > { %v2330_v40 = vsub.f32 %v12909_v5, %v2327_v23 }
 0xccd   : > { %v2323_v25 = vpop.xlane.xlu1 %2322 }
 0xcce   : > { %v2328_v35 = vmul.f32 0.020833334, %v2323_v25  ;;  %v2333_v43 = vmul.f32 %v2330_v40, %v2330_v40 }
 0xcd0   : > { %v2331_v10 = vsub.f32 %v12914_v59, %v2328_v35  ;;  %v2336_v29 = vsel %vm814_vm2, %v2333_v43, 0.0 }
 0xcd1   : > { %2337 = vadd.xlane.f32.xlu1 %v2336_v29  ;;  %v2326_v22 = vpop.xlane.xlu0 %2325 }
 0xcd2   : > { %v2329_v31 = vmul.f32 0.020833334, %v2326_v22  ;;  %v2334_v30 = vmul.f32 %v2331_v10, %v2331_v10 }
 0xcd4   : > { %v2332_v32 = vsub.f32 %v12919_v19, %v2329_v31  ;;  %v2339_v33 = vsel %vm814_vm2, %v2334_v30, 0.0 }
 0xcd5   : > { %2340 = vadd.xlane.f32.xlu0 %v2339_v33 }
 0xcd6   : > { %v2335_v34 = vmul.f32 %v2332_v32, %v2332_v32 }
 0xcd8   : > { %v2342_v13 = vsel %vm814_vm2, %v2335_v34, 0.0  ;;  %v11623_v34 = vld [vmem:[%s16321_s7 + $0x60] sm:$0xff]  }
 0xcd9   : > { %2343 = vadd.xlane.f32.xlu1 %v2342_v13 }
 0xd5a   : > { %v2338_v39 = vpop.xlane.xlu1 %2337 }
 0xd5b   : > { %v2345_v16 = vmul.f32 0.020833334, %v2338_v39 }
 0xd5d   : > { %v2348_v44 = vadd.f32 1e-06, %v2345_v16 }
 0xd5e   : > { %v2341_v45 = vpop.xlane.xlu0 %2340 }
 0xd5f   : > { %11801 = vrsqrt.f32 %v2348_v44  ;;  %v2346_v49 = vmul.f32 0.020833334, %v2341_v45 }
 0xd61   : > { %v2349_v24 = vadd.f32 1e-06, %v2346_v49 }
 0xd62   : > { %v2344_v50 = vpop.xlane.xlu1 %2343 }
 0xd63   : > { %11803 = vrsqrt.f32 %v2349_v24  ;;  %v2347_v51 = vmul.f32 0.020833334, %v2344_v50 }
 0xd65   : > { %v2350_v52 = vadd.f32 1e-06, %v2347_v51 }
 0xd67   : > { %11805 = vrsqrt.f32 %v2350_v52 }
 0xd6c   : > { %v11802_v54 = vpop.eup %11801 }
 0xd6d   : > { %v2354_v55 = vmul.f32 %v11802_v54, %v2330_v40 }
 0xd6f   : > { %v2361_v41 = vmul.f32 %v2360_v56, %v2354_v55 }
 0xd70   : > { %v11804_v58 = vpop.eup %11803 }
 0xd71   : > { %v2355_v61 = vmul.f32 %v11804_v58, %v2331_v10  ;;  %v2368_v28 = vadd.f32 %v2367_v63, %v2361_v41  ;;  %v11621_v10 = vld [vmem:[%s16321_s7 + $0x70] sm:$0xff]  }
 0xd73   : > { %v2362_v46 = vmul.f32 %v2360_v56, %v2355_v61 }
 0xd74   : > { %v11806_v37 = vpop.eup %11805 }
 0xd75   : > { %v2369_v3 = vadd.f32 %v2367_v63, %v2362_v46  ;;  %v2356_v4 = vmul.f32 %v11806_v37, %v2332_v32  ;;  %v11622_v32 = vld [vmem:[%s16321_s7 + $0x68] sm:$0xff]  }
 0xd77   : > { %v12947_v6 = vpack.c.bf16 %v2369_v3, %v2368_v28  ;;  %v2363_v57 = vmul.f32 %v2360_v56, %v2356_v4 }
 0xd79   : > { %10666 = vmatprep.mubr.msk.bf16.mxu0 %vm814_vm2, %v12947_v6  ;;  %v2370_v7 = vadd.f32 %v2367_v63, %v2363_v57 }
 0xd7b   : > { %v12951_v8 = vpack.c.bf16 %v2370_v7, %v2370_v7 }
 0xd7d   : > { %10667 = vmatmul.mubr.msk.bf16.vlgmr.msra.gmra.mxu0 %vm814_vm2, %v12951_v8 }
 0xe3d   : > { %v10668_v11 = vpop.f32.mrf.mxu0 }
 0xe3e   : > { %v2455_v12 = vadd.f32 %v10668_v11, %v9751_v9 }
 0xe3f   : > { %v2446_v14 = vpop.f32.mrf.mxu0 }
 0xe40   : > { %v12958_v15 = vpack.c.bf16 %v2455_v12, %v2455_v12  ;;  %v2447_v62 = vadd.f32 %v9751_v9, %v2446_v14 }
 0xe41   : > { %v10669_v17 = vpop.f32.mrf.mxu0 }
 0xe42   : > { %2471 = vrot.lane.b32.xlu0 %v12958_v15, %s16297_s30 }
 0xe43   : > { %v2449_v18 = vpop.f32.mrf.mxu0 }
 0xe44   : > { %v2450_v20 = vadd.f32 %v9751_v9, %v2449_v18 }
 0xe46   : > { %v12962_v23 = vpack.c.bf16 %v2450_v20, %v2447_v62 }
 0xe48   : > { %2709 = vrot.lane.b32.xlu0 %v12962_v23, %s16295_s21  ;;  %2469 = vrot.lane.b32.xlu1 %v12962_v23, %s16297_s30  ;;  %s16333_s30 = smov 116  }
 0xe49   : > { %10674 = vmatprep.mubr.msk.bf16.mxu0 %vm969_vm3, %v12962_v23 }
 0xe4c   : > { %2715 = vrot.lane.b32.xlu1 %v12958_v15, %s16325_s25 }
 0xe50   : > { %2713 = vrot.lane.b32.xlu1 %v12962_v23, %s16325_s25 }
 0xe54   : > { %2711 = vrot.lane.b32.xlu1 %v12958_v15, %s16295_s21 }
 0xeb4   : > { %v2472_v40 = vpop.permute.xlu0 %2471 }
 0xeb5   : > { %11540 = vmatprep.subr.msk.bf16.mxu0 %vm969_vm3, %v2472_v40  ;;  %v2483_v25 = vsel %vm969_vm3, %v2472_v40, 0 }
 0xeb6   : > { %10671 = vmatpush3.bf16.xpose.msra.mxu0 %v2483_v25 }
 0xeba   : > { %v2710_v35 = vpop.permute.xlu0 %2709  ;;  %v2470_v43 = vpop.permute.xlu1 %2469 }
 0xebb   : > { %11541 = vmatprep.subr.msk.bf16.mxu0 %vm969_vm3, %v2470_v43  ;;  %10700 = vmatprep.mubr.msk.bf16.mxu1 %vm969_vm3, %v2710_v35  ;;  %v2480_v29 = vsel %vm969_vm3, %v2470_v43, 0 }
 0xebe   : > { %10673 = vmatpush3.bf16.xpose.msra.mxu0 %v2480_v29  ;;  %v2716_v22 = vpop.permute.xlu1 %2715 }
 0xebf   : > { %11543 = vmatprep.subr.msk.bf16.mxu1 %vm969_vm3, %v2716_v22  ;;  %v2727_v31 = vsel %vm969_vm3, %v2716_v22, 0  ;;  %10678 = vmatprep.subr.bf16.mxu0 %v11621_v10 }
 0xec0   : > { %10697 = vmatpush3.bf16.xpose.msra.mxu1 %v2727_v31 }
 0xec2   : > { %v2714_v30 = vpop.permute.xlu1 %2713 }
 0xec3   : > { %11544 = vmatprep.subr.msk.bf16.mxu1 %vm969_vm3, %v2714_v30  ;;  %v2724_v33 = vsel %vm969_vm3, %v2714_v30, 0 }
 0xec5   : > { %10675 = vmatmul.mubr.msk.bf16.vlgmr.msra.gmra.mxu0 %vm969_vm3, %v12958_v15 }
 0xec6   : > { %10679 = vmatpush3.bf16.msra.mxu0 %v11621_v10  ;;  %10684 = vmatprep.mubr.msk.bf16.mxu0 %vm814_vm2, %v12947_v6  ;;  %v2712_v13 = vpop.permute.xlu1 %2711  ;;  %v11624_v10 = vld [vmem:[%s16321_s7 + $0x88] sm:$0xff]  }
 0xec7   : > { %10680 = vmatprep.subr.bf16.mxu0 %v11622_v32 }
 0xec8   : > { %10699 = vmatpush3.bf16.xpose.msra.mxu1 %v2724_v33 }
 0xeca   : > { %10681 = vmatpush3.bf16.msra.mxu0 %v11622_v32 }
 0xecb   : > { %10682 = vmatprep.subr.bf16.mxu0 %v11623_v34 }
 0xece   : > { %10683 = vmatpush3.bf16.msra.mxu0 %v11623_v34 }
 0xecf   : > { %10701 = vmatmul.mubr.msk.bf16.vlgmr.msra.gmra.mxu1 %vm969_vm3, %v2712_v13 }
 0xed1   : > { %10685 = vmatmul.mubr.msk.bf16.vlgmr.msra.gmra.mxu0 %vm814_vm2, %v12951_v8 }
 0xf85   : > { %v10676_v26 = vpop.f32.mrf.mxu0 }
 0xf86   : > { %v2535_v21 = vmul.f32 0.28867513, %v10676_v26 }
 0xf87   : > { %v2519_v36 = vpop.f32.mrf.mxu0 }
 0xf88   : > { %v2533_v39 = vmul.f32 0.28867513, %v2519_v36  ;;  %v2538_v50 = vadd.f32 %v2535_v21, %v12637_v48 }
 0xf89   : > { %v10677_v16 = vpop.f32.mrf.mxu0 }
 0xf8a   : > { %v2536_v44 = vadd.f32 %v2533_v39, %v12637_v48  ;;  %v2545_v54 = vsel %vm1036_vm7, %v2538_v50, -inf }
 0xf8b   : > { %v2522_v45 = vpop.f32.mrf.mxu0 }
 0xf8c   : > { %v2534_v49 = vmul.f32 0.28867513, %v2522_v45  ;;  %v2539_v24 = vsel %vm1036_vm7, %v2536_v44, -inf }
 0xf8d   : > { %2540 = vmax.xlane.f32.xlu0 %v2539_v24 }
 0xf8e   : > { %v2537_v51 = vadd.f32 %v2534_v49, %v12637_v48 }
 0xf8f   : > { %v10702_v52 = vpop.f32.mrf.mxu1 }
 0xf90   : > { %v2542_v55 = vsel %vm1036_vm7, %v2537_v51, -inf  ;;  %v2779_v22 = vmul.f32 0.28867513, %v10702_v52 }
 0xf91   : > { %v2763_v56 = vpop.f32.mrf.mxu1  ;;  %2546 = vmax.xlane.f32.xlu0 %v2545_v54  ;;  %v10686_v58 = vpop.f32.mrf.mxu0  ;;  %2543 = vmax.xlane.f32.xlu1 %v2542_v55  ;;  %v11625_v55 = vld [vmem:[%s16321_s7 + $0x80] sm:$0xff]  }
 0xf92   : > { %v2646_v61 = vpack.c.bf16 %v10686_v58, %v10686_v58  ;;  %v2777_v29 = vmul.f32 0.28867513, %v2763_v56  ;;  %v2782_v34 = vadd.f32 %v2779_v22, %v12637_v48  ;;  %v11626_v56 = vld [vmem:[%s16321_s7 + $0x78] sm:$0xff]  }
 0xf93   : > { %v2631_v41 = vpop.f32.mrf.mxu0  ;;  %v10703_v63 = vpop.f32.mrf.mxu1 }
 0xf94   : > { %v2656_v46 = vsel %vm1152_vm8, %v2646_v61, 0  ;;  %11542 = vmatprep.subr.msk.bf16.mxu0 %vm1152_vm8, %v2646_v61  ;;  %v2780_v30 = vadd.f32 %v2777_v29, %v12637_v48  ;;  %v2789_v26 = vsel %vm1036_vm7, %v2782_v34, -inf }
 0xf95   : > { %v10687_v37 = vpop.f32.mrf.mxu0  ;;  %10689 = vmatpush3.bf16.msra.mxu0 %v2656_v46  ;;  %v2766_v31 = vpop.f32.mrf.mxu1 }
 0xf96   : > { %v2778_v32 = vmul.f32 0.28867513, %v2766_v31  ;;  %v2783_v33 = vsel %vm1036_vm7, %v2780_v30, -inf }
 0xf97   : > { %v2634_v28 = vpop.f32.mrf.mxu0 }
 0xf98   : > { %v2645_v3 = vpack.c.bf16 %v2634_v28, %v2631_v41  ;;  %v2781_v13 = vadd.f32 %v2778_v32, %v12637_v48 }
 0xf9a   : > { %10690 = vmatprep.subr.bf16.mxu0 %v2645_v3  ;;  %v2786_v36 = vsel %vm1036_vm7, %v2781_v13, -inf }
 0xf9b   : > { %10691 = vmatpush3.bf16.msra.mxu0 %v2645_v3 }
 0xf9c   : > { %10704 = vmatprep.subr.bf16.mxu0 %v11624_v10 }
0x1016   : > { %v2541_v4 = vpop.xlane.xlu0 %2540 }
0x1017   : > { %v2548_v57 = vsub.f32 %v2536_v44, %v2541_v4 }
0x1019   : > { %v2551_v7 = vmul.f32 1.442695, %v2548_v57 }
0x101a   : > { %v2547_v9 = vpop.xlane.xlu0 %2546  ;;  %v2544_v11 = vpop.xlane.xlu1 %2543 }
0x101b   : > { %11807 = vpow2.f32 %v2551_v7  ;;  %v2550_v12 = vsub.f32 %v2538_v50, %v2547_v9  ;;  %v2549_v14 = vsub.f32 %v2537_v51, %v2544_v11 }
0x101d   : > { %v2555_v17 = vmul.f32 1.442695, %v2550_v12  ;;  %v2553_v18 = vmul.f32 1.442695, %v2549_v14 }
0x101f   : > { %11809 = vpow2.f32 %v2555_v17 }
0x1020   : > { %11811 = vpow2.f32 %v2553_v18 }
0x1028   : > { %v11808_v62 = vpop.eup %11807 }
0x1029   : > { %v2557_v20 = vsel %vm1036_vm7, %v11808_v62, 0.0 }
0x102a   : > { %2558 = vadd.xlane.f32.xlu0 %v2557_v20 }
0x102c   : > { %v11810_v40 = vpop.eup %11809 }
0x102d   : > { %v11812_v25 = vpop.eup %11811  ;;  %v2563_v35 = vsel %vm1036_vm7, %v11810_v40, 0.0 }
0x102e   : > { %2564 = vadd.xlane.f32.xlu1 %v2563_v35  ;;  %v2560_v43 = vsel %vm1036_vm7, %v11812_v25, 0.0  ;;  %v13060_v35 = vrot.slane %v12941_v53, %v12735_v27 }
0x102f   : > { %2561 = vadd.xlane.f32.xlu0 %v2560_v43 }
0x103f   : > { %2957 = vrot.lane.b32.xlu1 %v12962_v23, %s16326_s26 }
0x1043   : > { %2953 = vrot.lane.b32.xlu1 %v12962_v23, %s16327_s23 }
0x1045   : > { %2959 = vrot.lane.b32.xlu0 %v12958_v15, %s16326_s26 }
0x1047   : > { %2955 = vrot.lane.b32.xlu1 %v12958_v15, %s16327_s23 }
0x1064   : > { %2784 = vmax.xlane.f32.xlu0 %v2783_v33 }
0x1068   : > { %2790 = vmax.xlane.f32.xlu0 %v2789_v26 }
0x106b   : > { %2787 = vmax.xlane.f32.xlu1 %v2786_v36 }
0x10b3   : > { %v2559_v21 = vpop.xlane.xlu0 %2558 }
0x10b4   : > { %11813 = vrcp.f32 %v2559_v21 }
0x10b7   : > { %v2565_v39 = vpop.xlane.xlu1 %2564 }
0x10b8   : > { %v2562_v16 = vpop.xlane.xlu0 %2561  ;;  %11815 = vrcp.f32 %v2565_v39 }
0x10b9   : > { %11817 = vrcp.f32 %v2562_v16 }
0x10bb   : > { %v2958_v58 = vpop.permute.xlu1 %2957 }
0x10bc   : > { %v2960_v61 = vpop.permute.xlu0 %2959  ;;  %v2968_v46 = vsel %vm969_vm3, %v2958_v58, 0 }
0x10bd   : > { %v2971_v63 = vsel %vm969_vm3, %v2960_v61, 0 }
0x10bf   : > { %v2954_v41 = vpop.permute.xlu1 %2953 }
0x10c1   : > { %v11814_v44 = vpop.eup %11813 }
0x10c2   : > { %v2569_v50 = vmul.f32 %v11814_v44, %v11808_v62 }
0x10c3   : > { %v2956_v37 = vpop.permute.xlu1 %2955 }
0x10c5   : > { %v11816_v45 = vpop.eup %11815 }
0x10c6   : > { %v11818_v49 = vpop.eup %11817  ;;  %v2571_v24 = vmul.f32 %v11816_v45, %v11810_v40 }
0x10c7   : > { %v2570_v51 = vmul.f32 %v11818_v49, %v11812_v25 }
0x10c8   : > { %v2648_v52 = vpack.c.bf16 %v2571_v24, %v2571_v24 }
0x10c9   : > { %v2647_v54 = vpack.c.bf16 %v2570_v51, %v2569_v50 }
0x10cb   : > { %10692 = vmatprep.mubr.msk.bf16.mxu0 %vm1036_vm7, %v2647_v54 }
0x10cc   : > { %10693 = vmatmul.mubr.msk.bf16.vlgmr.msra.gmra.mxu0 %vm1036_vm7, %v2648_v52  ;;  %v11627_v52 = vld [vmem:[%s16321_s7 + $0xa0] sm:$0xff]  }
0x10cd   : > { %10705 = vmatpush3.bf16.msra.mxu0 %v11624_v10  ;;  %10710 = vmatprep.mubr.msk.bf16.mxu0 %vm814_vm2, %v12947_v6 }
0x10ce   : > { %10706 = vmatprep.subr.bf16.mxu0 %v11625_v55 }
0x10d1   : > { %10707 = vmatpush3.bf16.msra.mxu0 %v11625_v55 }
0x10d2   : > { %10708 = vmatprep.subr.bf16.mxu0 %v11626_v56 }
0x10d5   : > { %10709 = vmatpush3.bf16.msra.mxu0 %v11626_v56 }
0x10d6   : > { %11546 = vmatprep.subr.msk.bf16.mxu0 %vm969_vm3, %v2960_v61 }
0x10d8   : > { %10711 = vmatmul.mubr.msk.bf16.vlgmr.msra.gmra.mxu0 %vm814_vm2, %v12951_v8 }
0x10d9   : > { %10723 = vmatpush3.bf16.xpose.msra.mxu0 %v2971_v63  ;;  %10726 = vmatprep.mubr.msk.bf16.mxu0 %vm969_vm3, %v2954_v41  ;;  %v11628_v41 = vld [vmem:[%s16321_s7 + $0x98] sm:$0xff]  }
0x10da   : > { %11547 = vmatprep.subr.msk.bf16.mxu0 %vm969_vm3, %v2958_v58 }
0x10e1   : > { %10725 = vmatpush3.bf16.xpose.msra.mxu0 %v2968_v46  ;;  %v11629_v46 = vld [vmem:[%s16321_s7 + $0x90] sm:$0xff]  }
0x10e8   : > { %10727 = vmatmul.mubr.msk.bf16.vlgmr.msra.gmra.mxu0 %vm969_vm3, %v2956_v37 }
0x10ed   : > { %v2785_v28 = vpop.xlane.xlu0 %2784 }
0x10ee   : > { %v2792_v3 = vsub.f32 %v2780_v30, %v2785_v28 }
0x10f0   : > { %v2795_v4 = vmul.f32 1.442695, %v2792_v3 }
0x10f1   : > { %v2791_v57 = vpop.xlane.xlu0 %2790 }
0x10f2   : > { %11819 = vpow2.f32 %v2795_v4  ;;  %v2794_v7 = vsub.f32 %v2782_v34, %v2791_v57 }
0x10f4   : > { %v2799_v9 = vmul.f32 1.442695, %v2794_v7  ;;  %v2788_v11 = vpop.xlane.xlu1 %2787 }
0x10f5   : > { %v2793_v12 = vsub.f32 %v2781_v13, %v2788_v11 }
0x10f6   : > { %11821 = vpow2.f32 %v2799_v9 }
0x10f7   : > { %v2797_v14 = vmul.f32 1.442695, %v2793_v12 }
0x10f9   : > { %11823 = vpow2.f32 %v2797_v14 }
0x10ff   : > { %v11820_v17 = vpop.eup %11819 }
0x1100   : > { %v2801_v18 = vsel %vm1036_vm7, %v11820_v17, 0.0 }
0x1101   : > { %2802 = vadd.xlane.f32.xlu0 %v2801_v18 }
0x1103   : > { %v11822_v62 = vpop.eup %11821 }
0x1104   : > { %v2807_v20 = vsel %vm1036_vm7, %v11822_v62, 0.0 }
0x1105   : > { %2808 = vadd.xlane.f32.xlu1 %v2807_v20 }
0x1106   : > { %v11824_v40 = vpop.eup %11823 }
0x1107   : > { %v2804_v25 = vsel %vm1036_vm7, %v11824_v40, 0.0 }
0x1108   : > { %2805 = vadd.xlane.f32.xlu0 %v2804_v25 }
0x1116   : > { %3201 = vrot.lane.b32.xlu1 %v12962_v23, %s16328_s29 }
0x111a   : > { %3197 = vrot.lane.b32.xlu1 %v12962_v23, %s16329_s24 }
0x111e   : > { %3199 = vrot.lane.b32.xlu1 %v12958_v15, %s16329_s24  ;;  %3203 = vrot.lane.b32.xlu0 %v12958_v15, %s16328_s29 }
0x118a   : > { %v2803_v10 = vpop.xlane.xlu0 %2802 }
0x118c   : > { %v10694_v43 = vpop.f32.mrf.mxu0 }
0x118d   : > { %v13063_v29 = vadd.f32 %v10694_v43, %v13060_v35 }
0x118e   : > { %v13065_v22 = vpop.f32.mrf.mxu0  ;;  %v2809_v31 = vpop.xlane.xlu1 %2808 }
0x118f   : > { %11825 = vrcp.f32 %v2809_v31 }
0x1190   : > { %11827 = vrcp.f32 %v2803_v10  ;;  %v10695_v23 = vpop.f32.mrf.mxu0 }
0x1191   : > { %v2806_v30 = vpop.xlane.xlu0 %2805 }
0x1192   : > { %11829 = vrcp.f32 %v2806_v30  ;;  %v3202_v32 = vpop.permute.xlu1 %3201  ;;  %v13067_v15 = vpop.f32.mrf.mxu0 }
0x1193   : > { %v3212_v24 = vsel %vm969_vm3, %v3202_v32, 0 }
0x1195   : > { %v3204_v33 = vpop.permute.xlu0 %3203 }
0x1196   : > { %v3198_v34 = vpop.permute.xlu1 %3197  ;;  %11549 = vmatprep.subr.msk.bf16.mxu0 %vm969_vm3, %v3204_v33  ;;  %v3215_v13 = vsel %vm969_vm3, %v3204_v33, 0 }
0x1197   : > { %10752 = vmatprep.mubr.msk.bf16.mxu0 %vm969_vm3, %v3198_v34  ;;  %10749 = vmatpush3.bf16.xpose.msra.mxu0 %v3215_v13 }
0x1198   : > { %v10712_v26 = vpop.f32.mrf.mxu0  ;;  %11550 = vmatprep.subr.msk.bf16.mxu0 %vm969_vm3, %v3202_v32 }
0x1199   : > { %v2890_v36 = vpack.c.bf16 %v10712_v26, %v10712_v26 }
0x119a   : > { %v2875_v21 = vpop.f32.mrf.mxu0  ;;  %v3200_v63 = vpop.permute.xlu1 %3199 }
0x119b   : > { %v2900_v39 = vsel %vm1152_vm8, %v2890_v36, 0  ;;  %11545 = vmatprep.subr.msk.bf16.mxu1 %vm1152_vm8, %v2890_v36 }
0x119c   : > { %v11826_v16 = vpop.eup %11825  ;;  %v10713_v44 = vpop.f32.mrf.mxu0  ;;  %10715 = vmatpush3.bf16.msra.mxu1 %v2900_v39 }
0x119d   : > { %v11828_v45 = vpop.eup %11827  ;;  %v2815_v54 = vmul.f32 %v11826_v16, %v11822_v62  ;;  %v2706_v16 = vadd.f32 %v13065_v22, %v13060_v35 }
0x119e   : > { %v2878_v49 = vpop.f32.mrf.mxu0  ;;  %v2813_v55 = vmul.f32 %v11828_v45, %v11820_v17 }
0x119f   : > { %v11830_v50 = vpop.eup %11829  ;;  %v2889_v51 = vpack.c.bf16 %v2878_v49, %v2875_v21  ;;  %10751 = vmatpush3.bf16.xpose.msra.mxu0 %v3212_v24  ;;  %v2892_v61 = vpack.c.bf16 %v2815_v54, %v2815_v54 }
0x11a0   : > { %v2814_v56 = vmul.f32 %v11830_v50, %v11824_v40 }
0x11a1   : > { %10716 = vmatprep.subr.bf16.mxu1 %v2889_v51 }
0x11a2   : > { %10717 = vmatpush3.bf16.msra.mxu1 %v2889_v51  ;;  %v2891_v58 = vpack.c.bf16 %v2814_v56, %v2813_v55 }
0x11a3   : > { %10730 = vmatprep.subr.bf16.mxu1 %v11627_v52 }
0x11a4   : > { %10718 = vmatprep.mubr.msk.bf16.mxu1 %vm1036_vm7, %v2891_v58 }
0x11a5   : > { %10719 = vmatmul.mubr.msk.bf16.vlgmr.msra.gmra.mxu1 %vm1036_vm7, %v2892_v61 }
0x11a6   : > { %10731 = vmatpush3.bf16.msra.mxu1 %v11627_v52  ;;  %10736 = vmatprep.mubr.msk.bf16.mxu1 %vm814_vm2, %v12947_v6 }
0x11a7   : > { %10753 = vmatmul.mubr.msk.bf16.vlgmr.msra.gmra.mxu0 %vm969_vm3, %v3200_v63  ;;  %10732 = vmatprep.subr.bf16.mxu1 %v11628_v41 }
0x11a8   : > { %v10728_v37 = vpop.f32.mrf.mxu0 }
0x11a9   : > { %v3023_v3 = vmul.f32 0.28867513, %v10728_v37 }
0x11aa   : > { %v3007_v28 = vpop.f32.mrf.mxu0  ;;  %10733 = vmatpush3.bf16.msra.mxu1 %v11628_v41 }
0x11ab   : > { %v3021_v4 = vmul.f32 0.28867513, %v3007_v28  ;;  %10734 = vmatprep.subr.bf16.mxu1 %v11629_v46  ;;  %v3026_v14 = vadd.f32 %v3023_v3, %v12637_v48 }
0x11ac   : > { %v10729_v57 = vpop.f32.mrf.mxu0 }
0x11ad   : > { %v3024_v7 = vadd.f32 %v3021_v4, %v12637_v48  ;;  %v3033_v62 = vsel %vm1036_vm7, %v3026_v14, -inf }
0x11ae   : > { %v3010_v9 = vpop.f32.mrf.mxu0  ;;  %10735 = vmatpush3.bf16.msra.mxu1 %v11629_v46 }
0x11af   : > { %v3022_v11 = vmul.f32 0.28867513, %v3010_v9  ;;  %v3027_v12 = vsel %vm1036_vm7, %v3024_v7, -inf }
0x11b0   : > { %3028 = vmax.xlane.f32.xlu0 %v3027_v12  ;;  %v11630_v12 = vld [vmem:[%s16321_s7 + $0xb8] sm:$0xff]  }
0x11b1   : > { %10737 = vmatmul.mubr.msk.bf16.vlgmr.msra.gmra.mxu1 %vm814_vm2, %v12951_v8  ;;  %v3025_v17 = vadd.f32 %v3022_v11, %v12637_v48 }
0x11b3   : > { %v3030_v18 = vsel %vm1036_vm7, %v3025_v17, -inf }
0x11b4   : > { %3031 = vmax.xlane.f32.xlu1 %v3030_v18  ;;  %3034 = vmax.xlane.f32.xlu0 %v3033_v62 }
0x1239   : > { %v3029_v20 = vpop.xlane.xlu0 %3028 }
0x123a   : > { %v3036_v40 = vsub.f32 %v3024_v7, %v3029_v20 }
0x123c   : > { %v3039_v25 = vmul.f32 1.442695, %v3036_v40 }
0x123d   : > { %v3035_v43 = vpop.xlane.xlu0 %3034  ;;  %v3032_v10 = vpop.xlane.xlu1 %3031 }
0x123e   : > { %11831 = vpow2.f32 %v3039_v25  ;;  %v3038_v31 = vsub.f32 %v3026_v14, %v3035_v43  ;;  %v3037_v23 = vsub.f32 %v3025_v17, %v3032_v10 }
0x1240   : > { %v3043_v30 = vmul.f32 1.442695, %v3038_v31  ;;  %v3041_v32 = vmul.f32 1.442695, %v3037_v23 }
0x1242   : > { %11833 = vpow2.f32 %v3043_v30  ;;  %v11631_v30 = vld [vmem:[%s16321_s7 + $0xb0] sm:$0xff]  }
0x1243   : > { %11835 = vpow2.f32 %v3041_v32  ;;  %v11632_v32 = vld [vmem:[%s16321_s7 + $0xa8] sm:$0xff]  }
0x124b   : > { %v11832_v33 = vpop.eup %11831 }
0x124c   : > { %v3045_v34 = vsel %vm1036_vm7, %v11832_v33, 0.0 }
0x124d   : > { %3046 = vadd.xlane.f32.xlu0 %v3045_v34 }
0x124f   : > { %v11834_v13 = vpop.eup %11833 }
0x1250   : > { %v11836_v26 = vpop.eup %11835  ;;  %v3051_v36 = vsel %vm1036_vm7, %v11834_v13, 0.0 }
0x1251   : > { %3052 = vadd.xlane.f32.xlu1 %v3051_v36  ;;  %v3048_v21 = vsel %vm1036_vm7, %v11836_v26, 0.0 }
0x1252   : > { %3049 = vadd.xlane.f32.xlu0 %v3048_v21 }
0x1265   : > { %v10720_v39 = vpop.f32.mrf.mxu1 }
0x1266   : > { %v13104_v44 = vadd.f32 %v10720_v39, %v13063_v29 }
0x1267   : > { %v10754_v45 = vpop.f32.mrf.mxu0  ;;  %v2936_v49 = vpop.f32.mrf.mxu1 }
0x1268   : > { %v13106_v24 = vadd.f32 %v2936_v49, %v2706_v16  ;;  %v3267_v52 = vmul.f32 0.28867513, %v10754_v45 }
0x1269   : > { %v3251_v50 = vpop.f32.mrf.mxu0  ;;  %v10721_v51 = vpop.f32.mrf.mxu1 }
0x126a   : > { %v3265_v54 = vmul.f32 0.28867513, %v3251_v50  ;;  %v3270_v22 = vadd.f32 %v3267_v52, %v12637_v48 }
0x126b   : > { %v10755_v55 = vpop.f32.mrf.mxu0  ;;  %v13111_v63 = vpop.f32.mrf.mxu1 }
0x126c   : > { %v3268_v56 = vadd.f32 %v3265_v54, %v12637_v48  ;;  %v3277_v3 = vsel %vm1036_vm7, %v3270_v22, -inf }
0x126d   : > { %v3254_v58 = vpop.f32.mrf.mxu0 }
0x126e   : > { %v3266_v61 = vmul.f32 0.28867513, %v3254_v58  ;;  %v3271_v41 = vsel %vm1036_vm7, %v3268_v56, -inf }
0x126f   : > { %3272 = vmax.xlane.f32.xlu0 %v3271_v41 }
0x1270   : > { %v3269_v29 = vadd.f32 %v3266_v61, %v12637_v48 }
0x1271   : > { %v10738_v46 = vpop.f32.mrf.mxu1 }
0x1272   : > { %v3134_v37 = vpack.c.bf16 %v10738_v46, %v10738_v46  ;;  %v3274_v28 = vsel %vm1036_vm7, %v3269_v29, -inf }
0x1273   : > { %v3119_v4 = vpop.f32.mrf.mxu1  ;;  %3275 = vmax.xlane.f32.xlu1 %v3274_v28  ;;  %3278 = vmax.xlane.f32.xlu0 %v3277_v3 }
0x1274   : > { %v3144_v57 = vsel %vm1152_vm8, %v3134_v37, 0  ;;  %11548 = vmatprep.subr.msk.bf16.mxu1 %vm1152_vm8, %v3134_v37 }
0x1275   : > { %v10739_v7 = vpop.f32.mrf.mxu1  ;;  %10741 = vmatpush3.bf16.msra.mxu1 %v3144_v57 }
0x1277   : > { %v3122_v9 = vpop.f32.mrf.mxu1 }
0x1278   : > { %v3133_v11 = vpack.c.bf16 %v3122_v9, %v3119_v4 }
0x127a   : > { %10742 = vmatprep.subr.bf16.mxu1 %v3133_v11 }
0x127b   : > { %10743 = vmatpush3.bf16.msra.mxu1 %v3133_v11 }
0x127c   : > { %10756 = vmatprep.subr.bf16.mxu1 %v11630_v12 }
0x12d6   : > { %v3047_v14 = vpop.xlane.xlu0 %3046 }
0x12d7   : > { %11837 = vrcp.f32 %v3047_v14 }
0x12da   : > { %v3053_v17 = vpop.xlane.xlu1 %3052 }
0x12db   : > { %v3050_v18 = vpop.xlane.xlu0 %3049  ;;  %11839 = vrcp.f32 %v3053_v17 }
0x12dc   : > { %11841 = vrcp.f32 %v3050_v18 }
0x12e4   : > { %v11838_v62 = vpop.eup %11837 }
0x12e5   : > { %v3057_v43 = vmul.f32 %v11838_v62, %v11832_v33 }
0x12e8   : > { %v11840_v20 = vpop.eup %11839 }
0x12e9   : > { %v11842_v40 = vpop.eup %11841  ;;  %v3059_v25 = vmul.f32 %v11840_v20, %v11834_v13 }
0x12ea   : > { %v3058_v10 = vmul.f32 %v11842_v40, %v11836_v26  ;;  %v2707_v40 = vadd.f32 %v13067_v15, %v13060_v35 }
0x12eb   : > { %v3136_v31 = vpack.c.bf16 %v3059_v25, %v3059_v25 }
0x12ec   : > { %v3135_v23 = vpack.c.bf16 %v3058_v10, %v3057_v43  ;;  %v2951_v10 = vadd.f32 %v13111_v63, %v2707_v40  ;;  %v11643_v40 = vld [vmem:[%s16323_s10 + $0x90] sm:$0xff]  }
0x12ee   : > { %10744 = vmatprep.mubr.msk.bf16.mxu1 %vm1036_vm7, %v3135_v23 }
0x12ef   : > { %10745 = vmatmul.mubr.msk.bf16.vlgmr.msra.gmra.mxu1 %vm1036_vm7, %v3136_v31 }
0x12f0   : > { %10757 = vmatpush3.bf16.msra.mxu1 %v11630_v12  ;;  %10762 = vmatprep.mubr.msk.bf16.mxu1 %vm814_vm2, %v12947_v6 }
0x12f1   : > { %10758 = vmatprep.subr.bf16.mxu1 %v11631_v30 }
0x12f4   : > { %10759 = vmatpush3.bf16.msra.mxu1 %v11631_v30 }
0x12f5   : > { %10760 = vmatprep.subr.bf16.mxu1 %v11632_v32 }
0x12f8   : > { %10761 = vmatpush3.bf16.msra.mxu1 %v11632_v32  ;;  %v3273_v33 = vpop.xlane.xlu0 %3272 }
0x12f9   : > { %v3280_v34 = vsub.f32 %v3268_v56, %v3273_v33 }
0x12fb   : > { %v3283_v13 = vmul.f32 1.442695, %v3280_v34  ;;  %10763 = vmatmul.mubr.msk.bf16.vlgmr.msra.gmra.mxu1 %vm814_vm2, %v12951_v8 }
0x12fc   : > { %v3279_v26 = vpop.xlane.xlu0 %3278  ;;  %v3276_v36 = vpop.xlane.xlu1 %3275  ;;  %3587 = vmatprep.mubr.bf16.mxu1 %v16301_v1 }
0x12fd   : > { %11843 = vpow2.f32 %v3283_v13  ;;  %v3282_v6 = vsub.f32 %v3270_v22, %v3279_v26  ;;  %v3281_v21 = vsub.f32 %v3269_v29, %v3276_v36 }
0x12ff   : > { %v3287_v39 = vmul.f32 1.442695, %v3282_v6  ;;  %v3285_v16 = vmul.f32 1.442695, %v3281_v21 }
0x1301   : > { %11845 = vpow2.f32 %v3287_v39 }
0x1302   : > { %11847 = vpow2.f32 %v3285_v16 }
0x130a   : > { %v11844_v45 = vpop.eup %11843 }
0x130b   : > { %v3289_v49 = vsel %vm1036_vm7, %v11844_v45, 0.0 }
0x130c   : > { %3290 = vadd.xlane.f32.xlu1 %v3289_v49 }
0x130e   : > { %v11846_v50 = vpop.eup %11845 }
0x130f   : > { %v11848_v51 = vpop.eup %11847  ;;  %v3295_v52 = vsel %vm1036_vm7, %v11846_v50, 0.0 }
0x1310   : > { %3296 = vadd.xlane.f32.xlu1 %v3295_v52  ;;  %v3292_v8 = vsel %vm1036_vm7, %v11848_v51, 0.0  ;;  %v11633_v52 = vld [vmem:[%s16322_s8 + $0x50] ss:$8 sps:$4 sm:$0xff]  }
0x1311   : > { %3293 = vadd.xlane.f32.xlu0 %v3292_v8  ;;  %v11636_v8 = vld [vmem:[%s16322_s8 + $0x40] ss:$8 sps:$4 sm:$0xff]  }
0x1395   : > { %v3291_v54 = vpop.xlane.xlu1 %3290 }
0x1396   : > { %11849 = vrcp.f32 %v3291_v54  ;;  %v11641_v54 = vld [vmem:[%s16322_s8 + $0x34] ss:$8 sps:$4 sm:$0xff]  }
0x1399   : > { %v3297_v29 = vpop.xlane.xlu1 %3296 }
0x139a   : > { %v3294_v55 = vpop.xlane.xlu0 %3293 }
0x139b   : > { %11851 = vrcp.f32 %v3294_v55  ;;  %v11639_v55 = vld [vmem:[%s16322_s8 + $0x30] ss:$8 sps:$4 sm:$0xff]  }
0x139c   : > { %11853 = vrcp.f32 %v3297_v29 }
0x13a3   : > { %v11850_v56 = vpop.eup %11849 }
0x13a4   : > { %v3301_v61 = vmul.f32 %v11850_v56, %v11844_v45 }
0x13a8   : > { %v11852_v58 = vpop.eup %11851 }
0x13a9   : > { %v3302_v41 = vmul.f32 %v11852_v58, %v11848_v51  ;;  %v11854_v14 = vpop.eup %11853  ;;  %v11635_v51 = vld [vmem:[%s16322_s8 + $0x54] ss:$8 sps:$4 sm:$0xff]  }
0x13aa   : > { %v3303_v20 = vmul.f32 %v11854_v14, %v11846_v50  ;;  %3565 = vmatprep.subr.bf16.mxu1 %v11635_v51 }
0x13ab   : > { %v3379_v22 = vpack.c.bf16 %v3302_v41, %v3301_v61  ;;  %3566 = vmatpush1.bf16.msra.mxu1 %v11633_v52 }
0x13ad   : > { %10770 = vmatprep.mubr.msk.bf16.mxu0 %vm1036_vm7, %v3379_v22 }
0x13af   : > { %v10746_v46 = vpop.f32.mrf.mxu1 }
0x13b0   : > { %v3196_v37 = vadd.f32 %v10746_v46, %v13104_v44  ;;  %v3380_v44 = vpack.c.bf16 %v3303_v20, %v3303_v20 }
0x13b1   : > { %v3180_v28 = vpop.f32.mrf.mxu1 }
0x13b2   : > { %v3194_v3 = vadd.f32 %v3180_v28, %v13106_v24 }
0x13b3   : > { %v10747_v4 = vpop.f32.mrf.mxu1 }
0x13b5   : > { %v3183_v57 = vpop.f32.mrf.mxu1 }
0x13b6   : > { %v3195_v30 = vadd.f32 %v3183_v57, %v2951_v10  ;;  %v11647_v10 = vld [vmem:[%s16323_s10 + $0x70] sm:$0xff]  }
0x13bb   : > { %v10764_v7 = vpop.f32.mrf.mxu1 }
0x13bc   : > { %v3378_v9 = vpack.c.bf16 %v10764_v7, %v10764_v7 }
0x13bd   : > { %v3363_v11 = vpop.f32.mrf.mxu1 }
0x13be   : > { %v3388_v12 = vsel %vm1152_vm8, %v3378_v9, 0  ;;  %11551 = vmatprep.subr.msk.bf16.mxu0 %vm1152_vm8, %v3378_v9  ;;  %v3486_v9 = vrot.slane %v12941_v53, %v12828_v38 }
0x13bf   : > { %v10765_v17 = vpop.f32.mrf.mxu1  ;;  %10767 = vmatpush3.bf16.msra.mxu0 %v3388_v12 }
0x13c0   : > { %v3493_v17 = vrot.slane %v12941_v53, %v12833_v0  ;;  %v11644_v53 = vld [vmem:[%s16323_s10 + $0x88] sm:$0xff]  }
0x13c1   : > { %v3366_v18 = vpop.f32.mrf.mxu1 }
0x13c2   : > { %v3377_v62 = vpack.c.bf16 %v3366_v18, %v3363_v11 }
0x13c4   : > { %10768 = vmatprep.subr.bf16.mxu0 %v3377_v62 }
0x13c5   : > { %10769 = vmatpush3.bf16.msra.mxu0 %v3377_v62 }
0x13c6   : > { %3771 = vmatprep.subr.bf16.mxu0 %v16301_v1 }
0x13c8   : > { %10771 = vmatmul.mubr.msk.bf16.vlgmr.msra.gmra.mxu0 %vm1036_vm7, %v3380_v44 }
0x1488   : > { %v10772_v24 = vpop.f32.mrf.mxu0 }
0x1489   : > { %v3440_v25 = vadd.f32 %v10772_v24, %v3196_v37  ;;  %v11642_v24 = vld [vmem:[%s16323_s10 + $0x98] sm:$0xff]  }
0x148a   : > { %v3424_v43 = vpop.f32.mrf.mxu0  ;;  %3772 = vmatpush1.bf16.msra.mxu0 %v11642_v24 }
0x148b   : > { %v3438_v31 = vadd.f32 %v3424_v43, %v3194_v3  ;;  %3773 = vmatprep.subr.bf16.mxu0 %v16301_v1  ;;  %v11646_v43 = vld [vmem:[%s16323_s10 + $0x78] sm:$0xff]  }
0x148c   : > { %v10773_v23 = vpop.f32.mrf.mxu0 }
0x148d   : > { %v13148_v32 = vadd.f32 %v3438_v31, %v12909_v5  ;;  %v3443_v5 = vadd.f32 %v3440_v25, %v12919_v19  ;;  %v11638_v19 = vld [vmem:[%s16322_s8 + $0x44] ss:$8 sps:$4 sm:$0xff]  }
0x148e   : > { %v3427_v33 = vpop.f32.mrf.mxu0  ;;  %3567 = vmatprep.subr.bf16.mxu1 %v11638_v19  ;;  %3774 = vmatpush1.bf16.msra.mxu0 %v11643_v40  ;;  %v11645_v25 = vld [vmem:[%s16323_s10 + $0x80] sm:$0xff]   ;;  %v11648_v31 = vld [vmem:[%s16323_s10 + $0x68] sm:$0xff]  }
0x148f   : > { %v3439_v34 = vadd.f32 %v3427_v33, %v3195_v30  ;;  %v3444_v13 = vsel %vm814_vm2, %v13148_v32, 0.0  ;;  %v3450_v50 = vsel %vm814_vm2, %v3443_v5, 0.0  ;;  %3568 = vmatpush1.bf16.msra.mxu1 %v11636_v8  ;;  %3775 = vmatprep.subr.bf16.mxu0 %v16301_v1  ;;  %v11649_v23 = vld [vmem:[%s16323_s10 + $0x60] sm:$0xff]   ;;  %v11650_v30 = vld [vmem:[%s16323_s10 + $0xb8] sm:$0xff]   ;;  %v11651_v33 = vld [vmem:[%s16323_s10 + $0xb0] sm:$0xff]  }
0x1490   : > { %3445 = vadd.xlane.f32.xlu0 %v3444_v13  ;;  %3569 = vmatprep.subr.bf16.mxu1 %v11641_v54  ;;  %v11653_v13 = vld [vmem:[%s16323_s10 + $0xa0] sm:$0xff]  }
0x1491   : > { %v3442_v26 = vadd.f32 %v3439_v34, %v12914_v59  ;;  %v11652_v34 = vld [vmem:[%s16323_s10 + $0xa8] sm:$0xff]  }
0x1492   : > { %3776 = vmatpush1.bf16.msra.mxu0 %v11644_v53 }
0x1493   : > { %v3447_v35 = vsel %vm814_vm2, %v3442_v26, 0.0  ;;  %3570 = vmatpush1.bf16.msra.mxu1 %v11639_v55  ;;  %3777 = vmatprep.subr.bf16.mxu0 %v16301_v1 }
0x1494   : > { %3448 = vadd.xlane.f32.xlu1 %v3447_v35 }
0x1496   : > { %3778 = vmatpush1.bf16.msra.mxu0 %v11645_v25 }
0x1497   : > { %3779 = vmatprep.subr.bf16.mxu0 %v16301_v1 }
0x149a   : > { %3780 = vmatpush1.bf16.msra.mxu0 %v11646_v43 }
0x149b   : > { %3781 = vmatprep.subr.bf16.mxu0 %v16301_v1 }
0x149e   : > { %3782 = vmatpush1.bf16.msra.mxu0 %v11647_v10 }
0x149f   : > { %3783 = vmatprep.subr.bf16.mxu0 %v16301_v1 }
0x14a2   : > { %3784 = vmatpush1.bf16.msra.mxu0 %v11648_v31 }
0x14a3   : > { %3785 = vmatprep.subr.bf16.mxu0 %v16301_v1 }
0x14a6   : > { %3786 = vmatpush1.bf16.msra.mxu0 %v11649_v23 }
0x14a7   : > { %3795 = vmatprep.subr.bf16.mxu0 %v16301_v1 }
0x14aa   : > { %3796 = vmatpush2.bf16.msra.mxu0 %v11650_v30 }
0x14ab   : > { %3797 = vmatprep.subr.bf16.mxu0 %v16301_v1 }
0x14ae   : > { %3798 = vmatpush2.bf16.msra.mxu0 %v11651_v33 }
0x14af   : > { %3799 = vmatprep.subr.bf16.mxu0 %v16301_v1 }
0x14b2   : > { %3800 = vmatpush2.bf16.msra.mxu0 %v11652_v34 }
0x14b3   : > { %3801 = vmatprep.subr.bf16.mxu0 %v16301_v1 }
0x14b6   : > { %3802 = vmatpush2.bf16.msra.mxu0 %v11653_v13 }
0x14b7   : > { %10844 = vmatprep.subr.bf16.mxu0 %v16303_v47 }
0x1519   : > { %v3446_v15 = vpop.xlane.xlu0 %3445 }
0x151a   : > { %v3453_v36 = vmul.f32 0.020833334, %v3446_v15 }
0x151c   : > { %v3456_v63 = vsub.f32 %v13148_v32, %v3453_v36 }
0x151d   : > { %v3449_v6 = vpop.xlane.xlu1 %3448 }
0x151e   : > { %v3454_v21 = vmul.f32 0.020833334, %v3449_v6  ;;  %v3459_v39 = vmul.f32 %v3456_v63, %v3456_v63 }
0x1520   : > { %v3457_v16 = vsub.f32 %v3442_v26, %v3454_v21  ;;  %v3462_v45 = vsel %vm814_vm2, %v3459_v39, 0.0 }
0x1521   : > { %3463 = vadd.xlane.f32.xlu0 %v3462_v45 }
0x1522   : > { %v3460_v49 = vmul.f32 %v3457_v16, %v3457_v16 }
0x1524   : > { %v3465_v59 = vsel %vm814_vm2, %v3460_v49, 0.0 }
0x1525   : > { %3451 = vadd.xlane.f32.xlu0 %v3450_v50  ;;  %3466 = vadd.xlane.f32.xlu1 %v3465_v59 }
0x15aa   : > { %v3464_v56 = vpop.xlane.xlu0 %3463 }
0x15ab   : > { %v3471_v58 = vmul.f32 0.020833334, %v3464_v56 }
0x15ad   : > { %v3474_v61 = vadd.f32 1e-06, %v3471_v58 }
0x15ae   : > { %v3452_v41 = vpop.xlane.xlu0 %3451  ;;  %v3467_v22 = vpop.xlane.xlu1 %3466 }
0x15af   : > { %11855 = vrsqrt.f32 %v3474_v61  ;;  %v3455_v29 = vmul.f32 0.020833334, %v3452_v41  ;;  %v3472_v46 = vmul.f32 0.020833334, %v3467_v22 }
0x15b1   : > { %v3458_v37 = vsub.f32 %v3443_v5, %v3455_v29  ;;  %v3475_v28 = vadd.f32 1e-06, %v3472_v46  ;;  %v9823_v5 = vld [vmem:[%s16324_s9 + $0x2] sm:$0x3]  ;;  %s16336_s9 = sshll.u32 %s16338_s22, 6 }
0x15b2   : > { %v13240_v45 = vrot.slane %v9823_v5, %v12577_v2  ;;  %s16212_s10 = scalar_lea.vmem %s16282_s20, %s16336_s9 }
0x15b3   : > { %11857 = vrsqrt.f32 %v3475_v28  ;;  %v3461_v3 = vmul.f32 %v3458_v37, %v3458_v37 }
0x15b5   : > { %v3468_v4 = vsel %vm814_vm2, %v3461_v3, 0.0 }
0x15b6   : > { %3469 = vadd.xlane.f32.xlu1 %v3468_v4 }
0x15bc   : > { %v11856_v57 = vpop.eup %11855 }
0x15bd   : > { %v3480_v7 = vmul.f32 %v11856_v57, %v3456_v63 }
0x15bf   : > { %v3487_v14 = vmul.f32 %v3486_v9, %v3480_v7 }
0x15c0   : > { %v11858_v11 = vpop.eup %11857 }
0x15c1   : > { %v3481_v12 = vmul.f32 %v11858_v11, %v3457_v16  ;;  %v3494_v62 = vadd.f32 %v3493_v17, %v3487_v14  ;;  %v13237_v16 = vrot.slane %v9823_v5, %v12567_v60  ;;  %v11656_v5 = vld [vmem:[%s16274_s12] sm:$0xff]  }
0x15c3   : > { %v3488_v18 = vmul.f32 %v3486_v9, %v3481_v12 }
0x15c5   : > { %v3495_v20 = vadd.f32 %v3493_v17, %v3488_v18 }
0x15c7   : > { %v3497_v44 = vpack.c.bf16 %v3495_v20, %v3494_v62 }
0x15c9   : > { %9830 = vmatmul.mubr.msk.bf16.vlgmr.msra.gmra.mxu1 %vm814_vm2, %v3497_v44 }
0x15ca   : > { %3597 = vmatprep.mubr.bf16.mxu1 %v16301_v1 }
0x163f   : > { %v3470_v26 = vpop.xlane.xlu1 %3469 }
0x1640   : > { %v3473_v35 = vmul.f32 0.020833334, %v3470_v26 }
0x1642   : > { %v3476_v15 = vadd.f32 1e-06, %v3473_v35 }
0x1644   : > { %11859 = vrsqrt.f32 %v3476_v15 }
0x1651   : > { %v11860_v36 = vpop.eup %11859 }
0x1652   : > { %v3482_v63 = vmul.f32 %v11860_v36, %v3458_v37  ;;  %v11654_v36 = vld [vmem:[%s16274_s12 + $0x10] sm:$0xff]  }
0x1653   : > { %10774 = vmatprep.subr.bf16.mxu1 %v11654_v36 }
0x1654   : > { %v3489_v6 = vmul.f32 %v3486_v9, %v3482_v63  ;;  %v11655_v63 = vld [vmem:[%s16274_s12 + $0x8] sm:$0xff]   ;;  %10775 = vmatpush3.bf16.msra.mxu1 %v11654_v36  ;;  %v13289_v36 = vld [vmem:[%s16281_s19 + $0x12] ss:$0 sm:$0xff] }
0x1655   : > { %10776 = vmatprep.subr.bf16.mxu1 %v11655_v63 }
0x1656   : > { %v3496_v21 = vadd.f32 %v3493_v17, %v3489_v6  ;;  %v3843_v6 = vld [vmem:[%s13253_s5] sm:$0xff] }
0x1658   : > { %v3498_v39 = vpack.c.bf16 %v3496_v21, %v3496_v21  ;;  %v3844_v21 = vld [vmem:[%s13253_s5 + $0x8] sm:$0xff]  ;;  %10777 = vmatpush3.bf16.msra.mxu1 %v11655_v63 }
0x1659   : > { %10778 = vmatprep.subr.bf16.mxu1 %v11656_v5 }
0x165a   : > { %9831 = vmatmul.mubr.msk.bf16.gmra.mxu1 %vm814_vm2, %v3498_v39  ;;  %v3851_v39 = vpack.c.bf16 %v3844_v21, %v3843_v6 }
0x165c   : > { %10780 = vmatprep.mubr.msk.bf16.mxu1 %vm814_vm2, %v3851_v39  ;;  %10779 = vmatpush3.bf16.msra.mxu1 %v11656_v5 }
0x165d   : > { %10788 = vmatprep.subr.bf16.mxu1 %v16303_v47 }
0x1689   : > { %v3589_v49 = vpop.f32.mrf.mxu1 }
0x168a   : > { %v3590_v50 = vadd.f32 %v3589_v49, %v13237_v16  ;;  %v3845_v49 = vld [vmem:[%s13253_s5 + $0x10] sm:$0xff] }
0x168b   : > { %v3591_v59 = vpop.f32.mrf.mxu1 }
0x168c   : > { %v3606_v51 = vmul.f32 %v3590_v50, %v3590_v50  ;;  %v3592_v52 = vadd.f32 %v3591_v59, %v13240_v45  ;;  %v3847_v59 = vld [vmem:[%s13253_s5 + $0x20] sm:$0xff] }
0x168d   : > { %v3593_v19 = vpop.f32.mrf.mxu1 }
0x168e   : > { %v3612_v8 = vmul.f32 %v3606_v51, %v3590_v50  ;;  %v3607_v54 = vmul.f32 %v3592_v52, %v3592_v52  ;;  %v3594_v55 = vadd.f32 %v3593_v19, %v13237_v16  ;;  %v3848_v51 = vld [vmem:[%s13253_s5 + $0x28] sm:$0xff] }
0x168f   : > { %v3595_v56 = vpop.f32.mrf.mxu1  ;;  %v3853_v19 = vpack.c.bf16 %v3848_v51, %v3847_v59 }
0x1690   : > { %v3618_v58 = vmul.f32 0.044715, %v3612_v8  ;;  %v3613_v61 = vmul.f32 %v3607_v54, %v3592_v52  ;;  %v3608_v41 = vmul.f32 %v3594_v55, %v3594_v55  ;;  %v3596_v22 = vadd.f32 %v3595_v56, %v13240_v45  ;;  %v3849_v8 = vld [vmem:[%s13253_s5 + $0x30] sm:$0xff]  ;;  %v3850_v54 = vld [vmem:[%s13253_s5 + $0x38] sm:$0xff] }
0x1692   : > { %v3624_v29 = vadd.f32 %v3618_v58, %v3590_v50  ;;  %v3619_v46 = vmul.f32 0.044715, %v3613_v61  ;;  %v3614_v37 = vmul.f32 %v3608_v41, %v3594_v55  ;;  %v3609_v28 = vmul.f32 %v3596_v22, %v3596_v22 }
0x1694   : > { %v3630_v3 = vmul.f32 0.7978846, %v3624_v29  ;;  %v3625_v4 = vadd.f32 %v3619_v46, %v3592_v52  ;;  %v3620_v57 = vmul.f32 0.044715, %v3614_v37  ;;  %v3615_v7 = vmul.f32 %v3609_v28, %v3596_v22 }
0x1696   : > { %v3631_v9 = vmul.f32 0.7978846, %v3625_v4  ;;  %v3626_v11 = vadd.f32 %v3620_v57, %v3594_v55  ;;  %v3621_v12 = vmul.f32 0.044715, %v3615_v7  ;;  %11861 = vtanh.f32 %v3630_v3 }
0x1698   : > { %11863 = vtanh.f32 %v3631_v9  ;;  %v3632_v14 = vmul.f32 0.7978846, %v3626_v11  ;;  %v3627_v17 = vadd.f32 %v3621_v12, %v3596_v22 }
0x169a   : > { %11865 = vtanh.f32 %v3632_v14  ;;  %v3633_v18 = vmul.f32 0.7978846, %v3627_v17 }
0x169c   : > { %11867 = vtanh.f32 %v3633_v18 }
0x16a3   : > { %v11862_v62 = vpop.eup %11861 }
0x16a4   : > { %v3642_v40 = vadd.f32 1.0, %v11862_v62 }
0x16a5   : > { %v11864_v20 = vpop.eup %11863 }
0x16a6   : > { %v3643_v44 = vadd.f32 1.0, %v11864_v20  ;;  %v3648_v23 = vmul.f32 0.5, %v3642_v40 }
0x16a7   : > { %v11866_v24 = vpop.eup %11865 }
0x16a8   : > { %v3644_v53 = vadd.f32 1.0, %v11866_v24  ;;  %v3649_v43 = vmul.f32 0.5, %v3643_v44  ;;  %v3654_v26 = vmul.f32 %v3648_v23, %v3590_v50  ;;  %v3846_v50 = vld [vmem:[%s13253_s5 + $0x18] sm:$0xff] }
0x16a9   : > { %v11868_v25 = vpop.eup %11867 }
0x16aa   : > { %v3650_v10 = vmul.f32 0.5, %v3644_v53  ;;  %v3645_v31 = vadd.f32 1.0, %v11868_v25  ;;  %v3655_v34 = vmul.f32 %v3649_v43, %v3592_v52  ;;  %v3852_v52 = vpack.c.bf16 %v3846_v50, %v3845_v49  ;;  %v12324_v53 = vld [vmem:[%s16273_s11 + $0x8] sm:$0xff] }
0x16ab   : > { %v3692_v25 = vrot.slane %v12324_v53, %v12902_v42  ;;  %v3962_v49 = vld [vmem:[%s16331_s27 + $0x8] sm:$0xff] }
0x16ac   : > { %v3651_v30 = vmul.f32 0.5, %v3645_v31  ;;  %v3656_v33 = vmul.f32 %v3650_v10, %v3594_v55  ;;  %10781 = vmatmul.mubr.msk.bf16.vlgmr.msra.gmra.mxu1 %vm814_vm2, %v3852_v52  ;;  %v3854_v55 = vpack.c.bf16 %v3850_v54, %v3849_v8  ;;  %v3964_v54 = vld [vmem:[%s16331_s27 + $0x18] sm:$0xff] }
0x16ad   : > { %10784 = vmatprep.mubr.msk.bf16.mxu1 %vm814_vm2, %v3853_v19 }
0x16ae   : > { %v3657_v13 = vmul.f32 %v3651_v30, %v3596_v22  ;;  %v3660_v15 = vpack.c.bf16 %v3656_v33, %v3654_v26 }
0x16b0   : > { %v3661_v35 = vpack.c.bf16 %v3657_v13, %v3655_v34 }
0x16b2   : > { %9868 = vmatprep.mubr.msk.bf16.mxu0 %vm759_vm1, %v3661_v35 }
0x16b3   : > { %3804 = vmatmul.mubr.bf16.vlgmr.msra.gmra.mxu0 %v3660_v15 }
0x16b4   : > { %10785 = vmatmul.mubr.msk.bf16.gmra.mxu1 %vm814_vm2, %v3854_v55 }
0x16b5   : > { %10794 = vmatprep.mubr.msk.bf16.mxu1 %vm12354_vm9, %v16303_v47 }
0x171a   : > { %v3599_v56 = vpop.f32.mrf.mxu1 }
0x171b   : > { %v3600_v58 = vadd.f32 %v3599_v56, %v13237_v16 }
0x171c   : > { %v3601_v61 = vpop.f32.mrf.mxu1 }
0x171d   : > { %v3610_v41 = vmul.f32 %v3600_v58, %v3600_v58  ;;  %v3602_v22 = vadd.f32 %v3601_v61, %v13240_v45 }
0x171e   : > { %v3603_v29 = vpop.f32.mrf.mxu1 }
0x171f   : > { %v3616_v46 = vmul.f32 %v3610_v41, %v3600_v58  ;;  %v3611_v37 = vmul.f32 %v3602_v22, %v3602_v22 }
0x1720   : > { %v3604_v28 = vpop.f32.mrf.mxu1 }
0x1721   : > { %v3622_v3 = vmul.f32 0.044715, %v3616_v46  ;;  %v3617_v4 = vmul.f32 %v3611_v37, %v3602_v22  ;;  %v3968_v28 = vld [vmem:[%s16331_s27 + $0x38] sm:$0xff] }
0x1723   : > { %v3628_v57 = vadd.f32 %v3622_v3, %v3600_v58  ;;  %v3623_v7 = vmul.f32 0.044715, %v3617_v4 }
0x1725   : > { %v3634_v9 = vmul.f32 0.7978846, %v3628_v57  ;;  %v3629_v11 = vadd.f32 %v3623_v7, %v3602_v22 }
0x1727   : > { %11869 = vtanh.f32 %v3634_v9  ;;  %v3635_v12 = vmul.f32 0.7978846, %v3629_v11 }
0x1729   : > { %11871 = vtanh.f32 %v3635_v12 }
0x1734   : > { %v11870_v14 = vpop.eup %11869 }
0x1735   : > { %v3646_v17 = vadd.f32 1.0, %v11870_v14  ;;  %v9870_v14 = vld [vmem:[%s16273_s11 + $0x10] ss:$0 sm:$0xff] }
0x1736   : > { %v11872_v16 = vpop.eup %11871 }
0x1737   : > { %v3647_v18 = vadd.f32 1.0, %v11872_v16  ;;  %v3652_v62 = vmul.f32 0.5, %v3646_v17  ;;  %v9871_v16 = vld [vmem:[%s16273_s11 + $0x11] ss:$0 sm:$0xff] }
0x1739   : > { %v3653_v20 = vmul.f32 0.5, %v3647_v18  ;;  %v3658_v45 = vmul.f32 %v3652_v62, %v3600_v58 }
0x173b   : > { %v3659_v44 = vmul.f32 %v3653_v20, %v3602_v22  ;;  %v3662_v40 = vpack.c.bf16 %v3658_v45, %v3658_v45  ;;  %v3966_v22 = vld [vmem:[%s16331_s27 + $0x28] sm:$0xff]  ;;  %v3961_v20 = vld [vmem:[%s16331_s27] sm:$0xff] }
0x173d   : > { %v3663_v24 = vpack.c.bf16 %v3659_v44, %v3659_v44 }
0x173f   : > { %9869 = vmatprep.mubr.msk.bf16.mxu0 %vm759_vm1, %v3663_v24  ;;  %v3963_v24 = vld [vmem:[%s16331_s27 + $0x10] sm:$0xff] }
0x1740   : > { %3811 = vmatmul.mubr.bf16.gmra.mxu0 %v3662_v40 }
0x1741   : > { %10850 = vmatprep.mubr.msk.bf16.mxu0 %vm12354_vm9, %v16303_v47 }
0x176c   : > { %v10782_v13 = vpop.f32.mrf.mxu1 }
0x176d   : > { %v3938_v19 = vadd.f32 %v10782_v13, %v13289_v36 }
0x176e   : > { %v3929_v26 = vpop.f32.mrf.mxu1 }
0x176f   : > { %v13302_v58 = vadd.f32 %v3964_v54, %v3938_v19 }
0x1770   : > { %v10783_v35 = vpop.f32.mrf.mxu1 }
0x1771   : > { %v3989_v29 = vsel %vm814_vm2, %v13302_v58, 0.0 }
0x1772   : > { %v3932_v63 = vpop.f32.mrf.mxu1 }
0x1773   : > { %v3805_v43 = vpop.f32.mrf.mxu0  ;;  %v3933_v44 = vadd.f32 %v13289_v36, %v3932_v63 }
0x1774   : > { %v3806_v10 = vadd.f32 %v3805_v43, %v3692_v25  ;;  %v10786_v50 = vpop.f32.mrf.mxu1  ;;  %v3941_v43 = vadd.f32 %v10783_v35, %v13289_v36 }
0x1775   : > { %v3807_v31 = vpop.f32.mrf.mxu0  ;;  %v3954_v46 = vadd.f32 %v10786_v50, %v13289_v36 }
0x1776   : > { %v3817_v23 = vadd.f32 %v3806_v10, %v13148_v32  ;;  %v3930_v32 = vadd.f32 %v13289_v36, %v3929_v26  ;;  %v3945_v55 = vpop.f32.mrf.mxu1  ;;  %v13341_v10 = vadd.f32 %v3963_v24, %v3933_v44 }
0x1777   : > { %v3808_v30 = vpop.f32.mrf.mxu0  ;;  %v3946_v41 = vadd.f32 %v13289_v36, %v3945_v55  ;;  %v13318_v3 = vadd.f32 %v3968_v28, %v3954_v46 }
0x1778   : > { %v3820_v33 = vsel %vm814_vm2, %v3817_v23, 0.0  ;;  %v13296_v8 = vadd.f32 %v3962_v49, %v3930_v32  ;;  %v10787_v45 = vpop.f32.mrf.mxu1  ;;  %v3986_v26 = vsel %vm814_vm2, %v13341_v10, 0.0 }
0x1779   : > { %v3809_v34 = vpop.f32.mrf.mxu0  ;;  %3821 = vadd.xlane.f32.xlu0 %v3820_v33  ;;  %v13313_v37 = vadd.f32 %v3966_v22, %v3946_v41  ;;  %v4001_v57 = vsel %vm814_vm2, %v13318_v3, 0.0 }
0x177a   : > { %v3983_v61 = vsel %vm814_vm2, %v13296_v8, 0.0  ;;  %v3948_v25 = vpop.f32.mrf.mxu1  ;;  %v3967_v34 = vld [vmem:[%s16331_s27 + $0x30] sm:$0xff] }
0x177b   : > { %v3995_v4 = vsel %vm814_vm2, %v13313_v37, 0.0  ;;  %v3949_v33 = vadd.f32 %v13289_v36, %v3948_v25 }
0x177d   : > { %v13356_v35 = vadd.f32 %v3967_v34, %v3949_v33 }
0x177f   : > { %v3998_v32 = vsel %vm814_vm2, %v13356_v35, 0.0 }
0x1800   : > { %v3812_v15 = vpop.f32.mrf.mxu0 }
0x1802   : > { %v3822_v6 = vpop.xlane.xlu0 %3821  ;;  %v3813_v21 = vpop.f32.mrf.mxu0 }
0x1803   : > { %v3823_v39 = vmul.f32 0.020833334, %v3822_v6  ;;  %v3957_v6 = vadd.f32 %v10787_v45, %v13289_v36 }
0x1804   : > { %v3814_v5 = vpop.f32.mrf.mxu0 }
0x1805   : > { %v3824_v59 = vsub.f32 %v3817_v23, %v3823_v39  ;;  %v3965_v23 = vld [vmem:[%s16331_s27 + $0x20] sm:$0xff] }
0x1806   : > { %v3815_v51 = vpop.f32.mrf.mxu0  ;;  %v13352_v13 = vadd.f32 %v3965_v23, %v3941_v43  ;;  %v3969_v39 = vld [vmem:[%s16331_s27 + $0x40] sm:$0xff] }
0x1807   : > { %v3825_v52 = vmul.f32 %v3824_v59, %v3824_v59 }
0x1808   : > { %v3992_v21 = vsel %vm814_vm2, %v13352_v13, 0.0 }
0x1809   : > { %v3826_v56 = vsel %vm814_vm2, %v3825_v52, 0.0 }
0x180a   : > { %3827 = vadd.xlane.f32.xlu1 %v3826_v56 }
0x180e   : > { %3984 = vadd.xlane.f32.xlu1 %v3983_v61 }
0x1812   : > { %3990 = vadd.xlane.f32.xlu1 %v3989_v29 }
0x1816   : > { %3996 = vadd.xlane.f32.xlu1 %v3995_v4 }
0x181a   : > { %4002 = vadd.xlane.f32.xlu1 %v4001_v57 }
0x1893   : > { %v3828_v7 = vpop.xlane.xlu1 %3827 }
0x1894   : > { %v3829_v9 = vmul.f32 0.020833334, %v3828_v7 }
0x1896   : > { %v3830_v11 = vadd.f32 1e-06, %v3829_v9 }
0x1897   : > { %v3985_v30 = vpop.xlane.xlu1 %3984 }
0x1898   : > { %11873 = vrsqrt.f32 %v3830_v11  ;;  %v4008_v63 = vmul.f32 0.020833334, %v3985_v30 }
0x189a   : > { %v13367_v49 = vsub.f32 %v13296_v8, %v4008_v63 }
0x189b   : > { %v3991_v15 = vpop.xlane.xlu1 %3990 }
0x189c   : > { %v4010_v50 = vmul.f32 0.020833334, %v3991_v15  ;;  %v4026_v19 = vmul.f32 %v13367_v49, %v13367_v49 }
0x189e   : > { %v13372_v36 = vsub.f32 %v13302_v58, %v4010_v50  ;;  %v4037_v61 = vsel %vm814_vm2, %v4026_v19, 0.0  ;;  %v11661_v50 = vld [vmem:[%s16275_s13] sm:$0xff]  }
0x189f   : > { %v3997_v5 = vpop.xlane.xlu1 %3996 }
0x18a0   : > { %v4012_v51 = vmul.f32 0.020833334, %v3997_v5  ;;  %v4028_v41 = vmul.f32 %v13372_v36, %v13372_v36  ;;  %v11660_v5 = vld [vmem:[%s16277_s15 + $0x8] sm:$0xff]  }
0x18a2   : > { %v13379_v55 = vsub.f32 %v13313_v37, %v4012_v51  ;;  %v4043_v29 = vsel %vm814_vm2, %v4028_v41, 0.0  ;;  %v11662_v51 = vld [vmem:[%s16277_s15] sm:$0xff]  }
0x18a3   : > { %v4003_v54 = vpop.xlane.xlu1 %4002 }
0x18a4   : > { %v4014_v56 = vmul.f32 0.020833334, %v4003_v54  ;;  %v4030_v46 = vmul.f32 %v13379_v55, %v13379_v55 }
0x18a5   : > { %v11874_v12 = vpop.eup %11873 }
0x18a6   : > { %v3832_v17 = vmul.f32 %v11874_v12, %v3824_v59  ;;  %v13369_v59 = vadd.f32 %v3969_v39, %v3957_v6  ;;  %v13385_v22 = vsub.f32 %v13318_v3, %v4014_v56  ;;  %v4049_v28 = vsel %vm814_vm2, %v4030_v46, 0.0  ;;  %v11658_v39 = vld [vmem:[%s16277_s15 + $0x10] sm:$0xff]  }
0x18a7   : > { %10845 = vmatpush3.bf16.msra.mxu0 %v11658_v39 }
0x18a8   : > { %v3837_v18 = vmul.f32 %v9870_v14, %v3832_v17  ;;  %v4004_v52 = vsel %vm814_vm2, %v13369_v59, 0.0  ;;  %v4032_v4 = vmul.f32 %v13385_v22, %v13385_v22  ;;  %10846 = vmatprep.subr.bf16.mxu0 %v16303_v47 }
0x18aa   : > { %v3842_v62 = vadd.f32 %v9871_v16, %v3837_v18  ;;  %v4055_v57 = vsel %vm814_vm2, %v4032_v4, 0.0 }
0x18ab   : > { %10847 = vmatpush3.bf16.msra.mxu0 %v11660_v5 }
0x18ac   : > { %v3960_v40 = vsel %vm805_vm0, %v3842_v62, 0.0  ;;  %10848 = vmatprep.subr.bf16.mxu0 %v16303_v47 }
0x18ad   : > { %v13338_v53 = vadd.f32 %v3961_v20, %v3960_v40 }
0x18af   : > { %v3980_v31 = vsel %vm814_vm2, %v13338_v53, 0.0  ;;  %10849 = vmatpush3.bf16.msra.mxu0 %v11662_v51 }
0x18b0   : > { %3981 = vadd.xlane.f32.xlu0 %v3980_v31  ;;  %10870 = vmatprep.subr.bf16.mxu0 %v16303_v47 }
0x18b4   : > { %3987 = vadd.xlane.f32.xlu0 %v3986_v26 }
0x18b8   : > { %3993 = vadd.xlane.f32.xlu0 %v3992_v21  ;;  %v11657_v21 = vld [vmem:[%s16275_s13 + $0x10] sm:$0xff]  }
0x18b9   : > { %10789 = vmatpush3.bf16.msra.mxu1 %v11657_v21 }
0x18ba   : > { %10790 = vmatprep.subr.bf16.mxu1 %v16303_v47 }
0x18bc   : > { %3999 = vadd.xlane.f32.xlu0 %v3998_v32  ;;  %v11659_v32 = vld [vmem:[%s16275_s13 + $0x8] sm:$0xff]  }
0x18bd   : > { %10791 = vmatpush3.bf16.msra.mxu1 %v11659_v32 }
0x18be   : > { %10792 = vmatprep.subr.bf16.mxu1 %v16303_v47 }
0x18c0   : > { %4005 = vadd.xlane.f32.xlu0 %v4004_v52 }
0x18c1   : > { %10793 = vmatpush3.bf16.msra.mxu1 %v11661_v50 }
0x18c2   : > { %10814 = vmatprep.subr.bf16.mxu1 %v16303_v47 }
0x18c4   : > { %4038 = vadd.xlane.f32.xlu0 %v4037_v61 }
0x18c8   : > { %4044 = vadd.xlane.f32.xlu0 %v4043_v29 }
0x18cc   : > { %4050 = vadd.xlane.f32.xlu0 %v4049_v28 }
0x18d0   : > { %4056 = vadd.xlane.f32.xlu0 %v4055_v57 }
0x1939   : > { %v3982_v7 = vpop.xlane.xlu0 %3981 }
0x193a   : > { %v4007_v9 = vmul.f32 0.020833334, %v3982_v7 }
0x193c   : > { %v13395_v11 = vsub.f32 %v13338_v53, %v4007_v9 }
0x193d   : > { %v3988_v12 = vpop.xlane.xlu0 %3987 }
0x193e   : > { %v4009_v14 = vmul.f32 0.020833334, %v3988_v12  ;;  %v4025_v17 = vmul.f32 %v13395_v11, %v13395_v11 }
0x1940   : > { %v13400_v16 = vsub.f32 %v13341_v10, %v4009_v14  ;;  %v4034_v18 = vsel %vm814_vm2, %v4025_v17, 0.0 }
0x1941   : > { %4035 = vadd.xlane.f32.xlu1 %v4034_v18  ;;  %v3994_v62 = vpop.xlane.xlu0 %3993 }
0x1942   : > { %v4011_v20 = vmul.f32 0.020833334, %v3994_v62  ;;  %v4027_v45 = vmul.f32 %v13400_v16, %v13400_v16 }
0x1944   : > { %v13406_v44 = vsub.f32 %v13352_v13, %v4011_v20  ;;  %v4040_v24 = vsel %vm814_vm2, %v4027_v45, 0.0 }
0x1945   : > { %4041 = vadd.xlane.f32.xlu1 %v4040_v24  ;;  %v4000_v40 = vpop.xlane.xlu0 %3999  ;;  %v3979_v24 = vld [vmem:[%s16281_s19] sm:$0xff] }
0x1946   : > { %v4013_v25 = vmul.f32 0.020833334, %v4000_v40  ;;  %v4029_v43 = vmul.f32 %v13406_v44, %v13406_v44 }
0x1948   : > { %v13412_v31 = vsub.f32 %v13356_v35, %v4013_v25  ;;  %v4046_v23 = vsel %vm814_vm2, %v4029_v43, 0.0 }
0x1949   : > { %4047 = vadd.xlane.f32.xlu1 %v4046_v23  ;;  %v4006_v30 = vpop.xlane.xlu0 %4005  ;;  %v4100_v23 = vrot.slane %v3979_v24, %v12567_v60 }
0x194a   : > { %v4015_v33 = vmul.f32 0.020833334, %v4006_v30  ;;  %v4031_v34 = vmul.f32 %v13412_v31, %v13412_v31 }
0x194c   : > { %v13418_v26 = vsub.f32 %v13369_v59, %v4015_v33  ;;  %v4052_v15 = vsel %vm814_vm2, %v4031_v34, 0.0 }
0x194d   : > { %4053 = vadd.xlane.f32.xlu1 %v4052_v15  ;;  %v4039_v52 = vpop.xlane.xlu0 %4038 }
0x194e   : > { %v4033_v63 = vmul.f32 %v13418_v26, %v13418_v26  ;;  %v4062_v19 = vmul.f32 0.020833334, %v4039_v52 }
0x1950   : > { %v4058_v6 = vsel %vm814_vm2, %v4033_v63, 0.0  ;;  %v4071_v54 = vadd.f32 1e-06, %v4062_v19 }
0x1951   : > { %4059 = vadd.xlane.f32.xlu1 %v4058_v6  ;;  %v4045_v56 = vpop.xlane.xlu0 %4044  ;;  %v4113_v6 = vrot.slane %v3979_v24, %v12577_v2 }
0x1952   : > { %11875 = vrsqrt.f32 %v4071_v54  ;;  %v4064_v61 = vmul.f32 0.020833334, %v4045_v56 }
0x1954   : > { %v4073_v46 = vadd.f32 1e-06, %v4064_v61 }
0x1955   : > { %v4051_v4 = vpop.xlane.xlu0 %4050 }
0x1956   : > { %v4066_v9 = vmul.f32 0.020833334, %v4051_v4 }
0x1958   : > { %v4075_v18 = vadd.f32 1e-06, %v4066_v9 }
0x1959   : > { %v4057_v62 = vpop.xlane.xlu0 %4056 }
0x195a   : > { %v4068_v43 = vmul.f32 0.020833334, %v4057_v62 }
0x195c   : > { %v4077_v15 = vadd.f32 1e-06, %v4068_v43 }
0x195f   : > { %v11876_v45 = vpop.eup %11875 }
0x1960   : > { %v4089_v30 = vmul.f32 %v11876_v45, %v13367_v49 }
0x1962   : > { %v4102_v21 = vmul.f32 %v4100_v23, %v4089_v30 }
0x1964   : > { %v4115_v54 = vadd.f32 %v4113_v6, %v4102_v21 }
0x19ca   : > { %v4036_v41 = vpop.xlane.xlu1 %4035 }
0x19cb   : > { %v4061_v29 = vmul.f32 0.020833334, %v4036_v41 }
0x19cd   : > { %v4070_v28 = vadd.f32 1e-06, %v4061_v29 }
0x19ce   : > { %v4042_v57 = vpop.xlane.xlu1 %4041 }
0x19cf   : > { %11877 = vrsqrt.f32 %v4070_v28  ;;  %v4063_v7 = vmul.f32 0.020833334, %v4042_v57 }
0x19d0   : > { %11879 = vrsqrt.f32 %v4073_v46 }
0x19d1   : > { %v4072_v12 = vadd.f32 1e-06, %v4063_v7 }
0x19d2   : > { %v4048_v14 = vpop.xlane.xlu1 %4047 }
0x19d3   : > { %11881 = vrsqrt.f32 %v4072_v12  ;;  %v4065_v17 = vmul.f32 0.020833334, %v4048_v14 }
0x19d5   : > { %v4074_v20 = vadd.f32 1e-06, %v4065_v17 }
0x19d6   : > { %v4054_v40 = vpop.xlane.xlu1 %4053 }
0x19d7   : > { %11883 = vrsqrt.f32 %v4074_v20  ;;  %v4067_v25 = vmul.f32 0.020833334, %v4054_v40 }
0x19d8   : > { %11885 = vrsqrt.f32 %v4075_v18 }
0x19d9   : > { %v4076_v33 = vadd.f32 1e-06, %v4067_v25 }
0x19da   : > { %v4060_v63 = vpop.xlane.xlu1 %4059 }
0x19db   : > { %11887 = vrsqrt.f32 %v4076_v33  ;;  %v4069_v50 = vmul.f32 0.020833334, %v4060_v63 }
0x19dc   : > { %v11878_v34 = vpop.eup %11877  ;;  %11889 = vrsqrt.f32 %v4077_v15 }
0x19dd   : > { %v4088_v39 = vmul.f32 %v11878_v34, %v13395_v11  ;;  %v11880_v32 = vpop.eup %11879  ;;  %v4078_v56 = vadd.f32 1e-06, %v4069_v50 }
0x19de   : > { %v4091_v52 = vmul.f32 %v11880_v32, %v13372_v36 }
0x19df   : > { %v4101_v5 = vmul.f32 %v4100_v23, %v4088_v39  ;;  %11891 = vrsqrt.f32 %v4078_v56 }
0x19e0   : > { %v11882_v51 = vpop.eup %11881  ;;  %v4104_v11 = vmul.f32 %v4100_v23, %v4091_v52 }
0x19e1   : > { %v4090_v49 = vmul.f32 %v11882_v51, %v13400_v16  ;;  %v4114_v19 = vadd.f32 %v4113_v6, %v4101_v5 }
0x19e2   : > { %v4117_v4 = vadd.f32 %v4113_v6, %v4104_v11 }
0x19e3   : > { %v13461_v61 = vpack.c.bf16 %v4115_v54, %v4114_v19  ;;  %v4103_v41 = vmul.f32 %v4100_v23, %v4090_v49 }
0x19e4   : > { %v11884_v29 = vpop.eup %11883 }
0x19e5   : > { %10795 = vmatmul.mubr.msk.bf16.vlgmr.msra.gmra.mxu1 %vm814_vm2, %v13461_v61  ;;  %10851 = vmatmul.mubr.msk.bf16.vlgmr.msra.gmra.mxu0 %vm814_vm2, %v13461_v61  ;;  %v11886_v46 = vpop.eup %11885  ;;  %v4092_v36 = vmul.f32 %v11884_v29, %v13406_v44  ;;  %v4116_v16 = vadd.f32 %v4113_v6, %v4103_v41 }
0x19e6   : > { %10798 = vmatprep.mubr.msk.bf16.mxu1 %vm12354_vm9, %v16303_v47  ;;  %10854 = vmatprep.mubr.msk.bf16.mxu0 %vm12354_vm9, %v16303_v47  ;;  %v4093_v28 = vmul.f32 %v11886_v46, %v13379_v55 }
0x19e7   : > { %v13473_v57 = vpack.c.bf16 %v4117_v4, %v4116_v16  ;;  %v4105_v7 = vmul.f32 %v4100_v23, %v4092_v36 }
0x19e8   : > { %v11888_v9 = vpop.eup %11887  ;;  %v4106_v14 = vmul.f32 %v4100_v23, %v4093_v28 }
0x19e9   : > { %v11890_v12 = vpop.eup %11889  ;;  %v4094_v55 = vmul.f32 %v11888_v9, %v13412_v31  ;;  %v4118_v44 = vadd.f32 %v4113_v6, %v4105_v7 }
0x19ea   : > { %v4095_v17 = vmul.f32 %v11890_v12, %v13385_v22  ;;  %v4119_v18 = vadd.f32 %v4113_v6, %v4106_v14  ;;  %v9880_v14 = vld [vmem:[%s16276_s14] ss:$0 sm:$0xff] }
0x19eb   : > { %v4107_v20 = vmul.f32 %v4100_v23, %v4094_v55 }
0x19ec   : > { %v13485_v62 = vpack.c.bf16 %v4119_v18, %v4118_v44  ;;  %v11892_v45 = vpop.eup %11891  ;;  %v4108_v24 = vmul.f32 %v4100_v23, %v4095_v17 }
0x19ed   : > { %10799 = vmatmul.mubr.msk.bf16.gmra.mxu1 %vm814_vm2, %v13473_v57  ;;  %10855 = vmatmul.mubr.msk.bf16.gmra.mxu0 %vm814_vm2, %v13473_v57  ;;  %v4120_v31 = vadd.f32 %v4113_v6, %v4107_v20  ;;  %v4096_v22 = vmul.f32 %v11892_v45, %v13418_v26 }
0x19ee   : > { %10802 = vmatprep.mubr.msk.bf16.mxu1 %vm12354_vm9, %v16303_v47  ;;  %10858 = vmatprep.mubr.msk.bf16.mxu0 %vm12354_vm9, %v16303_v47  ;;  %v4121_v40 = vadd.f32 %v4113_v6, %v4108_v24 }
0x19ef   : > { %v4109_v43 = vmul.f32 %v4100_v23, %v4096_v22 }
0x19f0   : > { %v13496_v25 = vpack.c.bf16 %v4121_v40, %v4120_v31 }
0x19f1   : > { %v4122_v30 = vadd.f32 %v4113_v6, %v4109_v43 }
0x19f3   : > { %v13506_v33 = vpack.c.bf16 %v4122_v30, %v4122_v30 }
0x19f5   : > { %10803 = vmatmul.mubr.msk.bf16.gmra.mxu1 %vm814_vm2, %v13485_v62  ;;  %10859 = vmatmul.mubr.msk.bf16.gmra.mxu0 %vm814_vm2, %v13485_v62 }
0x19f6   : > { %10806 = vmatprep.mubr.msk.bf16.mxu1 %vm12354_vm9, %v16303_v47  ;;  %10862 = vmatprep.mubr.msk.bf16.mxu0 %vm12354_vm9, %v16303_v47 }
0x19fd   : > { %10807 = vmatmul.mubr.msk.bf16.gmra.mxu1 %vm814_vm2, %v13496_v25  ;;  %10863 = vmatmul.mubr.msk.bf16.gmra.mxu0 %vm814_vm2, %v13496_v25 }
0x19fe   : > { %10810 = vmatprep.mubr.msk.bf16.mxu1 %vm12354_vm9, %v16303_v47  ;;  %10866 = vmatprep.mubr.msk.bf16.mxu0 %vm12354_vm9, %v16303_v47 }
0x1a05   : > { %10811 = vmatmul.mubr.msk.bf16.gmra.mxu1 %vm814_vm2, %v13506_v33  ;;  %10867 = vmatmul.mubr.msk.bf16.gmra.mxu0 %vm814_vm2, %v13506_v33 }
0x1a06   : > { %10824 = vmatprep.mubr.msk.bf16.mxu1 %vm12354_vm9, %v16303_v47  ;;  %10880 = vmatprep.mubr.msk.bf16.mxu0 %vm12354_vm9, %v16303_v47 }
0x1aa5   : > { %v4208_v26 = vpop.f32.mrf.mxu1  ;;  %v13516_v23 = vpop.f32.mrf.mxu0 }
0x1aa7   : > { %v10796_v34 = vpop.f32.mrf.mxu1  ;;  %v10852_v15 = vpop.f32.mrf.mxu0 }
0x1aa9   : > { %v4211_v63 = vpop.f32.mrf.mxu1  ;;  %v13518_v6 = vpop.f32.mrf.mxu0 }
0x1aaa   : > { %v4212_v15 = vadd.f32 %v9880_v14, %v4211_v63 }
0x1aab   : > { %v10797_v21 = vpop.f32.mrf.mxu1  ;;  %v10853_v39 = vpop.f32.mrf.mxu0 }
0x1aad   : > { %v4216_v32 = vpop.f32.mrf.mxu1  ;;  %v13520_v5 = vpop.f32.mrf.mxu0 }
0x1aaf   : > { %v10800_v50 = vpop.f32.mrf.mxu1  ;;  %v10856_v51 = vpop.f32.mrf.mxu0 }
0x1ab1   : > { %v4219_v52 = vpop.f32.mrf.mxu1  ;;  %v4560_v49 = vpop.f32.mrf.mxu0 }
0x1ab2   : > { %v4220_v50 = vadd.f32 %v9880_v14, %v4219_v52 }
0x1ab3   : > { %v10801_v19 = vpop.f32.mrf.mxu1  ;;  %v10857_v54 = vpop.f32.mrf.mxu0 }
0x1ab5   : > { %v4224_v56 = vpop.f32.mrf.mxu1  ;;  %v4565_v41 = vpop.f32.mrf.mxu0 }
0x1ab6   : > { %v4225_v43 = vadd.f32 %v9880_v14, %v4224_v56  ;;  %v4217_v56 = vadd.f32 %v9880_v14, %v4216_v32  ;;  %v4588_v32 = vpack.c.bf16 %v4560_v49, %v13520_v5 }
0x1ab7   : > { %v10804_v29 = vpop.f32.mrf.mxu1  ;;  %v10860_v11 = vpop.f32.mrf.mxu0 }
0x1ab9   : > { %v4227_v46 = vpop.f32.mrf.mxu1  ;;  %v4568_v36 = vpop.f32.mrf.mxu0 }
0x1aba   : > { %v4228_v24 = vadd.f32 %v9880_v14, %v4227_v46  ;;  %v4209_v46 = vadd.f32 %v9880_v14, %v4208_v26  ;;  %v4589_v26 = vpack.c.bf16 %v4568_v36, %v4565_v41  ;;  %v4587_v41 = vpack.c.bf16 %v13518_v6, %v13516_v23 }
0x1abb   : > { %v10805_v16 = vpop.f32.mrf.mxu1  ;;  %v10861_v28 = vpop.f32.mrf.mxu0 }
0x1abc   : > { %v13529_v51 = vpack.c.bf16 %v4228_v24, %v4225_v43  ;;  %v13539_v28 = vpack.c.bf16 %v4212_v15, %v4209_v46 }
0x1abd   : > { %v4232_v4 = vpop.f32.mrf.mxu1  ;;  %v4573_v7 = vpop.f32.mrf.mxu0 }
0x1abe   : > { %v4233_v17 = vadd.f32 %v9880_v14, %v4232_v4  ;;  %v13541_v4 = vpack.c.bf16 %v4220_v50, %v4217_v56 }
0x1abf   : > { %v10808_v9 = vpop.f32.mrf.mxu1  ;;  %v10864_v12 = vpop.f32.mrf.mxu0 }
0x1ac1   : > { %v4235_v55 = vpop.f32.mrf.mxu1  ;;  %v4576_v44 = vpop.f32.mrf.mxu0 }
0x1ac2   : > { %v4236_v18 = vadd.f32 %v9880_v14, %v4235_v55  ;;  %v4590_v63 = vpack.c.bf16 %v4576_v44, %v4573_v7 }
0x1ac3   : > { %v10809_v20 = vpop.f32.mrf.mxu1  ;;  %v10865_v45 = vpop.f32.mrf.mxu0 }
0x1ac4   : > { %v13525_v31 = vpack.c.bf16 %v4236_v18, %v4233_v17 }
0x1ac5   : > { %v4240_v22 = vpop.f32.mrf.mxu1  ;;  %v4581_v40 = vpop.f32.mrf.mxu0 }
0x1ac6   : > { %v4241_v30 = vadd.f32 %v9880_v14, %v4240_v22  ;;  %v4591_v34 = vpack.c.bf16 %v4581_v40, %v4581_v40  ;;  %4267 = vrot.lane.b32.xlu1 %v13525_v31, %s16332_s2 }
0x1ac7   : > { %v10812_v21 = vpop.f32.mrf.mxu1  ;;  %v10868_v39 = vpop.f32.mrf.mxu0 }
0x1ac8   : > { %v13531_v19 = vpack.c.bf16 %v4241_v30, %v4241_v30  ;;  %v4613_v54 = vsel %vm1152_vm8, %v4591_v34, 0 }
0x1ac9   : > { %v4243_v29 = vpop.f32.mrf.mxu1  ;;  %v4584_v11 = vpop.f32.mrf.mxu0  ;;  %10871 = vmatpush3.bf16.msra.mxu0 %v4613_v54 }
0x1aca   : > { %4265 = vrot.lane.b32.xlu1 %v13529_v51, %s16332_s2  ;;  %4269 = vrot.lane.b32.xlu0 %v13531_v19, %s16332_s2 }
0x1acb   : > { %v10813_v16 = vpop.f32.mrf.mxu1  ;;  %v10869_v52 = vpop.f32.mrf.mxu0  ;;  %10872 = vmatprep.subr.bf16.mxu0 %v16303_v47 }
0x1acd   : > { %10873 = vmatpush3.bf16.msra.mxu0 %v4590_v63 }
0x1ace   : > { %4263 = vrot.lane.b32.xlu1 %v13541_v4, %s16332_s2  ;;  %4261 = vrot.lane.b32.xlu0 %v13539_v28, %s16332_s2 }
0x1acf   : > { %10874 = vmatprep.subr.bf16.mxu0 %v16303_v47 }
0x1ad1   : > { %10875 = vmatpush3.bf16.msra.mxu0 %v4589_v26 }
0x1ad2   : > { %4708 = vrot.lane.b32.xlu1 %v13541_v4, %s16325_s25  ;;  %4712 = vrot.lane.b32.xlu0 %v13525_v31, %s16325_s25 }
0x1ad3   : > { %10876 = vmatprep.subr.bf16.mxu0 %v16303_v47 }
0x1ad5   : > { %10877 = vmatpush3.bf16.msra.mxu0 %v4588_v32 }
0x1ad6   : > { %4714 = vrot.lane.b32.xlu1 %v13531_v19, %s16325_s25  ;;  %4710 = vrot.lane.b32.xlu0 %v13529_v51, %s16325_s25 }
0x1ad7   : > { %10878 = vmatprep.subr.bf16.mxu0 %v16303_v47 }
0x1ad9   : > { %10879 = vmatpush3.bf16.msra.mxu0 %v4587_v41 }
0x1ada   : > { %10930 = vmatprep.subr.bf16.mxu0 %v16303_v47 }
0x1b38   : > { %v4268_v49 = vpop.permute.xlu1 %4267 }
0x1b39   : > { %v4296_v7 = vsel %vm969_vm3, %v4268_v49, 0 }
0x1b3c   : > { %v4270_v36 = vpop.permute.xlu0 %4269  ;;  %v4266_v9 = vpop.permute.xlu1 %4265 }
0x1b3d   : > { %v4299_v5 = vsel %vm969_vm3, %v4270_v36, 0  ;;  %v4293_v23 = vsel %vm969_vm3, %v4266_v9, 0 }
0x1b3e   : > { %10815 = vmatpush3.bf16.xpose.msra.mxu1 %v4299_v5 }
0x1b3f   : > { %10816 = vmatprep.subr.bf16.mxu1 %v16303_v47 }
0x1b40   : > { %v4264_v6 = vpop.permute.xlu1 %4263  ;;  %v4262_v14 = vpop.permute.xlu0 %4261 }
0x1b41   : > { %v4290_v12 = vsel %vm969_vm3, %v4264_v6, 0  ;;  %v4287_v44 = vsel %vm969_vm3, %v4262_v14, 0 }
0x1b44   : > { %v4709_v55 = vpop.permute.xlu1 %4708  ;;  %v4713_v20 = vpop.permute.xlu0 %4712 }
0x1b45   : > { %v4741_v45 = vsel %vm969_vm3, %v4713_v20, 0  ;;  %v4735_v40 = vsel %vm969_vm3, %v4709_v55, 0 }
0x1b46   : > { %10817 = vmatpush3.bf16.xpose.msra.mxu1 %v4296_v7 }
0x1b47   : > { %10818 = vmatprep.subr.bf16.mxu1 %v16303_v47 }
0x1b48   : > { %v4715_v17 = vpop.permute.xlu1 %4714  ;;  %v4711_v24 = vpop.permute.xlu0 %4710 }
0x1b49   : > { %v4744_v18 = vsel %vm969_vm3, %v4715_v17, 0  ;;  %v4738_v22 = vsel %vm969_vm3, %v4711_v24, 0 }
0x1b4e   : > { %10819 = vmatpush3.bf16.xpose.msra.mxu1 %v4293_v23 }
0x1b4f   : > { %10820 = vmatprep.subr.bf16.mxu1 %v16303_v47 }
0x1b56   : > { %10821 = vmatpush3.bf16.xpose.msra.mxu1 %v4290_v12 }
0x1b57   : > { %10822 = vmatprep.subr.bf16.mxu1 %v16303_v47 }
0x1b5e   : > { %10823 = vmatpush3.bf16.xpose.msra.mxu1 %v4287_v44 }
0x1b5f   : > { %10900 = vmatprep.subr.bf16.mxu1 %v16303_v47 }
0x1b65   : > { %10825 = vmatmul.mubr.msk.bf16.vlgmr.msra.gmra.mxu1 %vm969_vm3, %v13539_v28 }
0x1b66   : > { %10901 = vmatpush3.bf16.xpose.msra.mxu1 %v4744_v18  ;;  %10828 = vmatprep.mubr.msk.bf16.mxu1 %vm12354_vm9, %v16303_v47 }
0x1b67   : > { %10902 = vmatprep.subr.bf16.mxu1 %v16303_v47 }
0x1b6d   : > { %10829 = vmatmul.mubr.msk.bf16.gmra.mxu1 %vm969_vm3, %v13541_v4 }
0x1b6e   : > { %10903 = vmatpush3.bf16.xpose.msra.mxu1 %v4741_v45  ;;  %10832 = vmatprep.mubr.msk.bf16.mxu1 %vm12354_vm9, %v16303_v47 }
0x1b6f   : > { %10904 = vmatprep.subr.bf16.mxu1 %v16303_v47 }
0x1b75   : > { %10833 = vmatmul.mubr.msk.bf16.gmra.mxu1 %vm969_vm3, %v13529_v51 }
0x1b76   : > { %10905 = vmatpush3.bf16.xpose.msra.mxu1 %v4738_v22  ;;  %10836 = vmatprep.mubr.msk.bf16.mxu1 %vm12354_vm9, %v16303_v47 }
0x1b77   : > { %10906 = vmatprep.subr.bf16.mxu1 %v16303_v47 }
0x1b7d   : > { %10837 = vmatmul.mubr.msk.bf16.gmra.mxu1 %vm969_vm3, %v13525_v31 }
0x1b7e   : > { %10907 = vmatpush3.bf16.xpose.msra.mxu1 %v4735_v40  ;;  %10840 = vmatprep.mubr.msk.bf16.mxu1 %vm12354_vm9, %v16303_v47 }
0x1b7f   : > { %10908 = vmatprep.subr.bf16.mxu1 %v16303_v47 }
0x1b85   : > { %10841 = vmatmul.mubr.msk.bf16.gmra.mxu1 %vm969_vm3, %v13531_v19 }
0x1b86   : > { %10910 = vmatprep.mubr.msk.bf16.mxu1 %vm12354_vm9, %v16303_v47 }
0x1c25   : > { %v4335_v43 = vpop.f32.mrf.mxu1 }
0x1c26   : > { %v4373_v30 = vmul.f32 0.28867513, %v4335_v43 }
0x1c27   : > { %v10826_v34 = vpop.f32.mrf.mxu1 }
0x1c28   : > { %v4382_v15 = vadd.f32 %v4373_v30, %v12637_v48 }
0x1c29   : > { %v4338_v21 = vpop.f32.mrf.mxu1 }
0x1c2a   : > { %v4374_v39 = vmul.f32 0.28867513, %v4338_v21  ;;  %v4392_v50 = vsel %vm4391_vm10, %v4382_v15, -inf }
0x1c2b   : > { %4393 = vmax.xlane.f32.xlu1 %v4392_v50  ;;  %v10827_v54 = vpop.f32.mrf.mxu1 }
0x1c2c   : > { %v4383_v29 = vadd.f32 %v4374_v39, %v12637_v48 }
0x1c2d   : > { %v4343_v11 = vpop.f32.mrf.mxu1 }
0x1c2e   : > { %v4375_v46 = vmul.f32 0.28867513, %v4343_v11  ;;  %v4395_v56 = vsel %vm4391_vm10, %v4383_v29, -inf }
0x1c2f   : > { %4396 = vmax.xlane.f32.xlu0 %v4395_v56  ;;  %v10830_v63 = vpop.f32.mrf.mxu1 }
0x1c30   : > { %v4384_v16 = vadd.f32 %v4375_v46, %v12637_v48 }
0x1c31   : > { %v4346_v52 = vpop.f32.mrf.mxu1 }
0x1c32   : > { %v4376_v26 = vmul.f32 0.28867513, %v4346_v52  ;;  %v4398_v32 = vsel %vm4391_vm10, %v4384_v16, -inf }
0x1c33   : > { %4399 = vmax.xlane.f32.xlu1 %v4398_v32  ;;  %v10831_v41 = vpop.f32.mrf.mxu1 }
0x1c34   : > { %v4385_v36 = vadd.f32 %v4376_v26, %v12637_v48 }
0x1c35   : > { %v4351_v5 = vpop.f32.mrf.mxu1 }
0x1c36   : > { %v4377_v49 = vmul.f32 0.28867513, %v4351_v5  ;;  %v4401_v7 = vsel %vm4391_vm10, %v4385_v36, -inf }
0x1c37   : > { %4402 = vmax.xlane.f32.xlu1 %v4401_v7  ;;  %v10834_v9 = vpop.f32.mrf.mxu1 }
0x1c38   : > { %v4386_v23 = vadd.f32 %v4377_v49, %v12637_v48 }
0x1c39   : > { %v4354_v6 = vpop.f32.mrf.mxu1 }
0x1c3a   : > { %v4404_v12 = vsel %vm4391_vm10, %v4386_v23, -inf  ;;  %v4378_v40 = vmul.f32 0.28867513, %v4354_v6 }
0x1c3b   : > { %4405 = vmax.xlane.f32.xlu0 %v4404_v12  ;;  %v10835_v14 = vpop.f32.mrf.mxu1 }
0x1c3c   : > { %v13615_v43 = vadd.f32 %v4378_v40, %v12637_v48 }
0x1c3d   : > { %v4359_v55 = vpop.f32.mrf.mxu1 }
0x1c3e   : > { %v4379_v30 = vmul.f32 0.28867513, %v4359_v55  ;;  %v4407_v54 = vsel %vm4391_vm10, %v13615_v43, -inf }
0x1c3f   : > { %v10838_v44 = vpop.f32.mrf.mxu1 }
0x1c40   : > { %v13618_v21 = vadd.f32 %v4379_v30, %v12637_v48 }
0x1c41   : > { %v4362_v17 = vpop.f32.mrf.mxu1 }
0x1c42   : > { %v4380_v39 = vmul.f32 0.28867513, %v4362_v17  ;;  %v4410_v46 = vsel %vm4391_vm10, %v13618_v21, -inf }
0x1c43   : > { %v10839_v18 = vpop.f32.mrf.mxu1 }
0x1c44   : > { %v13626_v11 = vadd.f32 %v4380_v39, %v12637_v48 }
0x1c45   : > { %v4367_v20 = vpop.f32.mrf.mxu1 }
0x1c46   : > { %v4381_v34 = vmul.f32 0.28867513, %v4367_v20  ;;  %v4413_v63 = vsel %vm4391_vm10, %v13626_v11, -inf }
0x1c47   : > { %v10842_v45 = vpop.f32.mrf.mxu1 }
0x1c48   : > { %4696 = vrot.lane.b32.xlu1 %v13539_v28, %s16333_s30  ;;  %v13621_v50 = vadd.f32 %v4381_v34, %v12637_v48 }
0x1c49   : > { %v4370_v24 = vpop.f32.mrf.mxu1 }
0x1c4a   : > { %v4416_v56 = vsel %vm4391_vm10, %v13621_v50, -inf }
0x1c4b   : > { %v10843_v22 = vpop.f32.mrf.mxu1 }
0x1c51   : > { %4706 = vrot.lane.b32.xlu0 %v13539_v28, %s16325_s25 }
0x1c6c   : > { %4408 = vmax.xlane.f32.xlu1 %v4407_v54 }
0x1c70   : > { %4411 = vmax.xlane.f32.xlu1 %v4410_v46  ;;  %4417 = vmax.xlane.f32.xlu0 %v4416_v56 }
0x1c74   : > { %4414 = vmax.xlane.f32.xlu1 %v4413_v63 }
0x1c85   : > { %4698 = vrot.lane.b32.xlu1 %v13541_v4, %s16333_s30 }
0x1c89   : > { %4700 = vrot.lane.b32.xlu1 %v13529_v51, %s16333_s30 }
0x1c8d   : > { %4702 = vrot.lane.b32.xlu1 %v13525_v31, %s16333_s30 }
0x1c91   : > { %4704 = vrot.lane.b32.xlu1 %v13531_v19, %s16333_s30 }
0x1cb4   : > { %v4394_v52 = vpop.xlane.xlu1 %4393 }
0x1cb5   : > { %v4419_v26 = vsub.f32 %v4382_v15, %v4394_v52 }
0x1cb7   : > { %v4428_v32 = vmul.f32 1.442695, %v4419_v26 }
0x1cb8   : > { %v4397_v41 = vpop.xlane.xlu0 %4396 }
0x1cb9   : > { %11893 = vpow2.f32 %v4428_v32  ;;  %v4420_v5 = vsub.f32 %v4383_v29, %v4397_v41 }
0x1cbb   : > { %v4430_v49 = vmul.f32 1.442695, %v4420_v5 }
0x1cbc   : > { %v4400_v7 = vpop.xlane.xlu1 %4399 }
0x1cbd   : > { %11895 = vpow2.f32 %v4430_v49  ;;  %v4421_v9 = vsub.f32 %v4384_v16, %v4400_v7 }
0x1cbf   : > { %v4432_v6 = vmul.f32 1.442695, %v4421_v9 }
0x1cc0   : > { %v4403_v12 = vpop.xlane.xlu1 %4402 }
0x1cc1   : > { %11897 = vpow2.f32 %v4432_v6  ;;  %v4422_v14 = vsub.f32 %v4385_v36, %v4403_v12 }
0x1cc3   : > { %v4434_v55 = vmul.f32 1.442695, %v4422_v14 }
0x1cc4   : > { %v4406_v44 = vpop.xlane.xlu0 %4405  ;;  %v4697_v22 = vpop.permute.xlu1 %4696 }
0x1cc5   : > { %11899 = vpow2.f32 %v4434_v55  ;;  %v4423_v17 = vsub.f32 %v4386_v23, %v4406_v44 }
0x1cc6   : > { %v13642_v18 = vpop.eup %11893 }
0x1cc7   : > { %v4436_v20 = vmul.f32 1.442695, %v4423_v17  ;;  %v4446_v15 = vsel %vm4391_vm10, %v13642_v18, 0.0 }
0x1cc8   : > { %v4707_v45 = vpop.permute.xlu0 %4706  ;;  %4447 = vadd.xlane.f32.xlu0 %v4446_v15 }
0x1cc9   : > { %11901 = vpow2.f32 %v4436_v20  ;;  %v4732_v29 = vsel %vm969_vm3, %v4707_v45, 0 }
0x1cca   : > { %v13647_v16 = vpop.eup %11895  ;;  %10909 = vmatpush3.bf16.xpose.msra.mxu1 %v4732_v29 }
0x1ccb   : > { %v4449_v36 = vsel %vm4391_vm10, %v13647_v16, 0.0  ;;  %10956 = vmatprep.subr.bf16.mxu1 %v16303_v47 }
0x1ccc   : > { %4450 = vadd.xlane.f32.xlu1 %v4449_v36 }
0x1cce   : > { %v13652_v23 = vpop.eup %11897 }
0x1ccf   : > { %v4452_v24 = vsel %vm4391_vm10, %v13652_v23, 0.0 }
0x1cd0   : > { %4453 = vadd.xlane.f32.xlu0 %v4452_v24 }
0x1cd1   : > { %10911 = vmatmul.mubr.msk.bf16.vlgmr.msra.gmra.mxu1 %vm969_vm3, %v4697_v22 }
0x1cd2   : > { %v13657_v40 = vpop.eup %11899  ;;  %10914 = vmatprep.mubr.msk.bf16.mxu1 %vm12354_vm9, %v16303_v47 }
0x1cd3   : > { %v4455_v30 = vsel %vm4391_vm10, %v13657_v40, 0.0 }
0x1cd4   : > { %4456 = vadd.xlane.f32.xlu0 %v4455_v30 }
0x1cd6   : > { %v13663_v34 = vpop.eup %11901 }
0x1cd7   : > { %v4458_v39 = vsel %vm4391_vm10, %v13663_v34, 0.0 }
0x1cd8   : > { %4459 = vadd.xlane.f32.xlu0 %v4458_v39 }
0x1cdd   : > { %5157 = vrot.lane.b32.xlu1 %v13525_v31, %s16326_s26 }
0x1cf5   : > { %v4409_v54 = vpop.xlane.xlu1 %4408 }
0x1cf6   : > { %v4424_v46 = vsub.f32 %v13615_v43, %v4409_v54 }
0x1cf8   : > { %v4438_v56 = vmul.f32 1.442695, %v4424_v46  ;;  %v11663_v46 = vld [vmem:[%s16277_s15 + $0x28] sm:$0xff]  }
0x1cf9   : > { %v4412_v63 = vpop.xlane.xlu1 %4411  ;;  %v4418_v52 = vpop.xlane.xlu0 %4417 }
0x1cfa   : > { %11903 = vpow2.f32 %v4438_v56  ;;  %v4425_v26 = vsub.f32 %v13618_v21, %v4412_v63  ;;  %v4427_v41 = vsub.f32 %v13621_v50, %v4418_v52  ;;  %v11664_v52 = vld [vmem:[%s16277_s15 + $0x20] sm:$0xff]  }
0x1cfc   : > { %v4440_v32 = vmul.f32 1.442695, %v4425_v26  ;;  %v4444_v9 = vmul.f32 1.442695, %v4427_v41 }
0x1cfd   : > { %v4415_v5 = vpop.xlane.xlu1 %4414 }
0x1cfe   : > { %v4426_v49 = vsub.f32 %v13626_v11, %v4415_v5  ;;  %11905 = vpow2.f32 %v4440_v32  ;;  %v11665_v32 = vld [vmem:[%s16277_s15 + $0x18] sm:$0xff]  }
0x1d00   : > { %v4442_v7 = vmul.f32 1.442695, %v4426_v49 }
0x1d01   : > { %v4699_v6 = vpop.permute.xlu1 %4698 }
0x1d02   : > { %11907 = vpow2.f32 %v4442_v7  ;;  %10915 = vmatmul.mubr.msk.bf16.gmra.mxu1 %vm969_vm3, %v4699_v6 }
0x1d03   : > { %10918 = vmatprep.mubr.msk.bf16.mxu1 %vm12354_vm9, %v16303_v47  ;;  %11909 = vpow2.f32 %v4444_v9 }
0x1d05   : > { %v4701_v50 = vpop.permute.xlu1 %4700 }
0x1d07   : > { %v13676_v43 = vpop.eup %11903 }
0x1d08   : > { %v4461_v21 = vsel %vm4391_vm10, %v13676_v43, 0.0 }
0x1d09   : > { %4462 = vadd.xlane.f32.xlu0 %v4461_v21  ;;  %v4703_v44 = vpop.permute.xlu1 %4702 }
0x1d0a   : > { %10919 = vmatmul.mubr.msk.bf16.gmra.mxu1 %vm969_vm3, %v4701_v50 }
0x1d0b   : > { %10922 = vmatprep.mubr.msk.bf16.mxu1 %vm12354_vm9, %v16303_v47  ;;  %v13683_v11 = vpop.eup %11905 }
0x1d0c   : > { %v4464_v12 = vsel %vm4391_vm10, %v13683_v11, 0.0 }
0x1d0d   : > { %4465 = vadd.xlane.f32.xlu0 %v4464_v12  ;;  %v4705_v15 = vpop.permute.xlu1 %4704 }
0x1d0f   : > { %v13687_v14 = vpop.eup %11907 }
0x1d10   : > { %v4467_v55 = vsel %vm4391_vm10, %v13687_v14, 0.0  ;;  %v13691_v17 = vpop.eup %11909 }
0x1d11   : > { %4468 = vadd.xlane.f32.xlu0 %v4467_v55  ;;  %v4470_v20 = vsel %vm4391_vm10, %v13691_v17, 0.0 }
0x1d12   : > { %10923 = vmatmul.mubr.msk.bf16.gmra.mxu1 %vm969_vm3, %v4703_v44 }
0x1d13   : > { %10926 = vmatprep.mubr.msk.bf16.mxu1 %vm12354_vm9, %v16303_v47 }
0x1d15   : > { %4471 = vadd.xlane.f32.xlu0 %v4470_v20 }
0x1d1a   : > { %10927 = vmatmul.mubr.msk.bf16.gmra.mxu1 %vm969_vm3, %v4705_v15 }
0x1d1b   : > { %10966 = vmatprep.mubr.msk.bf16.mxu1 %vm12354_vm9, %v16303_v47 }
0x1d2b   : > { %5159 = vrot.lane.b32.xlu0 %v13531_v19, %s16326_s26 }
0x1d51   : > { %v4448_v45 = vpop.xlane.xlu0 %4447 }
0x1d52   : > { %11911 = vrcp.f32 %v4448_v45 }
0x1d55   : > { %v4451_v29 = vpop.xlane.xlu1 %4450 }
0x1d56   : > { %11913 = vrcp.f32 %v4451_v29 }
0x1d59   : > { %v4454_v36 = vpop.xlane.xlu0 %4453 }
0x1d5a   : > { %11915 = vrcp.f32 %v4454_v36 }
0x1d5d   : > { %v4457_v24 = vpop.xlane.xlu0 %4456 }
0x1d5e   : > { %11917 = vrcp.f32 %v4457_v24 }
0x1d5f   : > { %v11912_v22 = vpop.eup %11911 }
0x1d60   : > { %v4482_v39 = vmul.f32 %v11912_v22, %v13642_v18 }
0x1d61   : > { %v4460_v5 = vpop.xlane.xlu0 %4459 }
0x1d62   : > { %11919 = vrcp.f32 %v4460_v5 }
0x1d63   : > { %v11914_v30 = vpop.eup %11913 }
0x1d64   : > { %v4483_v54 = vmul.f32 %v11914_v30, %v13647_v16 }
0x1d66   : > { %v4592_v56 = vpack.c.bf16 %v4483_v54, %v4482_v39 }
0x1d67   : > { %v11916_v63 = vpop.eup %11915 }
0x1d68   : > { %10881 = vmatmul.mubr.msk.bf16.vlgmr.msra.gmra.mxu0 %vm4391_vm10, %v4592_v56  ;;  %v4484_v16 = vmul.f32 %v11916_v63, %v13652_v23 }
0x1d69   : > { %10884 = vmatprep.mubr.msk.bf16.mxu0 %vm12354_vm9, %v16303_v47  ;;  %10931 = vmatpush3.bf16.msra.mxu0 %v11663_v46 }
0x1d6a   : > { %10932 = vmatprep.subr.bf16.mxu0 %v16303_v47 }
0x1d6b   : > { %v11918_v18 = vpop.eup %11917 }
0x1d6c   : > { %v4485_v26 = vmul.f32 %v11918_v18, %v13657_v40  ;;  %v5158_v18 = vpop.permute.xlu1 %5157 }
0x1d6d   : > { %10933 = vmatpush3.bf16.msra.mxu0 %v11664_v52 }
0x1d6e   : > { %v4593_v41 = vpack.c.bf16 %v4485_v26, %v4484_v16  ;;  %10934 = vmatprep.subr.bf16.mxu0 %v16303_v47 }
0x1d6f   : > { %v11920_v45 = vpop.eup %11919 }
0x1d70   : > { %10885 = vmatmul.mubr.msk.bf16.gmra.mxu0 %vm4391_vm10, %v4593_v41  ;;  %v4486_v24 = vmul.f32 %v11920_v45, %v13663_v34  ;;  %v5186_v41 = vsel %vm969_vm3, %v5158_v18, 0 }
0x1d71   : > { %10888 = vmatprep.mubr.msk.bf16.mxu0 %vm12354_vm9, %v16303_v47  ;;  %10935 = vmatpush3.bf16.msra.mxu0 %v11665_v32 }
0x1d72   : > { %10986 = vmatprep.subr.bf16.mxu0 %v16303_v47 }
0x1d91   : > { %v4780_v23 = vpop.f32.mrf.mxu1 }
0x1d92   : > { %v4818_v40 = vmul.f32 0.28867513, %v4780_v23  ;;  %v4463_v49 = vpop.xlane.xlu0 %4462 }
0x1d93   : > { %11921 = vrcp.f32 %v4463_v49  ;;  %v10912_v7 = vpop.f32.mrf.mxu1 }
0x1d94   : > { %v13726_v9 = vadd.f32 %v4818_v40, %v12637_v48 }
0x1d95   : > { %v4783_v6 = vpop.f32.mrf.mxu1 }
0x1d96   : > { %v4819_v21 = vmul.f32 0.28867513, %v4783_v6  ;;  %v4836_v50 = vsel %vm4391_vm10, %v13726_v9, -inf  ;;  %v4466_v12 = vpop.xlane.xlu0 %4465 }
0x1d97   : > { %4837 = vmax.xlane.f32.xlu1 %v4836_v50  ;;  %v10913_v55 = vpop.f32.mrf.mxu1  ;;  %11923 = vrcp.f32 %v4466_v12 }
0x1d98   : > { %v13731_v44 = vadd.f32 %v4819_v21, %v12637_v48 }
0x1d9a   : > { %v4839_v20 = vsel %vm4391_vm10, %v13731_v44, -inf  ;;  %v4469_v15 = vpop.xlane.xlu0 %4468 }
0x1d9b   : > { %4840 = vmax.xlane.f32.xlu0 %v4839_v20  ;;  %11925 = vrcp.f32 %v4469_v15 }
0x1d9e   : > { %v4472_v29 = vpop.xlane.xlu0 %4471 }
0x1d9f   : > { %11927 = vrcp.f32 %v4472_v29 }
0x1da0   : > { %v11922_v36 = vpop.eup %11921 }
0x1da1   : > { %v4487_v22 = vmul.f32 %v11922_v36, %v13676_v43 }
0x1da3   : > { %v4594_v30 = vpack.c.bf16 %v4487_v22, %v4486_v24 }
0x1da4   : > { %v11924_v39 = vpop.eup %11923 }
0x1da5   : > { %10889 = vmatmul.mubr.msk.bf16.gmra.mxu0 %vm4391_vm10, %v4594_v30  ;;  %v4488_v46 = vmul.f32 %v11924_v39, %v13683_v11  ;;  %v5160_v11 = vpop.permute.xlu0 %5159 }
0x1da6   : > { %10892 = vmatprep.mubr.msk.bf16.mxu0 %vm12354_vm9, %v16303_v47 }
0x1da8   : > { %v11926_v54 = vpop.eup %11925 }
0x1da9   : > { %v4489_v56 = vmul.f32 %v11926_v54, %v13687_v14  ;;  %v5189_v14 = vsel %vm969_vm3, %v5160_v11, 0 }
0x1dab   : > { %v4595_v63 = vpack.c.bf16 %v4489_v56, %v4488_v46 }
0x1dac   : > { %v11928_v52 = vpop.eup %11927 }
0x1dad   : > { %10893 = vmatmul.mubr.msk.bf16.gmra.mxu0 %vm4391_vm10, %v4595_v63  ;;  %v4490_v34 = vmul.f32 %v11928_v52, %v13691_v17 }
0x1dae   : > { %10896 = vmatprep.mubr.msk.bf16.mxu0 %vm12354_vm9, %v16303_v47 }
0x1daf   : > { %v4596_v43 = vpack.c.bf16 %v4490_v34, %v4490_v34 }
0x1db1   : > { %5155 = vrot.lane.b32.xlu0 %v13529_v51, %s16326_s26 }
0x1db5   : > { %10897 = vmatmul.mubr.msk.bf16.gmra.mxu0 %vm4391_vm10, %v4596_v43 }
0x1db6   : > { %10936 = vmatprep.mubr.msk.bf16.mxu0 %vm12354_vm9, %v16303_v47 }
0x1dbd   : > { %10937 = vmatmul.mubr.msk.bf16.vlgmr.msra.gmra.mxu0 %vm814_vm2, %v13461_v61 }
0x1dbe   : > { %10987 = vmatpush3.bf16.xpose.msra.mxu0 %v5189_v14  ;;  %10940 = vmatprep.mubr.msk.bf16.mxu0 %vm12354_vm9, %v16303_v47 }
0x1dbf   : > { %10988 = vmatprep.subr.bf16.mxu0 %v16303_v47 }
0x1dc2   : > { %v4788_v17 = vpop.f32.mrf.mxu1 }
0x1dc3   : > { %v4820_v16 = vmul.f32 0.28867513, %v4788_v17 }
0x1dc4   : > { %v10916_v26 = vpop.f32.mrf.mxu1 }
0x1dc5   : > { %v13758_v32 = vadd.f32 %v4820_v16, %v12637_v48  ;;  %10941 = vmatmul.mubr.msk.bf16.gmra.mxu0 %vm814_vm2, %v13473_v57 }
0x1dc6   : > { %v4791_v5 = vpop.f32.mrf.mxu1  ;;  %10989 = vmatpush3.bf16.xpose.msra.mxu0 %v5186_v41  ;;  %10944 = vmatprep.mubr.msk.bf16.mxu0 %vm12354_vm9, %v16303_v47 }
0x1dc7   : > { %v4821_v23 = vmul.f32 0.28867513, %v4791_v5  ;;  %v4842_v40 = vsel %vm4391_vm10, %v13758_v32, -inf  ;;  %10990 = vmatprep.subr.bf16.mxu0 %v16303_v47 }
0x1dc8   : > { %4843 = vmax.xlane.f32.xlu1 %v4842_v40  ;;  %v10917_v49 = vpop.f32.mrf.mxu1 }
0x1dc9   : > { %v13769_v7 = vadd.f32 %v4821_v23, %v12637_v48 }
0x1dca   : > { %v4796_v6 = vpop.f32.mrf.mxu1 }
0x1dcb   : > { %v4822_v21 = vmul.f32 0.28867513, %v4796_v6  ;;  %v4845_v50 = vsel %vm4391_vm10, %v13769_v7, -inf }
0x1dcc   : > { %4846 = vmax.xlane.f32.xlu1 %v4845_v50  ;;  %v10920_v12 = vpop.f32.mrf.mxu1 }
0x1dcd   : > { %v13774_v55 = vadd.f32 %v4822_v21, %v12637_v48  ;;  %10945 = vmatmul.mubr.msk.bf16.gmra.mxu0 %vm814_vm2, %v13485_v62 }
0x1dce   : > { %v4799_v20 = vpop.f32.mrf.mxu1  ;;  %10948 = vmatprep.mubr.msk.bf16.mxu0 %vm12354_vm9, %v16303_v47 }
0x1dcf   : > { %v4848_v15 = vsel %vm4391_vm10, %v13774_v55, -inf  ;;  %v4823_v56 = vmul.f32 0.28867513, %v4799_v20 }
0x1dd0   : > { %4849 = vmax.xlane.f32.xlu0 %v4848_v15  ;;  %v10921_v45 = vpop.f32.mrf.mxu1 }
0x1dd1   : > { %v13795_v63 = vadd.f32 %v4823_v56, %v12637_v48 }
0x1dd2   : > { %v4804_v29 = vpop.f32.mrf.mxu1 }
0x1dd3   : > { %v4824_v52 = vmul.f32 0.28867513, %v4804_v29  ;;  %v4851_v17 = vsel %vm4391_vm10, %v13795_v63, -inf }
0x1dd4   : > { %v10924_v36 = vpop.f32.mrf.mxu1 }
0x1dd5   : > { %10949 = vmatmul.mubr.msk.bf16.gmra.mxu0 %vm814_vm2, %v13496_v25  ;;  %v13798_v43 = vadd.f32 %v4824_v52, %v12637_v48 }
0x1dd6   : > { %v4807_v24 = vpop.f32.mrf.mxu1  ;;  %10952 = vmatprep.mubr.msk.bf16.mxu0 %vm12354_vm9, %v16303_v47 }
0x1dd7   : > { %v4825_v11 = vmul.f32 0.28867513, %v4807_v24  ;;  %v4854_v16 = vsel %vm4391_vm10, %v13798_v43, -inf }
0x1dd8   : > { %v10925_v22 = vpop.f32.mrf.mxu1 }
0x1dd9   : > { %v13806_v18 = vadd.f32 %v4825_v11, %v12637_v48 }
0x1dda   : > { %v4812_v30 = vpop.f32.mrf.mxu1 }
0x1ddb   : > { %v4826_v34 = vmul.f32 0.28867513, %v4812_v30  ;;  %v4857_v41 = vsel %vm4391_vm10, %v13806_v18, -inf }
0x1ddc   : > { %v10928_v39 = vpop.f32.mrf.mxu1 }
0x1ddd   : > { %5153 = vrot.lane.b32.xlu1 %v13541_v4, %s16326_s26  ;;  %10953 = vmatmul.mubr.msk.bf16.gmra.mxu0 %vm814_vm2, %v13506_v33  ;;  %v13801_v14 = vadd.f32 %v4826_v34, %v12637_v48 }
0x1dde   : > { %v4815_v54 = vpop.f32.mrf.mxu1  ;;  %10996 = vmatprep.mubr.msk.bf16.mxu0 %vm12354_vm9, %v16303_v47 }
0x1ddf   : > { %v4860_v26 = vsel %vm4391_vm10, %v13801_v14, -inf }
0x1de0   : > { %v10929_v46 = vpop.f32.mrf.mxu1 }
0x1de6   : > { %5151 = vrot.lane.b32.xlu0 %v13539_v28, %s16326_s26 }
0x1e01   : > { %4852 = vmax.xlane.f32.xlu1 %v4851_v17 }
0x1e05   : > { %4855 = vmax.xlane.f32.xlu1 %v4854_v16  ;;  %4861 = vmax.xlane.f32.xlu0 %v4860_v26 }
0x1e09   : > { %4858 = vmax.xlane.f32.xlu1 %v4857_v41 }
0x1e1a   : > { %5141 = vrot.lane.b32.xlu1 %v13539_v28, %s16327_s23 }
0x1e1e   : > { %5143 = vrot.lane.b32.xlu1 %v13541_v4, %s16327_s23 }
0x1e20   : > { %v4838_v5 = vpop.xlane.xlu1 %4837 }
0x1e21   : > { %v4863_v23 = vsub.f32 %v13726_v9, %v4838_v5 }
0x1e22   : > { %5145 = vrot.lane.b32.xlu1 %v13529_v51, %s16327_s23 }
0x1e23   : > { %v4872_v40 = vmul.f32 1.442695, %v4863_v23 }
0x1e24   : > { %v4841_v49 = vpop.xlane.xlu0 %4840 }
0x1e25   : > { %11929 = vpow2.f32 %v4872_v40  ;;  %v4864_v22 = vsub.f32 %v13731_v44, %v4841_v49 }
0x1e26   : > { %5147 = vrot.lane.b32.xlu1 %v13525_v31, %s16327_s23 }
0x1e27   : > { %v4874_v39 = vmul.f32 1.442695, %v4864_v22 }
0x1e28   : > { %v5156_v6 = vpop.permute.xlu0 %5155  ;;  %v13823_v21 = vpop.f32.mrf.mxu0 }
0x1e29   : > { %v5183_v50 = vsel %vm969_vm3, %v5156_v6, 0  ;;  %11931 = vpow2.f32 %v4874_v39 }
0x1e2a   : > { %5149 = vrot.lane.b32.xlu1 %v13531_v19, %s16327_s23  ;;  %v10882_v12 = vpop.f32.mrf.mxu0  ;;  %10991 = vmatpush3.bf16.xpose.msra.mxu0 %v5183_v50 }
0x1e2b   : > { %10992 = vmatprep.subr.bf16.mxu0 %v16303_v47 }
0x1e2c   : > { %v13829_v9 = vpop.f32.mrf.mxu0 }
0x1e2e   : > { %v10883_v20 = vpop.f32.mrf.mxu0 }
0x1e30   : > { %v13831_v15 = vpop.f32.mrf.mxu0 }
0x1e32   : > { %v13833_v45 = vpop.eup %11929  ;;  %v10886_v29 = vpop.f32.mrf.mxu0 }
0x1e33   : > { %v4890_v36 = vsel %vm4391_vm10, %v13833_v45, 0.0 }
0x1e34   : > { %v13837_v24 = vpop.f32.mrf.mxu0  ;;  %4891 = vadd.xlane.f32.xlu0 %v4890_v36 }
0x1e36   : > { %v10887_v30 = vpop.f32.mrf.mxu0  ;;  %v13840_v54 = vpop.eup %11931 }
0x1e37   : > { %v4893_v46 = vsel %vm4391_vm10, %v13840_v54, 0.0 }
0x1e4e   : > { %4894 = vadd.xlane.f32.xlu1 %v4893_v46 }
0x1e51   : > { %v4844_v56 = vpop.xlane.xlu1 %4843 }
0x1e52   : > { %v4865_v52 = vsub.f32 %v13758_v32, %v4844_v56 }
0x1e54   : > { %v4876_v34 = vmul.f32 1.442695, %v4865_v52 }
0x1e55   : > { %v4847_v11 = vpop.xlane.xlu1 %4846 }
0x1e56   : > { %11933 = vpow2.f32 %v4876_v34  ;;  %v4866_v17 = vsub.f32 %v13769_v7, %v4847_v11 }
0x1e58   : > { %v4878_v16 = vmul.f32 1.442695, %v4866_v17 }
0x1e59   : > { %v4850_v26 = vpop.xlane.xlu0 %4849  ;;  %v5154_v44 = vpop.permute.xlu1 %5153 }
0x1e5a   : > { %11935 = vpow2.f32 %v4878_v16  ;;  %v4867_v41 = vsub.f32 %v13774_v55, %v4850_v26  ;;  %v5180_v5 = vsel %vm969_vm3, %v5154_v44, 0 }
0x1e5b   : > { %10993 = vmatpush3.bf16.xpose.msra.mxu0 %v5180_v5 }
0x1e5c   : > { %v4880_v23 = vmul.f32 1.442695, %v4867_v41  ;;  %10994 = vmatprep.subr.bf16.mxu0 %v16303_v47 }
0x1e5d   : > { %v5152_v40 = vpop.permute.xlu0 %5151 }
0x1e5e   : > { %11937 = vpow2.f32 %v4880_v23  ;;  %v5177_v32 = vsel %vm969_vm3, %v5152_v40, 0 }
0x1e5f   : > { %5602 = vrot.lane.b32.xlu1 %v13525_v31, %s16328_s29 }
0x1e63   : > { %v13852_v7 = vpop.eup %11933  ;;  %5598 = vrot.lane.b32.xlu1 %v13541_v4, %s16328_s29  ;;  %10995 = vmatpush3.bf16.xpose.msra.mxu0 %v5177_v32 }
0x1e64   : > { %v4896_v55 = vsel %vm4391_vm10, %v13852_v7, 0.0  ;;  %11042 = vmatprep.subr.bf16.mxu0 %v16303_v47 }
0x1e65   : > { %v13859_v49 = vpop.f32.mrf.mxu0  ;;  %4897 = vadd.xlane.f32.xlu0 %v4896_v55 }
0x1e67   : > { %v13861_v6 = vpop.eup %11935  ;;  %v10890_v50 = vpop.f32.mrf.mxu0 }
0x1e68   : > { %v4899_v12 = vsel %vm4391_vm10, %v13861_v6, 0.0 }
0x1e69   : > { %v13865_v20 = vpop.f32.mrf.mxu0  ;;  %4900 = vadd.xlane.f32.xlu0 %v4899_v12 }
0x1e6b   : > { %v13867_v29 = vpop.eup %11937  ;;  %v10891_v36 = vpop.f32.mrf.mxu0 }
0x1e6c   : > { %v4902_v22 = vsel %vm4391_vm10, %v13867_v29, 0.0 }
0x1e6d   : > { %4903 = vadd.xlane.f32.xlu0 %v4902_v22  ;;  %v13871_v30 = vpop.f32.mrf.mxu0 }
0x1e6f   : > { %v10894_v39 = vpop.f32.mrf.mxu0 }
0x1e71   : > { %v13873_v46 = vpop.f32.mrf.mxu0 }
0x1e73   : > { %v10895_v56 = vpop.f32.mrf.mxu0 }
0x1e75   : > { %v13875_v52 = vpop.f32.mrf.mxu0 }
0x1e77   : > { %v10898_v34 = vpop.f32.mrf.mxu0 }
0x1e79   : > { %v4684_v11 = vpop.f32.mrf.mxu0 }
0x1e7b   : > { %v10899_v17 = vpop.f32.mrf.mxu0 }
0x1e7d   : > { %v13877_v16 = vpop.f32.mrf.mxu0 }
0x1e7f   : > { %v10938_v26 = vpop.f32.mrf.mxu0 }
0x1e81   : > { %v13879_v44 = vpop.f32.mrf.mxu0 }
0x1e83   : > { %v10939_v41 = vpop.f32.mrf.mxu0 }
0x1e85   : > { %v13881_v5 = vpop.f32.mrf.mxu0 }
0x1e87   : > { %v10942_v23 = vpop.f32.mrf.mxu0 }
0x1e89   : > { %v5005_v40 = vpop.f32.mrf.mxu0 }
0x1e8a   : > { %v4853_v32 = vpop.xlane.xlu1 %4852 }
0x1e8b   : > { %v4868_v55 = vsub.f32 %v13795_v63, %v4853_v32  ;;  %v10943_v50 = vpop.f32.mrf.mxu0 }
0x1e8d   : > { %v4882_v12 = vmul.f32 1.442695, %v4868_v55  ;;  %v5010_v36 = vpop.f32.mrf.mxu0 }
0x1e8e   : > { %v4862_v22 = vpop.xlane.xlu0 %4861  ;;  %v4856_v39 = vpop.xlane.xlu1 %4855 }
0x1e8f   : > { %11939 = vpow2.f32 %v4882_v12  ;;  %v4869_v56 = vsub.f32 %v13798_v43, %v4856_v39  ;;  %v10946_v34 = vpop.f32.mrf.mxu0  ;;  %v4871_v11 = vsub.f32 %v13801_v14, %v4862_v22  ;;  %v16334_v12 = vmov 0.0  }
0x1e91   : > { %v4884_v17 = vmul.f32 1.442695, %v4869_v56  ;;  %v5013_v26 = vpop.f32.mrf.mxu0  ;;  %v4888_v47 = vmul.f32 1.442695, %v4871_v11 }
0x1e92   : > { %v4859_v41 = vpop.xlane.xlu1 %4858 }
0x1e93   : > { %11941 = vpow2.f32 %v4884_v17  ;;  %v4870_v23 = vsub.f32 %v13806_v18, %v4859_v41  ;;  %v10947_v1 = vpop.f32.mrf.mxu0 }
0x1e95   : > { %v4886_v63 = vmul.f32 1.442695, %v4870_v23  ;;  %v5018_v32 = vpop.f32.mrf.mxu0 }
0x1e96   : > { %v5142_v55 = vpop.permute.xlu1 %5141 }
0x1e97   : > { %11943 = vpow2.f32 %v4886_v63  ;;  %v10950_v50 = vpop.f32.mrf.mxu0  ;;  %10997 = vmatmul.mubr.msk.bf16.vlgmr.msra.gmra.mxu0 %vm969_vm3, %v5142_v55 }
0x1e98   : > { %11000 = vmatprep.mubr.msk.bf16.mxu0 %vm12354_vm9, %v16334_v12  ;;  %11945 = vpow2.f32 %v4888_v47 }
0x1e99   : > { %v5021_v43 = vpop.f32.mrf.mxu0 }
0x1e9a   : > { %v5144_v39 = vpop.permute.xlu1 %5143  ;;  %v5035_v23 = vpack.c.bf16 %v5021_v43, %v5018_v32  ;;  %v5033_v43 = vpack.c.bf16 %v5005_v40, %v13881_v5 }
0x1e9b   : > { %v10951_v22 = vpop.f32.mrf.mxu0 }
0x1e9c   : > { %v13890_v14 = vpop.eup %11939 }
0x1e9d   : > { %v4905_v18 = vsel %vm4391_vm10, %v13890_v14, 0.0  ;;  %v5026_v1 = vpop.f32.mrf.mxu0 }
0x1e9e   : > { %4906 = vadd.xlane.f32.xlu0 %v4905_v18  ;;  %v5036_v56 = vpack.c.bf16 %v5026_v1, %v5026_v1  ;;  %v5146_v18 = vpop.permute.xlu1 %5145  ;;  %v5034_v1 = vpack.c.bf16 %v5013_v26, %v5010_v36  ;;  %v5032_v36 = vpack.c.bf16 %v13879_v44, %v13877_v16 }
0x1e9f   : > { %v10954_v34 = vpop.f32.mrf.mxu0  ;;  %11001 = vmatmul.mubr.msk.bf16.gmra.mxu0 %vm969_vm3, %v5144_v39 }
0x1ea0   : > { %v13895_v11 = vpop.eup %11941  ;;  %v5058_v17 = vsel %vm1152_vm8, %v5036_v56, 0  ;;  %11004 = vmatprep.mubr.msk.bf16.mxu0 %vm12354_vm9, %v16334_v12 }
0x1ea1   : > { %v5029_v47 = vpop.f32.mrf.mxu0  ;;  %10957 = vmatpush3.bf16.msra.mxu1 %v5058_v17  ;;  %v4908_v41 = vsel %vm4391_vm10, %v13895_v11, 0.0  ;;  %v11666_v17 = vld [vmem:[%s16277_s15 + $0x40] sm:$0xff]  }
0x1ea2   : > { %4909 = vadd.xlane.f32.xlu0 %v4908_v41  ;;  %10958 = vmatprep.subr.bf16.mxu1 %v16334_v12  ;;  %v5148_v39 = vpop.permute.xlu1 %5147  ;;  %v11667_v41 = vld [vmem:[%s16277_s15 + $0x38] sm:$0xff]  }
0x1ea3   : > { %v10955_v63 = vpop.f32.mrf.mxu0 }
0x1ea4   : > { %v13903_v55 = vpop.eup %11943 }
0x1ea5   : > { %10959 = vmatpush3.bf16.msra.mxu1 %v5035_v23  ;;  %v4911_v50 = vsel %vm4391_vm10, %v13903_v55, 0.0  ;;  %v13907_v22 = vpop.eup %11945 }
0x1ea6   : > { %4912 = vadd.xlane.f32.xlu0 %v4911_v50  ;;  %10960 = vmatprep.subr.bf16.mxu1 %v16334_v12  ;;  %v4914_v32 = vsel %vm4391_vm10, %v13907_v22, 0.0  ;;  %v5150_v26 = vpop.permute.xlu1 %5149 }
0x1ea7   : > { %11005 = vmatmul.mubr.msk.bf16.gmra.mxu0 %vm969_vm3, %v5146_v18 }
0x1ea8   : > { %11008 = vmatprep.mubr.msk.bf16.mxu0 %vm12354_vm9, %v16334_v12 }
0x1ea9   : > { %10961 = vmatpush3.bf16.msra.mxu1 %v5034_v1 }
0x1eaa   : > { %4915 = vadd.xlane.f32.xlu0 %v4914_v32  ;;  %10962 = vmatprep.subr.bf16.mxu1 %v16334_v12 }
0x1ead   : > { %10963 = vmatpush3.bf16.msra.mxu1 %v5033_v43 }
0x1eae   : > { %10964 = vmatprep.subr.bf16.mxu1 %v16334_v12 }
0x1eaf   : > { %11009 = vmatmul.mubr.msk.bf16.gmra.mxu0 %vm969_vm3, %v5148_v39 }
0x1eb0   : > { %11012 = vmatprep.mubr.msk.bf16.mxu0 %vm12354_vm9, %v16334_v12 }
0x1eb1   : > { %10965 = vmatpush3.bf16.msra.mxu1 %v5032_v36 }
0x1eb2   : > { %11016 = vmatprep.subr.bf16.mxu1 %v16334_v12 }
0x1eb7   : > { %11013 = vmatmul.mubr.msk.bf16.gmra.mxu0 %vm969_vm3, %v5150_v26 }
0x1eb8   : > { %11052 = vmatprep.mubr.msk.bf16.mxu0 %vm12354_vm9, %v16334_v12 }
0x1ebd   : > { %v4892_v16 = vpop.xlane.xlu0 %4891 }
0x1ebe   : > { %11947 = vrcp.f32 %v4892_v16 }
0x1ec0   : > { %5604 = vrot.lane.b32.xlu0 %v13531_v19, %s16328_s29 }
0x1ec4   : > { %5600 = vrot.lane.b32.xlu0 %v13529_v51, %s16328_s29 }
0x1ecb   : > { %v11948_v5 = vpop.eup %11947 }
0x1ecc   : > { %v4926_v56 = vmul.f32 %v11948_v5, %v13833_v45 }
0x1ed7   : > { %v4895_v44 = vpop.xlane.xlu1 %4894 }
0x1ed8   : > { %11949 = vrcp.f32 %v4895_v44 }
0x1ee5   : > { %v11950_v40 = vpop.eup %11949 }
0x1ee6   : > { %v4927_v34 = vmul.f32 %v11950_v40, %v13840_v54  ;;  %v11668_v54 = vld [vmem:[%s16277_s15 + $0x30] sm:$0xff]  }
0x1ee8   : > { %v5037_v47 = vpack.c.bf16 %v4927_v34, %v4926_v56 }
0x1eea   : > { %10967 = vmatmul.mubr.msk.bf16.vlgmr.msra.gmra.mxu1 %vm4391_vm10, %v5037_v47 }
0x1eeb   : > { %10970 = vmatprep.mubr.msk.bf16.mxu1 %vm12354_vm9, %v16334_v12  ;;  %11017 = vmatpush3.bf16.msra.mxu1 %v11666_v17 }
0x1eec   : > { %11018 = vmatprep.subr.bf16.mxu1 %v16334_v12 }
0x1eee   : > { %v4898_v45 = vpop.xlane.xlu0 %4897 }
0x1eef   : > { %11019 = vmatpush3.bf16.msra.mxu1 %v11667_v41  ;;  %11951 = vrcp.f32 %v4898_v45 }
0x1ef0   : > { %11020 = vmatprep.subr.bf16.mxu1 %v16334_v12 }
0x1ef2   : > { %v4901_v23 = vpop.xlane.xlu0 %4900 }
0x1ef3   : > { %11953 = vrcp.f32 %v4901_v23  ;;  %11021 = vmatpush3.bf16.msra.mxu1 %v11668_v54 }
0x1ef4   : > { %11072 = vmatprep.subr.bf16.mxu1 %v16334_v12 }
0x1ef6   : > { %v4904_v43 = vpop.xlane.xlu0 %4903 }
0x1ef7   : > { %11955 = vrcp.f32 %v4904_v43 }
0x1efc   : > { %v11952_v63 = vpop.eup %11951 }
0x1efd   : > { %v4928_v18 = vmul.f32 %v11952_v63, %v13852_v7 }
0x1f00   : > { %v11954_v50 = vpop.eup %11953 }
0x1f01   : > { %v4929_v1 = vmul.f32 %v11954_v50, %v13861_v6 }
0x1f03   : > { %v5038_v32 = vpack.c.bf16 %v4929_v1, %v4928_v18 }
0x1f04   : > { %v11956_v16 = vpop.eup %11955 }
0x1f05   : > { %10971 = vmatmul.mubr.msk.bf16.gmra.mxu1 %vm4391_vm10, %v5038_v32  ;;  %v4930_v7 = vmul.f32 %v11956_v16, %v13867_v29 }
0x1f06   : > { %10974 = vmatprep.mubr.msk.bf16.mxu1 %vm12354_vm9, %v16334_v12 }
0x1f27   : > { %v4907_v39 = vpop.xlane.xlu0 %4906 }
0x1f28   : > { %11957 = vrcp.f32 %v4907_v39 }
0x1f2b   : > { %v4910_v36 = vpop.xlane.xlu0 %4909 }
0x1f2c   : > { %11959 = vrcp.f32 %v4910_v36 }
0x1f2f   : > { %v4913_v26 = vpop.xlane.xlu0 %4912 }
0x1f30   : > { %11961 = vrcp.f32 %v4913_v26 }
0x1f33   : > { %v4916_v44 = vpop.xlane.xlu0 %4915 }
0x1f34   : > { %11963 = vrcp.f32 %v4916_v44 }
0x1f35   : > { %v11958_v5 = vpop.eup %11957 }
0x1f36   : > { %v4931_v6 = vmul.f32 %v11958_v5, %v13890_v14 }
0x1f37   : > { %v5605_v54 = vpop.permute.xlu0 %5604 }
0x1f38   : > { %v5039_v40 = vpack.c.bf16 %v4931_v6, %v4930_v7 }
0x1f39   : > { %v11960_v56 = vpop.eup %11959 }
0x1f3a   : > { %10975 = vmatmul.mubr.msk.bf16.gmra.mxu1 %vm4391_vm10, %v5039_v40  ;;  %v4932_v17 = vmul.f32 %v11960_v56, %v13895_v11  ;;  %v5634_v11 = vsel %vm969_vm3, %v5605_v54, 0 }
0x1f3b   : > { %10978 = vmatprep.mubr.msk.bf16.mxu1 %vm12354_vm9, %v16334_v12  ;;  %v5601_v26 = vpop.permute.xlu0 %5600 }
0x1f3c   : > { %v5628_v6 = vsel %vm969_vm3, %v5601_v26, 0 }
0x1f3d   : > { %v11962_v34 = vpop.eup %11961 }
0x1f3e   : > { %v4933_v47 = vmul.f32 %v11962_v34, %v13903_v55  ;;  %v5603_v55 = vpop.permute.xlu1 %5602 }
0x1f3f   : > { %v5631_v50 = vsel %vm969_vm3, %v5603_v55, 0 }
0x1f40   : > { %v5040_v41 = vpack.c.bf16 %v4933_v47, %v4932_v17 }
0x1f41   : > { %v11964_v45 = vpop.eup %11963 }
0x1f42   : > { %10979 = vmatmul.mubr.msk.bf16.gmra.mxu1 %vm4391_vm10, %v5040_v41  ;;  %v4934_v29 = vmul.f32 %v11964_v45, %v13907_v22  ;;  %v5599_v45 = vpop.permute.xlu1 %5598 }
0x1f43   : > { %10982 = vmatprep.mubr.msk.bf16.mxu1 %vm12354_vm9, %v16334_v12  ;;  %v5625_v55 = vsel %vm969_vm3, %v5599_v45, 0 }
0x1f44   : > { %v5041_v14 = vpack.c.bf16 %v4934_v29, %v4934_v29 }
0x1f4a   : > { %10983 = vmatmul.mubr.msk.bf16.gmra.mxu1 %vm4391_vm10, %v5041_v14 }
0x1f4b   : > { %11022 = vmatprep.mubr.msk.bf16.mxu1 %vm12354_vm9, %v16334_v12 }
0x1f52   : > { %11023 = vmatmul.mubr.msk.bf16.vlgmr.msra.gmra.mxu1 %vm814_vm2, %v13461_v61 }
0x1f53   : > { %11073 = vmatpush3.bf16.xpose.msra.mxu1 %v5634_v11  ;;  %11026 = vmatprep.mubr.msk.bf16.mxu1 %vm12354_vm9, %v16334_v12 }
0x1f54   : > { %11074 = vmatprep.subr.bf16.mxu1 %v16334_v12 }
0x1f57   : > { %v5225_v22 = vpop.f32.mrf.mxu0 }
0x1f58   : > { %v5263_v23 = vmul.f32 0.28867513, %v5225_v22 }
0x1f59   : > { %v10998_v63 = vpop.f32.mrf.mxu0 }
0x1f5a   : > { %v13975_v18 = vadd.f32 %v5263_v23, %v12637_v48  ;;  %11027 = vmatmul.mubr.msk.bf16.gmra.mxu1 %vm814_vm2, %v13473_v57 }
0x1f5b   : > { %11075 = vmatpush3.bf16.xpose.msra.mxu1 %v5631_v50  ;;  %v5228_v1 = vpop.f32.mrf.mxu0  ;;  %11030 = vmatprep.mubr.msk.bf16.mxu1 %vm12354_vm9, %v16334_v12 }
0x1f5c   : > { %v5264_v32 = vmul.f32 0.28867513, %v5228_v1  ;;  %v5281_v43 = vsel %vm4391_vm10, %v13975_v18, -inf  ;;  %11076 = vmatprep.subr.bf16.mxu1 %v16334_v12 }
0x1f5d   : > { %5282 = vmax.xlane.f32.xlu1 %v5281_v43  ;;  %v10999_v39 = vpop.f32.mrf.mxu0 }
0x1f5e   : > { %v13985_v36 = vadd.f32 %v5264_v32, %v12637_v48 }
0x1f5f   : > { %v5233_v16 = vpop.f32.mrf.mxu0 }
0x1f60   : > { %v5265_v44 = vmul.f32 0.28867513, %v5233_v16  ;;  %v5284_v5 = vsel %vm4391_vm10, %v13985_v36, -inf }
0x1f61   : > { %5285 = vmax.xlane.f32.xlu0 %v5284_v5  ;;  %v11002_v7 = vpop.f32.mrf.mxu0 }
0x1f62   : > { %v13991_v40 = vadd.f32 %v5265_v44, %v12637_v48  ;;  %11031 = vmatmul.mubr.msk.bf16.gmra.mxu1 %vm814_vm2, %v13485_v62 }
0x1f63   : > { %11077 = vmatpush3.bf16.xpose.msra.mxu1 %v5628_v6  ;;  %v5236_v56 = vpop.f32.mrf.mxu0  ;;  %11034 = vmatprep.mubr.msk.bf16.mxu1 %vm12354_vm9, %v16334_v12 }
0x1f64   : > { %v5266_v34 = vmul.f32 0.28867513, %v5236_v56  ;;  %v5287_v17 = vsel %vm4391_vm10, %v13991_v40, -inf  ;;  %11078 = vmatprep.subr.bf16.mxu1 %v16334_v12 }
0x1f65   : > { %5288 = vmax.xlane.f32.xlu1 %v5287_v17  ;;  %v11003_v47 = vpop.f32.mrf.mxu0 }
0x1f66   : > { %v14001_v41 = vadd.f32 %v5266_v34, %v12637_v48 }
0x1f67   : > { %v5241_v29 = vpop.f32.mrf.mxu0 }
0x1f68   : > { %v5267_v14 = vmul.f32 0.28867513, %v5241_v29  ;;  %v5290_v54 = vsel %vm4391_vm10, %v14001_v41, -inf }
0x1f69   : > { %5291 = vmax.xlane.f32.xlu1 %v5290_v54  ;;  %v11006_v11 = vpop.f32.mrf.mxu0 }
0x1f6a   : > { %v14007_v22 = vadd.f32 %v5267_v14, %v12637_v48  ;;  %11035 = vmatmul.mubr.msk.bf16.gmra.mxu1 %vm814_vm2, %v13496_v25  ;;  %v12325_v11 = vld [vmem:[%s16281_s19] sm:$0xff] }
0x1f6b   : > { %11079 = vmatpush3.bf16.xpose.msra.mxu1 %v5625_v55  ;;  %v5244_v23 = vpop.f32.mrf.mxu0  ;;  %11038 = vmatprep.mubr.msk.bf16.mxu1 %vm12354_vm9, %v16334_v12  ;;  %v14046_v55 = vrot.slane %v12325_v11, %v12735_v27 }
0x1f6c   : > { %v5293_v63 = vsel %vm4391_vm10, %v14007_v22, -inf  ;;  %11080 = vmatprep.subr.bf16.mxu1 %v16334_v12  ;;  %v5268_v7 = vmul.f32 0.28867513, %v5244_v23 }
0x1f6d   : > { %5294 = vmax.xlane.f32.xlu0 %v5293_v63  ;;  %v11007_v50 = vpop.f32.mrf.mxu0  ;;  %v4687_v63 = vadd.f32 %v13823_v21, %v14046_v55  ;;  %v4689_v21 = vadd.f32 %v13831_v15, %v14046_v55 }
0x1f6e   : > { %v14025_v6 = vadd.f32 %v5268_v7, %v12637_v48  ;;  %v4690_v7 = vadd.f32 %v13837_v24, %v14046_v55 }
0x1f6f   : > { %v5249_v1 = vpop.f32.mrf.mxu0 }
0x1f70   : > { %v5269_v56 = vmul.f32 0.28867513, %v5249_v1  ;;  %v5296_v29 = vsel %vm4391_vm10, %v14025_v6, -inf }
0x1f71   : > { %v11010_v32 = vpop.f32.mrf.mxu0 }
0x1f72   : > { %11039 = vmatmul.mubr.msk.bf16.gmra.mxu1 %vm814_vm2, %v13506_v33  ;;  %v14028_v17 = vadd.f32 %v5269_v56, %v12637_v48 }
0x1f73   : > { %v5252_v43 = vpop.f32.mrf.mxu0  ;;  %11082 = vmatprep.mubr.msk.bf16.mxu1 %vm12354_vm9, %v16334_v12 }
0x1f74   : > { %v5270_v47 = vmul.f32 0.28867513, %v5252_v43  ;;  %v4688_v43 = vadd.f32 %v13829_v9, %v14046_v55 }
0x1f75   : > { %v11011_v39 = vpop.f32.mrf.mxu0 }
0x1f76   : > { %v14036_v14 = vadd.f32 %v5270_v47, %v12637_v48 }
0x1f77   : > { %v5257_v26 = vpop.f32.mrf.mxu0 }
0x1f78   : > { %v5271_v34 = vmul.f32 0.28867513, %v5257_v26  ;;  %v5302_v23 = vsel %vm4391_vm10, %v14036_v14, -inf }
0x1f79   : > { %v11014_v16 = vpop.f32.mrf.mxu0 }
0x1f7a   : > { %5586 = vrot.lane.b32.xlu1 %v13539_v28, %s16329_s24  ;;  %v14031_v45 = vadd.f32 %v5271_v34, %v12637_v48 }
0x1f7b   : > { %v5260_v44 = vpop.f32.mrf.mxu0 }
0x1f7c   : > { %v5305_v54 = vsel %vm4391_vm10, %v14031_v45, -inf }
0x1f7d   : > { %v11015_v5 = vpop.f32.mrf.mxu0 }
0x1f83   : > { %5596 = vrot.lane.b32.xlu0 %v13539_v28, %s16328_s29  ;;  %v5299_v28 = vsel %vm4391_vm10, %v14028_v17, -inf }
0x1f9e   : > { %5297 = vmax.xlane.f32.xlu1 %v5296_v29 }
0x1fa2   : > { %5300 = vmax.xlane.f32.xlu1 %v5299_v28  ;;  %5306 = vmax.xlane.f32.xlu0 %v5305_v54 }
0x1fa6   : > { %5303 = vmax.xlane.f32.xlu1 %v5302_v23 }
0x1faa   : > { %v5094_v50 = vpop.f32.mrf.mxu1 }
0x1fab   : > { %v14052_v1 = vadd.f32 %v5094_v50, %v4687_v63 }
0x1fac   : > { %v10968_v32 = vpop.f32.mrf.mxu1 }
0x1fae   : > { %v5097_v39 = vpop.f32.mrf.mxu1 }
0x1faf   : > { %v14056_v26 = vadd.f32 %v5097_v39, %v4688_v43 }
0x1fb0   : > { %v10969_v16 = vpop.f32.mrf.mxu1 }
0x1fb7   : > { %5588 = vrot.lane.b32.xlu1 %v13541_v4, %s16329_s24 }
0x1fbb   : > { %5590 = vrot.lane.b32.xlu1 %v13529_v51, %s16329_s24 }
0x1fbf   : > { %5592 = vrot.lane.b32.xlu1 %v13525_v31, %s16329_s24 }
0x1fc3   : > { %5594 = vrot.lane.b32.xlu1 %v13531_v19, %s16329_s24 }
0x1fc5   : > { %v5102_v9 = vpop.f32.mrf.mxu1 }
0x1fc6   : > { %v14068_v44 = vadd.f32 %v5102_v9, %v4689_v21 }
0x1fc7   : > { %v10972_v5 = vpop.f32.mrf.mxu1 }
0x1fc9   : > { %v5105_v4 = vpop.f32.mrf.mxu1 }
0x1fca   : > { %v14072_v56 = vadd.f32 %v5105_v4, %v4690_v7 }
0x1fcb   : > { %v10973_v51 = vpop.f32.mrf.mxu1 }
0x1fe6   : > { %v5283_v34 = vpop.xlane.xlu1 %5282 }
0x1fe7   : > { %v5308_v31 = vsub.f32 %v13975_v18, %v5283_v34 }
0x1fe9   : > { %v5317_v47 = vmul.f32 1.442695, %v5308_v31  ;;  %v4693_v31 = vadd.f32 %v13871_v30, %v14046_v55 }
0x1fea   : > { %v5286_v29 = vpop.xlane.xlu0 %5285 }
0x1feb   : > { %11965 = vpow2.f32 %v5317_v47  ;;  %v5309_v15 = vsub.f32 %v13985_v36, %v5286_v29  ;;  %v4691_v36 = vadd.f32 %v13859_v49, %v14046_v55 }
0x1fed   : > { %v5319_v19 = vmul.f32 1.442695, %v5309_v15 }
0x1fee   : > { %v5289_v28 = vpop.xlane.xlu1 %5288 }
0x1fef   : > { %11967 = vpow2.f32 %v5319_v19  ;;  %v5310_v54 = vsub.f32 %v13991_v40, %v5289_v28 }
0x1ff1   : > { %v5321_v11 = vmul.f32 1.442695, %v5310_v54  ;;  %v4694_v54 = vadd.f32 %v13873_v46, %v14046_v55 }
0x1ff2   : > { %v5292_v23 = vpop.xlane.xlu1 %5291 }
0x1ff3   : > { %11969 = vpow2.f32 %v5321_v11  ;;  %v5311_v24 = vsub.f32 %v14001_v41, %v5292_v23 }
0x1ff5   : > { %v5323_v63 = vmul.f32 1.442695, %v5311_v24 }
0x1ff6   : > { %v5295_v50 = vpop.xlane.xlu0 %5294 }
0x1ff7   : > { %11971 = vpow2.f32 %v5323_v63  ;;  %v5312_v18 = vsub.f32 %v14007_v22, %v5295_v50  ;;  %v4692_v22 = vadd.f32 %v13865_v20, %v14046_v55  ;;  %v5587_v20 = vpop.permute.xlu1 %5586  ;;  %v4695_v50 = vadd.f32 %v13875_v52, %v14046_v55 }
0x1ff8   : > { %v14079_v32 = vpop.eup %11965 }
0x1ff9   : > { %v5325_v43 = vmul.f32 1.442695, %v5312_v18  ;;  %v5335_v40 = vsel %vm4391_vm10, %v14079_v32, 0.0 }
0x1ffa   : > { %v5110_v39 = vpop.f32.mrf.mxu1  ;;  %v5597_v16 = vpop.permute.xlu0 %5596  ;;  %5336 = vadd.xlane.f32.xlu0 %v5335_v40 }
0x1ffb   : > { %v14085_v21 = vadd.f32 %v5110_v39, %v4691_v36  ;;  %11973 = vpow2.f32 %v5325_v43  ;;  %v5622_v41 = vsel %vm969_vm3, %v5597_v16, 0 }
0x1ffc   : > { %v10976_v9 = vpop.f32.mrf.mxu1  ;;  %v14088_v5 = vpop.eup %11967  ;;  %11081 = vmatpush3.bf16.xpose.msra.mxu1 %v5622_v41 }
0x1ffd   : > { %v5338_v49 = vsel %vm4391_vm10, %v14088_v5, 0.0  ;;  %11128 = vmatprep.subr.bf16.mxu1 %v16334_v12 }
0x1ffe   : > { %v5113_v7 = vpop.f32.mrf.mxu1  ;;  %5339 = vadd.xlane.f32.xlu1 %v5338_v49 }
0x1fff   : > { %v14095_v4 = vadd.f32 %v5113_v7, %v4692_v22 }
0x2000   : > { %v10977_v51 = vpop.f32.mrf.mxu1  ;;  %v14097_v34 = vpop.eup %11969 }
0x2001   : > { %v5341_v47 = vsel %vm4391_vm10, %v14097_v34, 0.0 }
0x2002   : > { %v5118_v29 = vpop.f32.mrf.mxu1  ;;  %5342 = vadd.xlane.f32.xlu0 %v5341_v47 }
0x2003   : > { %v14103_v15 = vadd.f32 %v5118_v29, %v4693_v31  ;;  %11083 = vmatmul.mubr.msk.bf16.vlgmr.msra.gmra.mxu1 %vm969_vm3, %v5587_v20 }
0x2004   : > { %v14106_v19 = vpop.eup %11971  ;;  %v10980_v28 = vpop.f32.mrf.mxu1  ;;  %11086 = vmatprep.mubr.msk.bf16.mxu1 %vm12354_vm9, %v16334_v12 }
0x2005   : > { %v5344_v30 = vsel %vm4391_vm10, %v14106_v19, 0.0 }
0x2006   : > { %v5121_v11 = vpop.f32.mrf.mxu1  ;;  %5345 = vadd.xlane.f32.xlu0 %v5344_v30 }
0x2007   : > { %v14114_v23 = vadd.f32 %v5121_v11, %v4694_v54 }
0x2008   : > { %v14116_v24 = vpop.eup %11973  ;;  %v10981_v63 = vpop.f32.mrf.mxu1 }
0x2009   : > { %v5347_v18 = vsel %vm4391_vm10, %v14116_v24, 0.0 }
0x200a   : > { %v5126_v36 = vpop.f32.mrf.mxu1  ;;  %5348 = vadd.xlane.f32.xlu0 %v5347_v18 }
0x200b   : > { %v14122_v43 = vadd.f32 %v5126_v36, %v4695_v50 }
0x200c   : > { %v10984_v46 = vpop.f32.mrf.mxu1 }
0x200e   : > { %v5129_v39 = vpop.f32.mrf.mxu1 }
0x2010   : > { %v10985_v40 = vpop.f32.mrf.mxu1 }
0x2012   : > { %v14124_v16 = vpop.f32.mrf.mxu1 }
0x2014   : > { %v11024_v41 = vpop.f32.mrf.mxu1 }
0x2016   : > { %v14126_v9 = vpop.f32.mrf.mxu1 }
0x2018   : > { %v11025_v22 = vpop.f32.mrf.mxu1 }
0x201a   : > { %v5447_v49 = vpop.f32.mrf.mxu1 }
0x201c   : > { %v11028_v7 = vpop.f32.mrf.mxu1 }
0x201e   : > { %v5450_v51 = vpop.f32.mrf.mxu1 }
0x2020   : > { %v11029_v52 = vpop.f32.mrf.mxu1 }
0x2022   : > { %v5455_v55 = vpop.f32.mrf.mxu1 }
0x2024   : > { %v11032_v31 = vpop.f32.mrf.mxu1 }
0x2026   : > { %v5458_v47 = vpop.f32.mrf.mxu1 }
0x2027   : > { %v5298_v20 = vpop.xlane.xlu1 %5297 }
0x2028   : > { %v5313_v29 = vsub.f32 %v14025_v6, %v5298_v20  ;;  %v11033_v28 = vpop.f32.mrf.mxu1 }
0x202a   : > { %v5327_v54 = vmul.f32 1.442695, %v5313_v29  ;;  %v5463_v30 = vpop.f32.mrf.mxu1 }
0x202b   : > { %v5301_v11 = vpop.xlane.xlu1 %5300  ;;  %v5307_v63 = vpop.xlane.xlu0 %5306 }
0x202c   : > { %11975 = vpow2.f32 %v5327_v54  ;;  %v5314_v50 = vsub.f32 %v14028_v17, %v5301_v11  ;;  %v11036_v18 = vpop.f32.mrf.mxu1  ;;  %v5316_v39 = vsub.f32 %v14031_v45, %v5307_v63 }
0x202e   : > { %v5329_v36 = vmul.f32 1.442695, %v5314_v50  ;;  %v5466_v46 = vpop.f32.mrf.mxu1  ;;  %v5333_v52 = vmul.f32 1.442695, %v5316_v39  ;;  %v5479_v50 = vpack.c.bf16 %v5458_v47, %v5455_v55 }
0x202f   : > { %v5304_v40 = vpop.xlane.xlu1 %5303 }
0x2030   : > { %v5315_v41 = vsub.f32 %v14036_v14, %v5304_v40  ;;  %v11037_v22 = vpop.f32.mrf.mxu1  ;;  %11977 = vpow2.f32 %v5329_v36  ;;  %v5480_v14 = vpack.c.bf16 %v5466_v46, %v5463_v30  ;;  %v5478_v36 = vpack.c.bf16 %v5450_v51, %v5447_v49 }
0x2031   : > { %v5477_v40 = vpack.c.bf16 %v14126_v9, %v14124_v16 }
0x2032   : > { %v5331_v7 = vmul.f32 1.442695, %v5315_v41  ;;  %v5471_v6 = vpop.f32.mrf.mxu1 }
0x2033   : > { %v5481_v31 = vpack.c.bf16 %v5471_v6, %v5471_v6  ;;  %v5589_v20 = vpop.permute.xlu1 %5588 }
0x2034   : > { %11979 = vpow2.f32 %v5331_v7  ;;  %v11040_v29 = vpop.f32.mrf.mxu1  ;;  %11087 = vmatmul.mubr.msk.bf16.gmra.mxu1 %vm969_vm3, %v5589_v20  ;;  %v11669_v20 = vld [vmem:[%s16277_s15 + $0x58] sm:$0xff]  }
0x2035   : > { %v5503_v17 = vsel %vm1152_vm8, %v5481_v31, 0  ;;  %11090 = vmatprep.mubr.msk.bf16.mxu1 %vm12354_vm9, %v16334_v12  ;;  %11981 = vpow2.f32 %v5333_v52 }
0x2036   : > { %v5474_v45 = vpop.f32.mrf.mxu1  ;;  %11043 = vmatpush3.bf16.msra.mxu0 %v5503_v17 }
0x2037   : > { %11044 = vmatprep.subr.bf16.mxu0 %v16334_v12  ;;  %v5591_v63 = vpop.permute.xlu1 %5590  ;;  %v11670_v45 = vld [vmem:[%s16277_s15 + $0x50] sm:$0xff]  }
0x2038   : > { %v11041_v28 = vpop.f32.mrf.mxu1 }
0x2039   : > { %v14137_v54 = vpop.eup %11975  ;;  %v11671_v28 = vld [vmem:[%s16277_s15 + $0x48] sm:$0xff]  }
0x203a   : > { %11045 = vmatpush3.bf16.msra.mxu0 %v5480_v14  ;;  %v5350_v11 = vsel %vm4391_vm10, %v14137_v54, 0.0 }
0x203b   : > { %5351 = vadd.xlane.f32.xlu0 %v5350_v11  ;;  %11046 = vmatprep.subr.bf16.mxu0 %v16334_v12  ;;  %v5593_v47 = vpop.permute.xlu1 %5592 }
0x203c   : > { %11091 = vmatmul.mubr.msk.bf16.gmra.mxu1 %vm969_vm3, %v5591_v63 }
0x203d   : > { %11094 = vmatprep.mubr.msk.bf16.mxu1 %vm12354_vm9, %v16334_v12  ;;  %v14145_v18 = vpop.eup %11977 }
0x203e   : > { %11047 = vmatpush3.bf16.msra.mxu0 %v5479_v50  ;;  %v5353_v30 = vsel %vm4391_vm10, %v14145_v18, 0.0 }
0x203f   : > { %11048 = vmatprep.subr.bf16.mxu0 %v16334_v12  ;;  %5354 = vadd.xlane.f32.xlu0 %v5353_v30  ;;  %v5595_v51 = vpop.permute.xlu1 %5594 }
0x2041   : > { %v14150_v46 = vpop.eup %11979 }
0x2042   : > { %11049 = vmatpush3.bf16.msra.mxu0 %v5478_v36  ;;  %v5356_v55 = vsel %vm4391_vm10, %v14150_v46, 0.0  ;;  %v14155_v39 = vpop.eup %11981 }
0x2043   : > { %11050 = vmatprep.subr.bf16.mxu0 %v16334_v12  ;;  %5357 = vadd.xlane.f32.xlu0 %v5356_v55  ;;  %v5359_v49 = vsel %vm4391_vm10, %v14155_v39, 0.0 }
0x2044   : > { %11095 = vmatmul.mubr.msk.bf16.gmra.mxu1 %vm969_vm3, %v5593_v47 }
0x2045   : > { %11098 = vmatprep.mubr.msk.bf16.mxu1 %vm12354_vm9, %v16334_v12 }
0x2046   : > { %11051 = vmatpush3.bf16.msra.mxu0 %v5477_v40 }
0x2047   : > { %11102 = vmatprep.subr.bf16.mxu0 %v16334_v12  ;;  %5360 = vadd.xlane.f32.xlu0 %v5359_v49 }
0x204c   : > { %11099 = vmatmul.mubr.msk.bf16.gmra.mxu1 %vm969_vm3, %v5595_v51 }
0x204d   : > { %11138 = vmatprep.mubr.msk.bf16.mxu1 %vm12354_vm9, %v16334_v12 }
0x2083   : > { %v5337_v16 = vpop.xlane.xlu0 %5336 }
0x2084   : > { %11983 = vrcp.f32 %v5337_v16 }
0x2087   : > { %v5340_v9 = vpop.xlane.xlu1 %5339 }
0x2088   : > { %11985 = vrcp.f32 %v5340_v9 }
0x208b   : > { %v5343_v41 = vpop.xlane.xlu0 %5342 }
0x208c   : > { %11987 = vrcp.f32 %v5343_v41 }
0x208f   : > { %v5346_v22 = vpop.xlane.xlu0 %5345 }
0x2090   : > { %11989 = vrcp.f32 %v5346_v22 }
0x2091   : > { %v11984_v7 = vpop.eup %11983 }
0x2092   : > { %v5371_v52 = vmul.f32 %v11984_v7, %v14079_v32 }
0x2093   : > { %v5349_v63 = vpop.xlane.xlu0 %5348 }
0x2094   : > { %11991 = vrcp.f32 %v5349_v63 }
0x2095   : > { %v11986_v6 = vpop.eup %11985 }
0x2096   : > { %v5372_v31 = vmul.f32 %v11986_v6, %v14088_v5 }
0x2098   : > { %v5482_v29 = vpack.c.bf16 %v5372_v31, %v5371_v52 }
0x2099   : > { %v11988_v17 = vpop.eup %11987 }
0x209a   : > { %11053 = vmatmul.mubr.msk.bf16.vlgmr.msra.gmra.mxu0 %vm4391_vm10, %v5482_v29  ;;  %v5373_v5 = vmul.f32 %v11988_v17, %v14097_v34 }
0x209b   : > { %11056 = vmatprep.mubr.msk.bf16.mxu0 %vm12354_vm9, %v16334_v12  ;;  %11103 = vmatpush3.bf16.msra.mxu0 %v11669_v20 }
0x209c   : > { %11104 = vmatprep.subr.bf16.mxu0 %v16334_v12 }
0x209d   : > { %v11990_v32 = vpop.eup %11989 }
0x209e   : > { %v5374_v14 = vmul.f32 %v11990_v32, %v14106_v19 }
0x209f   : > { %11105 = vmatpush3.bf16.msra.mxu0 %v11670_v45 }
0x20a0   : > { %v5483_v11 = vpack.c.bf16 %v5374_v14, %v5373_v5  ;;  %11106 = vmatprep.subr.bf16.mxu0 %v16334_v12 }
0x20a1   : > { %v11992_v22 = vpop.eup %11991 }
0x20a2   : > { %11057 = vmatmul.mubr.msk.bf16.gmra.mxu0 %vm4391_vm10, %v5483_v11  ;;  %v5375_v52 = vmul.f32 %v11992_v22, %v14116_v24 }
0x20a3   : > { %11060 = vmatprep.mubr.msk.bf16.mxu0 %vm12354_vm9, %v16334_v12  ;;  %11107 = vmatpush3.bf16.msra.mxu0 %v11671_v28 }
0x20c3   : > { %v5670_v50 = vpop.f32.mrf.mxu1 }
0x20c4   : > { %v5708_v34 = vmul.f32 0.28867513, %v5670_v50  ;;  %v5352_v30 = vpop.xlane.xlu0 %5351 }
0x20c5   : > { %11993 = vrcp.f32 %v5352_v30  ;;  %v11084_v19 = vpop.f32.mrf.mxu1 }
0x20c6   : > { %v14190_v36 = vadd.f32 %v5708_v34, %v12637_v48 }
0x20c7   : > { %v5673_v55 = vpop.f32.mrf.mxu1 }
0x20c8   : > { %v5709_v47 = vmul.f32 0.28867513, %v5673_v55  ;;  %v5726_v40 = vsel %vm4391_vm10, %v14190_v36, -inf  ;;  %v5355_v49 = vpop.xlane.xlu0 %5354 }
0x20c9   : > { %v11085_v51 = vpop.f32.mrf.mxu1  ;;  %5727 = vmax.xlane.f32.xlu0 %v5726_v40  ;;  %11995 = vrcp.f32 %v5355_v49 }
0x20ca   : > { %v14195_v16 = vadd.f32 %v5709_v47, %v12637_v48 }
0x20cc   : > { %v5729_v9 = vsel %vm4391_vm10, %v14195_v16, -inf  ;;  %v5358_v41 = vpop.xlane.xlu0 %5357 }
0x20cd   : > { %5730 = vmax.xlane.f32.xlu0 %v5729_v9  ;;  %11997 = vrcp.f32 %v5358_v41 }
0x20d0   : > { %v5361_v7 = vpop.xlane.xlu0 %5360 }
0x20d1   : > { %11999 = vrcp.f32 %v5361_v7 }
0x20d2   : > { %v11994_v6 = vpop.eup %11993 }
0x20d3   : > { %v5376_v31 = vmul.f32 %v11994_v6, %v14137_v54 }
0x20d5   : > { %v5484_v20 = vpack.c.bf16 %v5376_v31, %v5375_v52 }
0x20d6   : > { %v11996_v29 = vpop.eup %11995 }
0x20d7   : > { %11061 = vmatmul.mubr.msk.bf16.gmra.mxu0 %vm4391_vm10, %v5484_v20  ;;  %v5377_v45 = vmul.f32 %v11996_v29, %v14145_v18 }
0x20d8   : > { %11064 = vmatprep.mubr.msk.bf16.mxu0 %vm12354_vm9, %v16334_v12 }
0x20da   : > { %v11998_v17 = vpop.eup %11997 }
0x20db   : > { %v5378_v32 = vmul.f32 %v11998_v17, %v14150_v46 }
0x20dd   : > { %v5485_v5 = vpack.c.bf16 %v5378_v32, %v5377_v45 }
0x20de   : > { %v12000_v14 = vpop.eup %11999 }
0x20df   : > { %11065 = vmatmul.mubr.msk.bf16.gmra.mxu0 %vm4391_vm10, %v5485_v5  ;;  %v5379_v24 = vmul.f32 %v12000_v14, %v14155_v39 }
0x20e0   : > { %11068 = vmatprep.mubr.msk.bf16.mxu0 %vm12354_vm9, %v16334_v12 }
0x20e1   : > { %v5486_v54 = vpack.c.bf16 %v5379_v24, %v5379_v24 }
0x20e7   : > { %11069 = vmatmul.mubr.msk.bf16.gmra.mxu0 %vm4391_vm10, %v5486_v54 }
0x20e8   : > { %11108 = vmatprep.mubr.msk.bf16.mxu0 %vm12354_vm9, %v16334_v12 }
0x20ef   : > { %11109 = vmatmul.mubr.msk.bf16.vlgmr.msra.gmra.mxu0 %vm814_vm2, %v13461_v61 }
0x20f0   : > { %11112 = vmatprep.mubr.msk.bf16.mxu0 %vm12354_vm9, %v16334_v12 }
0x20f4   : > { %v5678_v18 = vpop.f32.mrf.mxu1 }
0x20f5   : > { %v5710_v46 = vmul.f32 0.28867513, %v5678_v18 }
0x20f6   : > { %v11088_v28 = vpop.f32.mrf.mxu1 }
0x20f7   : > { %v14218_v11 = vadd.f32 %v5710_v46, %v12637_v48  ;;  %11113 = vmatmul.mubr.msk.bf16.gmra.mxu0 %vm814_vm2, %v13473_v57  ;;  %v16335_v46 = vmov 0  }
0x20f8   : > { %v5681_v39 = vpop.f32.mrf.mxu1  ;;  %11116 = vmatprep.mubr.msk.bf16.mxu0 %vm12354_vm9, %v16334_v12 }
0x20f9   : > { %v5711_v63 = vmul.f32 0.28867513, %v5681_v39  ;;  %v5732_v50 = vsel %vm4391_vm10, %v14218_v11, -inf }
0x20fa   : > { %5733 = vmax.xlane.f32.xlu1 %v5732_v50  ;;  %v11089_v61 = vpop.f32.mrf.mxu1 }
0x20fb   : > { %v14227_v34 = vadd.f32 %v5711_v63, %v12637_v48 }
0x20fc   : > { %v5686_v30 = vpop.f32.mrf.mxu1 }
0x20fd   : > { %v5712_v19 = vmul.f32 0.28867513, %v5686_v30  ;;  %v5735_v55 = vsel %vm4391_vm10, %v14227_v34, -inf }
0x20fe   : > { %5736 = vmax.xlane.f32.xlu0 %v5735_v55  ;;  %v11092_v57 = vpop.f32.mrf.mxu1 }
0x20ff   : > { %v14232_v47 = vadd.f32 %v5712_v19, %v12637_v48  ;;  %11117 = vmatmul.mubr.msk.bf16.gmra.mxu0 %vm814_vm2, %v13485_v62 }
0x2100   : > { %v5689_v40 = vpop.f32.mrf.mxu1  ;;  %11120 = vmatprep.mubr.msk.bf16.mxu0 %vm12354_vm9, %v16334_v12 }
0x2101   : > { %v5713_v49 = vmul.f32 0.28867513, %v5689_v40  ;;  %v5738_v51 = vsel %vm4391_vm10, %v14232_v47, -inf }
0x2102   : > { %5739 = vmax.xlane.f32.xlu1 %v5738_v51  ;;  %v11093_v9 = vpop.f32.mrf.mxu1 }
0x2103   : > { %v14241_v41 = vadd.f32 %v5713_v49, %v12637_v48 }
0x2104   : > { %v5694_v22 = vpop.f32.mrf.mxu1 }
0x2105   : > { %v5714_v7 = vmul.f32 0.28867513, %v5694_v22  ;;  %v5741_v6 = vsel %vm4391_vm10, %v14241_v41, -inf }
0x2106   : > { %5742 = vmax.xlane.f32.xlu0 %v5741_v6  ;;  %v11096_v62 = vpop.f32.mrf.mxu1 }
0x2107   : > { %v14246_v52 = vadd.f32 %v5714_v7, %v12637_v48  ;;  %11121 = vmatmul.mubr.msk.bf16.gmra.mxu0 %vm814_vm2, %v13496_v25 }
0x2108   : > { %v5697_v31 = vpop.f32.mrf.mxu1  ;;  %11124 = vmatprep.mubr.msk.bf16.mxu0 %vm12354_vm9, %v16334_v12 }
0x2109   : > { %v5715_v20 = vmul.f32 0.28867513, %v5697_v31  ;;  %v5744_v29 = vsel %vm4391_vm10, %v14246_v52, -inf }
0x210a   : > { %5745 = vmax.xlane.f32.xlu1 %v5744_v29  ;;  %v11097_v17 = vpop.f32.mrf.mxu1 }
0x210b   : > { %v14255_v45 = vadd.f32 %v5715_v20, %v12637_v48 }
0x210c   : > { %v5702_v32 = vpop.f32.mrf.mxu1 }
0x210d   : > { %v5716_v5 = vmul.f32 0.28867513, %v5702_v32  ;;  %v5747_v14 = vsel %vm4391_vm10, %v14255_v45, -inf }
0x210e   : > { %5748 = vmax.xlane.f32.xlu0 %v5747_v14  ;;  %v11100_v25 = vpop.f32.mrf.mxu1 }
0x210f   : > { %v14260_v24 = vadd.f32 %v5716_v5, %v12637_v48  ;;  %11125 = vmatmul.mubr.msk.bf16.gmra.mxu0 %vm814_vm2, %v13506_v33 }
0x2110   : > { %v5705_v54 = vpop.f32.mrf.mxu1  ;;  %6283 = vmatprep.mubr.bf16.mxu0 %v16335_v46 }
0x2111   : > { %v5750_v18 = vsel %vm4391_vm10, %v14260_v24, -inf }
0x2112   : > { %5751 = vmax.xlane.f32.xlu1 %v5750_v18  ;;  %v11101_v28 = vpop.f32.mrf.mxu1 }
0x2152   : > { %v5728_v39 = vpop.xlane.xlu0 %5727 }
0x2153   : > { %v5753_v63 = vsub.f32 %v14190_v36, %v5728_v39 }
0x2155   : > { %v5762_v50 = vmul.f32 1.442695, %v5753_v63 }
0x2156   : > { %v5731_v61 = vpop.xlane.xlu0 %5730 }
0x2157   : > { %12001 = vpow2.f32 %v5762_v50  ;;  %v5754_v30 = vsub.f32 %v14195_v16, %v5731_v61 }
0x2159   : > { %v5764_v19 = vmul.f32 1.442695, %v5754_v30 }
0x215a   : > { %v5539_v55 = vpop.f32.mrf.mxu0 }
0x215b   : > { %12003 = vpow2.f32 %v5764_v19  ;;  %v14270_v33 = vadd.f32 %v5539_v55, %v14052_v1 }
0x215c   : > { %v11054_v57 = vpop.f32.mrf.mxu0 }
0x215e   : > { %v5542_v40 = vpop.f32.mrf.mxu0 }
0x215f   : > { %v14273_v49 = vadd.f32 %v5542_v40, %v14056_v26 }
0x2160   : > { %v11055_v51 = vpop.f32.mrf.mxu0 }
0x2162   : > { %v5547_v9 = vpop.f32.mrf.mxu0 }
0x2163   : > { %v14276_v36 = vadd.f32 %v5547_v9, %v14068_v44 }
0x2164   : > { %v14278_v22 = vpop.eup %12001  ;;  %v11058_v7 = vpop.f32.mrf.mxu0 }
0x2165   : > { %v5780_v16 = vsel %vm4391_vm10, %v14278_v22, 0.0 }
0x2166   : > { %5781 = vadd.xlane.f32.xlu0 %v5780_v16  ;;  %v5550_v6 = vpop.f32.mrf.mxu0 }
0x2167   : > { %v14283_v1 = vadd.f32 %v5550_v6, %v14072_v56 }
0x2168   : > { %v14285_v62 = vpop.eup %12003  ;;  %v11059_v26 = vpop.f32.mrf.mxu0 }
0x2169   : > { %v5783_v31 = vsel %vm4391_vm10, %v14285_v62, 0.0 }
0x216a   : > { %5784 = vadd.xlane.f32.xlu1 %v5783_v31 }
0x2183   : > { %v5734_v44 = vpop.xlane.xlu1 %5733 }
0x2184   : > { %v5755_v20 = vsub.f32 %v14218_v11, %v5734_v44 }
0x2186   : > { %v5766_v29 = vmul.f32 1.442695, %v5755_v20 }
0x2187   : > { %v5737_v17 = vpop.xlane.xlu0 %5736 }
0x2188   : > { %12005 = vpow2.f32 %v5766_v29  ;;  %v5756_v32 = vsub.f32 %v14227_v34, %v5737_v17 }
0x218a   : > { %v5768_v5 = vmul.f32 1.442695, %v5756_v32 }
0x218b   : > { %v5740_v14 = vpop.xlane.xlu1 %5739 }
0x218c   : > { %12007 = vpow2.f32 %v5768_v5  ;;  %v5757_v56 = vsub.f32 %v14232_v47, %v5740_v14 }
0x218e   : > { %v5770_v25 = vmul.f32 1.442695, %v5757_v56 }
0x218f   : > { %v5743_v54 = vpop.xlane.xlu0 %5742 }
0x2190   : > { %12009 = vpow2.f32 %v5770_v25  ;;  %v5758_v18 = vsub.f32 %v14241_v41, %v5743_v54 }
0x2192   : > { %v5772_v28 = vmul.f32 1.442695, %v5758_v18 }
0x2193   : > { %v5746_v39 = vpop.xlane.xlu1 %5745 }
0x2194   : > { %12011 = vpow2.f32 %v5772_v28  ;;  %v5759_v11 = vsub.f32 %v14246_v52, %v5746_v39 }
0x2195   : > { %v14294_v63 = vpop.eup %12005 }
0x2196   : > { %v5774_v50 = vmul.f32 1.442695, %v5759_v11  ;;  %v5786_v34 = vsel %vm4391_vm10, %v14294_v63, 0.0 }
0x2197   : > { %v5749_v61 = vpop.xlane.xlu0 %5748  ;;  %v5555_v30 = vpop.f32.mrf.mxu0  ;;  %5787 = vadd.xlane.f32.xlu0 %v5786_v34 }
0x2198   : > { %12013 = vpow2.f32 %v5774_v50  ;;  %v5760_v47 = vsub.f32 %v14255_v45, %v5749_v61  ;;  %v14300_v19 = vadd.f32 %v5555_v30, %v14085_v21 }
0x2199   : > { %v14302_v41 = vpop.eup %12007  ;;  %v11062_v55 = vpop.f32.mrf.mxu0 }
0x219a   : > { %v5776_v57 = vmul.f32 1.442695, %v5760_v47  ;;  %v5789_v52 = vsel %vm4391_vm10, %v14302_v41, 0.0 }
0x219b   : > { %5790 = vadd.xlane.f32.xlu1 %v5789_v52  ;;  %v5558_v40 = vpop.f32.mrf.mxu0  ;;  %v5752_v51 = vpop.xlane.xlu1 %5751 }
0x219c   : > { %12015 = vpow2.f32 %v5776_v57  ;;  %v14307_v9 = vadd.f32 %v5558_v40, %v14095_v4  ;;  %v5761_v7 = vsub.f32 %v14260_v24, %v5752_v51 }
0x219d   : > { %v14310_v45 = vpop.eup %12009  ;;  %v11063_v21 = vpop.f32.mrf.mxu0 }
0x219e   : > { %v5778_v16 = vmul.f32 1.442695, %v5761_v7  ;;  %v5792_v6 = vsel %vm4391_vm10, %v14310_v45, 0.0 }
0x219f   : > { %5793 = vadd.xlane.f32.xlu0 %v5792_v6  ;;  %v5563_v26 = vpop.f32.mrf.mxu0 }
0x21a0   : > { %12017 = vpow2.f32 %v5778_v16  ;;  %v14317_v44 = vadd.f32 %v5563_v26, %v14103_v15 }
0x21a1   : > { %v14314_v31 = vpop.eup %12011  ;;  %v11066_v20 = vpop.f32.mrf.mxu0 }
0x21a2   : > { %v5795_v4 = vsel %vm4391_vm10, %v14314_v31, 0.0 }
0x21a3   : > { %5796 = vadd.xlane.f32.xlu1 %v5795_v4  ;;  %v5566_v24 = vpop.f32.mrf.mxu0 }
0x21a4   : > { %v14324_v17 = vadd.f32 %v5566_v24, %v14114_v23 }
0x21a5   : > { %v14321_v29 = vpop.eup %12013  ;;  %v11067_v32 = vpop.f32.mrf.mxu0 }
0x21a6   : > { %v5798_v5 = vsel %vm4391_vm10, %v14321_v29, 0.0 }
0x21a7   : > { %5799 = vadd.xlane.f32.xlu0 %v5798_v5  ;;  %v5571_v14 = vpop.f32.mrf.mxu0 }
0x21a8   : > { %v14331_v15 = vadd.f32 %v5571_v14, %v14122_v43 }
0x21a9   : > { %v14328_v56 = vpop.eup %12015  ;;  %v11070_v25 = vpop.f32.mrf.mxu0 }
0x21aa   : > { %v5801_v54 = vsel %vm4391_vm10, %v14328_v56, 0.0 }
0x21ab   : > { %5802 = vadd.xlane.f32.xlu1 %v5801_v54  ;;  %v5574_v18 = vpop.f32.mrf.mxu0 }
0x21ad   : > { %v14335_v28 = vpop.eup %12017  ;;  %v11071_v23 = vpop.f32.mrf.mxu0 }
0x21ae   : > { %v5804_v39 = vsel %vm4391_vm10, %v14335_v28, 0.0 }
0x21af   : > { %5805 = vadd.xlane.f32.xlu0 %v5804_v39  ;;  %v5884_v11 = vpop.f32.mrf.mxu0 }
0x21b1   : > { %v11110_v50 = vpop.f32.mrf.mxu0 }
0x21b3   : > { %v5887_v34 = vpop.f32.mrf.mxu0 }
0x21b4   : > { %v5922_v18 = vpack.c.bf16 %v5887_v34, %v5884_v11 }
0x21b5   : > { %v11111_v61 = vpop.f32.mrf.mxu0 }
0x21b7   : > { %v5892_v30 = vpop.f32.mrf.mxu0 }
0x21b9   : > { %v11114_v43 = vpop.f32.mrf.mxu0 }
0x21bb   : > { %v5895_v47 = vpop.f32.mrf.mxu0 }
0x21bc   : > { %v5923_v54 = vpack.c.bf16 %v5895_v47, %v5892_v30 }
0x21bd   : > { %v11115_v55 = vpop.f32.mrf.mxu0 }
0x21bf   : > { %v5900_v57 = vpop.f32.mrf.mxu0 }
0x21c1   : > { %v11118_v52 = vpop.f32.mrf.mxu0 }
0x21c3   : > { %v5903_v40 = vpop.f32.mrf.mxu0 }
0x21c4   : > { %v5924_v25 = vpack.c.bf16 %v5903_v40, %v5900_v57 }
0x21c5   : > { %v11119_v51 = vpop.f32.mrf.mxu0 }
0x21c7   : > { %v5908_v7 = vpop.f32.mrf.mxu0 }
0x21c9   : > { %v11122_v21 = vpop.f32.mrf.mxu0 }
0x21cb   : > { %v5911_v16 = vpop.f32.mrf.mxu0 }
0x21cc   : > { %v5925_v5 = vpack.c.bf16 %v5911_v16, %v5908_v7 }
0x21cd   : > { %v11123_v6 = vpop.f32.mrf.mxu0 }
0x21cf   : > { %v5916_v26 = vpop.f32.mrf.mxu0 }
0x21d0   : > { %v5926_v20 = vpack.c.bf16 %v5916_v26, %v5916_v26 }
0x21d1   : > { %v11126_v4 = vpop.f32.mrf.mxu0 }
0x21d2   : > { %v5948_v24 = vsel %vm1152_vm8, %v5926_v20, 0 }
0x21d3   : > { %v5919_v32 = vpop.f32.mrf.mxu0  ;;  %11129 = vmatpush3.bf16.msra.mxu1 %v5948_v24 }
0x21d4   : > { %11130 = vmatprep.subr.bf16.mxu1 %v16334_v12 }
0x21d5   : > { %v11127_v14 = vpop.f32.mrf.mxu0 }
0x21d7   : > { %11131 = vmatpush3.bf16.msra.mxu1 %v5925_v5 }
0x21d8   : > { %11132 = vmatprep.subr.bf16.mxu1 %v16334_v12 }
0x21db   : > { %11133 = vmatpush3.bf16.msra.mxu1 %v5924_v25 }
0x21dc   : > { %11134 = vmatprep.subr.bf16.mxu1 %v16334_v12 }
0x21df   : > { %11135 = vmatpush3.bf16.msra.mxu1 %v5923_v54 }
0x21e0   : > { %11136 = vmatprep.subr.bf16.mxu1 %v16334_v12 }
0x21e3   : > { %11137 = vmatpush3.bf16.msra.mxu1 %v5922_v18 }
0x21e4   : > { %6619 = vmatprep.subr.bf16.mxu1 %v16335_v46 }
0x21ef   : > { %v5782_v23 = vpop.xlane.xlu0 %5781 }
0x21f0   : > { %12019 = vrcp.f32 %v5782_v23 }
0x21f3   : > { %v5785_v39 = vpop.xlane.xlu1 %5784 }
0x21f4   : > { %12021 = vrcp.f32 %v5785_v39 }
0x21fd   : > { %v12020_v50 = vpop.eup %12019 }
0x21fe   : > { %v5816_v43 = vmul.f32 %v12020_v50, %v14278_v22 }
0x2201   : > { %v12022_v61 = vpop.eup %12021 }
0x2202   : > { %v5817_v55 = vmul.f32 %v12022_v61, %v14285_v62 }
0x2204   : > { %v5927_v57 = vpack.c.bf16 %v5817_v55, %v5816_v43 }
0x2206   : > { %11139 = vmatmul.mubr.msk.bf16.vlgmr.msra.gmra.mxu1 %vm4391_vm10, %v5927_v57 }
0x2207   : > { %11142 = vmatprep.mubr.msk.bf16.mxu1 %vm12354_vm9, %v16334_v12 }
0x2220   : > { %v5788_v11 = vpop.xlane.xlu0 %5787 }
0x2221   : > { %12023 = vrcp.f32 %v5788_v11 }
0x2224   : > { %v5791_v34 = vpop.xlane.xlu1 %5790 }
0x2225   : > { %12025 = vrcp.f32 %v5791_v34 }
0x2228   : > { %v5794_v30 = vpop.xlane.xlu0 %5793 }
0x2229   : > { %12027 = vrcp.f32 %v5794_v30 }
0x222c   : > { %v5797_v47 = vpop.xlane.xlu1 %5796 }
0x222d   : > { %12029 = vrcp.f32 %v5797_v47 }
0x222e   : > { %v12024_v52 = vpop.eup %12023 }
0x222f   : > { %v5818_v22 = vmul.f32 %v12024_v52, %v14294_v63 }
0x2230   : > { %v5800_v40 = vpop.xlane.xlu0 %5799 }
0x2231   : > { %12031 = vrcp.f32 %v5800_v40 }
0x2232   : > { %v12026_v51 = vpop.eup %12025 }
0x2233   : > { %v5819_v62 = vmul.f32 %v12026_v51, %v14302_v41 }
0x2234   : > { %v5803_v7 = vpop.xlane.xlu1 %5802 }
0x2235   : > { %12033 = vrcp.f32 %v5803_v7  ;;  %v5928_v21 = vpack.c.bf16 %v5819_v62, %v5818_v22 }
0x2236   : > { %v12028_v16 = vpop.eup %12027 }
0x2237   : > { %11143 = vmatmul.mubr.msk.bf16.gmra.mxu1 %vm4391_vm10, %v5928_v21  ;;  %v5820_v20 = vmul.f32 %v12028_v16, %v14310_v45 }
0x2238   : > { %v5806_v6 = vpop.xlane.xlu0 %5805  ;;  %11146 = vmatprep.mubr.msk.bf16.mxu1 %vm12354_vm9, %v16334_v12 }
0x2239   : > { %12035 = vrcp.f32 %v5806_v6 }
0x223a   : > { %v12030_v26 = vpop.eup %12029 }
0x223b   : > { %v5821_v4 = vmul.f32 %v12030_v26, %v14314_v31 }
0x223d   : > { %v5929_v24 = vpack.c.bf16 %v5821_v4, %v5820_v20 }
0x223e   : > { %v12032_v63 = vpop.eup %12031 }
0x223f   : > { %11147 = vmatmul.mubr.msk.bf16.gmra.mxu1 %vm4391_vm10, %v5929_v24  ;;  %v5822_v32 = vmul.f32 %v12032_v63, %v14321_v29 }
0x2240   : > { %11150 = vmatprep.mubr.msk.bf16.mxu1 %vm12354_vm9, %v16334_v12 }
0x2242   : > { %v12034_v41 = vpop.eup %12033 }
0x2243   : > { %v5823_v5 = vmul.f32 %v12034_v41, %v14328_v56 }
0x2245   : > { %v5930_v14 = vpack.c.bf16 %v5823_v5, %v5822_v32 }
0x2246   : > { %v12036_v25 = vpop.eup %12035 }
0x2247   : > { %11151 = vmatmul.mubr.msk.bf16.gmra.mxu1 %vm4391_vm10, %v5930_v14  ;;  %v5824_v45 = vmul.f32 %v12036_v25, %v14335_v28 }
0x2248   : > { %11154 = vmatprep.mubr.msk.bf16.mxu1 %vm12354_vm9, %v16334_v12 }
0x2249   : > { %v5931_v31 = vpack.c.bf16 %v5824_v45, %v5824_v45 }
0x224f   : > { %11155 = vmatmul.mubr.msk.bf16.gmra.mxu1 %vm4391_vm10, %v5931_v31 }
0x22c6   : > { %v5984_v54 = vpop.f32.mrf.mxu1 }
0x22c7   : > { %v6022_v18 = vadd.f32 %v5984_v54, %v14270_v33 }
0x22c8   : > { %v11140_v23 = vpop.f32.mrf.mxu1 }
0x22c9   : > { %v14369_v29 = vadd.f32 %v6022_v18, %v13338_v53  ;;  %v11674_v23 = vld [vmem:[%s16278_s16 + $0x24] ss:$8 sps:$4 sm:$0xff]  }
0x22ca   : > { %v5987_v56 = vpop.f32.mrf.mxu1  ;;  %6261 = vmatprep.subr.bf16.mxu0 %v11674_v23 }
0x22cb   : > { %v6023_v39 = vadd.f32 %v5987_v56, %v14273_v49  ;;  %v6040_v50 = vsel %vm814_vm2, %v14369_v29, 0.0  ;;  %v11672_v56 = vld [vmem:[%s16278_s16 + $0x20] ss:$8 sps:$4 sm:$0xff]  }
0x22cc   : > { %6041 = vadd.xlane.f32.xlu1 %v6040_v50  ;;  %v11141_v61 = vpop.f32.mrf.mxu1  ;;  %6262 = vmatpush1.bf16.msra.mxu0 %v11672_v56  ;;  %v11675_v50 = vld [vmem:[%s16278_s16 + $0x10] ss:$8 sps:$4 sm:$0xff]  }
0x22cd   : > { %v14375_v28 = vadd.f32 %v6023_v39, %v13296_v8  ;;  %v11677_v39 = vld [vmem:[%s16278_s16 + $0x14] ss:$8 sps:$4 sm:$0xff]   ;;  %v11680_v61 = vld [vmem:[%s16278_s16 + $0x4] ss:$8 sps:$4 sm:$0xff]  }
0x22ce   : > { %6263 = vmatprep.subr.bf16.mxu0 %v11677_v39 }
0x22cf   : > { %v6043_v43 = vsel %vm814_vm2, %v14375_v28, 0.0 }
0x22d0   : > { %6044 = vadd.xlane.f32.xlu0 %v6043_v43  ;;  %6264 = vmatpush1.bf16.msra.mxu0 %v11675_v50  ;;  %v11678_v43 = vld [vmem:[%s16278_s16] ss:$8 sps:$4 sm:$0xff]  }
0x22d1   : > { %6265 = vmatprep.subr.bf16.mxu0 %v11680_v61 }
0x22d4   : > { %6266 = vmatpush1.bf16.msra.mxu0 %v11678_v43 }
0x22d5   : > { %11158 = vmatprep.subr.bf16.mxu0 %v16334_v12 }
0x22f7   : > { %v5992_v33 = vpop.f32.mrf.mxu1 }
0x22f8   : > { %v6024_v55 = vadd.f32 %v5992_v33, %v14276_v36 }
0x22f9   : > { %v11144_v53 = vpop.f32.mrf.mxu1 }
0x22fa   : > { %v14381_v57 = vadd.f32 %v6024_v55, %v13341_v10 }
0x22fb   : > { %v5995_v49 = vpop.f32.mrf.mxu1 }
0x22fc   : > { %v6025_v11 = vadd.f32 %v5995_v49, %v14283_v1  ;;  %v6046_v34 = vsel %vm814_vm2, %v14381_v57, 0.0 }
0x22fd   : > { %6047 = vadd.xlane.f32.xlu1 %v6046_v34  ;;  %v11145_v8 = vpop.f32.mrf.mxu1 }
0x22fe   : > { %v14387_v30 = vadd.f32 %v6025_v11, %v13302_v58 }
0x22ff   : > { %v6000_v47 = vpop.f32.mrf.mxu1 }
0x2300   : > { %v6026_v52 = vadd.f32 %v6000_v47, %v14300_v19  ;;  %v6049_v36 = vsel %vm814_vm2, %v14387_v30, 0.0 }
0x2301   : > { %6050 = vadd.xlane.f32.xlu0 %v6049_v36  ;;  %v11148_v10 = vpop.f32.mrf.mxu1 }
0x2302   : > { %v14393_v40 = vadd.f32 %v6026_v52, %v13352_v13 }
0x2303   : > { %v6003_v1 = vpop.f32.mrf.mxu1 }
0x2304   : > { %v6027_v51 = vadd.f32 %v6003_v1, %v14307_v9  ;;  %v6052_v22 = vsel %vm814_vm2, %v14393_v40, 0.0 }
0x2305   : > { %6053 = vadd.xlane.f32.xlu1 %v6052_v22  ;;  %v11149_v58 = vpop.f32.mrf.mxu1 }
0x2306   : > { %v14399_v62 = vadd.f32 %v6027_v51, %v13313_v37 }
0x2307   : > { %v6008_v19 = vpop.f32.mrf.mxu1 }
0x2308   : > { %v6028_v7 = vadd.f32 %v6008_v19, %v14317_v44  ;;  %v6055_v21 = vsel %vm814_vm2, %v14399_v62, 0.0 }
0x2309   : > { %6056 = vadd.xlane.f32.xlu0 %v6055_v21  ;;  %v11152_v13 = vpop.f32.mrf.mxu1 }
0x230a   : > { %v14405_v16 = vadd.f32 %v6028_v7, %v13356_v35 }
0x230b   : > { %v6011_v9 = vpop.f32.mrf.mxu1 }
0x230c   : > { %v6029_v6 = vadd.f32 %v6011_v9, %v14324_v17  ;;  %v6058_v26 = vsel %vm814_vm2, %v14405_v16, 0.0 }
0x230d   : > { %6059 = vadd.xlane.f32.xlu1 %v6058_v26  ;;  %v11153_v37 = vpop.f32.mrf.mxu1 }
0x230e   : > { %v14411_v20 = vadd.f32 %v6029_v6, %v13318_v3 }
0x230f   : > { %v6016_v44 = vpop.f32.mrf.mxu1 }
0x2310   : > { %v6030_v4 = vadd.f32 %v6016_v44, %v14331_v15  ;;  %v6061_v24 = vsel %vm814_vm2, %v14411_v20, 0.0 }
0x2311   : > { %6062 = vadd.xlane.f32.xlu0 %v6061_v24  ;;  %v11156_v35 = vpop.f32.mrf.mxu1 }
0x2312   : > { %v14417_v63 = vadd.f32 %v6030_v4, %v13369_v59 }
0x2313   : > { %v6019_v17 = vpop.f32.mrf.mxu1 }
0x2314   : > { %v6064_v41 = vsel %vm814_vm2, %v14417_v63, 0.0 }
0x2315   : > { %6065 = vadd.xlane.f32.xlu1 %v6064_v41  ;;  %v11157_v32 = vpop.f32.mrf.mxu1 }
0x2355   : > { %v6042_v5 = vpop.xlane.xlu1 %6041 }
0x2356   : > { %v6067_v3 = vmul.f32 0.020833334, %v6042_v5 }
0x2358   : > { %v14422_v14 = vsub.f32 %v14369_v29, %v6067_v3 }
0x2359   : > { %v6045_v15 = vpop.xlane.xlu0 %6044 }
0x235a   : > { %v6068_v25 = vmul.f32 0.020833334, %v6045_v15  ;;  %v6085_v45 = vmul.f32 %v14422_v14, %v14422_v14 }
0x235c   : > { %v14427_v31 = vsub.f32 %v14375_v28, %v6068_v25  ;;  %v6094_v59 = vsel %vm814_vm2, %v6085_v45, 0.0 }
0x235d   : > { %6095 = vadd.xlane.f32.xlu0 %v6094_v59  ;;  %v11681_v59 = vld [vmem:[%s16280_s18 + $0x38] sm:$0xff]  }
0x235e   : > { %v6086_v54 = vmul.f32 %v14427_v31, %v14427_v31  ;;  %6620 = vmatpush1.bf16.msra.mxu1 %v11681_v59 }
0x235f   : > { %6621 = vmatprep.subr.bf16.mxu1 %v16335_v46 }
0x2360   : > { %v6097_v18 = vsel %vm814_vm2, %v6086_v54, 0.0  ;;  %v11682_v54 = vld [vmem:[%s16280_s18 + $0x30] sm:$0xff]  }
0x2361   : > { %6098 = vadd.xlane.f32.xlu1 %v6097_v18 }
0x2362   : > { %6622 = vmatpush1.bf16.msra.mxu1 %v11682_v54 }
0x2363   : > { %6623 = vmatprep.subr.bf16.mxu1 %v16335_v46 }
0x2386   : > { %v6048_v33 = vpop.xlane.xlu1 %6047 }
0x2387   : > { %v6069_v55 = vmul.f32 0.020833334, %v6048_v33  ;;  %v14505_v33 = vld [vmem:[%s16281_s19] sm:$0xff] }
0x2389   : > { %v14453_v53 = vsub.f32 %v14381_v57, %v6069_v55  ;;  %v14509_v55 = vrot.slane %v14505_v33, %v12828_v38 }
0x238a   : > { %v6051_v49 = vpop.xlane.xlu0 %6050 }
0x238b   : > { %v6070_v11 = vmul.f32 0.020833334, %v6051_v49  ;;  %v6087_v34 = vmul.f32 %v14453_v53, %v14453_v53 }
0x238d   : > { %v14458_v8 = vsub.f32 %v14387_v30, %v6070_v11  ;;  %v6100_v47 = vsel %vm814_vm2, %v6087_v34, 0.0  ;;  %v14514_v34 = vrot.slane %v14505_v33, %v12833_v0 }
0x238e   : > { %6101 = vadd.xlane.f32.xlu0 %v6100_v47  ;;  %v6054_v52 = vpop.xlane.xlu1 %6053 }
0x238f   : > { %v6071_v36 = vmul.f32 0.020833334, %v6054_v52  ;;  %v6088_v10 = vmul.f32 %v14458_v8, %v14458_v8 }
0x2391   : > { %v14464_v1 = vsub.f32 %v14393_v40, %v6071_v36  ;;  %v6103_v51 = vsel %vm814_vm2, %v6088_v10, 0.0 }
0x2392   : > { %v6057_v22 = vpop.xlane.xlu0 %6056  ;;  %6104 = vadd.xlane.f32.xlu1 %v6103_v51 }
0x2393   : > { %v6072_v58 = vmul.f32 0.020833334, %v6057_v22  ;;  %v6089_v19 = vmul.f32 %v14464_v1, %v14464_v1 }
0x2395   : > { %v14470_v7 = vsub.f32 %v14399_v62, %v6072_v58  ;;  %v6106_v21 = vsel %vm814_vm2, %v6089_v19, 0.0 }
0x2396   : > { %6107 = vadd.xlane.f32.xlu0 %v6106_v21  ;;  %v6060_v13 = vpop.xlane.xlu1 %6059 }
0x2397   : > { %v6073_v9 = vmul.f32 0.020833334, %v6060_v13  ;;  %v6090_v6 = vmul.f32 %v14470_v7, %v14470_v7 }
0x2399   : > { %v14476_v26 = vsub.f32 %v14405_v16, %v6073_v9  ;;  %v6109_v37 = vsel %vm814_vm2, %v6090_v6, 0.0 }
0x239a   : > { %v6063_v44 = vpop.xlane.xlu0 %6062  ;;  %6110 = vadd.xlane.f32.xlu1 %v6109_v37 }
0x239b   : > { %v6074_v4 = vmul.f32 0.020833334, %v6063_v44  ;;  %v6091_v24 = vmul.f32 %v14476_v26, %v14476_v26 }
0x239d   : > { %v14482_v35 = vsub.f32 %v14411_v20, %v6074_v4  ;;  %v6112_v17 = vsel %vm814_vm2, %v6091_v24, 0.0 }
0x239e   : > { %6113 = vadd.xlane.f32.xlu0 %v6112_v17  ;;  %v6066_v41 = vpop.xlane.xlu1 %6065 }
0x239f   : > { %v6075_v32 = vmul.f32 0.020833334, %v6066_v41  ;;  %v6092_v5 = vmul.f32 %v14482_v35, %v14482_v35 }
0x23a1   : > { %v14488_v3 = vsub.f32 %v14417_v63, %v6075_v32  ;;  %v6115_v15 = vsel %vm814_vm2, %v6092_v5, 0.0 }
0x23a2   : > { %6116 = vadd.xlane.f32.xlu1 %v6115_v15 }
0x23a3   : > { %v6093_v25 = vmul.f32 %v14488_v3, %v14488_v3 }
0x23a5   : > { %v6118_v45 = vsel %vm814_vm2, %v6093_v25, 0.0 }
0x23a6   : > { %6119 = vadd.xlane.f32.xlu0 %v6118_v45 }
0x23e6   : > { %v6096_v18 = vpop.xlane.xlu0 %6095 }
0x23e7   : > { %v6121_v23 = vmul.f32 0.020833334, %v6096_v18 }
0x23e9   : > { %v6130_v56 = vadd.f32 1e-06, %v6121_v23 }
0x23ea   : > { %v6099_v39 = vpop.xlane.xlu1 %6098 }
0x23eb   : > { %12037 = vrsqrt.f32 %v6130_v56  ;;  %v6122_v50 = vmul.f32 0.020833334, %v6099_v39 }
0x23ed   : > { %v6131_v61 = vadd.f32 1e-06, %v6122_v50 }
0x23ef   : > { %12039 = vrsqrt.f32 %v6131_v61 }
0x23f8   : > { %v12038_v43 = vpop.eup %12037 }
0x23f9   : > { %v6148_v49 = vmul.f32 %v12038_v43, %v14422_v14 }
0x23fb   : > { %v6161_v47 = vmul.f32 %v14509_v55, %v6148_v49 }
0x23fc   : > { %v12040_v11 = vpop.eup %12039 }
0x23fd   : > { %v6149_v52 = vmul.f32 %v12040_v11, %v14427_v31  ;;  %v6174_v10 = vadd.f32 %v14514_v34, %v6161_v47 }
0x23ff   : > { %v6162_v36 = vmul.f32 %v14509_v55, %v6149_v52 }
0x2401   : > { %v6175_v51 = vadd.f32 %v14514_v34, %v6162_v36 }
0x2403   : > { %v6183_v22 = vpack.c.bf16 %v6175_v51, %v6174_v10 }
0x2405   : > { %9985 = vmatmul.mubr.msk.bf16.vlgmr.msra.gmra.mxu0 %vm814_vm2, %v6183_v22 }
0x2406   : > { %6293 = vmatprep.mubr.bf16.mxu0 %v16335_v46 }
0x2417   : > { %v6102_v14 = vpop.xlane.xlu0 %6101 }
0x2418   : > { %v6123_v58 = vmul.f32 0.020833334, %v6102_v14 }
0x241a   : > { %v6132_v19 = vadd.f32 1e-06, %v6123_v58 }
0x241b   : > { %v6105_v21 = vpop.xlane.xlu1 %6104 }
0x241c   : > { %12041 = vrsqrt.f32 %v6132_v19  ;;  %v6124_v13 = vmul.f32 0.020833334, %v6105_v21 }
0x241e   : > { %v6133_v9 = vadd.f32 1e-06, %v6124_v13 }
0x241f   : > { %v6108_v6 = vpop.xlane.xlu0 %6107 }
0x2420   : > { %12043 = vrsqrt.f32 %v6133_v9  ;;  %v6125_v31 = vmul.f32 0.020833334, %v6108_v6 }
0x2422   : > { %v6134_v37 = vadd.f32 1e-06, %v6125_v31 }
0x2423   : > { %v6111_v44 = vpop.xlane.xlu1 %6110 }
0x2424   : > { %12045 = vrsqrt.f32 %v6134_v37  ;;  %v6126_v4 = vmul.f32 0.020833334, %v6111_v44 }
0x2426   : > { %v6135_v24 = vadd.f32 1e-06, %v6126_v4 }
0x2427   : > { %v6114_v17 = vpop.xlane.xlu0 %6113 }
0x2428   : > { %12047 = vrsqrt.f32 %v6135_v24  ;;  %v6127_v41 = vmul.f32 0.020833334, %v6114_v17  ;;  %v11687_v17 = vld [vmem:[%s16280_s18 + $0x8] sm:$0xff]  }
0x2429   : > { %v12042_v32 = vpop.eup %12041 }
0x242a   : > { %v6150_v5 = vmul.f32 %v12042_v32, %v14453_v53  ;;  %v6136_v15 = vadd.f32 1e-06, %v6127_v41  ;;  %v11688_v41 = vld [vmem:[%s16280_s18] sm:$0xff]   ;;  %v11689_v32 = vld [vmem:[%s16280_s18 + $0x58] sm:$0xff]  }
0x242b   : > { %v6117_v25 = vpop.xlane.xlu1 %6116 }
0x242c   : > { %12049 = vrsqrt.f32 %v6136_v15  ;;  %v6128_v45 = vmul.f32 0.020833334, %v6117_v25  ;;  %v6163_v23 = vmul.f32 %v14509_v55, %v6150_v5  ;;  %v11690_v5 = vld [vmem:[%s16280_s18 + $0x50] sm:$0xff]   ;;  %v11691_v15 = vld [vmem:[%s16280_s18 + $0x48] sm:$0xff]   ;;  %v11692_v25 = vld [vmem:[%s16280_s18 + $0x40] sm:$0xff]  }
0x242d   : > { %v12044_v59 = vpop.eup %12043 }
0x242e   : > { %v6151_v54 = vmul.f32 %v12044_v59, %v14458_v8  ;;  %v6137_v18 = vadd.f32 1e-06, %v6128_v45  ;;  %v6176_v53 = vadd.f32 %v14514_v34, %v6163_v23  ;;  %v6194_v45 = vld [vmem:[%s16279_s17] sm:$0x3] }
0x242f   : > { %v6120_v56 = vpop.xlane.xlu0 %6119  ;;  %v14597_v59 = vrot.slane %v6194_v45, %v12567_v60 }
0x2430   : > { %12051 = vrsqrt.f32 %v6137_v18  ;;  %v6129_v39 = vmul.f32 0.020833334, %v6120_v56  ;;  %v6164_v50 = vmul.f32 %v14509_v55, %v6151_v54  ;;  %v14600_v54 = vrot.slane %v6194_v45, %v12577_v2 }
0x2431   : > { %v12046_v61 = vpop.eup %12045 }
0x2432   : > { %v6152_v43 = vmul.f32 %v12046_v61, %v14464_v1  ;;  %v6138_v49 = vadd.f32 1e-06, %v6129_v39  ;;  %v6177_v11 = vadd.f32 %v14514_v34, %v6164_v50 }
0x2434   : > { %12053 = vrsqrt.f32 %v6138_v49  ;;  %v6184_v47 = vpack.c.bf16 %v6177_v11, %v6176_v53  ;;  %v6165_v36 = vmul.f32 %v14509_v55, %v6152_v43 }
0x2435   : > { %v12048_v52 = vpop.eup %12047 }
0x2436   : > { %v6153_v8 = vmul.f32 %v12048_v52, %v14470_v7  ;;  %9986 = vmatmul.mubr.msk.bf16.gmra.mxu0 %vm814_vm2, %v6184_v47  ;;  %v6178_v22 = vadd.f32 %v14514_v34, %v6165_v36 }
0x2437   : > { %6303 = vmatprep.mubr.bf16.mxu0 %v16335_v46 }
0x2438   : > { %v6166_v10 = vmul.f32 %v14509_v55, %v6153_v8 }
0x2439   : > { %v12050_v51 = vpop.eup %12049 }
0x243a   : > { %v6154_v1 = vmul.f32 %v12050_v51, %v14476_v26  ;;  %v6179_v14 = vadd.f32 %v14514_v34, %v6166_v10 }
0x243c   : > { %v6185_v58 = vpack.c.bf16 %v6179_v14, %v6178_v22  ;;  %v6167_v7 = vmul.f32 %v14509_v55, %v6154_v1 }
0x243d   : > { %v12052_v19 = vpop.eup %12051 }
0x243e   : > { %v6155_v21 = vmul.f32 %v12052_v19, %v14482_v35  ;;  %9987 = vmatmul.mubr.msk.bf16.gmra.mxu0 %vm814_vm2, %v6185_v58  ;;  %v6180_v6 = vadd.f32 %v14514_v34, %v6167_v7  ;;  %v11683_v35 = vld [vmem:[%s16280_s18 + $0x28] sm:$0xff]  }
0x243f   : > { %6313 = vmatprep.mubr.bf16.mxu0 %v16335_v46  ;;  %6624 = vmatpush1.bf16.msra.mxu1 %v11683_v35 }
0x2440   : > { %v6168_v13 = vmul.f32 %v14509_v55, %v6155_v21  ;;  %6625 = vmatprep.subr.bf16.mxu1 %v16335_v46 }
0x2441   : > { %v12054_v9 = vpop.eup %12053 }
0x2442   : > { %v6181_v26 = vadd.f32 %v14514_v34, %v6168_v13  ;;  %v6156_v31 = vmul.f32 %v12054_v9, %v14488_v3  ;;  %v11684_v3 = vld [vmem:[%s16280_s18 + $0x20] sm:$0xff]  }
0x2443   : > { %6626 = vmatpush1.bf16.msra.mxu1 %v11684_v3 }
0x2444   : > { %v6186_v37 = vpack.c.bf16 %v6181_v26, %v6180_v6  ;;  %v6169_v44 = vmul.f32 %v14509_v55, %v6156_v31  ;;  %6627 = vmatprep.subr.bf16.mxu1 %v16335_v46  ;;  %v11685_v55 = vld [vmem:[%s16280_s18 + $0x18] sm:$0xff]  }
0x2446   : > { %9988 = vmatmul.mubr.msk.bf16.gmra.mxu0 %vm814_vm2, %v6186_v37  ;;  %v6182_v4 = vadd.f32 %v14514_v34, %v6169_v44  ;;  %v11686_v34 = vld [vmem:[%s16280_s18 + $0x10] sm:$0xff]  }
0x2447   : > { %6323 = vmatprep.mubr.bf16.mxu0 %v16335_v46  ;;  %6628 = vmatpush1.bf16.msra.mxu1 %v11685_v55 }
0x2448   : > { %v6187_v24 = vpack.c.bf16 %v6182_v4, %v6182_v4  ;;  %6629 = vmatprep.subr.bf16.mxu1 %v16335_v46 }
0x244b   : > { %6630 = vmatpush1.bf16.msra.mxu1 %v11686_v34 }
0x244c   : > { %6631 = vmatprep.subr.bf16.mxu1 %v16335_v46 }
0x244e   : > { %9989 = vmatmul.mubr.msk.bf16.gmra.mxu0 %vm814_vm2, %v6187_v24 }
0x244f   : > { %11164 = vmatprep.mubr.msk.bf16.mxu0 %vm12354_vm9, %v16334_v12  ;;  %6632 = vmatpush1.bf16.msra.mxu1 %v11687_v17 }
0x2450   : > { %6633 = vmatprep.subr.bf16.mxu1 %v16335_v46 }
0x2453   : > { %6634 = vmatpush1.bf16.msra.mxu1 %v11688_v41 }
0x2454   : > { %6643 = vmatprep.subr.bf16.mxu1 %v16335_v46 }
0x2457   : > { %6644 = vmatpush2.bf16.msra.mxu1 %v11689_v32 }
0x2458   : > { %6645 = vmatprep.subr.bf16.mxu1 %v16335_v46 }
0x245b   : > { %6646 = vmatpush2.bf16.msra.mxu1 %v11690_v5 }
0x245c   : > { %6647 = vmatprep.subr.bf16.mxu1 %v16335_v46 }
0x245f   : > { %6648 = vmatpush2.bf16.msra.mxu1 %v11691_v15 }
0x2460   : > { %6649 = vmatprep.subr.bf16.mxu1 %v16335_v46 }
0x2463   : > { %6650 = vmatpush2.bf16.msra.mxu1 %v11692_v25 }
0x2464   : > { %11184 = vmatprep.subr.bf16.mxu1 %v16334_v12 }
0x24c5   : > { %v6285_v18 = vpop.f32.mrf.mxu0 }
0x24c6   : > { %v6286_v23 = vadd.f32 %v6285_v18, %v14597_v59 }
0x24c7   : > { %v6287_v56 = vpop.f32.mrf.mxu0 }
0x24c8   : > { %v6332_v39 = vmul.f32 %v6286_v23, %v6286_v23  ;;  %v6288_v50 = vadd.f32 %v6287_v56, %v14600_v54 }
0x24c9   : > { %v6289_v61 = vpop.f32.mrf.mxu0 }
0x24ca   : > { %v6350_v43 = vmul.f32 %v6332_v39, %v6286_v23  ;;  %v6333_v49 = vmul.f32 %v6288_v50, %v6288_v50  ;;  %v6290_v53 = vadd.f32 %v6289_v61, %v14597_v59 }
0x24cb   : > { %v6291_v11 = vpop.f32.mrf.mxu0 }
0x24cc   : > { %v6368_v47 = vmul.f32 0.044715, %v6350_v43  ;;  %v6351_v52 = vmul.f32 %v6333_v49, %v6288_v50  ;;  %v6334_v8 = vmul.f32 %v6290_v53, %v6290_v53  ;;  %v6292_v36 = vadd.f32 %v6291_v11, %v14600_v54 }
0x24ce   : > { %v6386_v10 = vadd.f32 %v6368_v47, %v6286_v23  ;;  %v6369_v51 = vmul.f32 0.044715, %v6351_v52  ;;  %v6352_v1 = vmul.f32 %v6334_v8, %v6290_v53  ;;  %v6335_v22 = vmul.f32 %v6292_v36, %v6292_v36 }
0x24d0   : > { %v6404_v14 = vmul.f32 0.7978846, %v6386_v10  ;;  %v6387_v58 = vadd.f32 %v6369_v51, %v6288_v50  ;;  %v6370_v19 = vmul.f32 0.044715, %v6352_v1  ;;  %v6353_v21 = vmul.f32 %v6335_v22, %v6292_v36 }
0x24d2   : > { %v6405_v7 = vmul.f32 0.7978846, %v6387_v58  ;;  %v6388_v13 = vadd.f32 %v6370_v19, %v6290_v53  ;;  %v6371_v9 = vmul.f32 0.044715, %v6353_v21  ;;  %12055 = vtanh.f32 %v6404_v14 }
0x24d4   : > { %12057 = vtanh.f32 %v6405_v7  ;;  %v6406_v6 = vmul.f32 0.7978846, %v6388_v13  ;;  %v6389_v26 = vadd.f32 %v6371_v9, %v6292_v36 }
0x24d6   : > { %12059 = vtanh.f32 %v6406_v6  ;;  %v6407_v31 = vmul.f32 0.7978846, %v6389_v26 }
0x24d8   : > { %12061 = vtanh.f32 %v6407_v31 }
0x24df   : > { %v12056_v37 = vpop.eup %12055 }
0x24e0   : > { %v6440_v3 = vadd.f32 1.0, %v12056_v37 }
0x24e1   : > { %v12058_v44 = vpop.eup %12057 }
0x24e2   : > { %v6441_v35 = vadd.f32 1.0, %v12058_v44  ;;  %v6458_v32 = vmul.f32 0.5, %v6440_v3 }
0x24e3   : > { %v12060_v4 = vpop.eup %12059 }
0x24e4   : > { %v6442_v24 = vadd.f32 1.0, %v12060_v4  ;;  %v6459_v34 = vmul.f32 0.5, %v6441_v35  ;;  %v6476_v18 = vmul.f32 %v6458_v32, %v6286_v23 }
0x24e5   : > { %v12062_v55 = vpop.eup %12061 }
0x24e6   : > { %v6460_v17 = vmul.f32 0.5, %v6442_v24  ;;  %v6443_v41 = vadd.f32 1.0, %v12062_v55  ;;  %v6477_v25 = vmul.f32 %v6459_v34, %v6288_v50 }
0x24e8   : > { %v6461_v5 = vmul.f32 0.5, %v6443_v41  ;;  %v6478_v15 = vmul.f32 %v6460_v17, %v6290_v53 }
0x24ea   : > { %v6479_v45 = vmul.f32 %v6461_v5, %v6292_v36  ;;  %v6494_v39 = vpack.c.bf16 %v6478_v15, %v6476_v18 }
0x24ec   : > { %v6495_v56 = vpack.c.bf16 %v6479_v45, %v6477_v25 }
0x24ee   : > { %10002 = vmatprep.mubr.msk.bf16.mxu1 %vm759_vm1, %v6495_v56 }
0x24ef   : > { %6652 = vmatmul.mubr.bf16.vlgmr.msra.gmra.mxu1 %v6494_v39 }
0x24f6   : > { %v6295_v61 = vpop.f32.mrf.mxu0 }
0x24f7   : > { %v14608_v43 = vadd.f32 %v6295_v61, %v14597_v59 }
0x24f8   : > { %v6297_v49 = vpop.f32.mrf.mxu0 }
0x24f9   : > { %v6336_v11 = vmul.f32 %v14608_v43, %v14608_v43  ;;  %v14613_v47 = vadd.f32 %v6297_v49, %v14600_v54 }
0x24fa   : > { %v6299_v53 = vpop.f32.mrf.mxu0 }
0x24fb   : > { %v6354_v50 = vmul.f32 %v6336_v11, %v14608_v43  ;;  %v6337_v23 = vmul.f32 %v14613_v47, %v14613_v47  ;;  %v14619_v52 = vadd.f32 %v6299_v53, %v14597_v59 }
0x24fc   : > { %v6301_v8 = vpop.f32.mrf.mxu0 }
0x24fd   : > { %v6372_v36 = vmul.f32 0.044715, %v6354_v50  ;;  %v6355_v10 = vmul.f32 %v6337_v23, %v14613_v47  ;;  %v6338_v51 = vmul.f32 %v14619_v52, %v14619_v52  ;;  %v14625_v1 = vadd.f32 %v6301_v8, %v14600_v54 }
0x24fe   : > { %v6305_v22 = vpop.f32.mrf.mxu0 }
0x24ff   : > { %v6390_v14 = vadd.f32 %v6372_v36, %v14608_v43  ;;  %v6373_v58 = vmul.f32 0.044715, %v6355_v10  ;;  %v6356_v19 = vmul.f32 %v6338_v51, %v14619_v52  ;;  %v6339_v21 = vmul.f32 %v14625_v1, %v14625_v1 }
0x2500   : > { %v14632_v7 = vadd.f32 %v6305_v22, %v14597_v59  ;;  %v6307_v13 = vpop.f32.mrf.mxu0 }
0x2501   : > { %v6408_v9 = vmul.f32 0.7978846, %v6390_v14  ;;  %v6391_v6 = vadd.f32 %v6373_v58, %v14613_v47  ;;  %v6374_v26 = vmul.f32 0.044715, %v6356_v19  ;;  %v6357_v31 = vmul.f32 %v6339_v21, %v14625_v1 }
0x2502   : > { %v6340_v37 = vmul.f32 %v14632_v7, %v14632_v7  ;;  %v14639_v44 = vadd.f32 %v6307_v13, %v14600_v54  ;;  %v6309_v35 = vpop.f32.mrf.mxu0 }
0x2503   : > { %12063 = vtanh.f32 %v6408_v9  ;;  %v6409_v4 = vmul.f32 0.7978846, %v6391_v6  ;;  %v6392_v3 = vadd.f32 %v6374_v26, %v14619_v52  ;;  %v6375_v24 = vmul.f32 0.044715, %v6357_v31 }
0x2504   : > { %v6358_v55 = vmul.f32 %v6340_v37, %v14632_v7  ;;  %v6341_v34 = vmul.f32 %v14639_v44, %v14639_v44  ;;  %v14646_v17 = vadd.f32 %v6309_v35, %v14597_v59  ;;  %v6311_v41 = vpop.f32.mrf.mxu0 }
0x2505   : > { %12065 = vtanh.f32 %v6409_v4  ;;  %v6410_v32 = vmul.f32 0.7978846, %v6392_v3  ;;  %v6393_v5 = vadd.f32 %v6375_v24, %v14625_v1  ;;  %v14650_v15 = vadd.f32 %v6311_v41, %v14600_v54 }
0x2506   : > { %v6376_v25 = vmul.f32 0.044715, %v6358_v55  ;;  %v6359_v45 = vmul.f32 %v6341_v34, %v14639_v44  ;;  %v6342_v18 = vmul.f32 %v14646_v17, %v14646_v17  ;;  %v6315_v56 = vpop.f32.mrf.mxu0 }
0x2507   : > { %12067 = vtanh.f32 %v6410_v32  ;;  %v6411_v39 = vmul.f32 0.7978846, %v6393_v5  ;;  %v6343_v61 = vmul.f32 %v14650_v15, %v14650_v15  ;;  %v14658_v49 = vadd.f32 %v6315_v56, %v14597_v59 }
0x2508   : > { %v6394_v11 = vadd.f32 %v6376_v25, %v14632_v7  ;;  %v6377_v53 = vmul.f32 0.044715, %v6359_v45  ;;  %v6360_v50 = vmul.f32 %v6342_v18, %v14646_v17  ;;  %v6317_v23 = vpop.f32.mrf.mxu0 }
0x2509   : > { %12069 = vtanh.f32 %v6411_v39  ;;  %v6361_v8 = vmul.f32 %v6343_v61, %v14650_v15  ;;  %v6344_v36 = vmul.f32 %v14658_v49, %v14658_v49  ;;  %v14666_v10 = vadd.f32 %v6317_v23, %v14600_v54 }
0x250a   : > { %v6412_v51 = vmul.f32 0.7978846, %v6394_v11  ;;  %v6395_v22 = vadd.f32 %v6377_v53, %v14639_v44  ;;  %v6378_v14 = vmul.f32 0.044715, %v6360_v50  ;;  %v6319_v58 = vpop.f32.mrf.mxu0 }
0x250b   : > { %v6379_v19 = vmul.f32 0.044715, %v6361_v8  ;;  %v6362_v21 = vmul.f32 %v6344_v36, %v14658_v49  ;;  %v6345_v13 = vmul.f32 %v14666_v10, %v14666_v10  ;;  %v14673_v9 = vadd.f32 %v6319_v58, %v14597_v59 }
0x250c   : > { %12071 = vtanh.f32 %v6412_v51  ;;  %v6413_v6 = vmul.f32 0.7978846, %v6395_v22  ;;  %v6396_v26 = vadd.f32 %v6378_v14, %v14646_v17  ;;  %v6321_v31 = vpop.f32.mrf.mxu0 }
0x250d   : > { %v6397_v37 = vadd.f32 %v6379_v19, %v14650_v15  ;;  %v6380_v35 = vmul.f32 0.044715, %v6362_v21  ;;  %v6363_v4 = vmul.f32 %v6345_v13, %v14666_v10  ;;  %v6346_v3 = vmul.f32 %v14673_v9, %v14673_v9 }
0x250e   : > { %12073 = vtanh.f32 %v6413_v6  ;;  %v6414_v24 = vmul.f32 0.7978846, %v6396_v26  ;;  %v14681_v55 = vadd.f32 %v6321_v31, %v14600_v54  ;;  %v6325_v34 = vpop.f32.mrf.mxu0 }
0x250f   : > { %v6415_v41 = vmul.f32 0.7978846, %v6397_v37  ;;  %v6398_v32 = vadd.f32 %v6380_v35, %v14658_v49  ;;  %v6381_v5 = vmul.f32 0.044715, %v6363_v4  ;;  %v6364_v25 = vmul.f32 %v6346_v3, %v14673_v9 }
0x2510   : > { %v12064_v45 = vpop.eup %12063  ;;  %12075 = vtanh.f32 %v6414_v24  ;;  %v6347_v18 = vmul.f32 %v14681_v55, %v14681_v55  ;;  %v14688_v56 = vadd.f32 %v6325_v34, %v14597_v59  ;;  %v6327_v39 = vpop.f32.mrf.mxu0 }
0x2511   : > { %12077 = vtanh.f32 %v6415_v41  ;;  %v6416_v61 = vmul.f32 0.7978846, %v6398_v32  ;;  %v6399_v11 = vadd.f32 %v6381_v5, %v14666_v10  ;;  %v6382_v50 = vmul.f32 0.044715, %v6364_v25 }
0x2512   : > { %v12066_v53 = vpop.eup %12065  ;;  %v6365_v23 = vmul.f32 %v6347_v18, %v14681_v55  ;;  %v6348_v8 = vmul.f32 %v14688_v56, %v14688_v56  ;;  %v14695_v36 = vadd.f32 %v6327_v39, %v14600_v54  ;;  %v6329_v51 = vpop.f32.mrf.mxu0  ;;  %v6444_v22 = vadd.f32 1.0, %v12064_v45 }
0x2513   : > { %v6445_v14 = vadd.f32 1.0, %v12066_v53  ;;  %12079 = vtanh.f32 %v6416_v61  ;;  %v6417_v59 = vmul.f32 0.7978846, %v6399_v11  ;;  %v6400_v19 = vadd.f32 %v6382_v50, %v14673_v9 }
0x2514   : > { %v12068_v58 = vpop.eup %12067  ;;  %v6383_v21 = vmul.f32 0.044715, %v6365_v23  ;;  %v6366_v13 = vmul.f32 %v6348_v8, %v14688_v56  ;;  %v6349_v6 = vmul.f32 %v14695_v36, %v14695_v36  ;;  %v6330_v26 = vpop.f32.mrf.mxu0  ;;  %v6462_v24 = vmul.f32 0.5, %v6444_v22 }
0x2515   : > { %v6446_v31 = vadd.f32 1.0, %v12068_v58  ;;  %12081 = vtanh.f32 %v6417_v59  ;;  %v6418_v54 = vmul.f32 0.7978846, %v6400_v19  ;;  %v6463_v34 = vmul.f32 0.5, %v6445_v14 }
0x2516   : > { %v12070_v37 = vpop.eup %12069  ;;  %v6401_v35 = vadd.f32 %v6383_v21, %v14681_v55  ;;  %v6384_v4 = vmul.f32 0.044715, %v6366_v13  ;;  %v6367_v3 = vmul.f32 %v6349_v6, %v14695_v36  ;;  %v6480_v23 = vmul.f32 %v6462_v24, %v14608_v43 }
0x2517   : > { %v6464_v41 = vmul.f32 0.5, %v6446_v31  ;;  %v6447_v32 = vadd.f32 1.0, %v12070_v37  ;;  %12083 = vtanh.f32 %v6418_v54  ;;  %v6481_v8 = vmul.f32 %v6463_v34, %v14613_v47 }
0x2518   : > { %v6419_v5 = vmul.f32 0.7978846, %v6401_v35  ;;  %v6402_v25 = vadd.f32 %v6384_v4, %v14688_v56  ;;  %v6385_v45 = vmul.f32 0.044715, %v6367_v3 }
0x2519   : > { %v12072_v18 = vpop.eup %12071  ;;  %v6465_v39 = vmul.f32 0.5, %v6447_v32  ;;  %v6482_v61 = vmul.f32 %v6464_v41, %v14619_v52 }
0x251a   : > { %12085 = vtanh.f32 %v6419_v5  ;;  %v6420_v11 = vmul.f32 0.7978846, %v6402_v25  ;;  %v6403_v53 = vadd.f32 %v6385_v45, %v14695_v36  ;;  %v6448_v22 = vadd.f32 1.0, %v12072_v18 }
0x251b   : > { %v12074_v50 = vpop.eup %12073  ;;  %v6483_v51 = vmul.f32 %v6465_v39, %v14625_v1  ;;  %v6496_v52 = vpack.c.bf16 %v6482_v61, %v6480_v23 }
0x251c   : > { %v6449_v14 = vadd.f32 1.0, %v12074_v50  ;;  %12087 = vtanh.f32 %v6420_v11  ;;  %v6421_v59 = vmul.f32 0.7978846, %v6403_v53  ;;  %v6466_v43 = vmul.f32 0.5, %v6448_v22 }
0x251d   : > { %v12076_v58 = vpop.eup %12075  ;;  %v6497_v19 = vpack.c.bf16 %v6483_v51, %v6481_v8 }
0x251e   : > { %v12078_v21 = vpop.eup %12077  ;;  %v6450_v13 = vadd.f32 1.0, %v12076_v58  ;;  %12089 = vtanh.f32 %v6421_v59  ;;  %v6467_v6 = vmul.f32 0.5, %v6449_v14  ;;  %v6484_v3 = vmul.f32 %v6466_v43, %v14632_v7 }
0x251f   : > { %10003 = vmatprep.mubr.msk.bf16.mxu1 %vm759_vm1, %v6497_v19  ;;  %v6451_v26 = vadd.f32 1.0, %v12078_v21 }
0x2520   : > { %v12080_v31 = vpop.eup %12079  ;;  %v6468_v37 = vmul.f32 0.5, %v6450_v13  ;;  %6660 = vmatmul.mubr.bf16.gmra.mxu1 %v6496_v52  ;;  %v6485_v35 = vmul.f32 %v6467_v6, %v14639_v44 }
0x2521   : > { %v6469_v47 = vmul.f32 0.5, %v6451_v26  ;;  %v6452_v41 = vadd.f32 1.0, %v12080_v31 }
0x2522   : > { %v12082_v1 = vpop.eup %12081  ;;  %v6486_v54 = vmul.f32 %v6468_v37, %v14646_v17 }
0x2523   : > { %v6487_v4 = vmul.f32 %v6469_v47, %v14650_v15  ;;  %v6453_v24 = vadd.f32 1.0, %v12082_v1  ;;  %v6470_v11 = vmul.f32 0.5, %v6452_v41 }
0x2524   : > { %v12084_v34 = vpop.eup %12083  ;;  %v6498_v25 = vpack.c.bf16 %v6486_v54, %v6484_v3 }
0x2525   : > { %v6499_v32 = vpack.c.bf16 %v6487_v4, %v6485_v35  ;;  %v6454_v5 = vadd.f32 1.0, %v12084_v34  ;;  %v6471_v18 = vmul.f32 0.5, %v6453_v24  ;;  %v6488_v51 = vmul.f32 %v6470_v11, %v14658_v49 }
0x2526   : > { %v6531_v49 = vrot.slane %v14505_v33, %v12902_v42 }
0x2527   : > { %v12086_v45 = vpop.eup %12085  ;;  %10004 = vmatprep.mubr.msk.bf16.mxu1 %vm759_vm1, %v6499_v32  ;;  %v6472_v39 = vmul.f32 0.5, %v6454_v5  ;;  %v6489_v50 = vmul.f32 %v6471_v18, %v14666_v10 }
0x2528   : > { %6668 = vmatmul.mubr.bf16.gmra.mxu1 %v6498_v25  ;;  %v6455_v61 = vadd.f32 1.0, %v12086_v45 }
0x2529   : > { %v12088_v17 = vpop.eup %12087  ;;  %v6490_v15 = vmul.f32 %v6472_v39, %v14673_v9 }
0x252a   : > { %v6473_v44 = vmul.f32 0.5, %v6455_v61  ;;  %v6456_v7 = vadd.f32 1.0, %v12088_v17 }
0x252b   : > { %v12090_v53 = vpop.eup %12089  ;;  %v6500_v59 = vpack.c.bf16 %v6490_v15, %v6488_v51 }
0x252c   : > { %v6491_v23 = vmul.f32 %v6473_v44, %v14681_v55  ;;  %v6457_v8 = vadd.f32 1.0, %v12090_v53  ;;  %v6474_v58 = vmul.f32 0.5, %v6456_v7 }
0x252e   : > { %v6501_v22 = vpack.c.bf16 %v6491_v23, %v6489_v50  ;;  %v6475_v14 = vmul.f32 0.5, %v6457_v8  ;;  %v6492_v9 = vmul.f32 %v6474_v58, %v14688_v56 }
0x2530   : > { %10005 = vmatprep.mubr.msk.bf16.mxu1 %vm759_vm1, %v6501_v22  ;;  %v6493_v19 = vmul.f32 %v6475_v14, %v14695_v36  ;;  %v6502_v10 = vpack.c.bf16 %v6492_v9, %v6492_v9 }
0x2531   : > { %6676 = vmatmul.mubr.bf16.gmra.mxu1 %v6500_v59 }
0x2532   : > { %v6503_v21 = vpack.c.bf16 %v6493_v19, %v6493_v19 }
0x2534   : > { %10006 = vmatprep.mubr.msk.bf16.mxu1 %vm759_vm1, %v6503_v21 }
0x2539   : > { %6684 = vmatmul.mubr.bf16.gmra.mxu1 %v6502_v10 }
0x253a   : > { %11194 = vmatprep.mubr.msk.bf16.mxu1 %vm12354_vm9, %v16334_v12 }
0x25af   : > { %v6653_v55 = vpop.f32.mrf.mxu1 }
0x25b0   : > { %v6654_v13 = vadd.f32 %v6653_v55, %v6531_v49 }
0x25b1   : > { %v6655_v52 = vpop.f32.mrf.mxu1 }
0x25b2   : > { %v14728_v6 = vadd.f32 %v6654_v13, %v14369_v29  ;;  %v11693_v52 = vld [vmem:[%s16275_s13 + $0x28] sm:$0xff]  }
0x25b3   : > { %v6656_v36 = vpop.f32.mrf.mxu1  ;;  %11159 = vmatpush3.bf16.msra.mxu0 %v11693_v52  ;;  %v6700_v52 = vld [vmem:[%s16281_s19 + $0x8] sm:$0xff] }
0x25b4   : > { %v6657_v26 = vadd.f32 %v6656_v36, %v6531_v49  ;;  %v6701_v56 = vsel %vm814_vm2, %v14728_v6, 0.0  ;;  %11160 = vmatprep.subr.bf16.mxu0 %v16334_v12  ;;  %v11694_v36 = vld [vmem:[%s16275_s13 + $0x20] sm:$0xff]  }
0x25b5   : > { %v6658_v31 = vpop.f32.mrf.mxu1  ;;  %6702 = vadd.xlane.f32.xlu1 %v6701_v56 }
0x25b6   : > { %v14733_v43 = vadd.f32 %v6657_v26, %v14375_v28  ;;  %v11695_v26 = vld [vmem:[%s16275_s13 + $0x18] sm:$0xff]  }
0x25b7   : > { %11161 = vmatpush3.bf16.msra.mxu0 %v11694_v36 }
0x25b8   : > { %v6704_v37 = vsel %vm814_vm2, %v14733_v43, 0.0  ;;  %11162 = vmatprep.subr.bf16.mxu0 %v16334_v12 }
0x25b9   : > { %6705 = vadd.xlane.f32.xlu0 %v6704_v37 }
0x25bb   : > { %11163 = vmatpush3.bf16.msra.mxu0 %v11695_v26  ;;  %v14842_v26 = vrot.slane %v6700_v52, %v12567_v60 }
0x25bc   : > { %11214 = vmatprep.subr.bf16.mxu0 %v16334_v12 }
0x25e0   : > { %v6661_v33 = vpop.f32.mrf.mxu1 }
0x25e1   : > { %v6662_v47 = vadd.f32 %v6661_v33, %v6531_v49 }
0x25e2   : > { %v6663_v1 = vpop.f32.mrf.mxu1 }
0x25e3   : > { %v14738_v29 = vadd.f32 %v6662_v47, %v14381_v57 }
0x25e4   : > { %v6664_v54 = vpop.f32.mrf.mxu1 }
0x25e5   : > { %v6665_v35 = vadd.f32 %v6664_v54, %v6531_v49  ;;  %v6707_v4 = vsel %vm814_vm2, %v14738_v29, 0.0 }
0x25e6   : > { %v6666_v3 = vpop.f32.mrf.mxu1  ;;  %6708 = vadd.xlane.f32.xlu1 %v6707_v4 }
0x25e7   : > { %v14743_v28 = vadd.f32 %v6665_v35, %v14387_v30 }
0x25e8   : > { %v6669_v24 = vpop.f32.mrf.mxu1 }
0x25e9   : > { %v6670_v34 = vadd.f32 %v6669_v24, %v6531_v49  ;;  %v6710_v41 = vsel %vm814_vm2, %v14743_v28, 0.0 }
0x25ea   : > { %6711 = vadd.xlane.f32.xlu0 %v6710_v41  ;;  %v6671_v32 = vpop.f32.mrf.mxu1 }
0x25eb   : > { %v14748_v57 = vadd.f32 %v6670_v34, %v14393_v40 }
0x25ec   : > { %v6672_v5 = vpop.f32.mrf.mxu1 }
0x25ed   : > { %v6673_v25 = vadd.f32 %v6672_v5, %v6531_v49  ;;  %v6713_v45 = vsel %vm814_vm2, %v14748_v57, 0.0 }
0x25ee   : > { %v6674_v18 = vpop.f32.mrf.mxu1  ;;  %6714 = vadd.xlane.f32.xlu1 %v6713_v45 }
0x25ef   : > { %v14753_v30 = vadd.f32 %v6673_v25, %v14399_v62 }
0x25f1   : > { %v6677_v39 = vpop.f32.mrf.mxu1  ;;  %v6716_v61 = vsel %vm814_vm2, %v14753_v30, 0.0 }
0x25f2   : > { %v6678_v17 = vadd.f32 %v6677_v39, %v6531_v49  ;;  %6717 = vadd.xlane.f32.xlu0 %v6716_v61 }
0x25f3   : > { %v6679_v11 = vpop.f32.mrf.mxu1 }
0x25f4   : > { %v14758_v40 = vadd.f32 %v6678_v17, %v14405_v16 }
0x25f5   : > { %v6680_v44 = vpop.f32.mrf.mxu1 }
0x25f6   : > { %v6681_v53 = vadd.f32 %v6680_v44, %v6531_v49  ;;  %v6719_v15 = vsel %vm814_vm2, %v14758_v40, 0.0 }
0x25f7   : > { %v6682_v7 = vpop.f32.mrf.mxu1  ;;  %6720 = vadd.xlane.f32.xlu1 %v6719_v15 }
0x25f8   : > { %v14763_v62 = vadd.f32 %v6681_v53, %v14411_v20 }
0x25f9   : > { %v6685_v50 = vpop.f32.mrf.mxu1 }
0x25fa   : > { %v6686_v23 = vadd.f32 %v6685_v50, %v6531_v49  ;;  %v6722_v8 = vsel %vm814_vm2, %v14763_v62, 0.0 }
0x25fb   : > { %v6687_v51 = vpop.f32.mrf.mxu1  ;;  %6723 = vadd.xlane.f32.xlu0 %v6722_v8 }
0x25fc   : > { %v14768_v16 = vadd.f32 %v6686_v23, %v14417_v63 }
0x25fd   : > { %v6688_v22 = vpop.f32.mrf.mxu1 }
0x25fe   : > { %v6725_v14 = vsel %vm814_vm2, %v14768_v16, 0.0 }
0x25ff   : > { %v6689_v59 = vpop.f32.mrf.mxu1  ;;  %6726 = vadd.xlane.f32.xlu1 %v6725_v14 }
0x263e   : > { %v6703_v58 = vpop.xlane.xlu1 %6702 }
0x263f   : > { %v6728_v19 = vmul.f32 0.020833334, %v6703_v58 }
0x2641   : > { %v14773_v20 = vsub.f32 %v14728_v6, %v6728_v19 }
0x2642   : > { %v6706_v21 = vpop.xlane.xlu0 %6705 }
0x2643   : > { %v6729_v9 = vmul.f32 0.020833334, %v6706_v21  ;;  %v6746_v10 = vmul.f32 %v14773_v20, %v14773_v20 }
0x2645   : > { %v14778_v49 = vsub.f32 %v14733_v43, %v6729_v9  ;;  %v6755_v63 = vsel %vm814_vm2, %v6746_v10, 0.0 }
0x2646   : > { %6756 = vadd.xlane.f32.xlu0 %v6755_v63 }
0x2647   : > { %v6747_v55 = vmul.f32 %v14778_v49, %v14778_v49 }
0x2649   : > { %v6758_v13 = vsel %vm814_vm2, %v6747_v55, 0.0 }
0x264a   : > { %6759 = vadd.xlane.f32.xlu1 %v6758_v13 }
0x266f   : > { %v6709_v56 = vpop.xlane.xlu1 %6708 }
0x2670   : > { %v6730_v31 = vmul.f32 0.020833334, %v6709_v56 }
0x2672   : > { %v14797_v37 = vsub.f32 %v14738_v29, %v6730_v31 }
0x2673   : > { %v6712_v33 = vpop.xlane.xlu0 %6711 }
0x2674   : > { %v6731_v47 = vmul.f32 0.020833334, %v6712_v33  ;;  %v6748_v1 = vmul.f32 %v14797_v37, %v14797_v37  ;;  %v14846_v33 = vrot.slane %v6700_v52, %v12577_v2 }
0x2676   : > { %v14802_v54 = vsub.f32 %v14743_v28, %v6731_v47  ;;  %v6761_v35 = vsel %vm814_vm2, %v6748_v1, 0.0 }
0x2677   : > { %6762 = vadd.xlane.f32.xlu0 %v6761_v35  ;;  %v6715_v4 = vpop.xlane.xlu1 %6714 }
0x2678   : > { %v6732_v3 = vmul.f32 0.020833334, %v6715_v4  ;;  %v6749_v24 = vmul.f32 %v14802_v54, %v14802_v54 }
0x267a   : > { %v14808_v34 = vsub.f32 %v14748_v57, %v6732_v3  ;;  %v6764_v41 = vsel %vm814_vm2, %v6749_v24, 0.0  ;;  %v11696_v24 = vld [vmem:[%s16277_s15 + $0x70] sm:$0xff]  }
0x267b   : > { %v6718_v32 = vpop.xlane.xlu0 %6717  ;;  %6765 = vadd.xlane.f32.xlu1 %v6764_v41 }
0x267c   : > { %v6733_v5 = vmul.f32 0.020833334, %v6718_v32  ;;  %v6750_v25 = vmul.f32 %v14808_v34, %v14808_v34 }
0x267e   : > { %v14814_v45 = vsub.f32 %v14753_v30, %v6733_v5  ;;  %v6767_v18 = vsel %vm814_vm2, %v6750_v25, 0.0 }
0x267f   : > { %6768 = vadd.xlane.f32.xlu0 %v6767_v18 }
0x2680   : > { %v6721_v39 = vpop.xlane.xlu1 %6720  ;;  %v6751_v61 = vmul.f32 %v14814_v45, %v14814_v45 }
0x2681   : > { %v6734_v17 = vmul.f32 0.020833334, %v6721_v39 }
0x2682   : > { %v6770_v11 = vsel %vm814_vm2, %v6751_v61, 0.0 }
0x2683   : > { %v14821_v44 = vsub.f32 %v14758_v40, %v6734_v17  ;;  %6771 = vadd.xlane.f32.xlu1 %v6770_v11 }
0x2684   : > { %v6724_v53 = vpop.xlane.xlu0 %6723 }
0x2685   : > { %v6735_v15 = vmul.f32 0.020833334, %v6724_v53  ;;  %v6752_v7 = vmul.f32 %v14821_v44, %v14821_v44 }
0x2687   : > { %v14826_v50 = vsub.f32 %v14763_v62, %v6735_v15  ;;  %v6773_v23 = vsel %vm814_vm2, %v6752_v7, 0.0 }
0x2688   : > { %6774 = vadd.xlane.f32.xlu0 %v6773_v23  ;;  %v6727_v8 = vpop.xlane.xlu1 %6726 }
0x2689   : > { %v6736_v51 = vmul.f32 0.020833334, %v6727_v8  ;;  %v6753_v22 = vmul.f32 %v14826_v50, %v14826_v50 }
0x268b   : > { %v14832_v14 = vsub.f32 %v14768_v16, %v6736_v51  ;;  %v6776_v59 = vsel %vm814_vm2, %v6753_v22, 0.0 }
0x268c   : > { %6777 = vadd.xlane.f32.xlu1 %v6776_v59 }
0x268d   : > { %v6754_v58 = vmul.f32 %v14832_v14, %v14832_v14 }
0x268f   : > { %v6779_v19 = vsel %vm814_vm2, %v6754_v58, 0.0 }
0x2690   : > { %6780 = vadd.xlane.f32.xlu0 %v6779_v19 }
0x26cf   : > { %v6757_v21 = vpop.xlane.xlu0 %6756 }
0x26d0   : > { %v6782_v9 = vmul.f32 0.020833334, %v6757_v21 }
0x26d2   : > { %v6791_v10 = vadd.f32 1e-06, %v6782_v9 }
0x26d3   : > { %v6760_v63 = vpop.xlane.xlu1 %6759 }
0x26d4   : > { %12091 = vrsqrt.f32 %v6791_v10  ;;  %v6783_v55 = vmul.f32 0.020833334, %v6760_v63 }
0x26d6   : > { %v6792_v13 = vadd.f32 1e-06, %v6783_v55 }
0x26d8   : > { %12093 = vrsqrt.f32 %v6792_v13 }
0x26e1   : > { %v12092_v36 = vpop.eup %12091 }
0x26e2   : > { %v6809_v56 = vmul.f32 %v12092_v36, %v14773_v20  ;;  %v11697_v20 = vld [vmem:[%s16277_s15 + $0x68] sm:$0xff]  }
0x26e4   : > { %v6822_v47 = vmul.f32 %v14842_v26, %v6809_v56 }
0x26e5   : > { %v12094_v31 = vpop.eup %12093 }
0x26e6   : > { %v6810_v1 = vmul.f32 %v12094_v31, %v14778_v49  ;;  %v6835_v4 = vadd.f32 %v14846_v33, %v6822_v47  ;;  %v11698_v49 = vld [vmem:[%s16277_s15 + $0x60] sm:$0xff]  }
0x26e8   : > { %v6823_v35 = vmul.f32 %v14842_v26, %v6810_v1 }
0x26ea   : > { %v6836_v3 = vadd.f32 %v14846_v33, %v6823_v35 }
0x26ec   : > { %v14856_v41 = vpack.c.bf16 %v6836_v3, %v6835_v4 }
0x26ee   : > { %11165 = vmatmul.mubr.msk.bf16.vlgmr.msra.gmra.mxu0 %vm814_vm2, %v14856_v41 }
0x26ef   : > { %11168 = vmatprep.mubr.msk.bf16.mxu0 %vm12354_vm9, %v16334_v12  ;;  %11215 = vmatpush3.bf16.msra.mxu0 %v11696_v24 }
0x26f0   : > { %11216 = vmatprep.subr.bf16.mxu0 %v16334_v12 }
0x26f3   : > { %11217 = vmatpush3.bf16.msra.mxu0 %v11697_v20 }
0x26f4   : > { %11218 = vmatprep.subr.bf16.mxu0 %v16334_v12 }
0x26f7   : > { %11219 = vmatpush3.bf16.msra.mxu0 %v11698_v49 }
0x26f8   : > { %11270 = vmatprep.subr.bf16.mxu0 %v16334_v12 }
0x2700   : > { %v6763_v32 = vpop.xlane.xlu0 %6762 }
0x2701   : > { %v6784_v5 = vmul.f32 0.020833334, %v6763_v32 }
0x2703   : > { %v6793_v25 = vadd.f32 1e-06, %v6784_v5 }
0x2704   : > { %v6766_v18 = vpop.xlane.xlu1 %6765 }
0x2705   : > { %12095 = vrsqrt.f32 %v6793_v25  ;;  %v6785_v39 = vmul.f32 0.020833334, %v6766_v18 }
0x2707   : > { %v6794_v61 = vadd.f32 1e-06, %v6785_v39 }
0x2708   : > { %v6769_v17 = vpop.xlane.xlu0 %6768 }
0x2709   : > { %12097 = vrsqrt.f32 %v6794_v61  ;;  %v6786_v11 = vmul.f32 0.020833334, %v6769_v17 }
0x270b   : > { %v6795_v53 = vadd.f32 1e-06, %v6786_v11 }
0x270c   : > { %v6772_v15 = vpop.xlane.xlu1 %6771 }
0x270d   : > { %12099 = vrsqrt.f32 %v6795_v53  ;;  %v6787_v7 = vmul.f32 0.020833334, %v6772_v15 }
0x270f   : > { %v6796_v23 = vadd.f32 1e-06, %v6787_v7 }
0x2711   : > { %12101 = vrsqrt.f32 %v6796_v23  ;;  %v6775_v8 = vpop.xlane.xlu0 %6774 }
0x2712   : > { %v12096_v51 = vpop.eup %12095  ;;  %v6788_v22 = vmul.f32 0.020833334, %v6775_v8 }
0x2713   : > { %v6811_v59 = vmul.f32 %v12096_v51, %v14797_v37 }
0x2714   : > { %v6797_v58 = vadd.f32 1e-06, %v6788_v22 }
0x2715   : > { %v6778_v19 = vpop.xlane.xlu1 %6777  ;;  %v6824_v63 = vmul.f32 %v14842_v26, %v6811_v59 }
0x2716   : > { %v12098_v21 = vpop.eup %12097  ;;  %12103 = vrsqrt.f32 %v6797_v58  ;;  %v6789_v9 = vmul.f32 0.020833334, %v6778_v19 }
0x2717   : > { %v6812_v10 = vmul.f32 %v12098_v21, %v14802_v54  ;;  %v6837_v37 = vadd.f32 %v14846_v33, %v6824_v63 }
0x2718   : > { %v6798_v55 = vadd.f32 1e-06, %v6789_v9 }
0x2719   : > { %v6781_v13 = vpop.xlane.xlu0 %6780  ;;  %v6825_v52 = vmul.f32 %v14842_v26, %v6812_v10 }
0x271a   : > { %v12100_v36 = vpop.eup %12099  ;;  %12105 = vrsqrt.f32 %v6798_v55  ;;  %v6790_v56 = vmul.f32 0.020833334, %v6781_v13 }
0x271b   : > { %v6813_v31 = vmul.f32 %v12100_v36, %v14808_v34  ;;  %v6838_v47 = vadd.f32 %v14846_v33, %v6825_v52 }
0x271c   : > { %v6799_v1 = vadd.f32 1e-06, %v6790_v56 }
0x271d   : > { %v14878_v35 = vpack.c.bf16 %v6838_v47, %v6837_v37  ;;  %v6826_v3 = vmul.f32 %v14842_v26, %v6813_v31 }
0x271e   : > { %v12102_v4 = vpop.eup %12101  ;;  %12107 = vrsqrt.f32 %v6799_v1 }
0x271f   : > { %v6814_v54 = vmul.f32 %v12102_v4, %v14814_v45  ;;  %11169 = vmatmul.mubr.msk.bf16.gmra.mxu0 %vm814_vm2, %v14878_v35  ;;  %v6839_v20 = vadd.f32 %v14846_v33, %v6826_v3 }
0x2720   : > { %11172 = vmatprep.mubr.msk.bf16.mxu0 %vm12354_vm9, %v16334_v12 }
0x2721   : > { %v6827_v34 = vmul.f32 %v14842_v26, %v6814_v54 }
0x2723   : > { %v12104_v24 = vpop.eup %12103  ;;  %v6840_v49 = vadd.f32 %v14846_v33, %v6827_v34 }
0x2724   : > { %v6815_v32 = vmul.f32 %v12104_v24, %v14821_v44 }
0x2725   : > { %v14890_v5 = vpack.c.bf16 %v6840_v49, %v6839_v20 }
0x2726   : > { %v6828_v18 = vmul.f32 %v14842_v26, %v6815_v32 }
0x2727   : > { %v12106_v45 = vpop.eup %12105  ;;  %11173 = vmatmul.mubr.msk.bf16.gmra.mxu0 %vm814_vm2, %v14890_v5 }
0x2728   : > { %v6816_v25 = vmul.f32 %v12106_v45, %v14826_v50  ;;  %11176 = vmatprep.mubr.msk.bf16.mxu0 %vm12354_vm9, %v16334_v12  ;;  %v6841_v17 = vadd.f32 %v14846_v33, %v6828_v18 }
0x272a   : > { %v6829_v39 = vmul.f32 %v14842_v26, %v6816_v25 }
0x272b   : > { %v12108_v61 = vpop.eup %12107 }
0x272c   : > { %v6842_v44 = vadd.f32 %v14846_v33, %v6829_v39  ;;  %v6817_v11 = vmul.f32 %v12108_v61, %v14832_v14 }
0x272e   : > { %v14902_v53 = vpack.c.bf16 %v6842_v44, %v6841_v17  ;;  %v6830_v15 = vmul.f32 %v14842_v26, %v6817_v11  ;;  %v10014_v26 = vld [vmem:[%s16276_s14 + $0x1] ss:$0 sm:$0xff] }
0x2730   : > { %11177 = vmatmul.mubr.msk.bf16.gmra.mxu0 %vm814_vm2, %v14902_v53  ;;  %v6843_v50 = vadd.f32 %v14846_v33, %v6830_v15 }
0x2731   : > { %11180 = vmatprep.mubr.msk.bf16.mxu0 %vm12354_vm9, %v16334_v12 }
0x2732   : > { %v14910_v7 = vpack.c.bf16 %v6843_v50, %v6843_v50 }
0x2738   : > { %11181 = vmatmul.mubr.msk.bf16.gmra.mxu0 %vm814_vm2, %v14910_v7 }
0x2739   : > { %11220 = vmatprep.mubr.msk.bf16.mxu0 %vm12354_vm9, %v16334_v12 }
0x2740   : > { %11221 = vmatmul.mubr.msk.bf16.vlgmr.msra.gmra.mxu0 %vm814_vm2, %v14856_v41 }
0x2741   : > { %11224 = vmatprep.mubr.msk.bf16.mxu0 %vm12354_vm9, %v16334_v12 }
0x2748   : > { %11225 = vmatmul.mubr.msk.bf16.gmra.mxu0 %vm814_vm2, %v14878_v35 }
0x2749   : > { %11228 = vmatprep.mubr.msk.bf16.mxu0 %vm12354_vm9, %v16334_v12 }
0x2750   : > { %11229 = vmatmul.mubr.msk.bf16.gmra.mxu0 %vm814_vm2, %v14890_v5 }
0x2751   : > { %11232 = vmatprep.mubr.msk.bf16.mxu0 %vm12354_vm9, %v16334_v12 }
0x2758   : > { %11233 = vmatmul.mubr.msk.bf16.gmra.mxu0 %vm814_vm2, %v14902_v53 }
0x2759   : > { %11236 = vmatprep.mubr.msk.bf16.mxu0 %vm12354_vm9, %v16334_v12 }
0x2760   : > { %11237 = vmatmul.mubr.msk.bf16.gmra.mxu0 %vm814_vm2, %v14910_v7 }
0x2761   : > { %11280 = vmatprep.mubr.msk.bf16.mxu0 %vm12354_vm9, %v16334_v12 }
0x27ae   : > { %v6931_v14 = vpop.f32.mrf.mxu0 }
0x27af   : > { %v6932_v8 = vadd.f32 %v10014_v26, %v6931_v14 }
0x27b0   : > { %v11166_v33 = vpop.f32.mrf.mxu0 }
0x27b2   : > { %v6934_v23 = vpop.f32.mrf.mxu0 }
0x27b3   : > { %v6935_v51 = vadd.f32 %v10014_v26, %v6934_v23 }
0x27b4   : > { %v11167_v22 = vpop.f32.mrf.mxu0 }
0x27b5   : > { %v14939_v59 = vpack.c.bf16 %v6935_v51, %v6932_v8 }
0x27df   : > { %v6939_v58 = vpop.f32.mrf.mxu0 }
0x27e0   : > { %v6940_v39 = vadd.f32 %v10014_v26, %v6939_v58 }
0x27e1   : > { %v11170_v19 = vpop.f32.mrf.mxu0 }
0x27e3   : > { %v6942_v21 = vpop.f32.mrf.mxu0 }
0x27e4   : > { %v6943_v25 = vadd.f32 %v10014_v26, %v6942_v21 }
0x27e5   : > { %v11171_v9 = vpop.f32.mrf.mxu0 }
0x27e6   : > { %v14959_v17 = vpack.c.bf16 %v6943_v25, %v6940_v39 }
0x27e7   : > { %v6947_v10 = vpop.f32.mrf.mxu0 }
0x27e8   : > { %v6948_v3 = vadd.f32 %v10014_v26, %v6947_v10 }
0x27e9   : > { %v11174_v63 = vpop.f32.mrf.mxu0 }
0x27eb   : > { %v6950_v55 = vpop.f32.mrf.mxu0 }
0x27ec   : > { %v6951_v1 = vadd.f32 %v10014_v26, %v6950_v55 }
0x27ed   : > { %v11175_v13 = vpop.f32.mrf.mxu0 }
0x27ee   : > { %v14945_v20 = vpack.c.bf16 %v6951_v1, %v6948_v3 }
0x27f0   : > { %v6955_v52 = vpop.f32.mrf.mxu0 }
0x27f1   : > { %v6956_v31 = vadd.f32 %v10014_v26, %v6955_v52 }
0x27f2   : > { %v11178_v36 = vpop.f32.mrf.mxu0 }
0x27f4   : > { %v6958_v56 = vpop.f32.mrf.mxu0 }
0x27f5   : > { %v6959_v37 = vadd.f32 %v10014_v26, %v6958_v56 }
0x27f6   : > { %v11179_v47 = vpop.f32.mrf.mxu0 }
0x27f7   : > { %v14941_v4 = vpack.c.bf16 %v6959_v37, %v6956_v31 }
0x27f8   : > { %v6963_v54 = vpop.f32.mrf.mxu0 }
0x27f9   : > { %v6964_v34 = vadd.f32 %v10014_v26, %v6963_v54  ;;  %6990 = vrot.lane.b32.xlu0 %v14941_v4, %s16332_s2 }
0x27fa   : > { %v11182_v24 = vpop.f32.mrf.mxu0 }
0x27fb   : > { %v14947_v49 = vpack.c.bf16 %v6964_v34, %v6964_v34 }
0x27fc   : > { %v6966_v32 = vpop.f32.mrf.mxu0 }
0x27fd   : > { %7433 = vrot.lane.b32.xlu0 %v14945_v20, %s16325_s25  ;;  %6992 = vrot.lane.b32.xlu1 %v14947_v49, %s16332_s2 }
0x27fe   : > { %v11183_v45 = vpop.f32.mrf.mxu0 }
0x2800   : > { %v14953_v18 = vpop.f32.mrf.mxu0 }
0x2801   : > { %7429 = vrot.lane.b32.xlu0 %v14939_v59, %s16325_s25  ;;  %6988 = vrot.lane.b32.xlu1 %v14945_v20, %s16332_s2 }
0x2802   : > { %v11222_v61 = vpop.f32.mrf.mxu0 }
0x2804   : > { %v14961_v44 = vpop.f32.mrf.mxu0 }
0x2805   : > { %v7310_v11 = vpack.c.bf16 %v14961_v44, %v14953_v18  ;;  %7419 = vrot.lane.b32.xlu0 %v14939_v59, %s16333_s30  ;;  %6986 = vrot.lane.b32.xlu1 %v14959_v17, %s16332_s2 }
0x2806   : > { %v11223_v15 = vpop.f32.mrf.mxu0 }
0x2808   : > { %v14969_v50 = vpop.f32.mrf.mxu0 }
0x2809   : > { %7437 = vrot.lane.b32.xlu0 %v14947_v49, %s16325_s25  ;;  %6984 = vrot.lane.b32.xlu1 %v14939_v59, %s16332_s2 }
0x280a   : > { %v11226_v14 = vpop.f32.mrf.mxu0 }
0x280c   : > { %v14975_v26 = vpop.f32.mrf.mxu0 }
0x280d   : > { %v7311_v33 = vpack.c.bf16 %v14975_v26, %v14969_v50  ;;  %7435 = vrot.lane.b32.xlu1 %v14941_v4, %s16325_s25 }
0x280e   : > { %v11227_v23 = vpop.f32.mrf.mxu0 }
0x2810   : > { %v14981_v8 = vpop.f32.mrf.mxu0 }
0x2811   : > { %7431 = vrot.lane.b32.xlu1 %v14959_v17, %s16325_s25 }
0x2812   : > { %v11230_v51 = vpop.f32.mrf.mxu0 }
0x2814   : > { %v7291_v22 = vpop.f32.mrf.mxu0 }
0x2815   : > { %v7312_v58 = vpack.c.bf16 %v7291_v22, %v14981_v8 }
0x2816   : > { %v11231_v19 = vpop.f32.mrf.mxu0 }
0x2818   : > { %v7296_v21 = vpop.f32.mrf.mxu0 }
0x281a   : > { %v11234_v9 = vpop.f32.mrf.mxu0 }
0x281c   : > { %v7299_v10 = vpop.f32.mrf.mxu0 }
0x281d   : > { %v7313_v63 = vpack.c.bf16 %v7299_v10, %v7296_v21 }
0x281e   : > { %v11235_v55 = vpop.f32.mrf.mxu0 }
0x2820   : > { %v7304_v13 = vpop.f32.mrf.mxu0 }
0x2821   : > { %v7314_v19 = vpack.c.bf16 %v7304_v13, %v7304_v13 }
0x2822   : > { %v11238_v52 = vpop.f32.mrf.mxu0 }
0x2823   : > { %v7336_v9 = vsel %vm1152_vm8, %v7314_v19, 0 }
0x2824   : > { %v7307_v36 = vpop.f32.mrf.mxu0 }
0x2826   : > { %v11239_v56 = vpop.f32.mrf.mxu0 }
0x286b   : > { %v6991_v31 = vpop.permute.xlu0 %6990 }
0x286c   : > { %v7019_v32 = vsel %vm969_vm3, %v6991_v31, 0 }
0x286f   : > { %v7434_v37 = vpop.permute.xlu0 %7433  ;;  %v6993_v47 = vpop.permute.xlu1 %6992 }
0x2870   : > { %v7022_v1 = vsel %vm969_vm3, %v6993_v47, 0  ;;  %v7461_v8 = vsel %vm969_vm3, %v7434_v37, 0 }
0x2871   : > { %11185 = vmatpush3.bf16.xpose.msra.mxu1 %v7022_v1 }
0x2872   : > { %11186 = vmatprep.subr.bf16.mxu1 %v16334_v12 }
0x2873   : > { %v7430_v54 = vpop.permute.xlu0 %7429  ;;  %v6989_v3 = vpop.permute.xlu1 %6988 }
0x2874   : > { %v7016_v61 = vsel %vm969_vm3, %v6989_v3, 0  ;;  %v7455_v10 = vsel %vm969_vm3, %v7430_v54, 0 }
0x2877   : > { %v7420_v34 = vpop.permute.xlu0 %7419  ;;  %v6987_v24 = vpop.permute.xlu1 %6986 }
0x2878   : > { %v7013_v23 = vsel %vm969_vm3, %v6987_v24, 0 }
0x2879   : > { %11187 = vmatpush3.bf16.xpose.msra.mxu1 %v7019_v32 }
0x287a   : > { %11188 = vmatprep.subr.bf16.mxu1 %v16334_v12 }
0x287b   : > { %v7438_v45 = vpop.permute.xlu0 %7437  ;;  %v6985_v25 = vpop.permute.xlu1 %6984 }
0x287c   : > { %v7467_v39 = vsel %vm969_vm3, %v7438_v45, 0  ;;  %v7010_v51 = vsel %vm969_vm3, %v6985_v25, 0 }
0x287d   : > { %11271 = vmatpush3.bf16.xpose.msra.mxu0 %v7467_v39 }
0x287e   : > { %11272 = vmatprep.subr.bf16.mxu0 %v16334_v12 }
0x287f   : > { %v7436_v15 = vpop.permute.xlu1 %7435 }
0x2880   : > { %v7464_v14 = vsel %vm969_vm3, %v7436_v15, 0 }
0x2881   : > { %11189 = vmatpush3.bf16.xpose.msra.mxu1 %v7016_v61 }
0x2882   : > { %11190 = vmatprep.subr.bf16.mxu1 %v16334_v12 }
0x2883   : > { %v7432_v22 = vpop.permute.xlu1 %7431 }
0x2884   : > { %v7458_v21 = vsel %vm969_vm3, %v7432_v22, 0 }
0x2885   : > { %11273 = vmatpush3.bf16.xpose.msra.mxu0 %v7464_v14 }
0x2886   : > { %11274 = vmatprep.subr.bf16.mxu0 %v16334_v12 }
0x2889   : > { %11191 = vmatpush3.bf16.xpose.msra.mxu1 %v7013_v23 }
0x288a   : > { %11192 = vmatprep.subr.bf16.mxu1 %v16334_v12 }
0x288d   : > { %11275 = vmatpush3.bf16.xpose.msra.mxu0 %v7461_v8 }
0x288e   : > { %11276 = vmatprep.subr.bf16.mxu0 %v16334_v12 }
0x2891   : > { %11193 = vmatpush3.bf16.xpose.msra.mxu1 %v7010_v51 }
0x2892   : > { %11240 = vmatprep.subr.bf16.mxu1 %v16334_v12 }
0x2895   : > { %11277 = vmatpush3.bf16.xpose.msra.mxu0 %v7458_v21 }
0x2896   : > { %11278 = vmatprep.subr.bf16.mxu0 %v16334_v12 }
0x2898   : > { %11195 = vmatmul.mubr.msk.bf16.vlgmr.msra.gmra.mxu1 %vm969_vm3, %v14939_v59 }
0x2899   : > { %11241 = vmatpush3.bf16.msra.mxu1 %v7336_v9  ;;  %11198 = vmatprep.mubr.msk.bf16.mxu1 %vm12354_vm9, %v16334_v12 }
0x289a   : > { %11242 = vmatprep.subr.bf16.mxu1 %v16334_v12 }
0x289d   : > { %11243 = vmatpush3.bf16.msra.mxu1 %v7313_v63  ;;  %11279 = vmatpush3.bf16.xpose.msra.mxu0 %v7455_v10 }
0x289e   : > { %11244 = vmatprep.subr.bf16.mxu1 %v16334_v12  ;;  %11326 = vmatprep.subr.bf16.mxu0 %v16334_v12 }
0x28a0   : > { %11199 = vmatmul.mubr.msk.bf16.gmra.mxu1 %vm969_vm3, %v14959_v17 }
0x28a1   : > { %11245 = vmatpush3.bf16.msra.mxu1 %v7312_v58  ;;  %11202 = vmatprep.mubr.msk.bf16.mxu1 %vm12354_vm9, %v16334_v12 }
0x28a2   : > { %11246 = vmatprep.subr.bf16.mxu1 %v16334_v12 }
0x28a4   : > { %11281 = vmatmul.mubr.msk.bf16.vlgmr.msra.gmra.mxu0 %vm969_vm3, %v7420_v34 }
0x28a5   : > { %11247 = vmatpush3.bf16.msra.mxu1 %v7311_v33  ;;  %11284 = vmatprep.mubr.msk.bf16.mxu0 %vm12354_vm9, %v16334_v12 }
0x28a6   : > { %11248 = vmatprep.subr.bf16.mxu1 %v16334_v12 }
0x28a8   : > { %11203 = vmatmul.mubr.msk.bf16.gmra.mxu1 %vm969_vm3, %v14945_v20 }
0x28a9   : > { %11249 = vmatpush3.bf16.msra.mxu1 %v7310_v11  ;;  %11206 = vmatprep.mubr.msk.bf16.mxu1 %vm12354_vm9, %v16334_v12 }
0x28aa   : > { %11300 = vmatprep.subr.bf16.mxu1 %v16334_v12 }
0x28b0   : > { %11207 = vmatmul.mubr.msk.bf16.gmra.mxu1 %vm969_vm3, %v14941_v4 }
0x28b1   : > { %11210 = vmatprep.mubr.msk.bf16.mxu1 %vm12354_vm9, %v16334_v12 }
0x28b8   : > { %11211 = vmatmul.mubr.msk.bf16.gmra.mxu1 %vm969_vm3, %v14947_v49 }
0x28b9   : > { %11250 = vmatprep.mubr.msk.bf16.mxu1 %vm12354_vm9, %v16334_v12 }
0x2958   : > { %v7058_v50 = vpop.f32.mrf.mxu1 }
0x2959   : > { %v7096_v18 = vmul.f32 0.28867513, %v7058_v50 }
0x295a   : > { %v11196_v44 = vpop.f32.mrf.mxu1 }
0x295b   : > { %v15042_v11 = vadd.f32 %v7096_v18, %v12637_v48 }
0x295c   : > { %v7061_v26 = vpop.f32.mrf.mxu1 }
0x295d   : > { %v7097_v33 = vmul.f32 0.28867513, %v7061_v26  ;;  %v7114_v58 = vsel %vm4391_vm10, %v15042_v11, -inf }
0x295e   : > { %7115 = vmax.xlane.f32.xlu0 %v7114_v58  ;;  %v11197_v63 = vpop.f32.mrf.mxu1 }
0x295f   : > { %v7106_v55 = vadd.f32 %v7097_v33, %v12637_v48 }
0x2960   : > { %v7066_v13 = vpop.f32.mrf.mxu1 }
0x2961   : > { %v7098_v52 = vmul.f32 0.28867513, %v7066_v13  ;;  %v7117_v36 = vsel %vm4391_vm10, %v7106_v55, -inf }
0x2962   : > { %7118 = vmax.xlane.f32.xlu1 %v7117_v36  ;;  %v11200_v56 = vpop.f32.mrf.mxu1 }
0x2963   : > { %v7107_v31 = vadd.f32 %v7098_v52, %v12637_v48 }
0x2964   : > { %v7069_v37 = vpop.f32.mrf.mxu1  ;;  %v15049_v47 = vpop.f32.mrf.mxu0 }
0x2965   : > { %v7099_v1 = vmul.f32 0.28867513, %v7069_v37  ;;  %v7120_v54 = vsel %vm4391_vm10, %v7107_v31, -inf }
0x2966   : > { %7121 = vmax.xlane.f32.xlu1 %v7120_v54  ;;  %v11201_v3 = vpop.f32.mrf.mxu1  ;;  %v11282_v34 = vpop.f32.mrf.mxu0 }
0x2967   : > { %v7108_v24 = vadd.f32 %v7099_v1, %v12637_v48 }
0x2968   : > { %v7074_v32 = vpop.f32.mrf.mxu1  ;;  %v15053_v45 = vpop.f32.mrf.mxu0 }
0x2969   : > { %v7100_v25 = vmul.f32 0.28867513, %v7074_v32  ;;  %v7123_v39 = vsel %vm4391_vm10, %v7108_v24, -inf }
0x296a   : > { %7124 = vmax.xlane.f32.xlu1 %v7123_v39  ;;  %v11204_v61 = vpop.f32.mrf.mxu1  ;;  %v11283_v15 = vpop.f32.mrf.mxu0 }
0x296b   : > { %v7109_v14 = vadd.f32 %v7100_v25, %v12637_v48 }
0x296c   : > { %v7077_v23 = vpop.f32.mrf.mxu1 }
0x296d   : > { %v7101_v8 = vmul.f32 0.28867513, %v7077_v23  ;;  %v7126_v51 = vsel %vm4391_vm10, %v7109_v14, -inf }
0x296e   : > { %7127 = vmax.xlane.f32.xlu0 %v7126_v51  ;;  %v11205_v22 = vpop.f32.mrf.mxu1 }
0x296f   : > { %v7110_v19 = vadd.f32 %v7101_v8, %v12637_v48 }
0x2970   : > { %v7082_v21 = vpop.f32.mrf.mxu1 }
0x2971   : > { %v7102_v9 = vmul.f32 0.28867513, %v7082_v21  ;;  %v7129_v10 = vsel %vm4391_vm10, %v7110_v19, -inf }
0x2972   : > { %7130 = vmax.xlane.f32.xlu1 %v7129_v10  ;;  %v11208_v50 = vpop.f32.mrf.mxu1 }
0x2973   : > { %v7111_v18 = vadd.f32 %v7102_v9, %v12637_v48 }
0x2974   : > { %v7085_v44 = vpop.f32.mrf.mxu1 }
0x2975   : > { %v7103_v26 = vmul.f32 0.28867513, %v7085_v44  ;;  %v7132_v33 = vsel %vm4391_vm10, %v7111_v18, -inf }
0x2976   : > { %7133 = vmax.xlane.f32.xlu1 %v7132_v33  ;;  %v11209_v58 = vpop.f32.mrf.mxu1 }
0x2977   : > { %v7112_v63 = vadd.f32 %v7103_v26, %v12637_v48 }
0x2978   : > { %v7090_v13 = vpop.f32.mrf.mxu1 }
0x2979   : > { %v7104_v52 = vmul.f32 0.28867513, %v7090_v13  ;;  %v7135_v36 = vsel %vm4391_vm10, %v7112_v63, -inf }
0x297a   : > { %7136 = vmax.xlane.f32.xlu1 %v7135_v36  ;;  %v11212_v56 = vpop.f32.mrf.mxu1 }
0x297b   : > { %v7113_v37 = vadd.f32 %v7104_v52, %v12637_v48 }
0x297c   : > { %v7093_v1 = vpop.f32.mrf.mxu1 }
0x297d   : > { %v7138_v54 = vsel %vm4391_vm10, %v7113_v37, -inf }
0x297e   : > { %7139 = vmax.xlane.f32.xlu1 %v7138_v54  ;;  %v11213_v3 = vpop.f32.mrf.mxu1 }
0x2984   : > { %7421 = vrot.lane.b32.xlu0 %v14959_v17, %s16333_s30 }
0x2988   : > { %7425 = vrot.lane.b32.xlu0 %v14941_v4, %s16333_s30 }
0x298c   : > { %7427 = vrot.lane.b32.xlu0 %v14947_v49, %s16333_s30 }
0x298f   : > { %7423 = vrot.lane.b32.xlu1 %v14945_v20, %s16333_s30 }
0x29e7   : > { %v7116_v34 = vpop.xlane.xlu0 %7115 }
0x29e8   : > { %v7141_v32 = vsub.f32 %v15042_v11, %v7116_v34 }
0x29ea   : > { %v7150_v25 = vmul.f32 1.442695, %v7141_v32 }
0x29eb   : > { %v7119_v39 = vpop.xlane.xlu1 %7118 }
0x29ec   : > { %12109 = vpow2.f32 %v7150_v25  ;;  %v7142_v61 = vsub.f32 %v7106_v55, %v7119_v39 }
0x29ee   : > { %v7152_v15 = vmul.f32 1.442695, %v7142_v61 }
0x29ef   : > { %v7122_v23 = vpop.xlane.xlu1 %7121 }
0x29f0   : > { %12111 = vpow2.f32 %v7152_v15  ;;  %v7143_v8 = vsub.f32 %v7107_v31, %v7122_v23 }
0x29f2   : > { %v7154_v51 = vmul.f32 1.442695, %v7143_v8 }
0x29f3   : > { %v7125_v22 = vpop.xlane.xlu1 %7124 }
0x29f4   : > { %12113 = vpow2.f32 %v7154_v51  ;;  %v7144_v21 = vsub.f32 %v7108_v24, %v7125_v22 }
0x29f6   : > { %v7156_v9 = vmul.f32 1.442695, %v7144_v21 }
0x29f7   : > { %v7128_v10 = vpop.xlane.xlu0 %7127 }
0x29f8   : > { %12115 = vpow2.f32 %v7156_v9  ;;  %v7145_v50 = vsub.f32 %v7109_v14, %v7128_v10 }
0x29f9   : > { %v15075_v44 = vpop.eup %12109 }
0x29fa   : > { %v7158_v26 = vmul.f32 1.442695, %v7145_v50  ;;  %v7168_v11 = vsel %vm4391_vm10, %v15075_v44, 0.0 }
0x29fb   : > { %7169 = vadd.xlane.f32.xlu0 %v7168_v11  ;;  %v7422_v55 = vpop.permute.xlu0 %7421  ;;  %v7131_v33 = vpop.xlane.xlu1 %7130  ;;  %v7542_v11 = vmul.f32 0.28867513, %v15053_v45 }
0x29fc   : > { %12117 = vpow2.f32 %v7158_v26  ;;  %v7146_v58 = vsub.f32 %v7110_v19, %v7131_v33  ;;  %11285 = vmatmul.mubr.msk.bf16.gmra.mxu0 %vm969_vm3, %v7422_v55  ;;  %v7541_v55 = vmul.f32 0.28867513, %v15049_v47 }
0x29fd   : > { %v15080_v31 = vpop.eup %12111  ;;  %11288 = vmatprep.mubr.msk.bf16.mxu0 %vm12354_vm9, %v16334_v12  ;;  %v15130_v33 = vadd.f32 %v7542_v11, %v12637_v48 }
0x29fe   : > { %v7160_v24 = vmul.f32 1.442695, %v7146_v58  ;;  %v7171_v14 = vsel %vm4391_vm10, %v15080_v31, 0.0  ;;  %v15133_v58 = vadd.f32 %v7541_v55, %v12637_v48 }
0x29ff   : > { %7172 = vadd.xlane.f32.xlu1 %v7171_v14  ;;  %v7134_v13 = vpop.xlane.xlu1 %7133  ;;  %v7426_v22 = vpop.permute.xlu0 %7425 }
0x2a00   : > { %12119 = vpow2.f32 %v7160_v24  ;;  %v7147_v52 = vsub.f32 %v7111_v18, %v7134_v13  ;;  %v7562_v24 = vsel %vm4391_vm10, %v15130_v33, -inf  ;;  %v7559_v14 = vsel %vm4391_vm10, %v15133_v58, -inf }
0x2a01   : > { %v15086_v36 = vpop.eup %12113 }
0x2a02   : > { %v7162_v56 = vmul.f32 1.442695, %v7147_v52  ;;  %v7174_v19 = vsel %vm4391_vm10, %v15086_v36, 0.0 }
0x2a03   : > { %7175 = vadd.xlane.f32.xlu0 %v7174_v19  ;;  %v7137_v1 = vpop.xlane.xlu1 %7136  ;;  %v7428_v26 = vpop.permute.xlu0 %7427 }
0x2a04   : > { %12121 = vpow2.f32 %v7162_v56  ;;  %v7148_v54 = vsub.f32 %v7112_v63, %v7137_v1 }
0x2a05   : > { %v15090_v3 = vpop.eup %12115 }
0x2a06   : > { %v7164_v34 = vmul.f32 1.442695, %v7148_v54  ;;  %v7177_v32 = vsel %vm4391_vm10, %v15090_v3, 0.0 }
0x2a07   : > { %7178 = vadd.xlane.f32.xlu0 %v7177_v32  ;;  %v7140_v25 = vpop.xlane.xlu1 %7139 }
0x2a08   : > { %12123 = vpow2.f32 %v7164_v34  ;;  %v7149_v18 = vsub.f32 %v7113_v37, %v7140_v25  ;;  %v11699_v25 = vld [vmem:[%s16277_s15 + $0x88] sm:$0xff]  }
0x2a09   : > { %v15094_v39 = vpop.eup %12117 }
0x2a0a   : > { %v7166_v61 = vmul.f32 1.442695, %v7149_v18  ;;  %v7180_v15 = vsel %vm4391_vm10, %v15094_v39, 0.0 }
0x2a0b   : > { %7181 = vadd.xlane.f32.xlu0 %v7180_v15  ;;  %v7424_v23 = vpop.permute.xlu1 %7423 }
0x2a0c   : > { %12125 = vpow2.f32 %v7166_v61  ;;  %11289 = vmatmul.mubr.msk.bf16.gmra.mxu0 %vm969_vm3, %v7424_v23 }
0x2a0d   : > { %v15099_v63 = vpop.eup %12119  ;;  %11292 = vmatprep.mubr.msk.bf16.mxu0 %vm12354_vm9, %v16334_v12 }
0x2a0e   : > { %v7183_v8 = vsel %vm4391_vm10, %v15099_v63, 0.0 }
0x2a0f   : > { %7184 = vadd.xlane.f32.xlu0 %v7183_v8 }
0x2a11   : > { %v15105_v37 = vpop.eup %12121 }
0x2a12   : > { %v7186_v51 = vsel %vm4391_vm10, %v15105_v37, 0.0 }
0x2a13   : > { %7187 = vadd.xlane.f32.xlu1 %v7186_v51 }
0x2a14   : > { %11293 = vmatmul.mubr.msk.bf16.gmra.mxu0 %vm969_vm3, %v7426_v22  ;;  %v11701_v22 = vld [vmem:[%s16277_s15 + $0x78] sm:$0xff]  }
0x2a15   : > { %v15110_v21 = vpop.eup %12123  ;;  %11296 = vmatprep.mubr.msk.bf16.mxu0 %vm12354_vm9, %v16334_v12 }
0x2a16   : > { %v7189_v9 = vsel %vm4391_vm10, %v15110_v21, 0.0 }
0x2a17   : > { %7190 = vadd.xlane.f32.xlu0 %v7189_v9 }
0x2a19   : > { %v15116_v10 = vpop.eup %12125 }
0x2a1a   : > { %v7192_v50 = vsel %vm4391_vm10, %v15116_v10, 0.0 }
0x2a1b   : > { %7193 = vadd.xlane.f32.xlu1 %v7192_v50 }
0x2a1c   : > { %11297 = vmatmul.mubr.msk.bf16.gmra.mxu0 %vm969_vm3, %v7428_v26 }
0x2a1d   : > { %11336 = vmatprep.mubr.msk.bf16.mxu0 %vm12354_vm9, %v16334_v12 }
0x2a2c   : > { %7880 = vrot.lane.b32.xlu1 %v14941_v4, %s16326_s26 }
0x2a2d   : > { %7882 = vrot.lane.b32.xlu0 %v14947_v49, %s16326_s26 }
0x2a4c   : > { %7563 = vmax.xlane.f32.xlu0 %v7562_v24 }
0x2a50   : > { %7560 = vmax.xlane.f32.xlu1 %v7559_v14 }
0x2a62   : > { %7878 = vrot.lane.b32.xlu0 %v14945_v20, %s16326_s26 }
0x2a84   : > { %v7170_v45 = vpop.xlane.xlu0 %7169 }
0x2a85   : > { %12127 = vrcp.f32 %v7170_v45 }
0x2a88   : > { %v7173_v47 = vpop.xlane.xlu1 %7172 }
0x2a89   : > { %12129 = vrcp.f32 %v7173_v47 }
0x2a8c   : > { %v7176_v13 = vpop.xlane.xlu0 %7175 }
0x2a8d   : > { %12131 = vrcp.f32 %v7176_v13 }
0x2a90   : > { %v7179_v52 = vpop.xlane.xlu0 %7178 }
0x2a91   : > { %12133 = vrcp.f32 %v7179_v52 }
0x2a92   : > { %v12128_v56 = vpop.eup %12127 }
0x2a93   : > { %v7204_v54 = vmul.f32 %v12128_v56, %v15075_v44  ;;  %v11700_v44 = vld [vmem:[%s16277_s15 + $0x80] sm:$0xff]  }
0x2a94   : > { %v7182_v19 = vpop.xlane.xlu0 %7181 }
0x2a95   : > { %12135 = vrcp.f32 %v7182_v19 }
0x2a96   : > { %v12130_v1 = vpop.eup %12129 }
0x2a97   : > { %v7205_v34 = vmul.f32 %v12130_v1, %v15080_v31 }
0x2a98   : > { %v7185_v32 = vpop.xlane.xlu0 %7184 }
0x2a99   : > { %v7315_v18 = vpack.c.bf16 %v7205_v34, %v7204_v54  ;;  %12137 = vrcp.f32 %v7185_v32 }
0x2a9a   : > { %v12132_v61 = vpop.eup %12131 }
0x2a9b   : > { %11251 = vmatmul.mubr.msk.bf16.vlgmr.msra.gmra.mxu1 %vm4391_vm10, %v7315_v18  ;;  %v7206_v23 = vmul.f32 %v12132_v61, %v15086_v36 }
0x2a9c   : > { %v7188_v15 = vpop.xlane.xlu1 %7187  ;;  %11254 = vmatprep.mubr.msk.bf16.mxu1 %vm12354_vm9, %v16334_v12  ;;  %11301 = vmatpush3.bf16.msra.mxu1 %v11699_v25 }
0x2a9d   : > { %11302 = vmatprep.subr.bf16.mxu1 %v16334_v12  ;;  %12139 = vrcp.f32 %v7188_v15 }
0x2a9e   : > { %v12134_v31 = vpop.eup %12133 }
0x2a9f   : > { %v7207_v8 = vmul.f32 %v12134_v31, %v15090_v3 }
0x2aa0   : > { %v7191_v51 = vpop.xlane.xlu0 %7190  ;;  %11303 = vmatpush3.bf16.msra.mxu1 %v11700_v44 }
0x2aa1   : > { %12141 = vrcp.f32 %v7191_v51  ;;  %v7316_v9 = vpack.c.bf16 %v7207_v8, %v7206_v23  ;;  %11304 = vmatprep.subr.bf16.mxu1 %v16334_v12 }
0x2aa2   : > { %v12136_v50 = vpop.eup %12135 }
0x2aa3   : > { %11255 = vmatmul.mubr.msk.bf16.gmra.mxu1 %vm4391_vm10, %v7316_v9  ;;  %v7208_v3 = vmul.f32 %v12136_v50, %v15094_v39 }
0x2aa4   : > { %v7194_v26 = vpop.xlane.xlu1 %7193  ;;  %11258 = vmatprep.mubr.msk.bf16.mxu1 %vm12354_vm9, %v16334_v12  ;;  %11305 = vmatpush3.bf16.msra.mxu1 %v11701_v22  ;;  %v7883_v1 = vpop.permute.xlu0 %7882 }
0x2aa5   : > { %12143 = vrcp.f32 %v7194_v26  ;;  %11356 = vmatprep.subr.bf16.mxu1 %v16334_v12  ;;  %v7912_v25 = vsel %vm969_vm3, %v7883_v1, 0 }
0x2aa6   : > { %v12138_v36 = vpop.eup %12137 }
0x2aa7   : > { %v7209_v11 = vmul.f32 %v12138_v36, %v15099_v63 }
0x2aa8   : > { %v7881_v15 = vpop.permute.xlu1 %7880 }
0x2aa9   : > { %v7317_v55 = vpack.c.bf16 %v7209_v11, %v7208_v3  ;;  %v7909_v44 = vsel %vm969_vm3, %v7881_v15, 0 }
0x2aaa   : > { %v12140_v24 = vpop.eup %12139 }
0x2aab   : > { %11259 = vmatmul.mubr.msk.bf16.gmra.mxu1 %vm4391_vm10, %v7317_v55  ;;  %v7210_v45 = vmul.f32 %v12140_v24, %v15105_v37 }
0x2aac   : > { %11262 = vmatprep.mubr.msk.bf16.mxu1 %vm12354_vm9, %v16334_v12 }
0x2aae   : > { %v12142_v14 = vpop.eup %12141 }
0x2aaf   : > { %v7211_v47 = vmul.f32 %v12142_v14, %v15110_v21 }
0x2ab1   : > { %v7318_v13 = vpack.c.bf16 %v7211_v47, %v7210_v45 }
0x2ab2   : > { %v12144_v52 = vpop.eup %12143 }
0x2ab3   : > { %11263 = vmatmul.mubr.msk.bf16.gmra.mxu1 %vm4391_vm10, %v7318_v13  ;;  %v7212_v39 = vmul.f32 %v12144_v52, %v15116_v10 }
0x2ab4   : > { %11266 = vmatprep.mubr.msk.bf16.mxu1 %vm12354_vm9, %v16334_v12 }
0x2ab5   : > { %v7319_v63 = vpack.c.bf16 %v7212_v39, %v7212_v39 }
0x2abb   : > { %11267 = vmatmul.mubr.msk.bf16.gmra.mxu1 %vm4391_vm10, %v7319_v63 }
0x2abc   : > { %v7511_v56 = vpop.f32.mrf.mxu0  ;;  %11306 = vmatprep.mubr.msk.bf16.mxu1 %vm12354_vm9, %v16334_v12 }
0x2abd   : > { %v7543_v19 = vmul.f32 0.28867513, %v7511_v56 }
0x2abe   : > { %v11286_v37 = vpop.f32.mrf.mxu0 }
0x2abf   : > { %v15178_v21 = vadd.f32 %v7543_v19, %v12637_v48 }
0x2ac0   : > { %v7514_v54 = vpop.f32.mrf.mxu0 }
0x2ac1   : > { %v7544_v34 = vmul.f32 0.28867513, %v7514_v54  ;;  %v7565_v32 = vsel %vm4391_vm10, %v15178_v21, -inf }
0x2ac2   : > { %7566 = vmax.xlane.f32.xlu1 %v7565_v32  ;;  %v11287_v10 = vpop.f32.mrf.mxu0 }
0x2ac3   : > { %v15184_v18 = vadd.f32 %v7544_v34, %v12637_v48  ;;  %11307 = vmatmul.mubr.msk.bf16.vlgmr.msra.gmra.mxu1 %vm814_vm2, %v14856_v41 }
0x2ac4   : > { %11357 = vmatpush3.bf16.xpose.msra.mxu1 %v7912_v25  ;;  %11310 = vmatprep.mubr.msk.bf16.mxu1 %vm12354_vm9, %v16334_v12 }
0x2ac5   : > { %v7568_v61 = vsel %vm4391_vm10, %v15184_v18, -inf  ;;  %11358 = vmatprep.subr.bf16.mxu1 %v16334_v12 }
0x2ac6   : > { %7569 = vmax.xlane.f32.xlu1 %v7568_v61 }
0x2acb   : > { %11311 = vmatmul.mubr.msk.bf16.gmra.mxu1 %vm814_vm2, %v14878_v35 }
0x2acc   : > { %11359 = vmatpush3.bf16.xpose.msra.mxu1 %v7909_v44  ;;  %v7519_v31 = vpop.f32.mrf.mxu0  ;;  %11314 = vmatprep.mubr.msk.bf16.mxu1 %vm12354_vm9, %v16334_v12 }
0x2acd   : > { %v7545_v23 = vmul.f32 0.28867513, %v7519_v31  ;;  %11360 = vmatprep.subr.bf16.mxu1 %v16334_v12 }
0x2ace   : > { %v11290_v8 = vpop.f32.mrf.mxu0 }
0x2acf   : > { %v15200_v51 = vadd.f32 %v7545_v23, %v12637_v48 }
0x2ad0   : > { %v7522_v22 = vpop.f32.mrf.mxu0 }
0x2ad1   : > { %v7571_v9 = vsel %vm4391_vm10, %v15200_v51, -inf  ;;  %v7546_v39 = vmul.f32 0.28867513, %v7522_v22 }
0x2ad2   : > { %7572 = vmax.xlane.f32.xlu0 %v7571_v9  ;;  %v11291_v50 = vpop.f32.mrf.mxu0 }
0x2ad3   : > { %11315 = vmatmul.mubr.msk.bf16.gmra.mxu1 %vm814_vm2, %v14890_v5  ;;  %v15224_v56 = vadd.f32 %v7546_v39, %v12637_v48 }
0x2ad4   : > { %v7527_v26 = vpop.f32.mrf.mxu0  ;;  %11318 = vmatprep.mubr.msk.bf16.mxu1 %vm12354_vm9, %v16334_v12 }
0x2ad5   : > { %v7564_v36 = vpop.xlane.xlu0 %7563  ;;  %v7547_v19 = vmul.f32 0.28867513, %v7527_v26  ;;  %v7574_v34 = vsel %vm4391_vm10, %v15224_v56, -inf }
0x2ad6   : > { %v11294_v3 = vpop.f32.mrf.mxu0  ;;  %v7587_v63 = vsub.f32 %v15130_v33, %v7564_v36 }
0x2ad7   : > { %7876 = vrot.lane.b32.xlu1 %v14959_v17, %s16326_s26  ;;  %v15227_v1 = vadd.f32 %v7547_v19, %v12637_v48 }
0x2ad8   : > { %v7530_v11 = vpop.f32.mrf.mxu0  ;;  %v7597_v37 = vmul.f32 1.442695, %v7587_v63 }
0x2ad9   : > { %v7879_v55 = vpop.permute.xlu0 %7878  ;;  %v7548_v54 = vmul.f32 0.28867513, %v7530_v11  ;;  %v7577_v33 = vsel %vm4391_vm10, %v15227_v1, -inf  ;;  %v7561_v23 = vpop.xlane.xlu1 %7560 }
0x2ada   : > { %v7906_v24 = vsel %vm969_vm3, %v7879_v55, 0  ;;  %v11295_v14 = vpop.f32.mrf.mxu0  ;;  %12145 = vpow2.f32 %v7597_v37  ;;  %v7586_v8 = vsub.f32 %v15133_v58, %v7561_v23 }
0x2adb   : > { %11319 = vmatmul.mubr.msk.bf16.gmra.mxu1 %vm814_vm2, %v14902_v53  ;;  %v15232_v32 = vadd.f32 %v7548_v54, %v12637_v48 }
0x2adc   : > { %11361 = vmatpush3.bf16.xpose.msra.mxu1 %v7906_v24  ;;  %v7535_v45 = vpop.f32.mrf.mxu0  ;;  %11322 = vmatprep.mubr.msk.bf16.mxu1 %vm12354_vm9, %v16334_v12  ;;  %v7595_v22 = vmul.f32 1.442695, %v7586_v8 }
0x2add   : > { %11362 = vmatprep.subr.bf16.mxu1 %v16334_v12  ;;  %v7549_v10 = vmul.f32 0.28867513, %v7535_v45  ;;  %v7580_v61 = vsel %vm4391_vm10, %v15232_v32, -inf }
0x2ade   : > { %v11298_v47 = vpop.f32.mrf.mxu0  ;;  %12147 = vpow2.f32 %v7595_v22 }
0x2adf   : > { %v15237_v25 = vadd.f32 %v7549_v10, %v12637_v48 }
0x2ae0   : > { %v7538_v13 = vpop.f32.mrf.mxu0 }
0x2ae1   : > { %v7583_v15 = vsel %vm4391_vm10, %v15237_v25, -inf }
0x2ae2   : > { %v11299_v52 = vpop.f32.mrf.mxu0 }
0x2ae3   : > { %11323 = vmatmul.mubr.msk.bf16.gmra.mxu1 %vm814_vm2, %v14910_v7 }
0x2ae4   : > { %11366 = vmatprep.mubr.msk.bf16.mxu1 %vm12354_vm9, %v16334_v12 }
0x2ae7   : > { %v15243_v44 = vpop.eup %12145 }
0x2ae8   : > { %7874 = vrot.lane.b32.xlu0 %v14939_v59, %s16326_s26  ;;  %v7616_v31 = vsel %vm4391_vm10, %v15243_v44, 0.0 }
0x2aeb   : > { %v15258_v9 = vpop.eup %12147 }
0x2aec   : > { %v7613_v50 = vsel %vm4391_vm10, %v15258_v9, 0.0 }
0x2afb   : > { %7575 = vmax.xlane.f32.xlu1 %v7574_v34 }
0x2aff   : > { %7578 = vmax.xlane.f32.xlu1 %v7577_v33 }
0x2b03   : > { %7581 = vmax.xlane.f32.xlu1 %v7580_v61 }
0x2b07   : > { %7584 = vmax.xlane.f32.xlu0 %v7583_v15 }
0x2b0b   : > { %7617 = vadd.xlane.f32.xlu0 %v7616_v31 }
0x2b14   : > { %7864 = vrot.lane.b32.xlu1 %v14939_v59, %s16327_s23 }
0x2b18   : > { %7866 = vrot.lane.b32.xlu1 %v14959_v17, %s16327_s23 }
0x2b1c   : > { %7868 = vrot.lane.b32.xlu1 %v14945_v20, %s16327_s23 }
0x2b20   : > { %7870 = vrot.lane.b32.xlu1 %v14941_v4, %s16327_s23 }
0x2b24   : > { %7872 = vrot.lane.b32.xlu1 %v14947_v49, %s16327_s23 }
0x2b48   : > { %7614 = vadd.xlane.f32.xlu1 %v7613_v50 }
0x2b4b   : > { %v7567_v26 = vpop.xlane.xlu1 %7566 }
0x2b4c   : > { %v7588_v36 = vsub.f32 %v15178_v21, %v7567_v26 }
0x2b4e   : > { %v7599_v3 = vmul.f32 1.442695, %v7588_v36  ;;  %v12327_v36 = vld [vmem:[%s16281_s19 + $0x8] sm:$0xff] }
0x2b4f   : > { %v7570_v11 = vpop.xlane.xlu1 %7569 }
0x2b50   : > { %12149 = vpow2.f32 %v7599_v3  ;;  %v7589_v55 = vsub.f32 %v15184_v18, %v7570_v11  ;;  %v15301_v3 = vrot.slane %v12327_v36, %v12735_v27 }
0x2b52   : > { %v7601_v24 = vmul.f32 1.442695, %v7589_v55 }
0x2b53   : > { %v7877_v14 = vpop.permute.xlu1 %7876 }
0x2b54   : > { %12151 = vpow2.f32 %v7601_v24  ;;  %v7903_v58 = vsel %vm969_vm3, %v7877_v14, 0 }
0x2b55   : > { %11363 = vmatpush3.bf16.xpose.msra.mxu1 %v7903_v58 }
0x2b56   : > { %11364 = vmatprep.subr.bf16.mxu1 %v16334_v12 }
0x2b59   : > { %8325 = vrot.lane.b32.xlu1 %v14941_v4, %s16328_s29 }
0x2b5b   : > { %v15268_v45 = vpop.f32.mrf.mxu1  ;;  %v7573_v47 = vpop.xlane.xlu0 %7572 }
0x2b5c   : > { %v7590_v21 = vsub.f32 %v15200_v51, %v7573_v47 }
0x2b5d   : > { %v15271_v13 = vpop.eup %12149  ;;  %v11252_v52 = vpop.f32.mrf.mxu1  ;;  %8321 = vrot.lane.b32.xlu1 %v14959_v17, %s16328_s29 }
0x2b5e   : > { %v7603_v18 = vmul.f32 1.442695, %v7590_v21  ;;  %v7619_v39 = vsel %vm4391_vm10, %v15271_v13, 0.0 }
0x2b5f   : > { %v15277_v63 = vpop.f32.mrf.mxu1  ;;  %v7875_v19 = vpop.permute.xlu0 %7874  ;;  %7620 = vadd.xlane.f32.xlu0 %v7619_v39 }
0x2b60   : > { %12153 = vpow2.f32 %v7603_v18  ;;  %v7900_v37 = vsel %vm969_vm3, %v7875_v19, 0 }
0x2b61   : > { %v15280_v54 = vpop.eup %12151  ;;  %v11253_v51 = vpop.f32.mrf.mxu1  ;;  %11365 = vmatpush3.bf16.xpose.msra.mxu1 %v7900_v37 }
0x2b62   : > { %v7622_v34 = vsel %vm4391_vm10, %v15280_v54, 0.0  ;;  %11412 = vmatprep.subr.bf16.mxu1 %v16334_v12 }
0x2b63   : > { %v15285_v10 = vpop.f32.mrf.mxu1  ;;  %7623 = vadd.xlane.f32.xlu0 %v7622_v34 }
0x2b65   : > { %v11256_v33 = vpop.f32.mrf.mxu1 }
0x2b67   : > { %v15287_v61 = vpop.f32.mrf.mxu1 }
0x2b69   : > { %v11257_v15 = vpop.f32.mrf.mxu1 }
0x2b6b   : > { %v15289_v31 = vpop.f32.mrf.mxu1 }
0x2b6d   : > { %v15291_v23 = vpop.eup %12153  ;;  %v11260_v8 = vpop.f32.mrf.mxu1 }
0x2b6e   : > { %v7625_v22 = vsel %vm4391_vm10, %v15291_v23, 0.0 }
0x2b6f   : > { %v15295_v50 = vpop.f32.mrf.mxu1  ;;  %7626 = vadd.xlane.f32.xlu0 %v7625_v22 }
0x2b71   : > { %v11261_v26 = vpop.f32.mrf.mxu1 }
0x2b73   : > { %v7396_v11 = vpop.f32.mrf.mxu1 }
0x2b74   : > { %v15304_v55 = vadd.f32 %v7396_v11, %v15301_v3 }
0x2b75   : > { %v11264_v24 = vpop.f32.mrf.mxu1 }
0x2b77   : > { %v7399_v14 = vpop.f32.mrf.mxu1 }
0x2b78   : > { %v15307_v58 = vadd.f32 %v7399_v14, %v15301_v3 }
0x2b79   : > { %v11265_v47 = vpop.f32.mrf.mxu1 }
0x2b7b   : > { %v7404_v21 = vpop.f32.mrf.mxu1 }
0x2b7c   : > { %v15310_v52 = vadd.f32 %v7404_v21, %v15301_v3 }
0x2b7d   : > { %v11268_v18 = vpop.f32.mrf.mxu1 }
0x2b7f   : > { %v7407_v39 = vpop.f32.mrf.mxu1 }
0x2b81   : > { %v11269_v19 = vpop.f32.mrf.mxu1 }
0x2b83   : > { %v15312_v37 = vpop.f32.mrf.mxu1 }
0x2b84   : > { %v7576_v27 = vpop.xlane.xlu1 %7575 }
0x2b85   : > { %v7591_v51 = vsub.f32 %v15224_v56, %v7576_v27  ;;  %v11308_v34 = vpop.f32.mrf.mxu1 }
0x2b87   : > { %v7605_v33 = vmul.f32 1.442695, %v7591_v51  ;;  %v15315_v15 = vpop.f32.mrf.mxu1 }
0x2b88   : > { %v7579_v8 = vpop.xlane.xlu1 %7578 }
0x2b89   : > { %12155 = vpow2.f32 %v7605_v33  ;;  %v7592_v22 = vsub.f32 %v15227_v1, %v7579_v8  ;;  %v11309_v26 = vpop.f32.mrf.mxu1 }
0x2b8b   : > { %v7607_v36 = vmul.f32 1.442695, %v7592_v22  ;;  %v15318_v11 = vpop.f32.mrf.mxu1 }
0x2b8c   : > { %v7582_v24 = vpop.xlane.xlu1 %7581 }
0x2b8d   : > { %12157 = vpow2.f32 %v7607_v36  ;;  %v7593_v14 = vsub.f32 %v15232_v32, %v7582_v24  ;;  %v11312_v47 = vpop.f32.mrf.mxu1 }
0x2b8f   : > { %v7609_v21 = vmul.f32 1.442695, %v7593_v14  ;;  %v7728_v18 = vpop.f32.mrf.mxu1 }
0x2b90   : > { %v7865_v56 = vpop.permute.xlu1 %7864  ;;  %v7585_v39 = vpop.xlane.xlu0 %7584 }
0x2b91   : > { %12159 = vpow2.f32 %v7609_v21  ;;  %v7594_v19 = vsub.f32 %v15237_v25, %v7585_v39  ;;  %v11313_v27 = vpop.f32.mrf.mxu1  ;;  %11367 = vmatmul.mubr.msk.bf16.vlgmr.msra.gmra.mxu1 %vm969_vm3, %v7865_v56 }
0x2b92   : > { %11370 = vmatprep.mubr.msk.bf16.mxu1 %vm12354_vm9, %v16334_v12 }
0x2b93   : > { %v7611_v1 = vmul.f32 1.442695, %v7594_v19  ;;  %v7733_v51 = vpop.f32.mrf.mxu1 }
0x2b94   : > { %v7867_v22 = vpop.permute.xlu1 %7866 }
0x2b95   : > { %12161 = vpow2.f32 %v7611_v1  ;;  %v11316_v34 = vpop.f32.mrf.mxu1 }
0x2b96   : > { %v15325_v33 = vpop.eup %12155 }
0x2b97   : > { %v7736_v32 = vpop.f32.mrf.mxu1  ;;  %v7628_v8 = vsel %vm4391_vm10, %v15325_v33, 0.0 }
0x2b98   : > { %7629 = vadd.xlane.f32.xlu0 %v7628_v8  ;;  %v7869_v39 = vpop.permute.xlu1 %7868 }
0x2b99   : > { %v11317_v26 = vpop.f32.mrf.mxu1  ;;  %11371 = vmatmul.mubr.msk.bf16.gmra.mxu1 %vm969_vm3, %v7867_v22 }
0x2b9a   : > { %v15330_v25 = vpop.eup %12157  ;;  %11374 = vmatprep.mubr.msk.bf16.mxu1 %vm12354_vm9, %v16334_v12 }
0x2b9b   : > { %v7741_v36 = vpop.f32.mrf.mxu1  ;;  %v7631_v24 = vsel %vm4391_vm10, %v15330_v25, 0.0 }
0x2b9c   : > { %7632 = vadd.xlane.f32.xlu0 %v7631_v24 }
0x2b9d   : > { %v11320_v14 = vpop.f32.mrf.mxu1 }
0x2b9e   : > { %v15336_v47 = vpop.eup %12159  ;;  %v7871_v14 = vpop.permute.xlu1 %7870 }
0x2b9f   : > { %v7744_v21 = vpop.f32.mrf.mxu1  ;;  %v7634_v56 = vsel %vm4391_vm10, %v15336_v47, 0.0 }
0x2ba0   : > { %7635 = vadd.xlane.f32.xlu0 %v7634_v56  ;;  %v7758_v56 = vpack.c.bf16 %v7744_v21, %v7741_v36  ;;  %v7755_v36 = vpack.c.bf16 %v15315_v15, %v15312_v37  ;;  %v11702_v37 = vld [vmem:[%s16277_s15 + $0xa0] sm:$0xff]  }
0x2ba1   : > { %v11321_v19 = vpop.f32.mrf.mxu1  ;;  %11375 = vmatmul.mubr.msk.bf16.gmra.mxu1 %vm969_vm3, %v7869_v39 }
0x2ba2   : > { %v15341_v27 = vpop.eup %12161  ;;  %11378 = vmatprep.mubr.msk.bf16.mxu1 %vm12354_vm9, %v16334_v12  ;;  %v7757_v19 = vpack.c.bf16 %v7736_v32, %v7733_v51 }
0x2ba3   : > { %v7749_v1 = vpop.f32.mrf.mxu1  ;;  %v7637_v34 = vsel %vm4391_vm10, %v15341_v27, 0.0 }
0x2ba4   : > { %v7759_v8 = vpack.c.bf16 %v7749_v1, %v7749_v1  ;;  %7638 = vadd.xlane.f32.xlu0 %v7637_v34  ;;  %v7873_v1 = vpop.permute.xlu1 %7872  ;;  %v7756_v34 = vpack.c.bf16 %v7728_v18, %v15318_v11  ;;  %v7618_v11 = vpop.xlane.xlu0 %7617 }
0x2ba5   : > { %v11324_v22 = vpop.f32.mrf.mxu1  ;;  %12163 = vrcp.f32 %v7618_v11 }
0x2ba6   : > { %v7781_v26 = vsel %vm1152_vm8, %v7759_v8, 0  ;;  %v11703_v22 = vld [vmem:[%s16277_s15 + $0x98] sm:$0xff]  }
0x2ba7   : > { %v7752_v24 = vpop.f32.mrf.mxu1  ;;  %11327 = vmatpush3.bf16.msra.mxu0 %v7781_v26 }
0x2ba8   : > { %11328 = vmatprep.subr.bf16.mxu0 %v16334_v12 }
0x2ba9   : > { %v11325_v39 = vpop.f32.mrf.mxu1  ;;  %11379 = vmatmul.mubr.msk.bf16.gmra.mxu1 %vm969_vm3, %v7871_v14 }
0x2baa   : > { %11382 = vmatprep.mubr.msk.bf16.mxu1 %vm12354_vm9, %v16334_v12 }
0x2bab   : > { %11329 = vmatpush3.bf16.msra.mxu0 %v7758_v56 }
0x2bac   : > { %11330 = vmatprep.subr.bf16.mxu0 %v16334_v12 }
0x2baf   : > { %11331 = vmatpush3.bf16.msra.mxu0 %v7757_v19 }
0x2bb0   : > { %11332 = vmatprep.subr.bf16.mxu0 %v16334_v12 }
0x2bb1   : > { %11383 = vmatmul.mubr.msk.bf16.gmra.mxu1 %vm969_vm3, %v7873_v1 }
0x2bb2   : > { %11422 = vmatprep.mubr.msk.bf16.mxu1 %vm12354_vm9, %v16334_v12  ;;  %v12164_v51 = vpop.eup %12163 }
0x2bb3   : > { %11333 = vmatpush3.bf16.msra.mxu0 %v7756_v34  ;;  %v7650_v21 = vmul.f32 %v12164_v51, %v15243_v44 }
0x2bb4   : > { %11334 = vmatprep.subr.bf16.mxu0 %v16334_v12 }
0x2bb7   : > { %11335 = vmatpush3.bf16.msra.mxu0 %v7755_v36 }
0x2bb8   : > { %11386 = vmatprep.subr.bf16.mxu0 %v16334_v12 }
0x2bba   : > { %8327 = vrot.lane.b32.xlu0 %v14947_v49, %s16328_s29 }
0x2bbe   : > { %8323 = vrot.lane.b32.xlu0 %v14945_v20, %s16328_s29 }
0x2bd1   : > { %v7615_v18 = vpop.xlane.xlu1 %7614 }
0x2bd2   : > { %12165 = vrcp.f32 %v7615_v18 }
0x2bdf   : > { %v12166_v32 = vpop.eup %12165 }
0x2be0   : > { %v7649_v8 = vmul.f32 %v12166_v32, %v15258_v9  ;;  %v11704_v9 = vld [vmem:[%s16277_s15 + $0x90] sm:$0xff]  }
0x2be2   : > { %v7760_v15 = vpack.c.bf16 %v7650_v21, %v7649_v8 }
0x2be4   : > { %11337 = vmatmul.mubr.msk.bf16.vlgmr.msra.gmra.mxu0 %vm4391_vm10, %v7760_v15 }
0x2be5   : > { %11340 = vmatprep.mubr.msk.bf16.mxu0 %vm12354_vm9, %v16334_v12  ;;  %11387 = vmatpush3.bf16.msra.mxu0 %v11702_v37 }
0x2be6   : > { %11388 = vmatprep.subr.bf16.mxu0 %v16334_v12 }
0x2be8   : > { %v7621_v44 = vpop.xlane.xlu0 %7620 }
0x2be9   : > { %11389 = vmatpush3.bf16.msra.mxu0 %v11703_v22  ;;  %12167 = vrcp.f32 %v7621_v44 }
0x2bea   : > { %11390 = vmatprep.subr.bf16.mxu0 %v16334_v12 }
0x2bec   : > { %v7624_v26 = vpop.xlane.xlu0 %7623 }
0x2bed   : > { %12169 = vrcp.f32 %v7624_v26  ;;  %11391 = vmatpush3.bf16.msra.mxu0 %v11704_v9 }
0x2bee   : > { %11442 = vmatprep.subr.bf16.mxu0 %v16334_v12 }
0x2bf6   : > { %v12168_v24 = vpop.eup %12167 }
0x2bf7   : > { %v7651_v56 = vmul.f32 %v12168_v24, %v15271_v13 }
0x2bf8   : > { %v7627_v1 = vpop.xlane.xlu0 %7626 }
0x2bf9   : > { %12171 = vrcp.f32 %v7627_v1 }
0x2bfa   : > { %v12170_v14 = vpop.eup %12169 }
0x2bfb   : > { %v7652_v39 = vmul.f32 %v12170_v14, %v15280_v54 }
0x2bfd   : > { %v7761_v19 = vpack.c.bf16 %v7652_v39, %v7651_v56 }
0x2bff   : > { %11341 = vmatmul.mubr.msk.bf16.gmra.mxu0 %vm4391_vm10, %v7761_v19 }
0x2c00   : > { %11344 = vmatprep.mubr.msk.bf16.mxu0 %vm12354_vm9, %v16334_v12 }
0x2c06   : > { %v12172_v18 = vpop.eup %12171 }
0x2c07   : > { %v7653_v54 = vmul.f32 %v12172_v18, %v15291_v23 }
0x2c21   : > { %v7630_v34 = vpop.xlane.xlu0 %7629 }
0x2c22   : > { %12173 = vrcp.f32 %v7630_v34 }
0x2c25   : > { %v7633_v36 = vpop.xlane.xlu0 %7632 }
0x2c26   : > { %12175 = vrcp.f32 %v7633_v36 }
0x2c29   : > { %v7636_v11 = vpop.xlane.xlu0 %7635 }
0x2c2a   : > { %12177 = vrcp.f32 %v7636_v11 }
0x2c2d   : > { %v7639_v51 = vpop.xlane.xlu0 %7638 }
0x2c2e   : > { %12179 = vrcp.f32 %v7639_v51 }
0x2c2f   : > { %v12174_v13 = vpop.eup %12173 }
0x2c30   : > { %v7654_v32 = vmul.f32 %v12174_v13, %v15325_v33 }
0x2c31   : > { %v8328_v26 = vpop.permute.xlu0 %8327 }
0x2c32   : > { %v7762_v21 = vpack.c.bf16 %v7654_v32, %v7653_v54 }
0x2c33   : > { %v12176_v8 = vpop.eup %12175 }
0x2c34   : > { %11345 = vmatmul.mubr.msk.bf16.gmra.mxu0 %vm4391_vm10, %v7762_v21  ;;  %v7655_v15 = vmul.f32 %v12176_v8, %v15330_v25  ;;  %v8357_v25 = vsel %vm969_vm3, %v8328_v26, 0 }
0x2c35   : > { %11348 = vmatprep.mubr.msk.bf16.mxu0 %vm12354_vm9, %v16334_v12  ;;  %v8324_v18 = vpop.permute.xlu0 %8323 }
0x2c36   : > { %v8351_v21 = vsel %vm969_vm3, %v8324_v18, 0 }
0x2c37   : > { %v12178_v37 = vpop.eup %12177 }
0x2c38   : > { %v7656_v22 = vmul.f32 %v12178_v37, %v15336_v47  ;;  %v8326_v47 = vpop.permute.xlu1 %8325 }
0x2c39   : > { %v8354_v56 = vsel %vm969_vm3, %v8326_v47, 0 }
0x2c3a   : > { %v7763_v44 = vpack.c.bf16 %v7656_v22, %v7655_v15 }
0x2c3b   : > { %v12180_v9 = vpop.eup %12179 }
0x2c3c   : > { %11349 = vmatmul.mubr.msk.bf16.gmra.mxu0 %vm4391_vm10, %v7763_v44  ;;  %v7657_v23 = vmul.f32 %v12180_v9, %v15341_v27 }
0x2c3d   : > { %11352 = vmatprep.mubr.msk.bf16.mxu0 %vm12354_vm9, %v16334_v12 }
0x2c3e   : > { %v7764_v33 = vpack.c.bf16 %v7657_v23, %v7657_v23  ;;  %v8322_v23 = vpop.permute.xlu1 %8321 }
0x2c44   : > { %11353 = vmatmul.mubr.msk.bf16.gmra.mxu0 %vm4391_vm10, %v7764_v33 }
0x2c45   : > { %11392 = vmatprep.mubr.msk.bf16.mxu0 %vm12354_vm9, %v16334_v12 }
0x2c4c   : > { %11393 = vmatmul.mubr.msk.bf16.vlgmr.msra.gmra.mxu0 %vm814_vm2, %v14856_v41 }
0x2c4d   : > { %11443 = vmatpush3.bf16.xpose.msra.mxu0 %v8357_v25  ;;  %11396 = vmatprep.mubr.msk.bf16.mxu0 %vm12354_vm9, %v16334_v12 }
0x2c4e   : > { %11444 = vmatprep.subr.bf16.mxu0 %v16334_v12 }
0x2c51   : > { %v7948_v27 = vpop.f32.mrf.mxu1 }
0x2c52   : > { %v7986_v24 = vmul.f32 0.28867513, %v7948_v27  ;;  %v8348_v27 = vsel %vm969_vm3, %v8322_v23, 0 }
0x2c53   : > { %v11368_v14 = vpop.f32.mrf.mxu1 }
0x2c54   : > { %v15410_v39 = vadd.f32 %v7986_v24, %v12637_v48  ;;  %11397 = vmatmul.mubr.msk.bf16.gmra.mxu0 %vm814_vm2, %v14878_v35 }
0x2c55   : > { %11445 = vmatpush3.bf16.xpose.msra.mxu0 %v8354_v56  ;;  %v7951_v19 = vpop.f32.mrf.mxu1  ;;  %11400 = vmatprep.mubr.msk.bf16.mxu0 %vm12354_vm9, %v16334_v12 }
0x2c56   : > { %v7987_v1 = vmul.f32 0.28867513, %v7951_v19  ;;  %v8004_v34 = vsel %vm4391_vm10, %v15410_v39, -inf  ;;  %11446 = vmatprep.subr.bf16.mxu0 %v16334_v12 }
0x2c57   : > { %8005 = vmax.xlane.f32.xlu1 %v8004_v34  ;;  %v11369_v36 = vpop.f32.mrf.mxu1 }
0x2c58   : > { %v15420_v11 = vadd.f32 %v7987_v1, %v12637_v48 }
0x2c59   : > { %v7956_v51 = vpop.f32.mrf.mxu1 }
0x2c5a   : > { %v7988_v13 = vmul.f32 0.28867513, %v7956_v51  ;;  %v8007_v54 = vsel %vm4391_vm10, %v15420_v11, -inf }
0x2c5b   : > { %v11372_v32 = vpop.f32.mrf.mxu1  ;;  %8008 = vmax.xlane.f32.xlu0 %v8007_v54 }
0x2c5c   : > { %v15426_v8 = vadd.f32 %v7988_v13, %v12637_v48  ;;  %11401 = vmatmul.mubr.msk.bf16.gmra.mxu0 %vm814_vm2, %v14890_v5 }
0x2c5d   : > { %11447 = vmatpush3.bf16.xpose.msra.mxu0 %v8351_v21  ;;  %v7959_v37 = vpop.f32.mrf.mxu1  ;;  %11404 = vmatprep.mubr.msk.bf16.mxu0 %vm12354_vm9, %v16334_v12 }
0x2c5e   : > { %v7989_v15 = vmul.f32 0.28867513, %v7959_v37  ;;  %v8010_v22 = vsel %vm4391_vm10, %v15426_v8, -inf  ;;  %11448 = vmatprep.subr.bf16.mxu0 %v16334_v12 }
0x2c5f   : > { %8011 = vmax.xlane.f32.xlu1 %v8010_v22  ;;  %v11373_v44 = vpop.f32.mrf.mxu1 }
0x2c60   : > { %v15436_v9 = vadd.f32 %v7989_v15, %v12637_v48 }
0x2c61   : > { %v7964_v33 = vpop.f32.mrf.mxu1 }
0x2c62   : > { %v7990_v26 = vmul.f32 0.28867513, %v7964_v33  ;;  %v8013_v25 = vsel %vm4391_vm10, %v15436_v9, -inf }
0x2c63   : > { %8014 = vmax.xlane.f32.xlu1 %v8013_v25  ;;  %v11376_v47 = vpop.f32.mrf.mxu1 }
0x2c64   : > { %v15442_v24 = vadd.f32 %v7990_v26, %v12637_v48  ;;  %11405 = vmatmul.mubr.msk.bf16.gmra.mxu0 %vm814_vm2, %v14902_v53 }
0x2c65   : > { %11449 = vmatpush3.bf16.xpose.msra.mxu0 %v8348_v27  ;;  %v7967_v14 = vpop.f32.mrf.mxu1  ;;  %11408 = vmatprep.mubr.msk.bf16.mxu0 %vm12354_vm9, %v16334_v12 }
0x2c66   : > { %v8016_v56 = vsel %vm4391_vm10, %v15442_v24, -inf  ;;  %11450 = vmatprep.subr.bf16.mxu0 %v16334_v12  ;;  %v7991_v21 = vmul.f32 0.28867513, %v7967_v14  ;;  %v7410_v14 = vadd.f32 %v15268_v45, %v15301_v3  ;;  %v7412_v45 = vadd.f32 %v15285_v10, %v15301_v3 }
0x2c67   : > { %v11377_v19 = vpop.f32.mrf.mxu1  ;;  %8017 = vmax.xlane.f32.xlu0 %v8016_v56 }
0x2c68   : > { %v15460_v37 = vadd.f32 %v7991_v21, %v12637_v48 }
0x2c69   : > { %v7972_v1 = vpop.f32.mrf.mxu1 }
0x2c6a   : > { %v7992_v15 = vmul.f32 0.28867513, %v7972_v1  ;;  %v8019_v26 = vsel %vm4391_vm10, %v15460_v37, -inf }
0x2c6b   : > { %v11380_v34 = vpop.f32.mrf.mxu1 }
0x2c6c   : > { %11409 = vmatmul.mubr.msk.bf16.gmra.mxu0 %vm814_vm2, %v14910_v7  ;;  %v15463_v44 = vadd.f32 %v7992_v15, %v12637_v48  ;;  %v7411_v34 = vadd.f32 %v15277_v63, %v15301_v3 }
0x2c6d   : > { %v7975_v36 = vpop.f32.mrf.mxu1  ;;  %11452 = vmatprep.mubr.msk.bf16.mxu0 %vm12354_vm9, %v16334_v12 }
0x2c6e   : > { %v7993_v23 = vmul.f32 0.28867513, %v7975_v36 }
0x2c6f   : > { %v11381_v18 = vpop.f32.mrf.mxu1 }
0x2c70   : > { %v15471_v25 = vadd.f32 %v7993_v23, %v12637_v48 }
0x2c71   : > { %v7980_v51 = vpop.f32.mrf.mxu1 }
0x2c72   : > { %v7994_v22 = vmul.f32 0.28867513, %v7980_v51  ;;  %v8025_v27 = vsel %vm4391_vm10, %v15471_v25, -inf }
0x2c73   : > { %v11384_v13 = vpop.f32.mrf.mxu1 }
0x2c74   : > { %8309 = vrot.lane.b32.xlu1 %v14939_v59, %s16329_s24  ;;  %v15466_v33 = vadd.f32 %v7994_v22, %v12637_v48 }
0x2c75   : > { %v7983_v54 = vpop.f32.mrf.mxu1 }
0x2c76   : > { %v8028_v47 = vsel %vm4391_vm10, %v15466_v33, -inf }
0x2c77   : > { %v11385_v32 = vpop.f32.mrf.mxu1 }
0x2c78   : > { %v7413_v32 = vadd.f32 %v15287_v61, %v15301_v3 }
0x2c7d   : > { %8319 = vrot.lane.b32.xlu0 %v14939_v59, %s16328_s29  ;;  %v8022_v59 = vsel %vm4391_vm10, %v15463_v44, -inf }
0x2c98   : > { %8020 = vmax.xlane.f32.xlu1 %v8019_v26 }
0x2c9c   : > { %8023 = vmax.xlane.f32.xlu1 %v8022_v59  ;;  %8029 = vmax.xlane.f32.xlu0 %v8028_v47 }
0x2ca0   : > { %8026 = vmax.xlane.f32.xlu1 %v8025_v27 }
0x2ca4   : > { %v7817_v56 = vpop.f32.mrf.mxu0 }
0x2ca5   : > { %v15481_v19 = vadd.f32 %v7817_v56, %v7410_v14 }
0x2ca6   : > { %v11338_v1 = vpop.f32.mrf.mxu0 }
0x2ca8   : > { %v7820_v36 = vpop.f32.mrf.mxu0 }
0x2ca9   : > { %v15485_v18 = vadd.f32 %v7820_v36, %v7411_v34 }
0x2caa   : > { %v11339_v51 = vpop.f32.mrf.mxu0 }
0x2cb1   : > { %8311 = vrot.lane.b32.xlu1 %v14959_v17, %s16329_s24 }
0x2cb5   : > { %8313 = vrot.lane.b32.xlu1 %v14945_v20, %s16329_s24 }
0x2cb9   : > { %8315 = vrot.lane.b32.xlu1 %v14941_v4, %s16329_s24 }
0x2cbd   : > { %8317 = vrot.lane.b32.xlu1 %v14947_v49, %s16329_s24 }
0x2cbf   : > { %v7825_v63 = vpop.f32.mrf.mxu0 }
0x2cc0   : > { %v15497_v13 = vadd.f32 %v7825_v63, %v7412_v45 }
0x2cc1   : > { %v11342_v54 = vpop.f32.mrf.mxu0 }
0x2cc2   : > { %v7415_v54 = vadd.f32 %v15295_v50, %v15301_v3 }
0x2cc3   : > { %v7828_v17 = vpop.f32.mrf.mxu0 }
0x2cc4   : > { %v15501_v21 = vadd.f32 %v7828_v17, %v7413_v32 }
0x2cc5   : > { %v11343_v20 = vpop.f32.mrf.mxu0 }
0x2ce0   : > { %v8006_v15 = vpop.xlane.xlu1 %8005 }
0x2ce1   : > { %v8031_v4 = vsub.f32 %v15410_v39, %v8006_v15 }
0x2ce3   : > { %v8040_v22 = vmul.f32 1.442695, %v8031_v4 }
0x2ce4   : > { %v8009_v23 = vpop.xlane.xlu0 %8008 }
0x2ce5   : > { %12181 = vpow2.f32 %v8040_v22  ;;  %v8032_v49 = vsub.f32 %v15420_v11, %v8009_v23  ;;  %v7414_v11 = vadd.f32 %v15289_v31, %v15301_v3 }
0x2ce7   : > { %v8042_v10 = vmul.f32 1.442695, %v8032_v49 }
0x2ce8   : > { %v8012_v26 = vpop.xlane.xlu1 %8011 }
0x2ce9   : > { %12183 = vpow2.f32 %v8042_v10  ;;  %v8033_v59 = vsub.f32 %v15426_v8, %v8012_v26 }
0x2ceb   : > { %v8044_v47 = vmul.f32 1.442695, %v8033_v59 }
0x2cec   : > { %v8015_v27 = vpop.xlane.xlu1 %8014 }
0x2ced   : > { %12185 = vpow2.f32 %v8044_v47  ;;  %v8034_v61 = vsub.f32 %v15436_v9, %v8015_v27 }
0x2cef   : > { %v8046_v14 = vmul.f32 1.442695, %v8034_v61 }
0x2cf0   : > { %v8018_v56 = vpop.xlane.xlu0 %8017  ;;  %v8310_v22 = vpop.permute.xlu1 %8309 }
0x2cf1   : > { %12187 = vpow2.f32 %v8046_v14  ;;  %v8035_v39 = vsub.f32 %v15442_v24, %v8018_v56 }
0x2cf2   : > { %v15508_v1 = vpop.eup %12181 }
0x2cf3   : > { %v8048_v34 = vmul.f32 1.442695, %v8035_v39  ;;  %v8058_v36 = vsel %vm4391_vm10, %v15508_v1, 0.0 }
0x2cf4   : > { %8059 = vadd.xlane.f32.xlu1 %v8058_v36  ;;  %v8320_v8 = vpop.permute.xlu0 %8319  ;;  %v7833_v51 = vpop.f32.mrf.mxu0 }
0x2cf5   : > { %12189 = vpow2.f32 %v8048_v34  ;;  %v8345_v9 = vsel %vm969_vm3, %v8320_v8, 0  ;;  %v15515_v45 = vadd.f32 %v7833_v51, %v7414_v11 }
0x2cf6   : > { %v15517_v63 = vpop.eup %12183  ;;  %v11346_v24 = vpop.f32.mrf.mxu0  ;;  %11451 = vmatpush3.bf16.xpose.msra.mxu0 %v8345_v9 }
0x2cf7   : > { %v8061_v31 = vsel %vm4391_vm10, %v15517_v63, 0.0  ;;  %11498 = vmatprep.subr.bf16.mxu0 %v16334_v12 }
0x2cf8   : > { %8062 = vadd.xlane.f32.xlu0 %v8061_v31  ;;  %v7836_v32 = vpop.f32.mrf.mxu0 }
0x2cf9   : > { %v15524_v17 = vadd.f32 %v7836_v32, %v7415_v54 }
0x2cfa   : > { %v15526_v20 = vpop.eup %12185  ;;  %v11347_v15 = vpop.f32.mrf.mxu0 }
0x2cfb   : > { %v8064_v4 = vsel %vm4391_vm10, %v15526_v20, 0.0 }
0x2cfc   : > { %8065 = vadd.xlane.f32.xlu0 %v8064_v4  ;;  %v7841_v23 = vpop.f32.mrf.mxu0 }
0x2cfd   : > { %v15531_v50 = vadd.f32 %v7841_v23, %v15304_v55  ;;  %11453 = vmatmul.mubr.msk.bf16.vlgmr.msra.gmra.mxu0 %vm969_vm3, %v8310_v22 }
0x2cfe   : > { %v15534_v3 = vpop.eup %12187  ;;  %v11350_v49 = vpop.f32.mrf.mxu0  ;;  %11456 = vmatprep.mubr.msk.bf16.mxu0 %vm12354_vm9, %v16334_v12 }
0x2cff   : > { %v8067_v10 = vsel %vm4391_vm10, %v15534_v3, 0.0 }
0x2d00   : > { %8068 = vadd.xlane.f32.xlu0 %v8067_v10  ;;  %v7844_v26 = vpop.f32.mrf.mxu0 }
0x2d01   : > { %v15541_v59 = vadd.f32 %v7844_v26, %v15307_v58 }
0x2d02   : > { %v15543_v47 = vpop.eup %12189  ;;  %v11351_v55 = vpop.f32.mrf.mxu0 }
0x2d03   : > { %v8070_v27 = vsel %vm4391_vm10, %v15543_v47, 0.0 }
0x2d04   : > { %8071 = vadd.xlane.f32.xlu0 %v8070_v27  ;;  %v7849_v61 = vpop.f32.mrf.mxu0 }
0x2d05   : > { %v15548_v14 = vadd.f32 %v7849_v61, %v15310_v52 }
0x2d06   : > { %v11354_v56 = vpop.f32.mrf.mxu0 }
0x2d08   : > { %v7852_v39 = vpop.f32.mrf.mxu0 }
0x2d0a   : > { %v11355_v11 = vpop.f32.mrf.mxu0 }
0x2d0c   : > { %v15550_v34 = vpop.f32.mrf.mxu0 }
0x2d0e   : > { %v11394_v36 = vpop.f32.mrf.mxu0 }
0x2d10   : > { %v15552_v8 = vpop.f32.mrf.mxu0 }
0x2d12   : > { %v11395_v58 = vpop.f32.mrf.mxu0 }
0x2d14   : > { %v8170_v51 = vpop.f32.mrf.mxu0 }
0x2d16   : > { %v11398_v9 = vpop.f32.mrf.mxu0 }
0x2d18   : > { %v8173_v24 = vpop.f32.mrf.mxu0 }
0x2d1a   : > { %v11399_v54 = vpop.f32.mrf.mxu0 }
0x2d1c   : > { %v8178_v31 = vpop.f32.mrf.mxu0 }
0x2d1e   : > { %v11402_v32 = vpop.f32.mrf.mxu0 }
0x2d20   : > { %v8181_v15 = vpop.f32.mrf.mxu0 }
0x2d21   : > { %v8021_v4 = vpop.xlane.xlu1 %8020 }
0x2d22   : > { %v8036_v52 = vsub.f32 %v15460_v37, %v8021_v4  ;;  %v11403_v22 = vpop.f32.mrf.mxu0 }
0x2d24   : > { %v8050_v23 = vmul.f32 1.442695, %v8036_v52  ;;  %v8186_v49 = vpop.f32.mrf.mxu0 }
0x2d25   : > { %v8024_v10 = vpop.xlane.xlu1 %8023  ;;  %v8030_v26 = vpop.xlane.xlu0 %8029 }
0x2d26   : > { %12191 = vpow2.f32 %v8050_v23  ;;  %v8037_v55 = vsub.f32 %v15463_v44, %v8024_v10  ;;  %v11406_v27 = vpop.f32.mrf.mxu0  ;;  %v8039_v56 = vsub.f32 %v15466_v33, %v8030_v26 }
0x2d28   : > { %v8052_v61 = vmul.f32 1.442695, %v8037_v55  ;;  %v8189_v39 = vpop.f32.mrf.mxu0  ;;  %v8056_v9 = vmul.f32 1.442695, %v8039_v56  ;;  %v8202_v55 = vpack.c.bf16 %v8181_v15, %v8178_v31 }
0x2d29   : > { %v8027_v11 = vpop.xlane.xlu1 %8026 }
0x2d2a   : > { %12193 = vpow2.f32 %v8052_v61  ;;  %v8038_v36 = vsub.f32 %v15471_v25, %v8027_v11  ;;  %v11407_v58 = vpop.f32.mrf.mxu0  ;;  %v8203_v25 = vpack.c.bf16 %v8189_v39, %v8186_v49  ;;  %v8201_v61 = vpack.c.bf16 %v8173_v24, %v8170_v51 }
0x2d2b   : > { %v8200_v11 = vpack.c.bf16 %v15552_v8, %v15550_v34 }
0x2d2c   : > { %v8054_v37 = vmul.f32 1.442695, %v8038_v36  ;;  %v8194_v54 = vpop.f32.mrf.mxu0 }
0x2d2d   : > { %v8204_v32 = vpack.c.bf16 %v8194_v54, %v8194_v54  ;;  %v8312_v4 = vpop.permute.xlu1 %8311 }
0x2d2e   : > { %12195 = vpow2.f32 %v8054_v37  ;;  %v11410_v52 = vpop.f32.mrf.mxu0  ;;  %11457 = vmatmul.mubr.msk.bf16.gmra.mxu0 %vm969_vm3, %v8312_v4  ;;  %v11705_v4 = vld [vmem:[%s16277_s15 + $0xb8] sm:$0xff]  }
0x2d2f   : > { %v8226_v44 = vsel %vm1152_vm8, %v8204_v32, 0  ;;  %11460 = vmatprep.mubr.msk.bf16.mxu0 %vm12354_vm9, %v16334_v12  ;;  %12197 = vpow2.f32 %v8056_v9 }
0x2d30   : > { %v8197_v33 = vpop.f32.mrf.mxu0  ;;  %11413 = vmatpush3.bf16.msra.mxu1 %v8226_v44 }
0x2d31   : > { %11414 = vmatprep.subr.bf16.mxu1 %v16334_v12  ;;  %v8314_v26 = vpop.permute.xlu1 %8313  ;;  %v11706_v33 = vld [vmem:[%s16277_s15 + $0xb0] sm:$0xff]  }
0x2d32   : > { %v11411_v22 = vpop.f32.mrf.mxu0 }
0x2d33   : > { %v15563_v23 = vpop.eup %12191  ;;  %v11707_v22 = vld [vmem:[%s16277_s15 + $0xa8] sm:$0xff]  }
0x2d34   : > { %11415 = vmatpush3.bf16.msra.mxu1 %v8203_v25  ;;  %v8073_v10 = vsel %vm4391_vm10, %v15563_v23, 0.0 }
0x2d35   : > { %8074 = vadd.xlane.f32.xlu0 %v8073_v10  ;;  %11416 = vmatprep.subr.bf16.mxu1 %v16334_v12  ;;  %v8316_v39 = vpop.permute.xlu1 %8315 }
0x2d36   : > { %11461 = vmatmul.mubr.msk.bf16.gmra.mxu0 %vm969_vm3, %v8314_v26 }
0x2d37   : > { %v15569_v27 = vpop.eup %12193  ;;  %11464 = vmatprep.mubr.msk.bf16.mxu0 %vm12354_vm9, %v16334_v12 }
0x2d38   : > { %11417 = vmatpush3.bf16.msra.mxu1 %v8202_v55  ;;  %v8076_v49 = vsel %vm4391_vm10, %v15569_v27, 0.0 }
0x2d39   : > { %8077 = vadd.xlane.f32.xlu0 %v8076_v49  ;;  %11418 = vmatprep.subr.bf16.mxu1 %v16334_v12  ;;  %v8318_v24 = vpop.permute.xlu1 %8317 }
0x2d3b   : > { %v15576_v56 = vpop.eup %12195 }
0x2d3c   : > { %11419 = vmatpush3.bf16.msra.mxu1 %v8201_v61  ;;  %v8079_v31 = vsel %vm4391_vm10, %v15576_v56, 0.0  ;;  %v15580_v15 = vpop.eup %12197 }
0x2d3d   : > { %8080 = vadd.xlane.f32.xlu0 %v8079_v31  ;;  %11420 = vmatprep.subr.bf16.mxu1 %v16334_v12  ;;  %v8082_v51 = vsel %vm4391_vm10, %v15580_v15, 0.0 }
0x2d3e   : > { %11465 = vmatmul.mubr.msk.bf16.gmra.mxu0 %vm969_vm3, %v8316_v39 }
0x2d3f   : > { %11468 = vmatprep.mubr.msk.bf16.mxu0 %vm12354_vm9, %v16334_v12 }
0x2d40   : > { %11421 = vmatpush3.bf16.msra.mxu1 %v8200_v11 }
0x2d41   : > { %8083 = vadd.xlane.f32.xlu0 %v8082_v51  ;;  %11472 = vmatprep.subr.bf16.mxu1 %v16334_v12 }
0x2d46   : > { %11469 = vmatmul.mubr.msk.bf16.gmra.mxu0 %vm969_vm3, %v8318_v24 }
0x2d47   : > { %11508 = vmatprep.mubr.msk.bf16.mxu0 %vm12354_vm9, %v16334_v12 }
0x2d7d   : > { %v8060_v36 = vpop.xlane.xlu1 %8059 }
0x2d7e   : > { %12199 = vrcp.f32 %v8060_v36 }
0x2d81   : > { %v8063_v34 = vpop.xlane.xlu0 %8062 }
0x2d82   : > { %12201 = vrcp.f32 %v8063_v34 }
0x2d85   : > { %v8066_v8 = vpop.xlane.xlu0 %8065 }
0x2d86   : > { %12203 = vrcp.f32 %v8066_v8 }
0x2d89   : > { %v8069_v58 = vpop.xlane.xlu0 %8068 }
0x2d8a   : > { %12205 = vrcp.f32 %v8069_v58 }
0x2d8b   : > { %v12200_v9 = vpop.eup %12199 }
0x2d8c   : > { %v8094_v54 = vmul.f32 %v12200_v9, %v15508_v1 }
0x2d8d   : > { %v8072_v26 = vpop.xlane.xlu0 %8071 }
0x2d8e   : > { %12207 = vrcp.f32 %v8072_v26 }
0x2d8f   : > { %v12202_v37 = vpop.eup %12201 }
0x2d90   : > { %v8095_v32 = vmul.f32 %v12202_v37, %v15517_v63 }
0x2d92   : > { %v8205_v52 = vpack.c.bf16 %v8095_v32, %v8094_v54 }
0x2d93   : > { %v12204_v44 = vpop.eup %12203 }
0x2d94   : > { %11423 = vmatmul.mubr.msk.bf16.vlgmr.msra.gmra.mxu1 %vm4391_vm10, %v8205_v52  ;;  %v8096_v63 = vmul.f32 %v12204_v44, %v15526_v20 }
0x2d95   : > { %11426 = vmatprep.mubr.msk.bf16.mxu1 %vm12354_vm9, %v16334_v12  ;;  %11473 = vmatpush3.bf16.msra.mxu1 %v11705_v4 }
0x2d96   : > { %11474 = vmatprep.subr.bf16.mxu1 %v16334_v12 }
0x2d97   : > { %v12206_v1 = vpop.eup %12205 }
0x2d98   : > { %v8097_v25 = vmul.f32 %v12206_v1, %v15534_v3 }
0x2d99   : > { %11475 = vmatpush3.bf16.msra.mxu1 %v11706_v33 }
0x2d9a   : > { %v8206_v10 = vpack.c.bf16 %v8097_v25, %v8096_v63  ;;  %11476 = vmatprep.subr.bf16.mxu1 %v16334_v12 }
0x2d9b   : > { %v12208_v58 = vpop.eup %12207 }
0x2d9c   : > { %11427 = vmatmul.mubr.msk.bf16.gmra.mxu1 %vm4391_vm10, %v8206_v10  ;;  %v8098_v54 = vmul.f32 %v12208_v58, %v15543_v47 }
0x2d9d   : > { %11430 = vmatprep.mubr.msk.bf16.mxu1 %vm12354_vm9, %v16334_v12  ;;  %11477 = vmatpush3.bf16.msra.mxu1 %v11707_v22 }
0x2dbd   : > { %v8393_v55 = vpop.f32.mrf.mxu0 }
0x2dbe   : > { %v8431_v20 = vmul.f32 0.28867513, %v8393_v55  ;;  %v8075_v49 = vpop.xlane.xlu0 %8074 }
0x2dbf   : > { %12209 = vrcp.f32 %v8075_v49  ;;  %v11454_v3 = vpop.f32.mrf.mxu0 }
0x2dc0   : > { %v15616_v61 = vadd.f32 %v8431_v20, %v12637_v48 }
0x2dc1   : > { %v8396_v31 = vpop.f32.mrf.mxu0 }
0x2dc2   : > { %v8432_v39 = vmul.f32 0.28867513, %v8396_v31  ;;  %v8078_v11 = vpop.xlane.xlu0 %8077  ;;  %v8449_v51 = vsel %vm4391_vm10, %v15616_v61, -inf }
0x2dc3   : > { %8450 = vmax.xlane.f32.xlu0 %v8449_v51  ;;  %v11455_v24 = vpop.f32.mrf.mxu0  ;;  %12211 = vrcp.f32 %v8078_v11 }
0x2dc4   : > { %v15621_v36 = vadd.f32 %v8432_v39, %v12637_v48 }
0x2dc6   : > { %v8081_v34 = vpop.xlane.xlu0 %8080  ;;  %v8452_v8 = vsel %vm4391_vm10, %v15621_v36, -inf }
0x2dc7   : > { %12213 = vrcp.f32 %v8081_v34  ;;  %8453 = vmax.xlane.f32.xlu1 %v8452_v8 }
0x2dca   : > { %v8084_v9 = vpop.xlane.xlu0 %8083 }
0x2dcb   : > { %12215 = vrcp.f32 %v8084_v9 }
0x2dcc   : > { %v12210_v37 = vpop.eup %12209 }
0x2dcd   : > { %v8099_v32 = vmul.f32 %v12210_v37, %v15563_v23 }
0x2dcf   : > { %v8207_v4 = vpack.c.bf16 %v8099_v32, %v8098_v54 }
0x2dd0   : > { %v12212_v52 = vpop.eup %12211 }
0x2dd1   : > { %11431 = vmatmul.mubr.msk.bf16.gmra.mxu1 %vm4391_vm10, %v8207_v4  ;;  %v8100_v33 = vmul.f32 %v12212_v52, %v15569_v27 }
0x2dd2   : > { %11434 = vmatprep.mubr.msk.bf16.mxu1 %vm12354_vm9, %v16334_v12 }
0x2dd4   : > { %v12214_v44 = vpop.eup %12213 }
0x2dd5   : > { %v8101_v1 = vmul.f32 %v12214_v44, %v15576_v56 }
0x2dd7   : > { %v8208_v63 = vpack.c.bf16 %v8101_v1, %v8100_v33 }
0x2dd8   : > { %v12216_v25 = vpop.eup %12215 }
0x2dd9   : > { %11435 = vmatmul.mubr.msk.bf16.gmra.mxu1 %vm4391_vm10, %v8208_v63  ;;  %v8102_v47 = vmul.f32 %v12216_v25, %v15580_v15 }
0x2dda   : > { %11438 = vmatprep.mubr.msk.bf16.mxu1 %vm12354_vm9, %v16334_v12 }
0x2ddb   : > { %v8209_v23 = vpack.c.bf16 %v8102_v47, %v8102_v47 }
0x2de1   : > { %11439 = vmatmul.mubr.msk.bf16.gmra.mxu1 %vm4391_vm10, %v8209_v23 }
0x2de2   : > { %11478 = vmatprep.mubr.msk.bf16.mxu1 %vm12354_vm9, %v16334_v12 }
0x2de9   : > { %11479 = vmatmul.mubr.msk.bf16.vlgmr.msra.gmra.mxu1 %vm814_vm2, %v14856_v41 }
0x2dea   : > { %11482 = vmatprep.mubr.msk.bf16.mxu1 %vm12354_vm9, %v16334_v12 }
0x2dee   : > { %v8401_v27 = vpop.f32.mrf.mxu0 }
0x2def   : > { %v8433_v56 = vmul.f32 0.28867513, %v8401_v27 }
0x2df0   : > { %v11458_v22 = vpop.f32.mrf.mxu0 }
0x2df1   : > { %v15644_v10 = vadd.f32 %v8433_v56, %v12637_v48  ;;  %11483 = vmatmul.mubr.msk.bf16.gmra.mxu1 %vm814_vm2, %v14878_v35 }
0x2df2   : > { %v8404_v15 = vpop.f32.mrf.mxu0  ;;  %11486 = vmatprep.mubr.msk.bf16.mxu1 %vm12354_vm9, %v16334_v12 }
0x2df3   : > { %v8434_v26 = vmul.f32 0.28867513, %v8404_v15  ;;  %v8455_v41 = vsel %vm4391_vm10, %v15644_v10, -inf }
0x2df4   : > { %8456 = vmax.xlane.f32.xlu0 %v8455_v41  ;;  %v11459_v55 = vpop.f32.mrf.mxu0 }
0x2df5   : > { %v15653_v20 = vadd.f32 %v8434_v26, %v12637_v48 }
0x2df6   : > { %v8409_v49 = vpop.f32.mrf.mxu0 }
0x2df7   : > { %v8435_v3 = vmul.f32 0.28867513, %v8409_v49  ;;  %v8458_v31 = vsel %vm4391_vm10, %v15653_v20, -inf }
0x2df8   : > { %8459 = vmax.xlane.f32.xlu1 %v8458_v31  ;;  %v11462_v35 = vpop.f32.mrf.mxu0 }
0x2df9   : > { %v15658_v39 = vadd.f32 %v8435_v3, %v12637_v48  ;;  %11487 = vmatmul.mubr.msk.bf16.gmra.mxu1 %vm814_vm2, %v14890_v5 }
0x2dfa   : > { %v8412_v11 = vpop.f32.mrf.mxu0  ;;  %11490 = vmatprep.mubr.msk.bf16.mxu1 %vm12354_vm9, %v16334_v12 }
0x2dfb   : > { %v8436_v51 = vmul.f32 0.28867513, %v8412_v11  ;;  %v8461_v24 = vsel %vm4391_vm10, %v15658_v39, -inf }
0x2dfc   : > { %8462 = vmax.xlane.f32.xlu0 %v8461_v24  ;;  %v11463_v34 = vpop.f32.mrf.mxu0 }
0x2dfd   : > { %v15667_v8 = vadd.f32 %v8436_v51, %v12637_v48 }
0x2dfe   : > { %v8417_v58 = vpop.f32.mrf.mxu0 }
0x2dff   : > { %v8437_v9 = vmul.f32 0.28867513, %v8417_v58  ;;  %v8464_v37 = vsel %vm4391_vm10, %v15667_v8, -inf }
0x2e00   : > { %8465 = vmax.xlane.f32.xlu1 %v8464_v37  ;;  %v11466_v5 = vpop.f32.mrf.mxu0 }
0x2e01   : > { %v15672_v54 = vadd.f32 %v8437_v9, %v12637_v48  ;;  %11491 = vmatmul.mubr.msk.bf16.gmra.mxu1 %vm814_vm2, %v14902_v53 }
0x2e02   : > { %v8420_v32 = vpop.f32.mrf.mxu0  ;;  %11494 = vmatprep.mubr.msk.bf16.mxu1 %vm12354_vm9, %v16334_v12 }
0x2e03   : > { %v8438_v4 = vmul.f32 0.28867513, %v8420_v32  ;;  %v8467_v52 = vsel %vm4391_vm10, %v15672_v54, -inf }
0x2e04   : > { %8468 = vmax.xlane.f32.xlu0 %v8467_v52  ;;  %v11467_v44 = vpop.f32.mrf.mxu0 }
0x2e05   : > { %v15681_v33 = vadd.f32 %v8438_v4, %v12637_v48 }
0x2e06   : > { %v8425_v1 = vpop.f32.mrf.mxu0 }
0x2e07   : > { %v8439_v63 = vmul.f32 0.28867513, %v8425_v1  ;;  %v8470_v25 = vsel %vm4391_vm10, %v15681_v33, -inf }
0x2e08   : > { %8471 = vmax.xlane.f32.xlu1 %v8470_v25  ;;  %v11470_v53 = vpop.f32.mrf.mxu0 }
0x2e09   : > { %v15686_v47 = vadd.f32 %v8439_v63, %v12637_v48  ;;  %11495 = vmatmul.mubr.msk.bf16.gmra.mxu1 %vm814_vm2, %v14910_v7 }
0x2e0a   : > { %v8428_v23 = vpop.f32.mrf.mxu0  ;;  %9008 = vmatprep.mubr.bf16.mxu1 %v16335_v46 }
0x2e0b   : > { %v8473_v27 = vsel %vm4391_vm10, %v15686_v47, -inf }
0x2e0c   : > { %8474 = vmax.xlane.f32.xlu0 %v8473_v27  ;;  %v11471_v56 = vpop.f32.mrf.mxu0 }
0x2e4c   : > { %v8451_v22 = vpop.xlane.xlu0 %8450 }
0x2e4d   : > { %v8476_v15 = vsub.f32 %v15616_v61, %v8451_v22 }
0x2e4f   : > { %v8485_v26 = vmul.f32 1.442695, %v8476_v15 }
0x2e50   : > { %v8454_v41 = vpop.xlane.xlu1 %8453 }
0x2e51   : > { %12217 = vpow2.f32 %v8485_v26  ;;  %v8477_v48 = vsub.f32 %v15621_v36, %v8454_v41 }
0x2e53   : > { %v8487_v55 = vmul.f32 1.442695, %v8477_v48 }
0x2e54   : > { %v8262_v49 = vpop.f32.mrf.mxu1 }
0x2e55   : > { %12219 = vpow2.f32 %v8487_v55  ;;  %v15696_v7 = vadd.f32 %v8262_v49, %v15481_v19 }
0x2e56   : > { %v11424_v3 = vpop.f32.mrf.mxu1 }
0x2e58   : > { %v8265_v31 = vpop.f32.mrf.mxu1 }
0x2e59   : > { %v15699_v35 = vadd.f32 %v8265_v31, %v15485_v18 }
0x2e5a   : > { %v11425_v11 = vpop.f32.mrf.mxu1 }
0x2e5c   : > { %v8270_v51 = vpop.f32.mrf.mxu1 }
0x2e5d   : > { %v15702_v61 = vadd.f32 %v8270_v51, %v15497_v13 }
0x2e5e   : > { %v15704_v24 = vpop.eup %12217  ;;  %v11428_v34 = vpop.f32.mrf.mxu1 }
0x2e5f   : > { %v8503_v36 = vsel %vm4391_vm10, %v15704_v24, 0.0 }
0x2e60   : > { %v8273_v58 = vpop.f32.mrf.mxu1  ;;  %8504 = vadd.xlane.f32.xlu1 %v8503_v36 }
0x2e61   : > { %v15709_v19 = vadd.f32 %v8273_v58, %v15501_v21 }
0x2e62   : > { %v15711_v9 = vpop.eup %12219  ;;  %v11429_v18 = vpop.f32.mrf.mxu1 }
0x2e63   : > { %v8506_v37 = vsel %vm4391_vm10, %v15711_v9, 0.0 }
0x2e64   : > { %8507 = vadd.xlane.f32.xlu0 %v8506_v37 }
0x2e7d   : > { %v8457_v13 = vpop.xlane.xlu0 %8456 }
0x2e7e   : > { %v8478_v5 = vsub.f32 %v15644_v10, %v8457_v13 }
0x2e80   : > { %v8489_v32 = vmul.f32 1.442695, %v8478_v5 }
0x2e81   : > { %v8460_v4 = vpop.xlane.xlu1 %8459 }
0x2e82   : > { %12221 = vpow2.f32 %v8489_v32  ;;  %v8479_v52 = vsub.f32 %v15653_v20, %v8460_v4 }
0x2e84   : > { %v8491_v44 = vmul.f32 1.442695, %v8479_v52 }
0x2e85   : > { %v8463_v1 = vpop.xlane.xlu0 %8462 }
0x2e86   : > { %12223 = vpow2.f32 %v8491_v44  ;;  %v8480_v21 = vsub.f32 %v15658_v39, %v8463_v1 }
0x2e88   : > { %v8493_v63 = vmul.f32 1.442695, %v8480_v21 }
0x2e89   : > { %v8466_v25 = vpop.xlane.xlu1 %8465 }
0x2e8a   : > { %12225 = vpow2.f32 %v8493_v63  ;;  %v8481_v53 = vsub.f32 %v15667_v8, %v8466_v25 }
0x2e8c   : > { %v8495_v23 = vmul.f32 1.442695, %v8481_v53 }
0x2e8d   : > { %v8469_v27 = vpop.xlane.xlu0 %8468 }
0x2e8e   : > { %12227 = vpow2.f32 %v8495_v23  ;;  %v8482_v10 = vsub.f32 %v15672_v54, %v8469_v27 }
0x2e8f   : > { %v15720_v56 = vpop.eup %12221 }
0x2e90   : > { %v8497_v22 = vmul.f32 1.442695, %v8482_v10  ;;  %v8509_v20 = vsel %vm4391_vm10, %v15720_v56, 0.0 }
0x2e91   : > { %v8278_v15 = vpop.f32.mrf.mxu1  ;;  %8510 = vadd.xlane.f32.xlu1 %v8509_v20  ;;  %v8472_v26 = vpop.xlane.xlu1 %8471 }
0x2e92   : > { %12229 = vpow2.f32 %v8497_v22  ;;  %v15725_v39 = vadd.f32 %v8278_v15, %v15515_v45  ;;  %v8483_v8 = vsub.f32 %v15681_v33, %v8472_v26 }
0x2e93   : > { %v15728_v41 = vpop.eup %12223  ;;  %v11432_v48 = vpop.f32.mrf.mxu1 }
0x2e94   : > { %v8499_v55 = vmul.f32 1.442695, %v8483_v8  ;;  %v8512_v54 = vsel %vm4391_vm10, %v15728_v41, 0.0 }
0x2e95   : > { %v8281_v49 = vpop.f32.mrf.mxu1  ;;  %8513 = vadd.xlane.f32.xlu0 %v8512_v54  ;;  %v8475_v3 = vpop.xlane.xlu0 %8474 }
0x2e96   : > { %12231 = vpow2.f32 %v8499_v55  ;;  %v15733_v31 = vadd.f32 %v8281_v49, %v15524_v17  ;;  %v8484_v11 = vsub.f32 %v15686_v47, %v8475_v3 }
0x2e97   : > { %v15736_v45 = vpop.eup %12225  ;;  %v11433_v51 = vpop.f32.mrf.mxu1 }
0x2e98   : > { %v8501_v33 = vmul.f32 1.442695, %v8484_v11  ;;  %v8515_v34 = vsel %vm4391_vm10, %v15736_v45, 0.0 }
0x2e99   : > { %v8286_v36 = vpop.f32.mrf.mxu1  ;;  %8516 = vadd.xlane.f32.xlu1 %v8515_v34 }
0x2e9a   : > { %12233 = vpow2.f32 %v8501_v33  ;;  %v15741_v58 = vadd.f32 %v8286_v36, %v15531_v50 }
0x2e9b   : > { %v15743_v18 = vpop.eup %12227  ;;  %v11436_v37 = vpop.f32.mrf.mxu1 }
0x2e9c   : > { %v8518_v17 = vsel %vm4391_vm10, %v15743_v18, 0.0 }
0x2e9d   : > { %v8289_v47 = vpop.f32.mrf.mxu1  ;;  %8519 = vadd.xlane.f32.xlu0 %v8518_v17 }
0x2e9e   : > { %v15748_v13 = vadd.f32 %v8289_v47, %v15541_v59 }
0x2e9f   : > { %v15750_v5 = vpop.eup %12229  ;;  %v11437_v32 = vpop.f32.mrf.mxu1 }
0x2ea0   : > { %v8521_v4 = vsel %vm4391_vm10, %v15750_v5, 0.0 }
0x2ea1   : > { %v8294_v52 = vpop.f32.mrf.mxu1  ;;  %8522 = vadd.xlane.f32.xlu1 %v8521_v4 }
0x2ea2   : > { %v15755_v50 = vadd.f32 %v8294_v52, %v15548_v14 }
0x2ea3   : > { %v15757_v44 = vpop.eup %12231  ;;  %v11440_v1 = vpop.f32.mrf.mxu1 }
0x2ea4   : > { %v8524_v21 = vsel %vm4391_vm10, %v15757_v44, 0.0 }
0x2ea5   : > { %v8297_v63 = vpop.f32.mrf.mxu1  ;;  %8525 = vadd.xlane.f32.xlu0 %v8524_v21 }
0x2ea7   : > { %v15761_v59 = vpop.eup %12233  ;;  %v11441_v25 = vpop.f32.mrf.mxu1 }
0x2ea8   : > { %v8527_v53 = vsel %vm4391_vm10, %v15761_v59, 0.0 }
0x2ea9   : > { %v8607_v23 = vpop.f32.mrf.mxu1  ;;  %8528 = vadd.xlane.f32.xlu1 %v8527_v53 }
0x2eab   : > { %v11480_v27 = vpop.f32.mrf.mxu1 }
0x2ead   : > { %v8610_v10 = vpop.f32.mrf.mxu1 }
0x2eae   : > { %v8645_v1 = vpack.c.bf16 %v8610_v10, %v8607_v23 }
0x2eaf   : > { %v11481_v14 = vpop.f32.mrf.mxu1 }
0x2eb1   : > { %v8615_v22 = vpop.f32.mrf.mxu1 }
0x2eb3   : > { %v11484_v20 = vpop.f32.mrf.mxu1 }
0x2eb5   : > { %v8618_v15 = vpop.f32.mrf.mxu1 }
0x2eb6   : > { %v8646_v52 = vpack.c.bf16 %v8618_v15, %v8615_v22 }
0x2eb7   : > { %v11485_v26 = vpop.f32.mrf.mxu1 }
0x2eb9   : > { %v8623_v8 = vpop.f32.mrf.mxu1 }
0x2ebb   : > { %v11488_v48 = vpop.f32.mrf.mxu1 }
0x2ebd   : > { %v8626_v55 = vpop.f32.mrf.mxu1 }
0x2ebe   : > { %v8647_v4 = vpack.c.bf16 %v8626_v55, %v8623_v8 }
0x2ebf   : > { %v11489_v54 = vpop.f32.mrf.mxu1 }
0x2ec1   : > { %v8631_v49 = vpop.f32.mrf.mxu1 }
0x2ec3   : > { %v11492_v3 = vpop.f32.mrf.mxu1 }
0x2ec5   : > { %v8634_v11 = vpop.f32.mrf.mxu1 }
0x2ec6   : > { %v8648_v47 = vpack.c.bf16 %v8634_v11, %v8631_v49 }
0x2ec7   : > { %v11493_v51 = vpop.f32.mrf.mxu1 }
0x2ec9   : > { %v8639_v33 = vpop.f32.mrf.mxu1 }
0x2eca   : > { %v8649_v34 = vpack.c.bf16 %v8639_v33, %v8639_v33 }
0x2ecb   : > { %v11496_v36 = vpop.f32.mrf.mxu1 }
0x2ecc   : > { %v8671_v37 = vsel %vm1152_vm8, %v8649_v34, 0 }
0x2ecd   : > { %v8642_v17 = vpop.f32.mrf.mxu1  ;;  %11499 = vmatpush3.bf16.msra.mxu0 %v8671_v37 }
0x2ece   : > { %11500 = vmatprep.subr.bf16.mxu0 %v16334_v12 }
0x2ecf   : > { %v11497_v32 = vpop.f32.mrf.mxu1 }
0x2ed1   : > { %11501 = vmatpush3.bf16.msra.mxu0 %v8648_v47 }
0x2ed2   : > { %11502 = vmatprep.subr.bf16.mxu0 %v16334_v12 }
0x2ed5   : > { %11503 = vmatpush3.bf16.msra.mxu0 %v8647_v4 }
0x2ed6   : > { %11504 = vmatprep.subr.bf16.mxu0 %v16334_v12 }
0x2ed9   : > { %11505 = vmatpush3.bf16.msra.mxu0 %v8646_v52 }
0x2eda   : > { %11506 = vmatprep.subr.bf16.mxu0 %v16334_v12 }
0x2edd   : > { %11507 = vmatpush3.bf16.msra.mxu0 %v8645_v1 }
0x2ede   : > { %9345 = vmatprep.subr.bf16.mxu0 %v16335_v46 }
0x2ee9   : > { %v8505_v21 = vpop.xlane.xlu1 %8504 }
0x2eea   : > { %12235 = vrcp.f32 %v8505_v21 }
0x2eed   : > { %v8508_v63 = vpop.xlane.xlu0 %8507 }
0x2eee   : > { %12237 = vrcp.f32 %v8508_v63 }
0x2ef7   : > { %v12236_v25 = vpop.eup %12235 }
0x2ef8   : > { %v8539_v27 = vmul.f32 %v12236_v25, %v15704_v24 }
0x2efb   : > { %v12238_v53 = vpop.eup %12237 }
0x2efc   : > { %v8540_v14 = vmul.f32 %v12238_v53, %v15711_v9 }
0x2efe   : > { %v8650_v20 = vpack.c.bf16 %v8540_v14, %v8539_v27 }
0x2f00   : > { %11509 = vmatmul.mubr.msk.bf16.vlgmr.msra.gmra.mxu0 %vm4391_vm10, %v8650_v20 }
0x2f01   : > { %11512 = vmatprep.mubr.msk.bf16.mxu0 %vm12354_vm9, %v16334_v12 }
0x2f1a   : > { %v8511_v23 = vpop.xlane.xlu1 %8510 }
0x2f1b   : > { %12239 = vrcp.f32 %v8511_v23 }
0x2f1e   : > { %v8514_v10 = vpop.xlane.xlu0 %8513 }
0x2f1f   : > { %12241 = vrcp.f32 %v8514_v10 }
0x2f22   : > { %v8517_v22 = vpop.xlane.xlu1 %8516 }
0x2f23   : > { %12243 = vrcp.f32 %v8517_v22 }
0x2f26   : > { %v8520_v15 = vpop.xlane.xlu0 %8519 }
0x2f27   : > { %12245 = vrcp.f32 %v8520_v15 }
0x2f28   : > { %v12240_v26 = vpop.eup %12239 }
0x2f29   : > { %v8541_v24 = vmul.f32 %v12240_v26, %v15720_v56 }
0x2f2a   : > { %v8523_v8 = vpop.xlane.xlu1 %8522 }
0x2f2b   : > { %12247 = vrcp.f32 %v8523_v8 }
0x2f2c   : > { %v12242_v48 = vpop.eup %12241 }
0x2f2d   : > { %v8542_v9 = vmul.f32 %v12242_v48, %v15728_v41 }
0x2f2e   : > { %v8526_v55 = vpop.xlane.xlu0 %8525 }
0x2f2f   : > { %12249 = vrcp.f32 %v8526_v55  ;;  %v8651_v54 = vpack.c.bf16 %v8542_v9, %v8541_v24 }
0x2f30   : > { %v12244_v49 = vpop.eup %12243 }
0x2f31   : > { %11513 = vmatmul.mubr.msk.bf16.gmra.mxu0 %vm4391_vm10, %v8651_v54  ;;  %v8543_v51 = vmul.f32 %v12244_v49, %v15736_v45 }
0x2f32   : > { %v8529_v3 = vpop.xlane.xlu1 %8528  ;;  %11516 = vmatprep.mubr.msk.bf16.mxu0 %vm12354_vm9, %v16334_v12 }
0x2f33   : > { %12251 = vrcp.f32 %v8529_v3 }
0x2f34   : > { %v12246_v11 = vpop.eup %12245 }
0x2f35   : > { %v8544_v33 = vmul.f32 %v12246_v11, %v15743_v18 }
0x2f37   : > { %v8652_v34 = vpack.c.bf16 %v8544_v33, %v8543_v51 }
0x2f38   : > { %v12248_v56 = vpop.eup %12247 }
0x2f39   : > { %11517 = vmatmul.mubr.msk.bf16.gmra.mxu0 %vm4391_vm10, %v8652_v34  ;;  %v8545_v36 = vmul.f32 %v12248_v56, %v15750_v5 }
0x2f3a   : > { %11520 = vmatprep.mubr.msk.bf16.mxu0 %vm12354_vm9, %v16334_v12 }
0x2f3c   : > { %v12250_v41 = vpop.eup %12249 }
0x2f3d   : > { %v8546_v37 = vmul.f32 %v12250_v41, %v15757_v44 }
0x2f3f   : > { %v8653_v17 = vpack.c.bf16 %v8546_v37, %v8545_v36 }
0x2f40   : > { %v12252_v47 = vpop.eup %12251 }
0x2f41   : > { %11521 = vmatmul.mubr.msk.bf16.gmra.mxu0 %vm4391_vm10, %v8653_v17  ;;  %v8547_v45 = vmul.f32 %v12252_v47, %v15761_v59 }
0x2f42   : > { %11524 = vmatprep.mubr.msk.bf16.mxu0 %vm12354_vm9, %v16334_v12 }
0x2f43   : > { %v8654_v18 = vpack.c.bf16 %v8547_v45, %v8547_v45 }
0x2f49   : > { %11525 = vmatmul.mubr.msk.bf16.gmra.mxu0 %vm4391_vm10, %v8654_v18  ;;  %v11710_v18 = vld [vmem:[%s16278_s16 + $0x54] ss:$8 sps:$4 sm:$0xff]  }
0x2f4a   : > { %8986 = vmatprep.subr.bf16.mxu1 %v11710_v18 }
0x2fc0   : > { %v8707_v32 = vpop.f32.mrf.mxu0 }
0x2fc1   : > { %v8745_v4 = vadd.f32 %v8707_v32, %v15696_v7  ;;  %v11708_v32 = vld [vmem:[%s16278_s16 + $0x50] ss:$8 sps:$4 sm:$0xff]  }
0x2fc2   : > { %v11510_v52 = vpop.f32.mrf.mxu0  ;;  %8987 = vmatpush1.bf16.msra.mxu1 %v11708_v32 }
0x2fc3   : > { %v8754_v5 = vadd.f32 %v8745_v4, %v14728_v6  ;;  %v11713_v4 = vld [vmem:[%s16278_s16 + $0x44] ss:$8 sps:$4 sm:$0xff]   ;;  %v11711_v52 = vld [vmem:[%s16278_s16 + $0x40] ss:$8 sps:$4 sm:$0xff]  }
0x2fc4   : > { %v8710_v1 = vpop.f32.mrf.mxu0  ;;  %8988 = vmatprep.subr.bf16.mxu1 %v11713_v4  ;;  %v15926_v4 = vld [vmem:[%s16281_s19 + $0x8] sm:$0xff] }
0x2fc5   : > { %v8746_v44 = vadd.f32 %v8710_v1, %v15699_v35  ;;  %v8763_v21 = vsel %vm814_vm2, %v8754_v5, 0.0  ;;  %v11714_v1 = vld [vmem:[%s16278_s16 + $0x30] ss:$8 sps:$4 sm:$0xff]  }
0x2fc6   : > { %8764 = vadd.xlane.f32.xlu0 %v8763_v21  ;;  %v11511_v63 = vpop.f32.mrf.mxu0  ;;  %8989 = vmatpush1.bf16.msra.mxu1 %v11711_v52  ;;  %v15930_v52 = vrot.slane %v15926_v4, %v12828_v38 }
0x2fc7   : > { %v15798_v12 = vadd.f32 %v8746_v44, %v14733_v43 }
0x2fc9   : > { %v8766_v59 = vsel %vm814_vm2, %v15798_v12, 0.0 }
0x2fca   : > { %8767 = vadd.xlane.f32.xlu1 %v8766_v59 }
0x2ff1   : > { %v8715_v25 = vpop.f32.mrf.mxu0 }
0x2ff2   : > { %v8747_v7 = vadd.f32 %v8715_v25, %v15702_v61 }
0x2ff3   : > { %v11514_v53 = vpop.f32.mrf.mxu0 }
0x2ff4   : > { %v15804_v6 = vadd.f32 %v8747_v7, %v14738_v29 }
0x2ff5   : > { %v8718_v27 = vpop.f32.mrf.mxu0 }
0x2ff6   : > { %v8748_v35 = vadd.f32 %v8718_v27, %v15709_v19  ;;  %v8769_v14 = vsel %vm814_vm2, %v15804_v6, 0.0 }
0x2ff7   : > { %8770 = vadd.xlane.f32.xlu0 %v8769_v14  ;;  %v11515_v43 = vpop.f32.mrf.mxu0 }
0x2ff8   : > { %v15810_v20 = vadd.f32 %v8748_v35, %v14743_v28 }
0x2ff9   : > { %v8723_v23 = vpop.f32.mrf.mxu0 }
0x2ffa   : > { %v8749_v10 = vadd.f32 %v8723_v23, %v15725_v39  ;;  %v8772_v61 = vsel %vm814_vm2, %v15810_v20, 0.0 }
0x2ffb   : > { %8773 = vadd.xlane.f32.xlu1 %v8772_v61  ;;  %v11518_v29 = vpop.f32.mrf.mxu0 }
0x2ffc   : > { %v15816_v22 = vadd.f32 %v8749_v10, %v14748_v57 }
0x2ffd   : > { %v8726_v19 = vpop.f32.mrf.mxu0 }
0x2ffe   : > { %v8750_v15 = vadd.f32 %v8726_v19, %v15733_v31  ;;  %v8775_v26 = vsel %vm814_vm2, %v15816_v22, 0.0 }
0x2fff   : > { %8776 = vadd.xlane.f32.xlu0 %v8775_v26  ;;  %v11519_v28 = vpop.f32.mrf.mxu0 }
0x3000   : > { %v15822_v8 = vadd.f32 %v8750_v15, %v14753_v30 }
0x3001   : > { %v8731_v39 = vpop.f32.mrf.mxu0 }
0x3002   : > { %v8751_v48 = vadd.f32 %v8731_v39, %v15741_v58  ;;  %v8778_v24 = vsel %vm814_vm2, %v15822_v8, 0.0 }
0x3003   : > { %8779 = vadd.xlane.f32.xlu1 %v8778_v24  ;;  %v11522_v57 = vpop.f32.mrf.mxu0 }
0x3004   : > { %v15828_v9 = vadd.f32 %v8751_v48, %v14758_v40 }
0x3005   : > { %v8734_v31 = vpop.f32.mrf.mxu0 }
0x3006   : > { %v8752_v55 = vadd.f32 %v8734_v31, %v15748_v13  ;;  %v8781_v54 = vsel %vm814_vm2, %v15828_v9, 0.0 }
0x3007   : > { %8782 = vadd.xlane.f32.xlu0 %v8781_v54  ;;  %v11523_v30 = vpop.f32.mrf.mxu0 }
0x3008   : > { %v15834_v49 = vadd.f32 %v8752_v55, %v14763_v62 }
0x3009   : > { %v8739_v58 = vpop.f32.mrf.mxu0 }
0x300a   : > { %v8753_v3 = vadd.f32 %v8739_v58, %v15755_v50  ;;  %v8784_v11 = vsel %vm814_vm2, %v15834_v49, 0.0 }
0x300b   : > { %8785 = vadd.xlane.f32.xlu1 %v8784_v11  ;;  %v11526_v40 = vpop.f32.mrf.mxu0 }
0x300c   : > { %v15840_v51 = vadd.f32 %v8753_v3, %v14768_v16 }
0x300d   : > { %v8742_v13 = vpop.f32.mrf.mxu0 }
0x300e   : > { %v8787_v33 = vsel %vm814_vm2, %v15840_v51, 0.0 }
0x300f   : > { %8788 = vadd.xlane.f32.xlu0 %v8787_v33  ;;  %v11527_v34 = vpop.f32.mrf.mxu0 }
0x304f   : > { %v8765_v56 = vpop.xlane.xlu0 %8764 }
0x3050   : > { %v8790_v62 = vmul.f32 0.020833334, %v8765_v56 }
0x3052   : > { %v15844_v41 = vsub.f32 %v8754_v5, %v8790_v62  ;;  %v11716_v5 = vld [vmem:[%s16278_s16 + $0x34] ss:$8 sps:$4 sm:$0xff]  }
0x3053   : > { %v8768_v36 = vpop.xlane.xlu1 %8767  ;;  %8990 = vmatprep.subr.bf16.mxu1 %v11716_v5  ;;  %v11717_v62 = vld [vmem:[%s16280_s18 + $0x98] sm:$0xff]  }
0x3054   : > { %v8791_v50 = vmul.f32 0.020833334, %v8768_v36  ;;  %v8808_v37 = vmul.f32 %v15844_v41, %v15844_v41  ;;  %8991 = vmatpush1.bf16.msra.mxu1 %v11714_v1  ;;  %9346 = vmatpush1.bf16.msra.mxu0 %v11717_v62  ;;  %v11718_v36 = vld [vmem:[%s16280_s18 + $0x90] sm:$0xff]  }
0x3055   : > { %9347 = vmatprep.subr.bf16.mxu0 %v16335_v46 }
0x3056   : > { %v15849_v17 = vsub.f32 %v15798_v12, %v8791_v50  ;;  %v8817_v16 = vsel %vm814_vm2, %v8808_v37, 0.0 }
0x3057   : > { %8818 = vadd.xlane.f32.xlu1 %v8817_v16 }
0x3058   : > { %v8809_v47 = vmul.f32 %v15849_v17, %v15849_v17  ;;  %9348 = vmatpush1.bf16.msra.mxu0 %v11718_v36 }
0x3059   : > { %9349 = vmatprep.subr.bf16.mxu0 %v16335_v46 }
0x305a   : > { %v8820_v45 = vsel %vm814_vm2, %v8809_v47, 0.0 }
0x305b   : > { %8821 = vadd.xlane.f32.xlu0 %v8820_v45 }
0x3080   : > { %v8771_v44 = vpop.xlane.xlu0 %8770 }
0x3081   : > { %v8792_v21 = vmul.f32 0.020833334, %v8771_v44  ;;  %v15935_v44 = vrot.slane %v15926_v4, %v12833_v0 }
0x3083   : > { %v15874_v63 = vsub.f32 %v15804_v6, %v8792_v21 }
0x3084   : > { %v8774_v59 = vpop.xlane.xlu1 %8773 }
0x3085   : > { %v8793_v25 = vmul.f32 0.020833334, %v8774_v59  ;;  %v8810_v7 = vmul.f32 %v15874_v63, %v15874_v63 }
0x3087   : > { %v15879_v53 = vsub.f32 %v15810_v20, %v8793_v25  ;;  %v8823_v27 = vsel %vm814_vm2, %v8810_v7, 0.0 }
0x3088   : > { %v8777_v35 = vpop.xlane.xlu0 %8776  ;;  %8824 = vadd.xlane.f32.xlu1 %v8823_v27 }
0x3089   : > { %v8794_v14 = vmul.f32 0.020833334, %v8777_v35  ;;  %v8811_v43 = vmul.f32 %v15879_v53, %v15879_v53 }
0x308b   : > { %v15885_v23 = vsub.f32 %v15816_v22, %v8794_v14  ;;  %v8826_v10 = vsel %vm814_vm2, %v8811_v43, 0.0 }
0x308c   : > { %v8780_v61 = vpop.xlane.xlu1 %8779  ;;  %8827 = vadd.xlane.f32.xlu0 %v8826_v10 }
0x308d   : > { %v8795_v29 = vmul.f32 0.020833334, %v8780_v61  ;;  %v8812_v19 = vmul.f32 %v15885_v23, %v15885_v23 }
0x308f   : > { %v15891_v15 = vsub.f32 %v15822_v8, %v8795_v29  ;;  %v8829_v26 = vsel %vm814_vm2, %v8812_v19, 0.0 }
0x3090   : > { %v8783_v28 = vpop.xlane.xlu0 %8782  ;;  %8830 = vadd.xlane.f32.xlu1 %v8829_v26 }
0x3091   : > { %v8796_v39 = vmul.f32 0.020833334, %v8783_v28  ;;  %v8813_v48 = vmul.f32 %v15891_v15, %v15891_v15 }
0x3093   : > { %v15897_v24 = vsub.f32 %v15828_v9, %v8796_v39  ;;  %v8832_v57 = vsel %vm814_vm2, %v8813_v48, 0.0 }
0x3094   : > { %v8786_v31 = vpop.xlane.xlu1 %8785  ;;  %8833 = vadd.xlane.f32.xlu0 %v8832_v57 }
0x3095   : > { %v8797_v55 = vmul.f32 0.020833334, %v8786_v31  ;;  %v8814_v54 = vmul.f32 %v15897_v24, %v15897_v24 }
0x3097   : > { %v15903_v30 = vsub.f32 %v15834_v49, %v8797_v55  ;;  %v8835_v58 = vsel %vm814_vm2, %v8814_v54, 0.0 }
0x3098   : > { %8836 = vadd.xlane.f32.xlu1 %v8835_v58  ;;  %v8789_v3 = vpop.xlane.xlu0 %8788 }
0x3099   : > { %v8798_v11 = vmul.f32 0.020833334, %v8789_v3  ;;  %v8815_v40 = vmul.f32 %v15903_v30, %v15903_v30 }
0x309b   : > { %v15909_v13 = vsub.f32 %v15840_v51, %v8798_v11  ;;  %v8838_v33 = vsel %vm814_vm2, %v8815_v40, 0.0 }
0x309c   : > { %8839 = vadd.xlane.f32.xlu0 %v8838_v33 }
0x309d   : > { %v8816_v34 = vmul.f32 %v15909_v13, %v15909_v13 }
0x309f   : > { %v8841_v56 = vsel %vm814_vm2, %v8816_v34, 0.0 }
0x30a0   : > { %8842 = vadd.xlane.f32.xlu1 %v8841_v56 }
0x30e0   : > { %v8819_v50 = vpop.xlane.xlu1 %8818 }
0x30e1   : > { %v8844_v37 = vmul.f32 0.020833334, %v8819_v50 }
0x30e3   : > { %v8853_v16 = vadd.f32 1e-06, %v8844_v37 }
0x30e4   : > { %v8822_v47 = vpop.xlane.xlu0 %8821 }
0x30e5   : > { %12253 = vrsqrt.f32 %v8853_v16  ;;  %v8845_v45 = vmul.f32 0.020833334, %v8822_v47 }
0x30e7   : > { %v8854_v18 = vadd.f32 1e-06, %v8845_v45 }
0x30e9   : > { %12255 = vrsqrt.f32 %v8854_v18 }
0x30f2   : > { %v12254_v32 = vpop.eup %12253 }
0x30f3   : > { %v8871_v5 = vmul.f32 %v12254_v32, %v15844_v41 }
0x30f5   : > { %v8884_v21 = vmul.f32 %v15930_v52, %v8871_v5 }
0x30f6   : > { %v12256_v1 = vpop.eup %12255 }
0x30f7   : > { %v8872_v59 = vmul.f32 %v12256_v1, %v15849_v17  ;;  %v8897_v7 = vadd.f32 %v15935_v44, %v8884_v21 }
0x30f9   : > { %v8885_v25 = vmul.f32 %v15930_v52, %v8872_v59 }
0x30fb   : > { %v8898_v27 = vadd.f32 %v15935_v44, %v8885_v25 }
0x30fd   : > { %v8906_v35 = vpack.c.bf16 %v8898_v27, %v8897_v7 }
0x30ff   : > { %10132 = vmatmul.mubr.msk.bf16.vlgmr.msra.gmra.mxu1 %vm814_vm2, %v8906_v35 }
0x3100   : > { %9018 = vmatprep.mubr.bf16.mxu1 %v16335_v46 }
0x3111   : > { %v8825_v38 = vpop.xlane.xlu1 %8824 }
0x3112   : > { %v8846_v41 = vmul.f32 0.020833334, %v8825_v38 }
0x3114   : > { %v8855_v14 = vadd.f32 1e-06, %v8846_v41 }
0x3115   : > { %v8828_v0 = vpop.xlane.xlu0 %8827 }
0x3116   : > { %12257 = vrsqrt.f32 %v8855_v14  ;;  %v8847_v43 = vmul.f32 0.020833334, %v8828_v0 }
0x3118   : > { %v8856_v10 = vadd.f32 1e-06, %v8847_v43 }
0x3119   : > { %v8831_v61 = vpop.xlane.xlu1 %8830 }
0x311a   : > { %12259 = vrsqrt.f32 %v8856_v10  ;;  %v8848_v17 = vmul.f32 0.020833334, %v8831_v61  ;;  %v11723_v61 = vld [vmem:[%s16280_s18 + $0x68] sm:$0xff]  }
0x311c   : > { %v8857_v29 = vadd.f32 1e-06, %v8848_v17  ;;  %v11724_v17 = vld [vmem:[%s16280_s18 + $0x60] sm:$0xff]  }
0x311d   : > { %v8834_v19 = vpop.xlane.xlu0 %8833 }
0x311e   : > { %12261 = vrsqrt.f32 %v8857_v29  ;;  %v8849_v26 = vmul.f32 0.020833334, %v8834_v19  ;;  %v11725_v29 = vld [vmem:[%s16280_s18 + $0xb8] sm:$0xff]   ;;  %v11726_v19 = vld [vmem:[%s16280_s18 + $0xb0] sm:$0xff]  }
0x3120   : > { %v8858_v28 = vadd.f32 1e-06, %v8849_v26  ;;  %v11727_v26 = vld [vmem:[%s16280_s18 + $0xa8] sm:$0xff]  }
0x3121   : > { %v8837_v39 = vpop.xlane.xlu1 %8836 }
0x3122   : > { %12263 = vrsqrt.f32 %v8858_v28  ;;  %v8850_v48 = vmul.f32 0.020833334, %v8837_v39  ;;  %v11728_v28 = vld [vmem:[%s16280_s18 + $0xa0] sm:$0xff]  }
0x3123   : > { %v12258_v57 = vpop.eup %12257  ;;  %v10125_v39 = vld [vmem:[%s16279_s17 + $0x2] sm:$0x3] }
0x3124   : > { %v8873_v31 = vmul.f32 %v12258_v57, %v15874_v63  ;;  %v8859_v55 = vadd.f32 1e-06, %v8850_v48  ;;  %v16015_v48 = vrot.slane %v10125_v39, %v12567_v60  ;;  %v16018_v57 = vrot.slane %v10125_v39, %v12577_v2 }
0x3125   : > { %v8840_v54 = vpop.xlane.xlu0 %8839 }
0x3126   : > { %12265 = vrsqrt.f32 %v8859_v55  ;;  %v8851_v58 = vmul.f32 0.020833334, %v8840_v54  ;;  %v8886_v33 = vmul.f32 %v15930_v52, %v8873_v31 }
0x3127   : > { %v12260_v3 = vpop.eup %12259 }
0x3128   : > { %v8874_v11 = vmul.f32 %v12260_v3, %v15879_v53  ;;  %v8860_v40 = vadd.f32 1e-06, %v8851_v58  ;;  %v8899_v63 = vadd.f32 %v15935_v44, %v8886_v33 }
0x3129   : > { %v8843_v34 = vpop.xlane.xlu1 %8842 }
0x312a   : > { %12267 = vrsqrt.f32 %v8860_v40  ;;  %v8852_v56 = vmul.f32 0.020833334, %v8843_v34  ;;  %v8887_v62 = vmul.f32 %v15930_v52, %v8874_v11 }
0x312b   : > { %v12262_v36 = vpop.eup %12261 }
0x312c   : > { %v8875_v50 = vmul.f32 %v12262_v36, %v15885_v23  ;;  %v8861_v37 = vadd.f32 1e-06, %v8852_v56  ;;  %v8900_v16 = vadd.f32 %v15935_v44, %v8887_v62 }
0x312e   : > { %12269 = vrsqrt.f32 %v8861_v37  ;;  %v8907_v47 = vpack.c.bf16 %v8900_v16, %v8899_v63  ;;  %v8888_v18 = vmul.f32 %v15930_v52, %v8875_v50 }
0x312f   : > { %v12264_v45 = vpop.eup %12263 }
0x3130   : > { %v8876_v53 = vmul.f32 %v12264_v45, %v15891_v15  ;;  %10133 = vmatmul.mubr.msk.bf16.gmra.mxu1 %vm814_vm2, %v8907_v47  ;;  %v8901_v1 = vadd.f32 %v15935_v44, %v8888_v18 }
0x3131   : > { %9028 = vmatprep.mubr.bf16.mxu1 %v16335_v46 }
0x3132   : > { %v8889_v32 = vmul.f32 %v15930_v52, %v8876_v53 }
0x3133   : > { %v12266_v5 = vpop.eup %12265 }
0x3134   : > { %v8877_v23 = vmul.f32 %v12266_v5, %v15897_v24  ;;  %v8902_v21 = vadd.f32 %v15935_v44, %v8889_v32 }
0x3136   : > { %v8908_v59 = vpack.c.bf16 %v8902_v21, %v8901_v1  ;;  %v8890_v15 = vmul.f32 %v15930_v52, %v8877_v23 }
0x3137   : > { %v12268_v25 = vpop.eup %12267 }
0x3138   : > { %v8878_v7 = vmul.f32 %v12268_v25, %v15903_v30  ;;  %10134 = vmatmul.mubr.msk.bf16.gmra.mxu1 %vm814_vm2, %v8908_v59  ;;  %v8903_v24 = vadd.f32 %v15935_v44, %v8890_v15  ;;  %v11719_v30 = vld [vmem:[%s16280_s18 + $0x88] sm:$0xff]  }
0x3139   : > { %9038 = vmatprep.mubr.bf16.mxu1 %v16335_v46  ;;  %9350 = vmatpush1.bf16.msra.mxu0 %v11719_v30 }
0x313a   : > { %v8891_v27 = vmul.f32 %v15930_v52, %v8878_v7  ;;  %9351 = vmatprep.subr.bf16.mxu0 %v16335_v46 }
0x313b   : > { %v12270_v35 = vpop.eup %12269 }
0x313c   : > { %v8879_v38 = vmul.f32 %v12270_v35, %v15909_v13  ;;  %v8904_v41 = vadd.f32 %v15935_v44, %v8891_v27  ;;  %v11720_v13 = vld [vmem:[%s16280_s18 + $0x80] sm:$0xff]  }
0x313d   : > { %9352 = vmatpush1.bf16.msra.mxu0 %v11720_v13 }
0x313e   : > { %v8909_v14 = vpack.c.bf16 %v8904_v41, %v8903_v24  ;;  %v8892_v0 = vmul.f32 %v15930_v52, %v8879_v38  ;;  %9353 = vmatprep.subr.bf16.mxu0 %v16335_v46  ;;  %v11721_v52 = vld [vmem:[%s16280_s18 + $0x78] sm:$0xff]  }
0x3140   : > { %10135 = vmatmul.mubr.msk.bf16.gmra.mxu1 %vm814_vm2, %v8909_v14  ;;  %v8905_v43 = vadd.f32 %v15935_v44, %v8892_v0  ;;  %v11722_v44 = vld [vmem:[%s16280_s18 + $0x70] sm:$0xff]  }
0x3141   : > { %9048 = vmatprep.mubr.bf16.mxu1 %v16335_v46  ;;  %9354 = vmatpush1.bf16.msra.mxu0 %v11721_v52 }
0x3142   : > { %v8910_v10 = vpack.c.bf16 %v8905_v43, %v8905_v43  ;;  %9355 = vmatprep.subr.bf16.mxu0 %v16335_v46 }
0x3145   : > { %9356 = vmatpush1.bf16.msra.mxu0 %v11722_v44 }
0x3146   : > { %9357 = vmatprep.subr.bf16.mxu0 %v16335_v46 }
0x3148   : > { %10136 = vmatmul.mubr.msk.bf16.gmra.mxu1 %vm814_vm2, %v8910_v10 }
0x3149   : > { %9358 = vmatpush1.bf16.msra.mxu0 %v11723_v61 }
0x314a   : > { %9359 = vmatprep.subr.bf16.mxu0 %v16335_v46 }
0x314d   : > { %9360 = vmatpush1.bf16.msra.mxu0 %v11724_v17 }
0x314e   : > { %9369 = vmatprep.subr.bf16.mxu0 %v16335_v46 }
0x3151   : > { %9370 = vmatpush2.bf16.msra.mxu0 %v11725_v29 }
0x3152   : > { %9371 = vmatprep.subr.bf16.mxu0 %v16335_v46 }
0x3155   : > { %9372 = vmatpush2.bf16.msra.mxu0 %v11726_v19 }
0x3156   : > { %9373 = vmatprep.subr.bf16.mxu0 %v16335_v46 }
0x3159   : > { %9374 = vmatpush2.bf16.msra.mxu0 %v11727_v26 }
0x315a   : > { %9375 = vmatprep.subr.bf16.mxu0 %v16335_v46 }
0x315d   : > { %9376 = vmatpush2.bf16.msra.mxu0 %v11728_v28 }
0x31bf   : > { %v9010_v31 = vpop.f32.mrf.mxu1 }
0x31c0   : > { %v9011_v55 = vadd.f32 %v9010_v31, %v16015_v48 }
0x31c1   : > { %v9012_v54 = vpop.f32.mrf.mxu1 }
0x31c2   : > { %v9057_v46 = vmul.f32 %v9011_v55, %v9011_v55  ;;  %v9013_v58 = vadd.f32 %v9012_v54, %v16018_v57 }
0x31c3   : > { %v9014_v3 = vpop.f32.mrf.mxu1 }
0x31c4   : > { %v9075_v11 = vmul.f32 %v9057_v46, %v9011_v55  ;;  %v9058_v40 = vmul.f32 %v9013_v58, %v9013_v58  ;;  %v9015_v33 = vadd.f32 %v9014_v3, %v16015_v48 }
0x31c5   : > { %v9016_v34 = vpop.f32.mrf.mxu1 }
0x31c6   : > { %v9093_v56 = vmul.f32 0.044715, %v9075_v11  ;;  %v9076_v62 = vmul.f32 %v9058_v40, %v9013_v58  ;;  %v9059_v60 = vmul.f32 %v9015_v33, %v9015_v33  ;;  %v9017_v36 = vadd.f32 %v9016_v34, %v16018_v57 }
0x31c8   : > { %v9111_v2 = vadd.f32 %v9093_v56, %v9011_v55  ;;  %v9094_v50 = vmul.f32 0.044715, %v9076_v62  ;;  %v9077_v37 = vmul.f32 %v9059_v60, %v9015_v33  ;;  %v9060_v63 = vmul.f32 %v9017_v36, %v9017_v36 }
0x31ca   : > { %v9129_v16 = vmul.f32 0.7978846, %v9111_v2  ;;  %v9112_v47 = vadd.f32 %v9094_v50, %v9013_v58  ;;  %v9095_v45 = vmul.f32 0.044715, %v9077_v37  ;;  %v9078_v53 = vmul.f32 %v9060_v63, %v9017_v36 }
0x31cc   : > { %v9130_v18 = vmul.f32 0.7978846, %v9112_v47  ;;  %v9113_v32 = vadd.f32 %v9095_v45, %v9015_v33  ;;  %v9096_v5 = vmul.f32 0.044715, %v9078_v53  ;;  %12271 = vtanh.f32 %v9129_v16 }
0x31ce   : > { %12273 = vtanh.f32 %v9130_v18  ;;  %v9131_v23 = vmul.f32 0.7978846, %v9113_v32  ;;  %v9114_v1 = vadd.f32 %v9096_v5, %v9017_v36 }
0x31d0   : > { %12275 = vtanh.f32 %v9131_v23  ;;  %v9132_v21 = vmul.f32 0.7978846, %v9114_v1 }
0x31d2   : > { %12277 = vtanh.f32 %v9132_v21 }
0x31d9   : > { %v12272_v59 = vpop.eup %12271 }
0x31da   : > { %v9165_v27 = vadd.f32 1.0, %v12272_v59 }
0x31db   : > { %v12274_v25 = vpop.eup %12273 }
0x31dc   : > { %v9166_v7 = vadd.f32 1.0, %v12274_v25  ;;  %v9183_v0 = vmul.f32 0.5, %v9165_v27 }
0x31dd   : > { %v12276_v15 = vpop.eup %12275 }
0x31de   : > { %v9167_v35 = vadd.f32 1.0, %v12276_v15  ;;  %v9184_v24 = vmul.f32 0.5, %v9166_v7  ;;  %v9201_v52 = vmul.f32 %v9183_v0, %v9011_v55 }
0x31df   : > { %v12278_v38 = vpop.eup %12277 }
0x31e0   : > { %v9185_v41 = vmul.f32 0.5, %v9167_v35  ;;  %v9168_v14 = vadd.f32 1.0, %v12278_v38  ;;  %v9202_v13 = vmul.f32 %v9184_v24, %v9013_v58 }
0x31e2   : > { %v9186_v30 = vmul.f32 0.5, %v9168_v14  ;;  %v9203_v43 = vmul.f32 %v9185_v41, %v9015_v33 }
0x31e4   : > { %v9204_v10 = vmul.f32 %v9186_v30, %v9017_v36  ;;  %v9219_v61 = vpack.c.bf16 %v9203_v43, %v9201_v52 }
0x31e6   : > { %v9220_v44 = vpack.c.bf16 %v9204_v10, %v9202_v13 }
0x31e8   : > { %10173 = vmatprep.mubr.msk.bf16.mxu0 %vm759_vm1, %v9220_v44 }
0x31e9   : > { %9378 = vmatmul.mubr.bf16.vlgmr.msra.gmra.mxu0 %v9219_v61 }
0x31f0   : > { %v9020_v17 = vpop.f32.mrf.mxu1 }
0x31f1   : > { %v16026_v29 = vadd.f32 %v9020_v17, %v16015_v48 }
0x31f2   : > { %v9022_v19 = vpop.f32.mrf.mxu1 }
0x31f3   : > { %v9061_v26 = vmul.f32 %v16026_v29, %v16026_v29  ;;  %v16031_v28 = vadd.f32 %v9022_v19, %v16018_v57 }
0x31f4   : > { %v9024_v39 = vpop.f32.mrf.mxu1 }
0x31f5   : > { %v9079_v31 = vmul.f32 %v9061_v26, %v16026_v29  ;;  %v9062_v55 = vmul.f32 %v16031_v28, %v16031_v28  ;;  %v16037_v54 = vadd.f32 %v9024_v39, %v16015_v48 }
0x31f6   : > { %v9026_v46 = vpop.f32.mrf.mxu1 }
0x31f7   : > { %v9097_v58 = vmul.f32 0.044715, %v9079_v31  ;;  %v9080_v3 = vmul.f32 %v9062_v55, %v16031_v28  ;;  %v9063_v11 = vmul.f32 %v16037_v54, %v16037_v54  ;;  %v16043_v40 = vadd.f32 %v9026_v46, %v16018_v57 }
0x31f8   : > { %v9030_v33 = vpop.f32.mrf.mxu1 }
0x31f9   : > { %v9115_v34 = vadd.f32 %v9097_v58, %v16026_v29  ;;  %v9098_v56 = vmul.f32 0.044715, %v9080_v3  ;;  %v9081_v62 = vmul.f32 %v9063_v11, %v16037_v54  ;;  %v9064_v60 = vmul.f32 %v16043_v40, %v16043_v40 }
0x31fa   : > { %v16050_v36 = vadd.f32 %v9030_v33, %v16015_v48  ;;  %v9032_v2 = vpop.f32.mrf.mxu1 }
0x31fb   : > { %v9133_v50 = vmul.f32 0.7978846, %v9115_v34  ;;  %v9116_v37 = vadd.f32 %v9098_v56, %v16031_v28  ;;  %v9099_v63 = vmul.f32 0.044715, %v9081_v62  ;;  %v9082_v16 = vmul.f32 %v9064_v60, %v16043_v40 }
0x31fc   : > { %v9065_v47 = vmul.f32 %v16050_v36, %v16050_v36  ;;  %v16057_v45 = vadd.f32 %v9032_v2, %v16018_v57  ;;  %v9034_v53 = vpop.f32.mrf.mxu1 }
0x31fd   : > { %12279 = vtanh.f32 %v9133_v50  ;;  %v9134_v18 = vmul.f32 0.7978846, %v9116_v37  ;;  %v9117_v32 = vadd.f32 %v9099_v63, %v16037_v54  ;;  %v9100_v5 = vmul.f32 0.044715, %v9082_v16 }
0x31fe   : > { %v9083_v23 = vmul.f32 %v9065_v47, %v16050_v36  ;;  %v9066_v1 = vmul.f32 %v16057_v45, %v16057_v45  ;;  %v16064_v21 = vadd.f32 %v9034_v53, %v16015_v48  ;;  %v9036_v59 = vpop.f32.mrf.mxu1 }
0x31ff   : > { %12281 = vtanh.f32 %v9134_v18  ;;  %v9135_v25 = vmul.f32 0.7978846, %v9117_v32  ;;  %v9118_v7 = vadd.f32 %v9100_v5, %v16043_v40  ;;  %v16068_v15 = vadd.f32 %v9036_v59, %v16018_v57 }
0x3200   : > { %v9101_v27 = vmul.f32 0.044715, %v9083_v23  ;;  %v9084_v35 = vmul.f32 %v9066_v1, %v16057_v45  ;;  %v9067_v38 = vmul.f32 %v16064_v21, %v16064_v21  ;;  %v9040_v24 = vpop.f32.mrf.mxu1 }
0x3201   : > { %12283 = vtanh.f32 %v9135_v25  ;;  %v9136_v41 = vmul.f32 0.7978846, %v9118_v7  ;;  %v9068_v14 = vmul.f32 %v16068_v15, %v16068_v15  ;;  %v16076_v0 = vadd.f32 %v9040_v24, %v16015_v48 }
0x3202   : > { %v9119_v30 = vadd.f32 %v9101_v27, %v16050_v36  ;;  %v9102_v43 = vmul.f32 0.044715, %v9084_v35  ;;  %v9085_v13 = vmul.f32 %v9067_v38, %v16064_v21  ;;  %v9042_v10 = vpop.f32.mrf.mxu1 }
0x3203   : > { %12285 = vtanh.f32 %v9136_v41  ;;  %v9086_v52 = vmul.f32 %v9068_v14, %v16068_v15  ;;  %v9069_v44 = vmul.f32 %v16076_v0, %v16076_v0  ;;  %v16084_v61 = vadd.f32 %v9042_v10, %v16018_v57 }
0x3204   : > { %v9137_v17 = vmul.f32 0.7978846, %v9119_v30  ;;  %v9120_v19 = vadd.f32 %v9102_v43, %v16057_v45  ;;  %v9103_v26 = vmul.f32 0.044715, %v9085_v13  ;;  %v9044_v39 = vpop.f32.mrf.mxu1 }
0x3205   : > { %v9104_v31 = vmul.f32 0.044715, %v9086_v52  ;;  %v9087_v55 = vmul.f32 %v9069_v44, %v16076_v0  ;;  %v9070_v46 = vmul.f32 %v16084_v61, %v16084_v61  ;;  %v16091_v58 = vadd.f32 %v9044_v39, %v16015_v48 }
0x3206   : > { %12287 = vtanh.f32 %v9137_v17  ;;  %v9138_v3 = vmul.f32 0.7978846, %v9120_v19  ;;  %v9121_v11 = vadd.f32 %v9103_v26, %v16064_v21  ;;  %v9046_v33 = vpop.f32.mrf.mxu1 }
0x3207   : > { %v9122_v34 = vadd.f32 %v9104_v31, %v16068_v15  ;;  %v9105_v56 = vmul.f32 0.044715, %v9087_v55  ;;  %v9088_v62 = vmul.f32 %v9070_v46, %v16084_v61  ;;  %v9071_v60 = vmul.f32 %v16091_v58, %v16091_v58 }
0x3208   : > { %12289 = vtanh.f32 %v9138_v3  ;;  %v9139_v2 = vmul.f32 0.7978846, %v9121_v11  ;;  %v16099_v50 = vadd.f32 %v9046_v33, %v16018_v57  ;;  %v9050_v37 = vpop.f32.mrf.mxu1 }
0x3209   : > { %v9140_v63 = vmul.f32 0.7978846, %v9122_v34  ;;  %v9123_v16 = vadd.f32 %v9105_v56, %v16076_v0  ;;  %v9106_v47 = vmul.f32 0.044715, %v9088_v62  ;;  %v9089_v53 = vmul.f32 %v9071_v60, %v16091_v58 }
0x320a   : > { %v12280_v18 = vpop.eup %12279  ;;  %12291 = vtanh.f32 %v9139_v2  ;;  %v9072_v32 = vmul.f32 %v16099_v50, %v16099_v50  ;;  %v16106_v5 = vadd.f32 %v9050_v37, %v16015_v48  ;;  %v9052_v23 = vpop.f32.mrf.mxu1 }
0x320b   : > { %12293 = vtanh.f32 %v9140_v63  ;;  %v9141_v1 = vmul.f32 0.7978846, %v9123_v16  ;;  %v9124_v59 = vadd.f32 %v9106_v47, %v16084_v61  ;;  %v9107_v7 = vmul.f32 0.044715, %v9089_v53 }
0x320c   : > { %v12282_v25 = vpop.eup %12281  ;;  %v9090_v27 = vmul.f32 %v9072_v32, %v16099_v50  ;;  %v9073_v35 = vmul.f32 %v16106_v5, %v16106_v5  ;;  %v16113_v38 = vadd.f32 %v9052_v23, %v16018_v57  ;;  %v9054_v24 = vpop.f32.mrf.mxu1  ;;  %v9169_v41 = vadd.f32 1.0, %v12280_v18 }
0x320d   : > { %v9170_v14 = vadd.f32 1.0, %v12282_v25  ;;  %12295 = vtanh.f32 %v9141_v1  ;;  %v9142_v48 = vmul.f32 0.7978846, %v9124_v59  ;;  %v9125_v43 = vadd.f32 %v9107_v7, %v16091_v58 }
0x320e   : > { %v12284_v30 = vpop.eup %12283  ;;  %v9108_v13 = vmul.f32 0.044715, %v9090_v27  ;;  %v9091_v10 = vmul.f32 %v9073_v35, %v16106_v5  ;;  %v9074_v52 = vmul.f32 %v16113_v38, %v16113_v38  ;;  %v9055_v44 = vpop.f32.mrf.mxu1  ;;  %v9187_v55 = vmul.f32 0.5, %v9169_v41 }
0x320f   : > { %v9171_v17 = vadd.f32 1.0, %v12284_v30  ;;  %12297 = vtanh.f32 %v9142_v48  ;;  %v9143_v57 = vmul.f32 0.7978846, %v9125_v43  ;;  %v9188_v46 = vmul.f32 0.5, %v9170_v14 }
0x3210   : > { %v12286_v19 = vpop.eup %12285  ;;  %v9126_v26 = vadd.f32 %v9108_v13, %v16099_v50  ;;  %v9109_v39 = vmul.f32 0.044715, %v9091_v10  ;;  %v9092_v31 = vmul.f32 %v9074_v52, %v16113_v38  ;;  %v9205_v47 = vmul.f32 %v9187_v55, %v16026_v29 }
0x3211   : > { %v9189_v3 = vmul.f32 0.5, %v9171_v17  ;;  %v9172_v11 = vadd.f32 1.0, %v12286_v19  ;;  %12299 = vtanh.f32 %v9143_v57  ;;  %v9206_v53 = vmul.f32 %v9188_v46, %v16031_v28 }
0x3212   : > { %v9144_v33 = vmul.f32 0.7978846, %v9126_v26  ;;  %v9127_v34 = vadd.f32 %v9109_v39, %v16106_v5  ;;  %v9110_v56 = vmul.f32 0.044715, %v9092_v31 }
0x3213   : > { %v12288_v62 = vpop.eup %12287  ;;  %v9190_v60 = vmul.f32 0.5, %v9172_v11  ;;  %v9207_v2 = vmul.f32 %v9189_v3, %v16037_v54 }
0x3214   : > { %12301 = vtanh.f32 %v9144_v33  ;;  %v9145_v37 = vmul.f32 0.7978846, %v9127_v34  ;;  %v9128_v63 = vadd.f32 %v9110_v56, %v16113_v38  ;;  %v9173_v32 = vadd.f32 1.0, %v12288_v62 }
0x3215   : > { %v12290_v16 = vpop.eup %12289  ;;  %v9208_v18 = vmul.f32 %v9190_v60, %v16043_v40  ;;  %v9221_v54 = vpack.c.bf16 %v9207_v2, %v9205_v47 }
0x3216   : > { %v9174_v23 = vadd.f32 1.0, %v12290_v16  ;;  %12303 = vtanh.f32 %v9145_v37  ;;  %v9146_v1 = vmul.f32 0.7978846, %v9128_v63  ;;  %v9191_v29 = vmul.f32 0.5, %v9173_v32 }
0x3217   : > { %v12292_v59 = vpop.eup %12291  ;;  %v9222_v25 = vpack.c.bf16 %v9208_v18, %v9206_v53 }
0x3218   : > { %v12294_v7 = vpop.eup %12293  ;;  %v9175_v27 = vadd.f32 1.0, %v12292_v59  ;;  %12305 = vtanh.f32 %v9146_v1  ;;  %v9192_v35 = vmul.f32 0.5, %v9174_v23  ;;  %v9209_v13 = vmul.f32 %v9191_v29, %v16050_v36 }
0x3219   : > { %v9176_v24 = vadd.f32 1.0, %v12294_v7  ;;  %10174 = vmatprep.mubr.msk.bf16.mxu0 %vm759_vm1, %v9222_v25 }
0x321a   : > { %v12296_v41 = vpop.eup %12295  ;;  %v9193_v14 = vmul.f32 0.5, %v9175_v27  ;;  %9385 = vmatmul.mubr.bf16.gmra.mxu0 %v9221_v54  ;;  %v9210_v30 = vmul.f32 %v9192_v35, %v16057_v45 }
0x321b   : > { %v9194_v28 = vmul.f32 0.5, %v9176_v24  ;;  %v9177_v44 = vadd.f32 1.0, %v12296_v41 }
0x321c   : > { %v12298_v40 = vpop.eup %12297  ;;  %v9211_v48 = vmul.f32 %v9193_v14, %v16064_v21 }
0x321d   : > { %v9212_v43 = vmul.f32 %v9194_v28, %v16068_v15  ;;  %v9178_v10 = vadd.f32 1.0, %v12298_v40  ;;  %v9195_v46 = vmul.f32 0.5, %v9177_v44 }
0x321e   : > { %v12300_v52 = vpop.eup %12299  ;;  %v9223_v57 = vpack.c.bf16 %v9211_v48, %v9209_v13 }
0x321f   : > { %v9224_v17 = vpack.c.bf16 %v9212_v43, %v9210_v30  ;;  %v9179_v19 = vadd.f32 1.0, %v12300_v52  ;;  %v9196_v39 = vmul.f32 0.5, %v9178_v10  ;;  %v9213_v56 = vmul.f32 %v9195_v46, %v16076_v0 }
0x3220   : > { %v9257_v0 = vrot.slane %v15926_v4, %v12902_v42 }
0x3221   : > { %v12302_v26 = vpop.eup %12301  ;;  %10175 = vmatprep.mubr.msk.bf16.mxu0 %vm759_vm1, %v9224_v17  ;;  %v9197_v31 = vmul.f32 0.5, %v9179_v19  ;;  %v9214_v11 = vmul.f32 %v9196_v39, %v16084_v61 }
0x3222   : > { %v9180_v55 = vadd.f32 1.0, %v12302_v26  ;;  %9393 = vmatmul.mubr.bf16.gmra.mxu0 %v9223_v57 }
0x3223   : > { %v12304_v21 = vpop.eup %12303  ;;  %v9215_v15 = vmul.f32 %v9197_v31, %v16091_v58 }
0x3224   : > { %v9198_v45 = vmul.f32 0.5, %v9180_v55  ;;  %v9181_v36 = vadd.f32 1.0, %v12304_v21 }
0x3225   : > { %v12306_v3 = vpop.eup %12305  ;;  %v9225_v2 = vpack.c.bf16 %v9215_v15, %v9213_v56 }
0x3226   : > { %v9216_v33 = vmul.f32 %v9198_v45, %v16099_v50  ;;  %v9182_v34 = vadd.f32 1.0, %v12306_v3  ;;  %v9199_v37 = vmul.f32 0.5, %v9181_v36 }
0x3228   : > { %v9226_v62 = vpack.c.bf16 %v9216_v33, %v9214_v11  ;;  %v9200_v60 = vmul.f32 0.5, %v9182_v34  ;;  %v9217_v58 = vmul.f32 %v9199_v37, %v16106_v5 }
0x322a   : > { %10176 = vmatprep.mubr.msk.bf16.mxu0 %vm759_vm1, %v9226_v62  ;;  %v9218_v63 = vmul.f32 %v9200_v60, %v16113_v38  ;;  %v9227_v61 = vpack.c.bf16 %v9217_v58, %v9217_v58 }
0x322b   : > { %9401 = vmatmul.mubr.bf16.gmra.mxu0 %v9225_v2 }
0x322c   : > { %v9228_v16 = vpack.c.bf16 %v9218_v63, %v9218_v63 }
0x322e   : > { %10177 = vmatprep.mubr.msk.bf16.mxu0 %vm759_vm1, %v9228_v16 }
0x3233   : > { %9409 = vmatmul.mubr.bf16.gmra.mxu0 %v9227_v61 }
0x32a9   : > { %v9379_v50 = vpop.f32.mrf.mxu0 }
0x32ab   : > { %v9380_v47 = vpop.f32.mrf.mxu0 }
0x32ad   : > { %v9381_v53 = vpop.f32.mrf.mxu0 }
0x32ae   : > { %v9382_v18 = vadd.f32 %v9381_v53, %v9257_v0 }
0x32af   : > { %v9383_v32 = vpop.f32.mrf.mxu0 }
0x32b0   : > { %v9416_v23 = vadd.f32 %v9382_v18, %v15798_v12 }
0x32b2   : > { %v9426_v38 = vsel %vm814_vm2, %v9416_v23, 0.0 }
0x32b3   : > { %9427 = vadd.xlane.f32.xlu0 %v9426_v38 }
0x32da   : > { %v9386_v1 = vpop.f32.mrf.mxu0 }
0x32db   : > { %v9387_v59 = vadd.f32 %v9386_v1, %v9257_v0 }
0x32dc   : > { %v9388_v5 = vpop.f32.mrf.mxu0 }
0x32dd   : > { %v9417_v25 = vadd.f32 %v9387_v59, %v15804_v6 }
0x32de   : > { %v9389_v7 = vpop.f32.mrf.mxu0 }
0x32df   : > { %v9390_v27 = vadd.f32 %v9389_v7, %v9257_v0  ;;  %v9429_v54 = vsel %vm814_vm2, %v9417_v25, 0.0 }
0x32e0   : > { %v9391_v35 = vpop.f32.mrf.mxu0  ;;  %9430 = vadd.xlane.f32.xlu1 %v9429_v54 }
0x32e1   : > { %v9418_v42 = vadd.f32 %v9390_v27, %v15810_v20 }
0x32e2   : > { %v9394_v4 = vpop.f32.mrf.mxu0 }
0x32e3   : > { %v9395_v24 = vadd.f32 %v9394_v4, %v9257_v0  ;;  %v9432_v12 = vsel %vm814_vm2, %v9418_v42, 0.0 }
0x32e4   : > { %v9396_v41 = vpop.f32.mrf.mxu0  ;;  %9433 = vadd.xlane.f32.xlu0 %v9432_v12 }
0x32e5   : > { %v9419_v29 = vadd.f32 %v9395_v24, %v15816_v22 }
0x32e6   : > { %v9397_v14 = vpop.f32.mrf.mxu0 }
0x32e7   : > { %v9398_v28 = vadd.f32 %v9397_v14, %v9257_v0  ;;  %v9435_v6 = vsel %vm814_vm2, %v9419_v29, 0.0 }
0x32e8   : > { %v9399_v40 = vpop.f32.mrf.mxu0  ;;  %9436 = vadd.xlane.f32.xlu1 %v9435_v6 }
0x32e9   : > { %v9420_v48 = vadd.f32 %v9398_v28, %v15822_v8  ;;  %v16198_v40 = vld [vmem:[%s16281_s19 + $0x10] ss:$0 sm:$0xff] }
0x32eb   : > { %v9402_v30 = vpop.f32.mrf.mxu0  ;;  %v9438_v43 = vsel %vm814_vm2, %v9420_v48, 0.0 }
0x32ec   : > { %v9403_v20 = vadd.f32 %v9402_v30, %v9257_v0  ;;  %9439 = vadd.xlane.f32.xlu0 %v9438_v43  ;;  %v16203_v30 = vld [vmem:[%s16281_s19 + $0x11] ss:$0 sm:$0xff] }
0x32ed   : > { %v9404_v13 = vpop.f32.mrf.mxu0 }
0x32ee   : > { %v9421_v10 = vadd.f32 %v9403_v20, %v15828_v9  ;;  %v12329_v13 = vld [vmem:[%s13253_s5] sm:$0xff] }
0x32ef   : > { %v9405_v52 = vpop.f32.mrf.mxu0 }
0x32f0   : > { %v9406_v44 = vadd.f32 %v9405_v52, %v9257_v0  ;;  %v9441_v22 = vsel %vm814_vm2, %v9421_v10, 0.0 }
0x32f1   : > { %v9407_v17 = vpop.f32.mrf.mxu0  ;;  %9442 = vadd.xlane.f32.xlu1 %v9441_v22 }
0x32f2   : > { %v9422_v19 = vadd.f32 %v9406_v44, %v15834_v49 }
0x32f3   : > { %v9410_v57 = vpop.f32.mrf.mxu0 }
0x32f4   : > { %v9411_v26 = vadd.f32 %v9410_v57, %v9257_v0  ;;  %v9444_v8 = vsel %vm814_vm2, %v9422_v19, 0.0 }
0x32f5   : > { %v9412_v39 = vpop.f32.mrf.mxu0  ;;  %9445 = vadd.xlane.f32.xlu0 %v9444_v8 }
0x32f6   : > { %v9423_v31 = vadd.f32 %v9411_v26, %v15840_v51 }
0x32f7   : > { %v9413_v55 = vpop.f32.mrf.mxu0 }
0x32f8   : > { %v9447_v21 = vsel %vm814_vm2, %v9423_v31, 0.0 }
0x32f9   : > { %v9414_v9 = vpop.f32.mrf.mxu0  ;;  %9448 = vadd.xlane.f32.xlu1 %v9447_v21 }
0x333c   : > { %v9428_v46 = vpop.xlane.xlu0 %9427 }
0x333d   : > { %v9450_v45 = vmul.f32 0.020833334, %v9428_v46 }
0x333f   : > { %v9458_v3 = vsub.f32 %v9416_v23, %v9450_v45 }
0x3341   : > { %v9466_v15 = vmul.f32 %v9458_v3, %v9458_v3 }
0x3343   : > { %v9474_v36 = vsel %vm814_vm2, %v9466_v15, 0.0 }
0x3344   : > { %9475 = vadd.xlane.f32.xlu0 %v9474_v36 }
0x3369   : > { %v9431_v49 = vpop.xlane.xlu1 %9430 }
0x336a   : > { %v9451_v11 = vmul.f32 0.020833334, %v9431_v49 }
0x336c   : > { %v16160_v33 = vsub.f32 %v9417_v25, %v9451_v11 }
0x336d   : > { %v9434_v34 = vpop.xlane.xlu0 %9433 }
0x336e   : > { %v9452_v56 = vmul.f32 0.020833334, %v9434_v34  ;;  %v9467_v51 = vmul.f32 %v16160_v33, %v16160_v33 }
0x3370   : > { %v16164_v62 = vsub.f32 %v9418_v42, %v9452_v56  ;;  %v9477_v60 = vsel %vm814_vm2, %v9467_v51, 0.0 }
0x3371   : > { %9478 = vadd.xlane.f32.xlu1 %v9477_v60  ;;  %v9437_v2 = vpop.xlane.xlu1 %9436 }
0x3372   : > { %v9453_v37 = vmul.f32 0.020833334, %v9437_v2  ;;  %v9468_v63 = vmul.f32 %v16164_v62, %v16164_v62  ;;  %v12330_v2 = vld [vmem:[%s13253_s5 + $0x8] sm:$0xff] }
0x3374   : > { %v16169_v16 = vsub.f32 %v9419_v29, %v9453_v37  ;;  %v9480_v58 = vsel %vm814_vm2, %v9468_v63, 0.0 }
0x3375   : > { %9481 = vadd.xlane.f32.xlu0 %v9480_v58  ;;  %v9440_v61 = vpop.xlane.xlu0 %9439 }
0x3376   : > { %v9454_v50 = vmul.f32 0.020833334, %v9440_v61  ;;  %v9469_v0 = vmul.f32 %v16169_v16, %v16169_v16 }
0x3378   : > { %v16174_v47 = vsub.f32 %v9420_v48, %v9454_v50  ;;  %v9483_v53 = vsel %vm814_vm2, %v9469_v0, 0.0 }
0x3379   : > { %9484 = vadd.xlane.f32.xlu1 %v9483_v53 }
0x337a   : > { %v9443_v18 = vpop.xlane.xlu1 %9442  ;;  %v9470_v32 = vmul.f32 %v16174_v47, %v16174_v47 }
0x337b   : > { %v9455_v23 = vmul.f32 0.020833334, %v9443_v18 }
0x337c   : > { %v9486_v38 = vsel %vm814_vm2, %v9470_v32, 0.0 }
0x337d   : > { %v16180_v1 = vsub.f32 %v9421_v10, %v9455_v23  ;;  %9487 = vadd.xlane.f32.xlu0 %v9486_v38 }
0x337e   : > { %v9446_v59 = vpop.xlane.xlu0 %9445 }
0x337f   : > { %v9456_v5 = vmul.f32 0.020833334, %v9446_v59  ;;  %v9471_v25 = vmul.f32 %v16180_v1, %v16180_v1 }
0x3381   : > { %v16184_v7 = vsub.f32 %v9422_v19, %v9456_v5  ;;  %v9489_v27 = vsel %vm814_vm2, %v9471_v25, 0.0  ;;  %v12332_v5 = vld [vmem:[%s13253_s5 + $0x18] sm:$0xff] }
0x3382   : > { %9490 = vadd.xlane.f32.xlu1 %v9489_v27  ;;  %v9449_v54 = vpop.xlane.xlu1 %9448 }
0x3383   : > { %v9457_v35 = vmul.f32 0.020833334, %v9449_v54  ;;  %v9472_v42 = vmul.f32 %v16184_v7, %v16184_v7 }
0x3385   : > { %v16189_v4 = vsub.f32 %v9423_v31, %v9457_v35  ;;  %v9492_v24 = vsel %vm814_vm2, %v9472_v42, 0.0  ;;  %v12333_v42 = vld [vmem:[%s13253_s5 + $0x20] sm:$0xff] }
0x3386   : > { %9493 = vadd.xlane.f32.xlu0 %v9492_v24 }
0x3387   : > { %v9473_v12 = vmul.f32 %v16189_v4, %v16189_v4 }
0x3389   : > { %v9495_v41 = vsel %vm814_vm2, %v9473_v12, 0.0 }
0x338a   : > { %9496 = vadd.xlane.f32.xlu1 %v9495_v41 }
0x33cd   : > { %v9476_v29 = vpop.xlane.xlu0 %9475 }
0x33ce   : > { %v9498_v14 = vmul.f32 0.020833334, %v9476_v29 }
0x33d0   : > { %v9506_v28 = vadd.f32 1e-06, %v9498_v14  ;;  %v12334_v14 = vld [vmem:[%s13253_s5 + $0x28] sm:$0xff] }
0x33d2   : > { %12307 = vrsqrt.f32 %v9506_v28 }
0x33df   : > { %v12308_v6 = vpop.eup %12307 }
0x33e0   : > { %v9522_v48 = vmul.f32 %v12308_v6, %v9458_v3 }
0x33e2   : > { %v9534_v43 = vmul.f32 %v16198_v40, %v9522_v48 }
0x33e4   : > { %v9546_v20 = vadd.f32 %v16203_v30, %v9534_v43 }
0x33e6   : > { %v9554_v10 = vadd.f32 %v12329_v13, %v9546_v20  ;;  %v12335_v20 = vld [vmem:[%s13253_s5 + $0x30] sm:$0xff] }
0x33e8   : > { %9562 = vst.msk [vmem:[%s16212_s10] sm:$0xff] %vm814_vm2, %v9554_v10 }
0x33fa   : > { %v9479_v52 = vpop.xlane.xlu1 %9478 }
0x33fb   : > { %v9499_v44 = vmul.f32 0.020833334, %v9479_v52 }
0x33fd   : > { %v9507_v22 = vadd.f32 1e-06, %v9499_v44 }
0x33fe   : > { %v9482_v17 = vpop.xlane.xlu0 %9481 }
0x33ff   : > { %12309 = vrsqrt.f32 %v9507_v22  ;;  %v9500_v19 = vmul.f32 0.020833334, %v9482_v17 }
0x3401   : > { %v9508_v57 = vadd.f32 1e-06, %v9500_v19 }
0x3402   : > { %v9485_v26 = vpop.xlane.xlu1 %9484 }
0x3403   : > { %12311 = vrsqrt.f32 %v9508_v57  ;;  %v9501_v8 = vmul.f32 0.020833334, %v9485_v26 }
0x3405   : > { %v9509_v39 = vadd.f32 1e-06, %v9501_v8 }
0x3406   : > { %v9488_v31 = vpop.xlane.xlu0 %9487 }
0x3407   : > { %12313 = vrsqrt.f32 %v9509_v39  ;;  %v9502_v55 = vmul.f32 0.020833334, %v9488_v31 }
0x3409   : > { %v9510_v21 = vadd.f32 1e-06, %v9502_v55 }
0x340b   : > { %12315 = vrsqrt.f32 %v9510_v21  ;;  %v9491_v9 = vpop.xlane.xlu1 %9490 }
0x340c   : > { %v12310_v46 = vpop.eup %12309  ;;  %v9503_v45 = vmul.f32 0.020833334, %v9491_v9 }
0x340d   : > { %v9523_v3 = vmul.f32 %v12310_v46, %v16160_v33 }
0x340e   : > { %v9511_v15 = vadd.f32 1e-06, %v9503_v45 }
0x340f   : > { %v9535_v36 = vmul.f32 %v16198_v40, %v9523_v3  ;;  %v9494_v49 = vpop.xlane.xlu0 %9493 }
0x3410   : > { %v12312_v11 = vpop.eup %12311  ;;  %12317 = vrsqrt.f32 %v9511_v15  ;;  %v9504_v34 = vmul.f32 0.020833334, %v9494_v49 }
0x3411   : > { %v9547_v56 = vadd.f32 %v16203_v30, %v9535_v36  ;;  %v9524_v51 = vmul.f32 %v12312_v11, %v16164_v62  ;;  %v12331_v62 = vld [vmem:[%s13253_s5 + $0x10] sm:$0xff] }
0x3412   : > { %v9512_v60 = vadd.f32 1e-06, %v9504_v34 }
0x3413   : > { %v9555_v37 = vadd.f32 %v12330_v2, %v9547_v56  ;;  %v9536_v63 = vmul.f32 %v16198_v40, %v9524_v51  ;;  %v9497_v33 = vpop.xlane.xlu1 %9496 }
0x3414   : > { %v12314_v58 = vpop.eup %12313  ;;  %12319 = vrsqrt.f32 %v9512_v60  ;;  %v9505_v61 = vmul.f32 0.020833334, %v9497_v33 }
0x3415   : > { %9563 = vst.msk [vmem:[%s16212_s10 + $0x8] sm:$0xff] %vm814_vm2, %v9555_v37  ;;  %v9548_v50 = vadd.f32 %v16203_v30, %v9536_v63  ;;  %v9525_v0 = vmul.f32 %v12314_v58, %v16169_v16 }
0x3416   : > { %v9513_v53 = vadd.f32 1e-06, %v9505_v61 }
0x3417   : > { %v9556_v18 = vadd.f32 %v12331_v62, %v9548_v50  ;;  %v9537_v32 = vmul.f32 %v16198_v40, %v9525_v0 }
0x3418   : > { %v12316_v23 = vpop.eup %12315  ;;  %12321 = vrsqrt.f32 %v9513_v53 }
0x3419   : > { %9564 = vst.msk [vmem:[%s16212_s10 + $0x10] sm:$0xff] %vm814_vm2, %v9556_v18  ;;  %v9549_v38 = vadd.f32 %v16203_v30, %v9537_v32  ;;  %v9526_v59 = vmul.f32 %v12316_v23, %v16174_v47 }
0x341b   : > { %v9557_v25 = vadd.f32 %v12332_v5, %v9549_v38  ;;  %v9538_v16 = vmul.f32 %v16198_v40, %v9526_v59 }
0x341d   : > { %v12318_v27 = vpop.eup %12317  ;;  %9565 = vst.msk [vmem:[%s16212_s10 + $0x18] sm:$0xff] %vm814_vm2, %v9557_v25  ;;  %v9550_v54 = vadd.f32 %v16203_v30, %v9538_v16 }
0x341e   : > { %v9527_v35 = vmul.f32 %v12318_v27, %v16180_v1 }
0x341f   : > { %v9558_v24 = vadd.f32 %v12333_v42, %v9550_v54 }
0x3420   : > { %v9539_v12 = vmul.f32 %v16198_v40, %v9527_v35 }
0x3421   : > { %v12320_v41 = vpop.eup %12319  ;;  %9566 = vst.msk [vmem:[%s16212_s10 + $0x20] sm:$0xff] %vm814_vm2, %v9558_v24 }
0x3422   : > { %v9551_v47 = vadd.f32 %v16203_v30, %v9539_v12  ;;  %v9528_v29 = vmul.f32 %v12320_v41, %v16184_v7  ;;  %v12336_v7 = vld [vmem:[%s13253_s5 + $0x38] sm:$0xff] }
0x3424   : > { %v9559_v28 = vadd.f32 %v12334_v14, %v9551_v47  ;;  %v9540_v6 = vmul.f32 %v16198_v40, %v9528_v29 }
0x3425   : > { %v12322_v48 = vpop.eup %12321 }
0x3426   : > { %9567 = vst.msk [vmem:[%s16212_s10 + $0x28] sm:$0xff] %vm814_vm2, %v9559_v28  ;;  %v9552_v1 = vadd.f32 %v16203_v30, %v9540_v6  ;;  %v9529_v43 = vmul.f32 %v12322_v48, %v16189_v4 }
0x3428   : > { %v9560_v13 = vadd.f32 %v12335_v20, %v9552_v1  ;;  %v9541_v10 = vmul.f32 %v16198_v40, %v9529_v43 }
0x342a   : > { %9568 = vst.msk [vmem:[%s16212_s10 + $0x30] sm:$0xff] %vm814_vm2, %v9560_v13  ;;  %v9553_v52 = vadd.f32 %v16203_v30, %v9541_v10 }
0x342c   : > { %v9561_v44 = vadd.f32 %v12336_v7, %v9553_v52 }
0x342e   : > { %9569 = vst.msk [vmem:[%s16212_s10 + $0x38] sm:$0xff] %vm814_vm2, %v9561_v44 }
0x342f PF: > { %s30_s1 = sadd.s32 1, %s12343_s1  }
0x3430   : > { %p27_p4 = scmp.ge.s32.totalorder %s30_s1, 4  }
0x3432   :  { %29 = sbr.rel (!%p27_p4) target bundleno = 12 (0xc), region = 157 }

</bundles_post_ra>
